<compile_context>
chip_gen: v7x
topology: tpu7x:2x2x1
jax: 0.10.0
libtpu: 0.0.40
codegen_flags: <defaults>
</compile_context>

<pallas_src>
import jax
import jax.numpy as jnp
import numpy as np
from jax.experimental import pallas as pl
from jax.experimental.pallas import tpu as pltpu

N_ROI = 16      # original module hardcodes n_roi = 155; small shape for the demo
EPS = 1e-3      # BatchNorm eps used by all three BN layers in the module
TI = 8          # target rows per grid step (sublane-aligned)
TJ = 8          # source-node chunk per reduction grid step


def _round_up(a, b):
    return (a + b - 1) // b * b


# ----------------------------------------------------------------------------
# Kernel 1: fused NNConv (mean aggregation over a fully-connected graph)
#           + folded eval-mode BatchNorm + sigmoid.
# Grid: (target blocks of TI rows  [parallel], source chunks of TJ nodes [arbitrary/reduction])
# ----------------------------------------------------------------------------
def _nnconv_bn_sig_kernel(x_ref, ea_ref, wnn_ref, bnn_ref, scale_ref, base_ref,
                          o_ref, acc_ref):
    tj, cin = x_ref.shape
    ti, cout = o_ref.shape
    c = pl.program_id(1)

    @pl.when(c == 0)
    def _init():
        acc_ref[...] = jnp.zeros_like(acc_ref)

    xj = x_ref[...]                      # [tj, cin]   chunk of source-node features
    wnn = wnn_ref[...][None, :, :]       # [1, cin, cout]
    bnn = bnn_ref[...][None, :, :]
    ea_jt = ea_ref[0, 0]                 # [tj, ti]    edge attrs: sources x targets

    rows = []
    for t in range(ti):                  # static unroll over the ti target rows of this block
        # Per-edge weights for the tj sources feeding target t (built once per chunk,
        # bounded [tj, cin, cout] VMEM footprint -- the j dimension is chunked by the grid).
        e = ea_jt[:, t:t + 1][:, :, None]                        # [tj, 1, 1]
        w = jnp.maximum(e * wnn + bnn, 0.0)                      # [tj, cin, cout]
        # Contraction over (j, k) on the MXU (M=1 dots; MXU slot is otherwise idle
        # and overlaps the VPU-bound W build of the next target / chunk).
        r = jnp.zeros((1, cout), jnp.float32)
        for jj in range(tj):
            r = r + jnp.dot(xj[jj:jj + 1, :], w[jj],
                            preferred_element_type=jnp.float32)  # [1, cout]
        rows.append(r)

    acc_ref[...] += jnp.concatenate(rows, axis=0)                # [ti, cout]

    @pl.when(c == pl.num_programs(1) - 1)
    def _finalize():
        # scale_ref already folds BatchNorm scale and the 1/n mean divisor;
        # base_ref folds x @ root + bias + BatchNorm shift.
        y = acc_ref[...] * scale_ref[...] + base_ref[...]
        o_ref[...] = jax.nn.sigmoid(y)


def nnconv_bn_sigmoid(x, ea_dense, params, *, ti=TI, tj=TJ, eps=EPS):
    """x: [n, cin] node features, ea_dense: [n(dst), n(src)] dense edge attrs."""
    wnn, bnn, root, bias, gamma, beta, rmean, rvar = params
    x = x.astype(jnp.float32)
    n, cin = x.shape
    cout = wnn.shape[1]

    # --- hoisted / folded glue (per perf review) ------------------------------
    # eval-BN folded to y = scale*conv + shift;   root term as one batched matmul.
    scale = gamma * jax.lax.rsqrt(rvar + eps)                         # [1, cout]
    shift = beta - rmean * scale                                      # [1, cout]
    base = (jnp.dot(x, root, precision=jax.lax.Precision.HIGHEST)
            + bias) * scale + shift                                   # [n, cout]
    scale_n = scale / float(n)          # also folds the 'mean' aggregation divisor

    # --- padding so blocks tile evenly; zero-padded sources contribute 0 ------
    n_t = _round_up(n, ti)
    n_j = _round_up(n, tj)
    n_t_blocks = n_t // ti
    n_chunks = n_j // tj

    x_p = jnp.zeros((n_j, cin), jnp.float32).at[:n, :].set(x)
    base_p = jnp.zeros((n_t, cout), jnp.float32).at[:n, :].set(base)
    ea_p = jnp.zeros((n_t, n_j), jnp.float32).at[:n, :n].set(ea_dense)
    # [n_t, n_j] -> [n_chunks, n_t_blocks, tj, ti]: one (tj sources x ti targets)
    # slab per grid step, sources on the sublane axis (layout the in-kernel
    # per-edge broadcast wants), <=1 vreg per step.
    ea4 = ea_p.reshape(n_t_blocks, ti, n_chunks, tj).transpose(2, 0, 3, 1)

    out = pl.pallas_call(
        _nnconv_bn_sig_kernel,
        grid=(n_t_blocks, n_chunks),
        in_specs=[
            pl.BlockSpec((tj, cin), lambda i, c: (c, 0)),             # x chunk (streamed over c)
            pl.BlockSpec((1, 1, tj, ti), lambda i, c: (c, i, 0, 0)),  # edge-attr slab
            pl.BlockSpec((cin, cout), lambda i, c: (0, 0)),           # Wnn (resident)
            pl.BlockSpec((cin, cout), lambda i, c: (0, 0)),           # Bnn (resident)
            pl.BlockSpec((1, cout), lambda i, c: (0, 0)),             # BN scale / n (resident)
            pl.BlockSpec((ti, cout), lambda i, c: (i, 0)),            # folded root+bias+BN shift
        ],
        out_specs=pl.BlockSpec((ti, cout), lambda i, c: (i, 0)),
        out_shape=jax.ShapeDtypeStruct((n_t, cout), jnp.float32),
        scratch_shapes=[pltpu.VMEM((ti, cout), jnp.float32)],
        compiler_params=pltpu.CompilerParams(
            dimension_semantics=("parallel", "arbitrary")),
    )(x_p, ea4, wnn, bnn, scale_n, base_p)
    return out[:n]


# ----------------------------------------------------------------------------
# Kernel 2a: x = (x + x.T)/2 ; zero diagonal   (single input: used for x1)
# Kernel 2b: x6 = (a + b)/2 ; x6 = (x6 + x6.T)/2 ; zero diagonal
# ----------------------------------------------------------------------------
def _zero_diag(s):
    n = s.shape[0]
    row = jax.lax.broadcasted_iota(jnp.int32, (n, n), 0)
    col = jax.lax.broadcasted_iota(jnp.int32, (n, n), 1)
    return jnp.where(row == col, jnp.zeros_like(s), s)


def _sym_zero_diag_kernel(a_ref, o_ref):
    a = a_ref[...]
    o_ref[...] = _zero_diag((a + a.T) * 0.5)


def _avg_sym_zero_diag_kernel(a_ref, b_ref, o_ref):
    m = (a_ref[...] + b_ref[...]) * 0.5
    o_ref[...] = _zero_diag((m + m.T) * 0.5)


def sym_zero_diag(a):
    n = a.shape[0]
    return pl.pallas_call(
        _sym_zero_diag_kernel,
        out_shape=jax.ShapeDtypeStruct((n, n), jnp.float32),
    )(a)


def avg_sym_zero_diag(a, b):
    n = a.shape[0]
    return pl.pallas_call(
        _avg_sym_zero_diag_kernel,
        out_shape=jax.ShapeDtypeStruct((n, n), jnp.float32),
    )(a, b)


# ----------------------------------------------------------------------------
# Full Generator forward (glue: edge densification; concat/slice removed)
# ----------------------------------------------------------------------------
def generator_forward(x, edge_index, edge_attr, params1, params2, params3):
    n = x.shape[0]
    # Densify edge attrs: ea[dst, src] = attr of edge src -> dst (glue).
    ea = jnp.zeros((n, n), jnp.float32).at[edge_index[1], edge_index[0]].set(edge_attr[:, 0])

    x1 = nnconv_bn_sigmoid(x, ea, params1)            # sigmoid(BN(conv1(x)))  [n, n]
    # F.dropout -> identity (eval mode)
    x1 = sym_zero_diag(x1)                            # (x1 + x1.T)/2, zero diag

    x2 = nnconv_bn_sigmoid(x1, ea, params2)           # sigmoid(BN(conv2(x1))) [n, 1]
    # F.dropout -> identity (eval mode)

    x3a = nnconv_bn_sigmoid(x2, ea, params3)          # sigmoid(BN(conv3(x2))) [n, n]
    # torch concat/slice of [x3a, x1] then x4/x5 is algebraically just (x3a, x1).
    return avg_sym_zero_diag(x3a, x1)


generator_forward_jit = jax.jit(generator_forward)


# ----------------------------------------------------------------------------
# Pure-JAX reference (faithful translation of the torch forward, for checking)
# ----------------------------------------------------------------------------
def _ref_nnconv_bn_sig(x, ea, params, eps=EPS):
    wnn, bnn, root, bias, gamma, beta, rmean, rvar = params
    n = x.shape[0]
    W = jnp.maximum(ea[:, :, None, None] * wnn[None, None] + bnn[None, None], 0.0)
    aggr = jnp.einsum('jk,ijko->io', x, W,
                      precision=jax.lax.Precision.HIGHEST) / n
    conv = aggr + jnp.dot(x, root, precision=jax.lax.Precision.HIGHEST) + bias
    y = gamma * (conv - rmean) * jax.lax.rsqrt(rvar + eps) + beta
    return jax.nn.sigmoid(y)


def _ref_sym_zero_diag(a):
    s = (a + a.T) * 0.5
    return jnp.where(jnp.eye(s.shape[0], dtype=bool), 0.0, s)


def _ref_forward(x, edge_index, edge_attr, params1, params2, params3):
    n = x.shape[0]
    ea = jnp.zeros((n, n), jnp.float32).at[edge_index[1], edge_index[0]].set(edge_attr[:, 0])
    x1 = _ref_sym_zero_diag(_ref_nnconv_bn_sig(x, ea, params1))
    x2 = _ref_nnconv_bn_sig(x1, ea, params2)
    x3 = jnp.concatenate([_ref_nnconv_bn_sig(x2, ea, params3), x1], axis=1)
    x4 = x3[:, 0:n]
    x5 = x3[:, n:2 * n]
    x6 = (x4 + x5) * 0.5
    return _ref_sym_zero_diag(x6)


# ----------------------------------------------------------------------------
# Deterministic parameter init (shapes implied by the module's __init__)
# ----------------------------------------------------------------------------
def init_layer_params(key, cin, cout):
    ks = jax.random.split(key, 8)
    wnn = 0.3 * jax.random.normal(ks[0], (cin, cout), jnp.float32)   # Linear(1, cin*cout).weight
    bnn = 0.3 * jax.random.normal(ks[1], (cin, cout), jnp.float32)   # Linear(1, cin*cout).bias
    root = 0.3 * jax.random.normal(ks[2], (cin, cout), jnp.float32)  # NNConv root weight
    bias = 0.1 * jax.random.normal(ks[3], (1, cout), jnp.float32)    # NNConv bias
    gamma = 1.0 + 0.1 * jax.random.normal(ks[4], (1, cout), jnp.float32)
    beta = 0.1 * jax.random.normal(ks[5], (1, cout), jnp.float32)
    rmean = 0.1 * jax.random.normal(ks[6], (1, cout), jnp.float32)
    rvar = jax.random.uniform(ks[7], (1, cout), jnp.float32, minval=0.5, maxval=1.5)
    return (wnn, bnn, root, bias, gamma, beta, rmean, rvar)


if __name__ == "__main__":
    n = N_ROI
    key = jax.random.PRNGKey(0)
    kx, ke, k1, k2, k3 = jax.random.split(key, 5)

    # data.x: [n_roi, n_roi] node features; fully-connected graph (all n^2 edges).
    x = jax.random.normal(kx, (n, n), jnp.float32)
    src = jnp.repeat(jnp.arange(n, dtype=jnp.int32), n)
    dst = jnp.tile(jnp.arange(n, dtype=jnp.int32), n)
    edge_index = jnp.stack([src, dst])                       # [2, n*n]
    edge_attr = jax.random.uniform(ke, (n * n, 1), jnp.float32)

    params1 = init_layer_params(k1, n, n)   # conv1: NNConv(n_roi, n_roi) + BN(n_roi)
    params2 = init_layer_params(k2, n, 1)   # conv2: NNConv(n_roi, 1)     + BN(1)
    params3 = init_layer_params(k3, 1, n)   # conv3: NNConv(1, n_roi)     + BN(n_roi)

    out = generator_forward_jit(x, edge_index, edge_attr, params1, params2, params3)
    out = jax.block_until_ready(out)

    ref = jax.block_until_ready(
        _ref_forward(x, edge_index, edge_attr, params1, params2, params3))

    assert out.shape == (n, n)
    np.testing.assert_allclose(np.asarray(out), np.asarray(ref), rtol=5e-3, atol=5e-3)

    print("KERNEL_OK")
</pallas_src>

<mosaic_0001>
module attributes {stable_mosaic.version = 11 : i64} {
  func.func @_sym_zero_diag_kernel(%arg0: memref<16x16xf32, #tpu.memory_space<vmem>>, %arg1: memref<16x16xf32, #tpu.memory_space<vmem>>) attributes {dimension_semantics = [], scalar_prefetch = 0 : i64, scratch_operands = 0 : i64, tpu.core_type = #tpu.core_type<tc>} {
    %c0 = arith.constant 0 : index
    %c0_0 = arith.constant 0 : index
    %0 = vector.load %arg0[%c0, %c0_0] : memref<16x16xf32, #tpu.memory_space<vmem>>, vector<16x16xf32>
    %1 = tpu.transpose %0, [1, 0] : vector<16x16xf32> -> vector<16x16xf32>
    %2 = arith.addf %0, %1 : vector<16x16xf32>
    %cst = arith.constant 5.000000e-01 : f32
    %3 = vector.broadcast %cst : f32 to vector<16x16xf32>
    %4 = arith.mulf %2, %3 : vector<16x16xf32>
    %5 = tpu.iota {dimensions = array<i32: 0>} : vector<16x16xi32>
    %6 = tpu.iota {dimensions = array<i32: 1>} : vector<16x16xi32>
    %7 = arith.cmpi eq, %5, %6 : vector<16x16xi32>
    %cst_1 = arith.constant 0.000000e+00 : f32
    %8 = vector.broadcast %cst_1 : f32 to vector<16x16xf32>
    %9 = arith.select %7, %8, %4 : vector<16x16xi1>, vector<16x16xf32>
    %c0_2 = arith.constant 0 : index
    %c0_3 = arith.constant 0 : index
    %10 = vector.load %arg1[%c0_2, %c0_3] : memref<16x16xf32, #tpu.memory_space<vmem>>, vector<16x16xf32>
    tpu.vector_store %arg1[%c0_2, %c0_3], %9 {strides = array<i32>} : memref<16x16xf32, #tpu.memory_space<vmem>>, vector<16x16xf32>,
    return
  }
}

module attributes {stable_mosaic.version = 11 : i64} {
  func.func @_nnconv_bn_sig_kernel(%arg0: i32, %arg1: i32, %arg2: memref<8x16xf32, #tpu.memory_space<vmem>>, %arg3: memref<1x1x8x8xf32, #tpu.memory_space<vmem>>, %arg4: memref<16x16xf32, #tpu.memory_space<vmem>>, %arg5: memref<16x16xf32, #tpu.memory_space<vmem>>, %arg6: memref<1x16xf32, #tpu.memory_space<vmem>>, %arg7: memref<8x16xf32, #tpu.memory_space<vmem>>, %arg8: memref<8x16xf32, #tpu.memory_space<vmem>>, %arg9: memref<8x16xf32, #tpu.memory_space<vmem>>) attributes {dimension_semantics = [#tpu.dimension_semantics<parallel>, #tpu.dimension_semantics<arbitrary>], iteration_bounds = array<i64: 2, 2>, scalar_prefetch = 0 : i64, scratch_operands = 1 : i64, tpu.core_type = #tpu.core_type<tc>, window_params = [{transform_indices = @transform_0, window_bounds = array<i64: 8, 16>}, {transform_indices = @transform_1, window_bounds = array<i64: 1, 1, 8, 8>}, {pipeline_mode = #tpu.pipeline_mode<synchronous>, transform_indices = @transform_2, window_bounds = array<i64: 16, 16>}, {pipeline_mode = #tpu.pipeline_mode<synchronous>, transform_indices = @transform_3, window_bounds = array<i64: 16, 16>}, {pipeline_mode = #tpu.pipeline_mode<synchronous>, transform_indices = @transform_4, window_bounds = array<i64: 1, 16>}, {transform_indices = @transform_5, window_bounds = array<i64: 8, 16>}, {transform_indices = @transform_6, window_bounds = array<i64: 8, 16>}]} {
    %c0_i32 = arith.constant 0 : i32
    %0 = arith.cmpi eq, %arg1, %c0_i32 : i32
    %1 = arith.extui %0 : i1 to i32
    %c0_i32_0 = arith.constant 0 : i32
    %2 = arith.cmpi ne, %1, %c0_i32_0 : i32
    scf.if %2 {
      %cst_94 = arith.constant 0.000000e+00 : f32
      %417 = vector.broadcast %cst_94 : f32 to vector<8x16xf32>
      %c0_95 = arith.constant 0 : index
      %c0_96 = arith.constant 0 : index
      %418 = vector.load %arg9[%c0_95, %c0_96] : memref<8x16xf32, #tpu.memory_space<vmem>>, vector<8x16xf32>
      tpu.vector_store %arg9[%c0_95, %c0_96], %417 {strides = array<i32>} : memref<8x16xf32, #tpu.memory_space<vmem>>, vector<8x16xf32>,
    } else {
    }
    %c0 = arith.constant 0 : index
    %c0_1 = arith.constant 0 : index
    %3 = vector.load %arg2[%c0, %c0_1] : memref<8x16xf32, #tpu.memory_space<vmem>>, vector<8x16xf32>
    %c0_2 = arith.constant 0 : index
    %c0_3 = arith.constant 0 : index
    %4 = vector.load %arg4[%c0_2, %c0_3] : memref<16x16xf32, #tpu.memory_space<vmem>>, vector<16x16xf32>
    %5 = vector.shape_cast %4 : vector<16x16xf32> to vector<1x16x16xf32>
    %c0_4 = arith.constant 0 : index
    %c0_5 = arith.constant 0 : index
    %6 = vector.load %arg5[%c0_4, %c0_5] : memref<16x16xf32, #tpu.memory_space<vmem>>, vector<16x16xf32>
    %7 = vector.shape_cast %6 : vector<16x16xf32> to vector<1x16x16xf32>
    %c0_6 = arith.constant 0 : index
    %c0_7 = arith.constant 0 : index
    %c0_8 = arith.constant 0 : index
    %c0_9 = arith.constant 0 : index
    %8 = vector.load %arg3[%c0_6, %c0_7, %c0_8, %c0_9] : memref<1x1x8x8xf32, #tpu.memory_space<vmem>>, vector<1x1x8x8xf32>
    %9 = vector.shape_cast %8 : vector<1x1x8x8xf32> to vector<8x8xf32>
    %10 = vector.extract_strided_slice %9 {offsets = [0, 0], sizes = [8, 1], strides = [1, 1]} : vector<8x8xf32> to vector<8x1xf32>
    %11 = vector.shape_cast %10 : vector<8x1xf32> to vector<8x1x1xf32>
    %12 = vector.broadcast %11 : vector<8x1x1xf32> to vector<8x16x16xf32>
    %13 = vector.broadcast %5 : vector<1x16x16xf32> to vector<8x16x16xf32>
    %14 = arith.mulf %12, %13 : vector<8x16x16xf32>
    %15 = vector.broadcast %7 : vector<1x16x16xf32> to vector<8x16x16xf32>
    %16 = arith.addf %14, %15 : vector<8x16x16xf32>
    %cst = arith.constant 0.000000e+00 : f32
    %17 = vector.broadcast %cst : f32 to vector<8x16x16xf32>
    %18 = arith.maximumf %16, %17 : vector<8x16x16xf32>
    %cst_10 = arith.constant 0.000000e+00 : f32
    %19 = vector.broadcast %cst_10 : f32 to vector<1x16xf32>
    %20 = vector.extract_strided_slice %3 {offsets = [0, 0], sizes = [1, 16], strides = [1, 1]} : vector<8x16xf32> to vector<1x16xf32>
    %21 = vector.extract_strided_slice %18 {offsets = [0, 0, 0], sizes = [1, 16, 16], strides = [1, 1, 1]} : vector<8x16x16xf32> to vector<1x16x16xf32>
    %22 = vector.shape_cast %21 : vector<1x16x16xf32> to vector<16x16xf32>
    %cst_11 = arith.constant dense<0.000000e+00> : vector<1x16xf32>
    %23 = tpu.matmul %20, %22, %cst_11 {dimension_numbers = #tpu.dot_dimension_numbers<[1], [0], [0], [1], [0, 0, 1, 1], [], []>} : vector<1x16xf32>, vector<16x16xf32>, vector<1x16xf32> -> vector<1x16xf32>
    %24 = arith.addf %19, %23 : vector<1x16xf32>
    %25 = vector.extract_strided_slice %3 {offsets = [1, 0], sizes = [1, 16], strides = [1, 1]} : vector<8x16xf32> to vector<1x16xf32>
    %26 = vector.extract_strided_slice %18 {offsets = [1, 0, 0], sizes = [1, 16, 16], strides = [1, 1, 1]} : vector<8x16x16xf32> to vector<1x16x16xf32>
    %27 = vector.shape_cast %26 : vector<1x16x16xf32> to vector<16x16xf32>
    %cst_12 = arith.constant dense<0.000000e+00> : vector<1x16xf32>
    %28 = tpu.matmul %25, %27, %cst_12 {dimension_numbers = #tpu.dot_dimension_numbers<[1], [0], [0], [1], [0, 0, 1, 1], [], []>} : vector<1x16xf32>, vector<16x16xf32>, vector<1x16xf32> -> vector<1x16xf32>
    %29 = arith.addf %24, %28 : vector<1x16xf32>
    %30 = vector.extract_strided_slice %3 {offsets = [2, 0], sizes = [1, 16], strides = [1, 1]} : vector<8x16xf32> to vector<1x16xf32>
    %31 = vector.extract_strided_slice %18 {offsets = [2, 0, 0], sizes = [1, 16, 16], strides = [1, 1, 1]} : vector<8x16x16xf32> to vector<1x16x16xf32>
    %32 = vector.shape_cast %31 : vector<1x16x16xf32> to vector<16x16xf32>
    %cst_13 = arith.constant dense<0.000000e+00> : vector<1x16xf32>
    %33 = tpu.matmul %30, %32, %cst_13 {dimension_numbers = #tpu.dot_dimension_numbers<[1], [0], [0], [1], [0, 0, 1, 1], [], []>} : vector<1x16xf32>, vector<16x16xf32>, vector<1x16xf32> -> vector<1x16xf32>
    %34 = arith.addf %29, %33 : vector<1x16xf32>
    %35 = vector.extract_strided_slice %3 {offsets = [3, 0], sizes = [1, 16], strides = [1, 1]} : vector<8x16xf32> to vector<1x16xf32>
    %36 = vector.extract_strided_slice %18 {offsets = [3, 0, 0], sizes = [1, 16, 16], strides = [1, 1, 1]} : vector<8x16x16xf32> to vector<1x16x16xf32>
    %37 = vector.shape_cast %36 : vector<1x16x16xf32> to vector<16x16xf32>
    %cst_14 = arith.constant dense<0.000000e+00> : vector<1x16xf32>
    %38 = tpu.matmul %35, %37, %cst_14 {dimension_numbers = #tpu.dot_dimension_numbers<[1], [0], [0], [1], [0, 0, 1, 1], [], []>} : vector<1x16xf32>, vector<16x16xf32>, vector<1x16xf32> -> vector<1x16xf32>
    %39 = arith.addf %34, %38 : vector<1x16xf32>
    %40 = vector.extract_strided_slice %3 {offsets = [4, 0], sizes = [1, 16], strides = [1, 1]} : vector<8x16xf32> to vector<1x16xf32>
    %41 = vector.extract_strided_slice %18 {offsets = [4, 0, 0], sizes = [1, 16, 16], strides = [1, 1, 1]} : vector<8x16x16xf32> to vector<1x16x16xf32>
    %42 = vector.shape_cast %41 : vector<1x16x16xf32> to vector<16x16xf32>
    %cst_15 = arith.constant dense<0.000000e+00> : vector<1x16xf32>
    %43 = tpu.matmul %40, %42, %cst_15 {dimension_numbers = #tpu.dot_dimension_numbers<[1], [0], [0], [1], [0, 0, 1, 1], [], []>} : vector<1x16xf32>, vector<16x16xf32>, vector<1x16xf32> -> vector<1x16xf32>
    %44 = arith.addf %39, %43 : vector<1x16xf32>
    %45 = vector.extract_strided_slice %3 {offsets = [5, 0], sizes = [1, 16], strides = [1, 1]} : vector<8x16xf32> to vector<1x16xf32>
    %46 = vector.extract_strided_slice %18 {offsets = [5, 0, 0], sizes = [1, 16, 16], strides = [1, 1, 1]} : vector<8x16x16xf32> to vector<1x16x16xf32>
    %47 = vector.shape_cast %46 : vector<1x16x16xf32> to vector<16x16xf32>
    %cst_16 = arith.constant dense<0.000000e+00> : vector<1x16xf32>
    %48 = tpu.matmul %45, %47, %cst_16 {dimension_numbers = #tpu.dot_dimension_numbers<[1], [0], [0], [1], [0, 0, 1, 1], [], []>} : vector<1x16xf32>, vector<16x16xf32>, vector<1x16xf32> -> vector<1x16xf32>
    %49 = arith.addf %44, %48 : vector<1x16xf32>
    %50 = vector.extract_strided_slice %3 {offsets = [6, 0], sizes = [1, 16], strides = [1, 1]} : vector<8x16xf32> to vector<1x16xf32>
    %51 = vector.extract_strided_slice %18 {offsets = [6, 0, 0], sizes = [1, 16, 16], strides = [1, 1, 1]} : vector<8x16x16xf32> to vector<1x16x16xf32>
    %52 = vector.shape_cast %51 : vector<1x16x16xf32> to vector<16x16xf32>
    %cst_17 = arith.constant dense<0.000000e+00> : vector<1x16xf32>
    %53 = tpu.matmul %50, %52, %cst_17 {dimension_numbers = #tpu.dot_dimension_numbers<[1], [0], [0], [1], [0, 0, 1, 1], [], []>} : vector<1x16xf32>, vector<16x16xf32>, vector<1x16xf32> -> vector<1x16xf32>
    %54 = arith.addf %49, %53 : vector<1x16xf32>
    %55 = vector.extract_strided_slice %3 {offsets = [7, 0], sizes = [1, 16], strides = [1, 1]} : vector<8x16xf32> to vector<1x16xf32>
    %56 = vector.extract_strided_slice %18 {offsets = [7, 0, 0], sizes = [1, 16, 16], strides = [1, 1, 1]} : vector<8x16x16xf32> to vector<1x16x16xf32>
    %57 = vector.shape_cast %56 : vector<1x16x16xf32> to vector<16x16xf32>
    %cst_18 = arith.constant dense<0.000000e+00> : vector<1x16xf32>
    %58 = tpu.matmul %55, %57, %cst_18 {dimension_numbers = #tpu.dot_dimension_numbers<[1], [0], [0], [1], [0, 0, 1, 1], [], []>} : vector<1x16xf32>, vector<16x16xf32>, vector<1x16xf32> -> vector<1x16xf32>
    %59 = arith.addf %54, %58 : vector<1x16xf32>
    %60 = vector.extract_strided_slice %9 {offsets = [0, 1], sizes = [8, 1], strides = [1, 1]} : vector<8x8xf32> to vector<8x1xf32>
    %61 = vector.shape_cast %60 : vector<8x1xf32> to vector<8x1x1xf32>
    %62 = vector.broadcast %61 : vector<8x1x1xf32> to vector<8x16x16xf32>
    %63 = vector.broadcast %5 : vector<1x16x16xf32> to vector<8x16x16xf32>
    %64 = arith.mulf %62, %63 : vector<8x16x16xf32>
    %65 = vector.broadcast %7 : vector<1x16x16xf32> to vector<8x16x16xf32>
    %66 = arith.addf %64, %65 : vector<8x16x16xf32>
    %cst_19 = arith.constant 0.000000e+00 : f32
    %67 = vector.broadcast %cst_19 : f32 to vector<8x16x16xf32>
    %68 = arith.maximumf %66, %67 : vector<8x16x16xf32>
    %cst_20 = arith.constant 0.000000e+00 : f32
    %69 = vector.broadcast %cst_20 : f32 to vector<1x16xf32>
    %70 = vector.extract_strided_slice %3 {offsets = [0, 0], sizes = [1, 16], strides = [1, 1]} : vector<8x16xf32> to vector<1x16xf32>
    %71 = vector.extract_strided_slice %68 {offsets = [0, 0, 0], sizes = [1, 16, 16], strides = [1, 1, 1]} : vector<8x16x16xf32> to vector<1x16x16xf32>
    %72 = vector.shape_cast %71 : vector<1x16x16xf32> to vector<16x16xf32>
    %cst_21 = arith.constant dense<0.000000e+00> : vector<1x16xf32>
    %73 = tpu.matmul %70, %72, %cst_21 {dimension_numbers = #tpu.dot_dimension_numbers<[1], [0], [0], [1], [0, 0, 1, 1], [], []>} : vector<1x16xf32>, vector<16x16xf32>, vector<1x16xf32> -> vector<1x16xf32>
    %74 = arith.addf %69, %73 : vector<1x16xf32>
    %75 = vector.extract_strided_slice %3 {offsets = [1, 0], sizes = [1, 16], strides = [1, 1]} : vector<8x16xf32> to vector<1x16xf32>
    %76 = vector.extract_strided_slice %68 {offsets = [1, 0, 0], sizes = [1, 16, 16], strides = [1, 1, 1]} : vector<8x16x16xf32> to vector<1x16x16xf32>
    %77 = vector.shape_cast %76 : vector<1x16x16xf32> to vector<16x16xf32>
    %cst_22 = arith.constant dense<0.000000e+00> : vector<1x16xf32>
    %78 = tpu.matmul %75, %77, %cst_22 {dimension_numbers = #tpu.dot_dimension_numbers<[1], [0], [0], [1], [0, 0, 1, 1], [], []>} : vector<1x16xf32>, vector<16x16xf32>, vector<1x16xf32> -> vector<1x16xf32>
    %79 = arith.addf %74, %78 : vector<1x16xf32>
    %80 = vector.extract_strided_slice %3 {offsets = [2, 0], sizes = [1, 16], strides = [1, 1]} : vector<8x16xf32> to vector<1x16xf32>
    %81 = vector.extract_strided_slice %68 {offsets = [2, 0, 0], sizes = [1, 16, 16], strides = [1, 1, 1]} : vector<8x16x16xf32> to vector<1x16x16xf32>
    %82 = vector.shape_cast %81 : vector<1x16x16xf32> to vector<16x16xf32>
    %cst_23 = arith.constant dense<0.000000e+00> : vector<1x16xf32>
    %83 = tpu.matmul %80, %82, %cst_23 {dimension_numbers = #tpu.dot_dimension_numbers<[1], [0], [0], [1], [0, 0, 1, 1], [], []>} : vector<1x16xf32>, vector<16x16xf32>, vector<1x16xf32> -> vector<1x16xf32>
    %84 = arith.addf %79, %83 : vector<1x16xf32>
    %85 = vector.extract_strided_slice %3 {offsets = [3, 0], sizes = [1, 16], strides = [1, 1]} : vector<8x16xf32> to vector<1x16xf32>
    %86 = vector.extract_strided_slice %68 {offsets = [3, 0, 0], sizes = [1, 16, 16], strides = [1, 1, 1]} : vector<8x16x16xf32> to vector<1x16x16xf32>
    %87 = vector.shape_cast %86 : vector<1x16x16xf32> to vector<16x16xf32>
    %cst_24 = arith.constant dense<0.000000e+00> : vector<1x16xf32>
    %88 = tpu.matmul %85, %87, %cst_24 {dimension_numbers = #tpu.dot_dimension_numbers<[1], [0], [0], [1], [0, 0, 1, 1], [], []>} : vector<1x16xf32>, vector<16x16xf32>, vector<1x16xf32> -> vector<1x16xf32>
    %89 = arith.addf %84, %88 : vector<1x16xf32>
    %90 = vector.extract_strided_slice %3 {offsets = [4, 0], sizes = [1, 16], strides = [1, 1]} : vector<8x16xf32> to vector<1x16xf32>
    %91 = vector.extract_strided_slice %68 {offsets = [4, 0, 0], sizes = [1, 16, 16], strides = [1, 1, 1]} : vector<8x16x16xf32> to vector<1x16x16xf32>
    %92 = vector.shape_cast %91 : vector<1x16x16xf32> to vector<16x16xf32>
    %cst_25 = arith.constant dense<0.000000e+00> : vector<1x16xf32>
    %93 = tpu.matmul %90, %92, %cst_25 {dimension_numbers = #tpu.dot_dimension_numbers<[1], [0], [0], [1], [0, 0, 1, 1], [], []>} : vector<1x16xf32>, vector<16x16xf32>, vector<1x16xf32> -> vector<1x16xf32>
    %94 = arith.addf %89, %93 : vector<1x16xf32>
    %95 = vector.extract_strided_slice %3 {offsets = [5, 0], sizes = [1, 16], strides = [1, 1]} : vector<8x16xf32> to vector<1x16xf32>
    %96 = vector.extract_strided_slice %68 {offsets = [5, 0, 0], sizes = [1, 16, 16], strides = [1, 1, 1]} : vector<8x16x16xf32> to vector<1x16x16xf32>
    %97 = vector.shape_cast %96 : vector<1x16x16xf32> to vector<16x16xf32>
    %cst_26 = arith.constant dense<0.000000e+00> : vector<1x16xf32>
    %98 = tpu.matmul %95, %97, %cst_26 {dimension_numbers = #tpu.dot_dimension_numbers<[1], [0], [0], [1], [0, 0, 1, 1], [], []>} : vector<1x16xf32>, vector<16x16xf32>, vector<1x16xf32> -> vector<1x16xf32>
    %99 = arith.addf %94, %98 : vector<1x16xf32>
    %100 = vector.extract_strided_slice %3 {offsets = [6, 0], sizes = [1, 16], strides = [1, 1]} : vector<8x16xf32> to vector<1x16xf32>
    %101 = vector.extract_strided_slice %68 {offsets = [6, 0, 0], sizes = [1, 16, 16], strides = [1, 1, 1]} : vector<8x16x16xf32> to vector<1x16x16xf32>
    %102 = vector.shape_cast %101 : vector<1x16x16xf32> to vector<16x16xf32>
    %cst_27 = arith.constant dense<0.000000e+00> : vector<1x16xf32>
    %103 = tpu.matmul %100, %102, %cst_27 {dimension_numbers = #tpu.dot_dimension_numbers<[1], [0], [0], [1], [0, 0, 1, 1], [], []>} : vector<1x16xf32>, vector<16x16xf32>, vector<1x16xf32> -> vector<1x16xf32>
    %104 = arith.addf %99, %103 : vector<1x16xf32>
    %105 = vector.extract_strided_slice %3 {offsets = [7, 0], sizes = [1, 16], strides = [1, 1]} : vector<8x16xf32> to vector<1x16xf32>
    %106 = vector.extract_strided_slice %68 {offsets = [7, 0, 0], sizes = [1, 16, 16], strides = [1, 1, 1]} : vector<8x16x16xf32> to vector<1x16x16xf32>
    %107 = vector.shape_cast %106 : vector<1x16x16xf32> to vector<16x16xf32>
    %cst_28 = arith.constant dense<0.000000e+00> : vector<1x16xf32>
    %108 = tpu.matmul %105, %107, %cst_28 {dimension_numbers = #tpu.dot_dimension_numbers<[1], [0], [0], [1], [0, 0, 1, 1], [], []>} : vector<1x16xf32>, vector<16x16xf32>, vector<1x16xf32> -> vector<1x16xf32>
    %109 = arith.addf %104, %108 : vector<1x16xf32>
    %110 = vector.extract_strided_slice %9 {offsets = [0, 2], sizes = [8, 1], strides = [1, 1]} : vector<8x8xf32> to vector<8x1xf32>
    %111 = vector.shape_cast %110 : vector<8x1xf32> to vector<8x1x1xf32>
    %112 = vector.broadcast %111 : vector<8x1x1xf32> to vector<8x16x16xf32>
    %113 = vector.broadcast %5 : vector<1x16x16xf32> to vector<8x16x16xf32>
    %114 = arith.mulf %112, %113 : vector<8x16x16xf32>
    %115 = vector.broadcast %7 : vector<1x16x16xf32> to vector<8x16x16xf32>
    %116 = arith.addf %114, %115 : vector<8x16x16xf32>
    %cst_29 = arith.constant 0.000000e+00 : f32
    %117 = vector.broadcast %cst_29 : f32 to vector<8x16x16xf32>
    %118 = arith.maximumf %116, %117 : vector<8x16x16xf32>
    %cst_30 = arith.constant 0.000000e+00 : f32
    %119 = vector.broadcast %cst_30 : f32 to vector<1x16xf32>
    %120 = vector.extract_strided_slice %3 {offsets = [0, 0], sizes = [1, 16], strides = [1, 1]} : vector<8x16xf32> to vector<1x16xf32>
    %121 = vector.extract_strided_slice %118 {offsets = [0, 0, 0], sizes = [1, 16, 16], strides = [1, 1, 1]} : vector<8x16x16xf32> to vector<1x16x16xf32>
    %122 = vector.shape_cast %121 : vector<1x16x16xf32> to vector<16x16xf32>
    %cst_31 = arith.constant dense<0.000000e+00> : vector<1x16xf32>
    %123 = tpu.matmul %120, %122, %cst_31 {dimension_numbers = #tpu.dot_dimension_numbers<[1], [0], [0], [1], [0, 0, 1, 1], [], []>} : vector<1x16xf32>, vector<16x16xf32>, vector<1x16xf32> -> vector<1x16xf32>
    %124 = arith.addf %119, %123 : vector<1x16xf32>
    %125 = vector.extract_strided_slice %3 {offsets = [1, 0], sizes = [1, 16], strides = [1, 1]} : vector<8x16xf32> to vector<1x16xf32>
    %126 = vector.extract_strided_slice %118 {offsets = [1, 0, 0], sizes = [1, 16, 16], strides = [1, 1, 1]} : vector<8x16x16xf32> to vector<1x16x16xf32>
    %127 = vector.shape_cast %126 : vector<1x16x16xf32> to vector<16x16xf32>
    %cst_32 = arith.constant dense<0.000000e+00> : vector<1x16xf32>
    %128 = tpu.matmul %125, %127, %cst_32 {dimension_numbers = #tpu.dot_dimension_numbers<[1], [0], [0], [1], [0, 0, 1, 1], [], []>} : vector<1x16xf32>, vector<16x16xf32>, vector<1x16xf32> -> vector<1x16xf32>
    %129 = arith.addf %124, %128 : vector<1x16xf32>
    %130 = vector.extract_strided_slice %3 {offsets = [2, 0], sizes = [1, 16], strides = [1, 1]} : vector<8x16xf32> to vector<1x16xf32>
    %131 = vector.extract_strided_slice %118 {offsets = [2, 0, 0], sizes = [1, 16, 16], strides = [1, 1, 1]} : vector<8x16x16xf32> to vector<1x16x16xf32>
    %132 = vector.shape_cast %131 : vector<1x16x16xf32> to vector<16x16xf32>
    %cst_33 = arith.constant dense<0.000000e+00> : vector<1x16xf32>
    %133 = tpu.matmul %130, %132, %cst_33 {dimension_numbers = #tpu.dot_dimension_numbers<[1], [0], [0], [1], [0, 0, 1, 1], [], []>} : vector<1x16xf32>, vector<16x16xf32>, vector<1x16xf32> -> vector<1x16xf32>
    %134 = arith.addf %129, %133 : vector<1x16xf32>
    %135 = vector.extract_strided_slice %3 {offsets = [3, 0], sizes = [1, 16], strides = [1, 1]} : vector<8x16xf32> to vector<1x16xf32>
    %136 = vector.extract_strided_slice %118 {offsets = [3, 0, 0], sizes = [1, 16, 16], strides = [1, 1, 1]} : vector<8x16x16xf32> to vector<1x16x16xf32>
    %137 = vector.shape_cast %136 : vector<1x16x16xf32> to vector<16x16xf32>
    %cst_34 = arith.constant dense<0.000000e+00> : vector<1x16xf32>
    %138 = tpu.matmul %135, %137, %cst_34 {dimension_numbers = #tpu.dot_dimension_numbers<[1], [0], [0], [1], [0, 0, 1, 1], [], []>} : vector<1x16xf32>, vector<16x16xf32>, vector<1x16xf32> -> vector<1x16xf32>
    %139 = arith.addf %134, %138 : vector<1x16xf32>
    %140 = vector.extract_strided_slice %3 {offsets = [4, 0], sizes = [1, 16], strides = [1, 1]} : vector<8x16xf32> to vector<1x16xf32>
    %141 = vector.extract_strided_slice %118 {offsets = [4, 0, 0], sizes = [1, 16, 16], strides = [1, 1, 1]} : vector<8x16x16xf32> to vector<1x16x16xf32>
    %142 = vector.shape_cast %141 : vector<1x16x16xf32> to vector<16x16xf32>
    %cst_35 = arith.constant dense<0.000000e+00> : vector<1x16xf32>
    %143 = tpu.matmul %140, %142, %cst_35 {dimension_numbers = #tpu.dot_dimension_numbers<[1], [0], [0], [1], [0, 0, 1, 1], [], []>} : vector<1x16xf32>, vector<16x16xf32>, vector<1x16xf32> -> vector<1x16xf32>
    %144 = arith.addf %139, %143 : vector<1x16xf32>
    %145 = vector.extract_strided_slice %3 {offsets = [5, 0], sizes = [1, 16], strides = [1, 1]} : vector<8x16xf32> to vector<1x16xf32>
    %146 = vector.extract_strided_slice %118 {offsets = [5, 0, 0], sizes = [1, 16, 16], strides = [1, 1, 1]} : vector<8x16x16xf32> to vector<1x16x16xf32>
    %147 = vector.shape_cast %146 : vector<1x16x16xf32> to vector<16x16xf32>
    %cst_36 = arith.constant dense<0.000000e+00> : vector<1x16xf32>
    %148 = tpu.matmul %145, %147, %cst_36 {dimension_numbers = #tpu.dot_dimension_numbers<[1], [0], [0], [1], [0, 0, 1, 1], [], []>} : vector<1x16xf32>, vector<16x16xf32>, vector<1x16xf32> -> vector<1x16xf32>
    %149 = arith.addf %144, %148 : vector<1x16xf32>
    %150 = vector.extract_strided_slice %3 {offsets = [6, 0], sizes = [1, 16], strides = [1, 1]} : vector<8x16xf32> to vector<1x16xf32>
    %151 = vector.extract_strided_slice %118 {offsets = [6, 0, 0], sizes = [1, 16, 16], strides = [1, 1, 1]} : vector<8x16x16xf32> to vector<1x16x16xf32>
    %152 = vector.shape_cast %151 : vector<1x16x16xf32> to vector<16x16xf32>
    %cst_37 = arith.constant dense<0.000000e+00> : vector<1x16xf32>
    %153 = tpu.matmul %150, %152, %cst_37 {dimension_numbers = #tpu.dot_dimension_numbers<[1], [0], [0], [1], [0, 0, 1, 1], [], []>} : vector<1x16xf32>, vector<16x16xf32>, vector<1x16xf32> -> vector<1x16xf32>
    %154 = arith.addf %149, %153 : vector<1x16xf32>
    %155 = vector.extract_strided_slice %3 {offsets = [7, 0], sizes = [1, 16], strides = [1, 1]} : vector<8x16xf32> to vector<1x16xf32>
    %156 = vector.extract_strided_slice %118 {offsets = [7, 0, 0], sizes = [1, 16, 16], strides = [1, 1, 1]} : vector<8x16x16xf32> to vector<1x16x16xf32>
    %157 = vector.shape_cast %156 : vector<1x16x16xf32> to vector<16x16xf32>
    %cst_38 = arith.constant dense<0.000000e+00> : vector<1x16xf32>
    %158 = tpu.matmul %155, %157, %cst_38 {dimension_numbers = #tpu.dot_dimension_numbers<[1], [0], [0], [1], [0, 0, 1, 1], [], []>} : vector<1x16xf32>, vector<16x16xf32>, vector<1x16xf32> -> vector<1x16xf32>
    %159 = arith.addf %154, %158 : vector<1x16xf32>
    %160 = vector.extract_strided_slice %9 {offsets = [0, 3], sizes = [8, 1], strides = [1, 1]} : vector<8x8xf32> to vector<8x1xf32>
    %161 = vector.shape_cast %160 : vector<8x1xf32> to vector<8x1x1xf32>
    %162 = vector.broadcast %161 : vector<8x1x1xf32> to vector<8x16x16xf32>
    %163 = vector.broadcast %5 : vector<1x16x16xf32> to vector<8x16x16xf32>
    %164 = arith.mulf %162, %163 : vector<8x16x16xf32>
    %165 = vector.broadcast %7 : vector<1x16x16xf32> to vector<8x16x16xf32>
    %166 = arith.addf %164, %165 : vector<8x16x16xf32>
    %cst_39 = arith.constant 0.000000e+00 : f32
    %167 = vector.broadcast %cst_39 : f32 to vector<8x16x16xf32>
    %168 = arith.maximumf %166, %167 : vector<8x16x16xf32>
    %cst_40 = arith.constant 0.000000e+00 : f32
    %169 = vector.broadcast %cst_40 : f32 to vector<1x16xf32>
    %170 = vector.extract_strided_slice %3 {offsets = [0, 0], sizes = [1, 16], strides = [1, 1]} : vector<8x16xf32> to vector<1x16xf32>
    %171 = vector.extract_strided_slice %168 {offsets = [0, 0, 0], sizes = [1, 16, 16], strides = [1, 1, 1]} : vector<8x16x16xf32> to vector<1x16x16xf32>
    %172 = vector.shape_cast %171 : vector<1x16x16xf32> to vector<16x16xf32>
    %cst_41 = arith.constant dense<0.000000e+00> : vector<1x16xf32>
    %173 = tpu.matmul %170, %172, %cst_41 {dimension_numbers = #tpu.dot_dimension_numbers<[1], [0], [0], [1], [0, 0, 1, 1], [], []>} : vector<1x16xf32>, vector<16x16xf32>, vector<1x16xf32> -> vector<1x16xf32>
    %174 = arith.addf %169, %173 : vector<1x16xf32>
    %175 = vector.extract_strided_slice %3 {offsets = [1, 0], sizes = [1, 16], strides = [1, 1]} : vector<8x16xf32> to vector<1x16xf32>
    %176 = vector.extract_strided_slice %168 {offsets = [1, 0, 0], sizes = [1, 16, 16], strides = [1, 1, 1]} : vector<8x16x16xf32> to vector<1x16x16xf32>
    %177 = vector.shape_cast %176 : vector<1x16x16xf32> to vector<16x16xf32>
    %cst_42 = arith.constant dense<0.000000e+00> : vector<1x16xf32>
    %178 = tpu.matmul %175, %177, %cst_42 {dimension_numbers = #tpu.dot_dimension_numbers<[1], [0], [0], [1], [0, 0, 1, 1], [], []>} : vector<1x16xf32>, vector<16x16xf32>, vector<1x16xf32> -> vector<1x16xf32>
    %179 = arith.addf %174, %178 : vector<1x16xf32>
    %180 = vector.extract_strided_slice %3 {offsets = [2, 0], sizes = [1, 16], strides = [1, 1]} : vector<8x16xf32> to vector<1x16xf32>
    %181 = vector.extract_strided_slice %168 {offsets = [2, 0, 0], sizes = [1, 16, 16], strides = [1, 1, 1]} : vector<8x16x16xf32> to vector<1x16x16xf32>
    %182 = vector.shape_cast %181 : vector<1x16x16xf32> to vector<16x16xf32>
    %cst_43 = arith.constant dense<0.000000e+00> : vector<1x16xf32>
    %183 = tpu.matmul %180, %182, %cst_43 {dimension_numbers = #tpu.dot_dimension_numbers<[1], [0], [0], [1], [0, 0, 1, 1], [], []>} : vector<1x16xf32>, vector<16x16xf32>, vector<1x16xf32> -> vector<1x16xf32>
    %184 = arith.addf %179, %183 : vector<1x16xf32>
    %185 = vector.extract_strided_slice %3 {offsets = [3, 0], sizes = [1, 16], strides = [1, 1]} : vector<8x16xf32> to vector<1x16xf32>
    %186 = vector.extract_strided_slice %168 {offsets = [3, 0, 0], sizes = [1, 16, 16], strides = [1, 1, 1]} : vector<8x16x16xf32> to vector<1x16x16xf32>
    %187 = vector.shape_cast %186 : vector<1x16x16xf32> to vector<16x16xf32>
    %cst_44 = arith.constant dense<0.000000e+00> : vector<1x16xf32>
    %188 = tpu.matmul %185, %187, %cst_44 {dimension_numbers = #tpu.dot_dimension_numbers<[1], [0], [0], [1], [0, 0, 1, 1], [], []>} : vector<1x16xf32>, vector<16x16xf32>, vector<1x16xf32> -> vector<1x16xf32>
    %189 = arith.addf %184, %188 : vector<1x16xf32>
    %190 = vector.extract_strided_slice %3 {offsets = [4, 0], sizes = [1, 16], strides = [1, 1]} : vector<8x16xf32> to vector<1x16xf32>
    %191 = vector.extract_strided_slice %168 {offsets = [4, 0, 0], sizes = [1, 16, 16], strides = [1, 1, 1]} : vector<8x16x16xf32> to vector<1x16x16xf32>
    %192 = vector.shape_cast %191 : vector<1x16x16xf32> to vector<16x16xf32>
    %cst_45 = arith.constant dense<0.000000e+00> : vector<1x16xf32>
    %193 = tpu.matmul %190, %192, %cst_45 {dimension_numbers = #tpu.dot_dimension_numbers<[1], [0], [0], [1], [0, 0, 1, 1], [], []>} : vector<1x16xf32>, vector<16x16xf32>, vector<1x16xf32> -> vector<1x16xf32>
    %194 = arith.addf %189, %193 : vector<1x16xf32>
    %195 = vector.extract_strided_slice %3 {offsets = [5, 0], sizes = [1, 16], strides = [1, 1]} : vector<8x16xf32> to vector<1x16xf32>
    %196 = vector.extract_strided_slice %168 {offsets = [5, 0, 0], sizes = [1, 16, 16], strides = [1, 1, 1]} : vector<8x16x16xf32> to vector<1x16x16xf32>
    %197 = vector.shape_cast %196 : vector<1x16x16xf32> to vector<16x16xf32>
    %cst_46 = arith.constant dense<0.000000e+00> : vector<1x16xf32>
    %198 = tpu.matmul %195, %197, %cst_46 {dimension_numbers = #tpu.dot_dimension_numbers<[1], [0], [0], [1], [0, 0, 1, 1], [], []>} : vector<1x16xf32>, vector<16x16xf32>, vector<1x16xf32> -> vector<1x16xf32>
    %199 = arith.addf %194, %198 : vector<1x16xf32>
    %200 = vector.extract_strided_slice %3 {offsets = [6, 0], sizes = [1, 16], strides = [1, 1]} : vector<8x16xf32> to vector<1x16xf32>
    %201 = vector.extract_strided_slice %168 {offsets = [6, 0, 0], sizes = [1, 16, 16], strides = [1, 1, 1]} : vector<8x16x16xf32> to vector<1x16x16xf32>
    %202 = vector.shape_cast %201 : vector<1x16x16xf32> to vector<16x16xf32>
    %cst_47 = arith.constant dense<0.000000e+00> : vector<1x16xf32>
    %203 = tpu.matmul %200, %202, %cst_47 {dimension_numbers = #tpu.dot_dimension_numbers<[1], [0], [0], [1], [0, 0, 1, 1], [], []>} : vector<1x16xf32>, vector<16x16xf32>, vector<1x16xf32> -> vector<1x16xf32>
    %204 = arith.addf %199, %203 : vector<1x16xf32>
    %205 = vector.extract_strided_slice %3 {offsets = [7, 0], sizes = [1, 16], strides = [1, 1]} : vector<8x16xf32> to vector<1x16xf32>
    %206 = vector.extract_strided_slice %168 {offsets = [7, 0, 0], sizes = [1, 16, 16], strides = [1, 1, 1]} : vector<8x16x16xf32> to vector<1x16x16xf32>
    %207 = vector.shape_cast %206 : vector<1x16x16xf32> to vector<16x16xf32>
    %cst_48 = arith.constant dense<0.000000e+00> : vector<1x16xf32>
    %208 = tpu.matmul %205, %207, %cst_48 {dimension_numbers = #tpu.dot_dimension_numbers<[1], [0], [0], [1], [0, 0, 1, 1], [], []>} : vector<1x16xf32>, vector<16x16xf32>, vector<1x16xf32> -> vector<1x16xf32>
    %209 = arith.addf %204, %208 : vector<1x16xf32>
    %210 = vector.extract_strided_slice %9 {offsets = [0, 4], sizes = [8, 1], strides = [1, 1]} : vector<8x8xf32> to vector<8x1xf32>
    %211 = vector.shape_cast %210 : vector<8x1xf32> to vector<8x1x1xf32>
    %212 = vector.broadcast %211 : vector<8x1x1xf32> to vector<8x16x16xf32>
    %213 = vector.broadcast %5 : vector<1x16x16xf32> to vector<8x16x16xf32>
    %214 = arith.mulf %212, %213 : vector<8x16x16xf32>
    %215 = vector.broadcast %7 : vector<1x16x16xf32> to vector<8x16x16xf32>
    %216 = arith.addf %214, %215 : vector<8x16x16xf32>
    %cst_49 = arith.constant 0.000000e+00 : f32
    %217 = vector.broadcast %cst_49 : f32 to vector<8x16x16xf32>
    %218 = arith.maximumf %216, %217 : vector<8x16x16xf32>
    %cst_50 = arith.constant 0.000000e+00 : f32
    %219 = vector.broadcast %cst_50 : f32 to vector<1x16xf32>
    %220 = vector.extract_strided_slice %3 {offsets = [0, 0], sizes = [1, 16], strides = [1, 1]} : vector<8x16xf32> to vector<1x16xf32>
    %221 = vector.extract_strided_slice %218 {offsets = [0, 0, 0], sizes = [1, 16, 16], strides = [1, 1, 1]} : vector<8x16x16xf32> to vector<1x16x16xf32>
    %222 = vector.shape_cast %221 : vector<1x16x16xf32> to vector<16x16xf32>
    %cst_51 = arith.constant dense<0.000000e+00> : vector<1x16xf32>
    %223 = tpu.matmul %220, %222, %cst_51 {dimension_numbers = #tpu.dot_dimension_numbers<[1], [0], [0], [1], [0, 0, 1, 1], [], []>} : vector<1x16xf32>, vector<16x16xf32>, vector<1x16xf32> -> vector<1x16xf32>
    %224 = arith.addf %219, %223 : vector<1x16xf32>
    %225 = vector.extract_strided_slice %3 {offsets = [1, 0], sizes = [1, 16], strides = [1, 1]} : vector<8x16xf32> to vector<1x16xf32>
    %226 = vector.extract_strided_slice %218 {offsets = [1, 0, 0], sizes = [1, 16, 16], strides = [1, 1, 1]} : vector<8x16x16xf32> to vector<1x16x16xf32>
    %227 = vector.shape_cast %226 : vector<1x16x16xf32> to vector<16x16xf32>
    %cst_52 = arith.constant dense<0.000000e+00> : vector<1x16xf32>
    %228 = tpu.matmul %225, %227, %cst_52 {dimension_numbers = #tpu.dot_dimension_numbers<[1], [0], [0], [1], [0, 0, 1, 1], [], []>} : vector<1x16xf32>, vector<16x16xf32>, vector<1x16xf32> -> vector<1x16xf32>
    %229 = arith.addf %224, %228 : vector<1x16xf32>
    %230 = vector.extract_strided_slice %3 {offsets = [2, 0], sizes = [1, 16], strides = [1, 1]} : vector<8x16xf32> to vector<1x16xf32>
    %231 = vector.extract_strided_slice %218 {offsets = [2, 0, 0], sizes = [1, 16, 16], strides = [1, 1, 1]} : vector<8x16x16xf32> to vector<1x16x16xf32>
    %232 = vector.shape_cast %231 : vector<1x16x16xf32> to vector<16x16xf32>
    %cst_53 = arith.constant dense<0.000000e+00> : vector<1x16xf32>
    %233 = tpu.matmul %230, %232, %cst_53 {dimension_numbers = #tpu.dot_dimension_numbers<[1], [0], [0], [1], [0, 0, 1, 1], [], []>} : vector<1x16xf32>, vector<16x16xf32>, vector<1x16xf32> -> vector<1x16xf32>
    %234 = arith.addf %229, %233 : vector<1x16xf32>
    %235 = vector.extract_strided_slice %3 {offsets = [3, 0], sizes = [1, 16], strides = [1, 1]} : vector<8x16xf32> to vector<1x16xf32>
    %236 = vector.extract_strided_slice %218 {offsets = [3, 0, 0], sizes = [1, 16, 16], strides = [1, 1, 1]} : vector<8x16x16xf32> to vector<1x16x16xf32>
    %237 = vector.shape_cast %236 : vector<1x16x16xf32> to vector<16x16xf32>
    %cst_54 = arith.constant dense<0.000000e+00> : vector<1x16xf32>
    %238 = tpu.matmul %235, %237, %cst_54 {dimension_numbers = #tpu.dot_dimension_numbers<[1], [0], [0], [1], [0, 0, 1, 1], [], []>} : vector<1x16xf32>, vector<16x16xf32>, vector<1x16xf32> -> vector<1x16xf32>
    %239 = arith.addf %234, %238 : vector<1x16xf32>
    %240 = vector.extract_strided_slice %3 {offsets = [4, 0], sizes = [1, 16], strides = [1, 1]} : vector<8x16xf32> to vector<1x16xf32>
    %241 = vector.extract_strided_slice %218 {offsets = [4, 0, 0], sizes = [1, 16, 16], strides = [1, 1, 1]} : vector<8x16x16xf32> to vector<1x16x16xf32>
    %242 = vector.shape_cast %241 : vector<1x16x16xf32> to vector<16x16xf32>
    %cst_55 = arith.constant dense<0.000000e+00> : vector<1x16xf32>
    %243 = tpu.matmul %240, %242, %cst_55 {dimension_numbers = #tpu.dot_dimension_numbers<[1], [0], [0], [1], [0, 0, 1, 1], [], []>} : vector<1x16xf32>, vector<16x16xf32>, vector<1x16xf32> -> vector<1x16xf32>
    %244 = arith.addf %239, %243 : vector<1x16xf32>
    %245 = vector.extract_strided_slice %3 {offsets = [5, 0], sizes = [1, 16], strides = [1, 1]} : vector<8x16xf32> to vector<1x16xf32>
    %246 = vector.extract_strided_slice %218 {offsets = [5, 0, 0], sizes = [1, 16, 16], strides = [1, 1, 1]} : vector<8x16x16xf32> to vector<1x16x16xf32>
    %247 = vector.shape_cast %246 : vector<1x16x16xf32> to vector<16x16xf32>
    %cst_56 = arith.constant dense<0.000000e+00> : vector<1x16xf32>
    %248 = tpu.matmul %245, %247, %cst_56 {dimension_numbers = #tpu.dot_dimension_numbers<[1], [0], [0], [1], [0, 0, 1, 1], [], []>} : vector<1x16xf32>, vector<16x16xf32>, vector<1x16xf32> -> vector<1x16xf32>
    %249 = arith.addf %244, %248 : vector<1x16xf32>
    %250 = vector.extract_strided_slice %3 {offsets = [6, 0], sizes = [1, 16], strides = [1, 1]} : vector<8x16xf32> to vector<1x16xf32>
    %251 = vector.extract_strided_slice %218 {offsets = [6, 0, 0], sizes = [1, 16, 16], strides = [1, 1, 1]} : vector<8x16x16xf32> to vector<1x16x16xf32>
    %252 = vector.shape_cast %251 : vector<1x16x16xf32> to vector<16x16xf32>
    %cst_57 = arith.constant dense<0.000000e+00> : vector<1x16xf32>
    %253 = tpu.matmul %250, %252, %cst_57 {dimension_numbers = #tpu.dot_dimension_numbers<[1], [0], [0], [1], [0, 0, 1, 1], [], []>} : vector<1x16xf32>, vector<16x16xf32>, vector<1x16xf32> -> vector<1x16xf32>
    %254 = arith.addf %249, %253 : vector<1x16xf32>
    %255 = vector.extract_strided_slice %3 {offsets = [7, 0], sizes = [1, 16], strides = [1, 1]} : vector<8x16xf32> to vector<1x16xf32>
    %256 = vector.extract_strided_slice %218 {offsets = [7, 0, 0], sizes = [1, 16, 16], strides = [1, 1, 1]} : vector<8x16x16xf32> to vector<1x16x16xf32>
    %257 = vector.shape_cast %256 : vector<1x16x16xf32> to vector<16x16xf32>
    %cst_58 = arith.constant dense<0.000000e+00> : vector<1x16xf32>
    %258 = tpu.matmul %255, %257, %cst_58 {dimension_numbers = #tpu.dot_dimension_numbers<[1], [0], [0], [1], [0, 0, 1, 1], [], []>} : vector<1x16xf32>, vector<16x16xf32>, vector<1x16xf32> -> vector<1x16xf32>
    %259 = arith.addf %254, %258 : vector<1x16xf32>
    %260 = vector.extract_strided_slice %9 {offsets = [0, 5], sizes = [8, 1], strides = [1, 1]} : vector<8x8xf32> to vector<8x1xf32>
    %261 = vector.shape_cast %260 : vector<8x1xf32> to vector<8x1x1xf32>
    %262 = vector.broadcast %261 : vector<8x1x1xf32> to vector<8x16x16xf32>
    %263 = vector.broadcast %5 : vector<1x16x16xf32> to vector<8x16x16xf32>
    %264 = arith.mulf %262, %263 : vector<8x16x16xf32>
    %265 = vector.broadcast %7 : vector<1x16x16xf32> to vector<8x16x16xf32>
    %266 = arith.addf %264, %265 : vector<8x16x16xf32>
    %cst_59 = arith.constant 0.000000e+00 : f32
    %267 = vector.broadcast %cst_59 : f32 to vector<8x16x16xf32>
    %268 = arith.maximumf %266, %267 : vector<8x16x16xf32>
    %cst_60 = arith.constant 0.000000e+00 : f32
    %269 = vector.broadcast %cst_60 : f32 to vector<1x16xf32>
    %270 = vector.extract_strided_slice %3 {offsets = [0, 0], sizes = [1, 16], strides = [1, 1]} : vector<8x16xf32> to vector<1x16xf32>
    %271 = vector.extract_strided_slice %268 {offsets = [0, 0, 0], sizes = [1, 16, 16], strides = [1, 1, 1]} : vector<8x16x16xf32> to vector<1x16x16xf32>
    %272 = vector.shape_cast %271 : vector<1x16x16xf32> to vector<16x16xf32>
    %cst_61 = arith.constant dense<0.000000e+00> : vector<1x16xf32>
    %273 = tpu.matmul %270, %272, %cst_61 {dimension_numbers = #tpu.dot_dimension_numbers<[1], [0], [0], [1], [0, 0, 1, 1], [], []>} : vector<1x16xf32>, vector<16x16xf32>, vector<1x16xf32> -> vector<1x16xf32>
    %274 = arith.addf %269, %273 : vector<1x16xf32>
    %275 = vector.extract_strided_slice %3 {offsets = [1, 0], sizes = [1, 16], strides = [1, 1]} : vector<8x16xf32> to vector<1x16xf32>
    %276 = vector.extract_strided_slice %268 {offsets = [1, 0, 0], sizes = [1, 16, 16], strides = [1, 1, 1]} : vector<8x16x16xf32> to vector<1x16x16xf32>
    %277 = vector.shape_cast %276 : vector<1x16x16xf32> to vector<16x16xf32>
    %cst_62 = arith.constant dense<0.000000e+00> : vector<1x16xf32>
    %278 = tpu.matmul %275, %277, %cst_62 {dimension_numbers = #tpu.dot_dimension_numbers<[1], [0], [0], [1], [0, 0, 1, 1], [], []>} : vector<1x16xf32>, vector<16x16xf32>, vector<1x16xf32> -> vector<1x16xf32>
    %279 = arith.addf %274, %278 : vector<1x16xf32>
    %280 = vector.extract_strided_slice %3 {offsets = [2, 0], sizes = [1, 16], strides = [1, 1]} : vector<8x16xf32> to vector<1x16xf32>
    %281 = vector.extract_strided_slice %268 {offsets = [2, 0, 0], sizes = [1, 16, 16], strides = [1, 1, 1]} : vector<8x16x16xf32> to vector<1x16x16xf32>
    %282 = vector.shape_cast %281 : vector<1x16x16xf32> to vector<16x16xf32>
    %cst_63 = arith.constant dense<0.000000e+00> : vector<1x16xf32>
    %283 = tpu.matmul %280, %282, %cst_63 {dimension_numbers = #tpu.dot_dimension_numbers<[1], [0], [0], [1], [0, 0, 1, 1], [], []>} : vector<1x16xf32>, vector<16x16xf32>, vector<1x16xf32> -> vector<1x16xf32>
    %284 = arith.addf %279, %283 : vector<1x16xf32>
    %285 = vector.extract_strided_slice %3 {offsets = [3, 0], sizes = [1, 16], strides = [1, 1]} : vector<8x16xf32> to vector<1x16xf32>
    %286 = vector.extract_strided_slice %268 {offsets = [3, 0, 0], sizes = [1, 16, 16], strides = [1, 1, 1]} : vector<8x16x16xf32> to vector<1x16x16xf32>
    %287 = vector.shape_cast %286 : vector<1x16x16xf32> to vector<16x16xf32>
    %cst_64 = arith.constant dense<0.000000e+00> : vector<1x16xf32>
    %288 = tpu.matmul %285, %287, %cst_64 {dimension_numbers = #tpu.dot_dimension_numbers<[1], [0], [0], [1], [0, 0, 1, 1], [], []>} : vector<1x16xf32>, vector<16x16xf32>, vector<1x16xf32> -> vector<1x16xf32>
    %289 = arith.addf %284, %288 : vector<1x16xf32>
    %290 = vector.extract_strided_slice %3 {offsets = [4, 0], sizes = [1, 16], strides = [1, 1]} : vector<8x16xf32> to vector<1x16xf32>
    %291 = vector.extract_strided_slice %268 {offsets = [4, 0, 0], sizes = [1, 16, 16], strides = [1, 1, 1]} : vector<8x16x16xf32> to vector<1x16x16xf32>
    %292 = vector.shape_cast %291 : vector<1x16x16xf32> to vector<16x16xf32>
    %cst_65 = arith.constant dense<0.000000e+00> : vector<1x16xf32>
    %293 = tpu.matmul %290, %292, %cst_65 {dimension_numbers = #tpu.dot_dimension_numbers<[1], [0], [0], [1], [0, 0, 1, 1], [], []>} : vector<1x16xf32>, vector<16x16xf32>, vector<1x16xf32> -> vector<1x16xf32>
    %294 = arith.addf %289, %293 : vector<1x16xf32>
    %295 = vector.extract_strided_slice %3 {offsets = [5, 0], sizes = [1, 16], strides = [1, 1]} : vector<8x16xf32> to vector<1x16xf32>
    %296 = vector.extract_strided_slice %268 {offsets = [5, 0, 0], sizes = [1, 16, 16], strides = [1, 1, 1]} : vector<8x16x16xf32> to vector<1x16x16xf32>
    %297 = vector.shape_cast %296 : vector<1x16x16xf32> to vector<16x16xf32>
    %cst_66 = arith.constant dense<0.000000e+00> : vector<1x16xf32>
    %298 = tpu.matmul %295, %297, %cst_66 {dimension_numbers = #tpu.dot_dimension_numbers<[1], [0], [0], [1], [0, 0, 1, 1], [], []>} : vector<1x16xf32>, vector<16x16xf32>, vector<1x16xf32> -> vector<1x16xf32>
    %299 = arith.addf %294, %298 : vector<1x16xf32>
    %300 = vector.extract_strided_slice %3 {offsets = [6, 0], sizes = [1, 16], strides = [1, 1]} : vector<8x16xf32> to vector<1x16xf32>
    %301 = vector.extract_strided_slice %268 {offsets = [6, 0, 0], sizes = [1, 16, 16], strides = [1, 1, 1]} : vector<8x16x16xf32> to vector<1x16x16xf32>
    %302 = vector.shape_cast %301 : vector<1x16x16xf32> to vector<16x16xf32>
    %cst_67 = arith.constant dense<0.000000e+00> : vector<1x16xf32>
    %303 = tpu.matmul %300, %302, %cst_67 {dimension_numbers = #tpu.dot_dimension_numbers<[1], [0], [0], [1], [0, 0, 1, 1], [], []>} : vector<1x16xf32>, vector<16x16xf32>, vector<1x16xf32> -> vector<1x16xf32>
    %304 = arith.addf %299, %303 : vector<1x16xf32>
    %305 = vector.extract_strided_slice %3 {offsets = [7, 0], sizes = [1, 16], strides = [1, 1]} : vector<8x16xf32> to vector<1x16xf32>
    %306 = vector.extract_strided_slice %268 {offsets = [7, 0, 0], sizes = [1, 16, 16], strides = [1, 1, 1]} : vector<8x16x16xf32> to vector<1x16x16xf32>
    %307 = vector.shape_cast %306 : vector<1x16x16xf32> to vector<16x16xf32>
    %cst_68 = arith.constant dense<0.000000e+00> : vector<1x16xf32>
    %308 = tpu.matmul %305, %307, %cst_68 {dimension_numbers = #tpu.dot_dimension_numbers<[1], [0], [0], [1], [0, 0, 1, 1], [], []>} : vector<1x16xf32>, vector<16x16xf32>, vector<1x16xf32> -> vector<1x16xf32>
    %309 = arith.addf %304, %308 : vector<1x16xf32>
    %310 = vector.extract_strided_slice %9 {offsets = [0, 6], sizes = [8, 1], strides = [1, 1]} : vector<8x8xf32> to vector<8x1xf32>
    %311 = vector.shape_cast %310 : vector<8x1xf32> to vector<8x1x1xf32>
    %312 = vector.broadcast %311 : vector<8x1x1xf32> to vector<8x16x16xf32>
    %313 = vector.broadcast %5 : vector<1x16x16xf32> to vector<8x16x16xf32>
    %314 = arith.mulf %312, %313 : vector<8x16x16xf32>
    %315 = vector.broadcast %7 : vector<1x16x16xf32> to vector<8x16x16xf32>
    %316 = arith.addf %314, %315 : vector<8x16x16xf32>
    %cst_69 = arith.constant 0.000000e+00 : f32
    %317 = vector.broadcast %cst_69 : f32 to vector<8x16x16xf32>
    %318 = arith.maximumf %316, %317 : vector<8x16x16xf32>
    %cst_70 = arith.constant 0.000000e+00 : f32
    %319 = vector.broadcast %cst_70 : f32 to vector<1x16xf32>
    %320 = vector.extract_strided_slice %3 {offsets = [0, 0], sizes = [1, 16], strides = [1, 1]} : vector<8x16xf32> to vector<1x16xf32>
    %321 = vector.extract_strided_slice %318 {offsets = [0, 0, 0], sizes = [1, 16, 16], strides = [1, 1, 1]} : vector<8x16x16xf32> to vector<1x16x16xf32>
    %322 = vector.shape_cast %321 : vector<1x16x16xf32> to vector<16x16xf32>
    %cst_71 = arith.constant dense<0.000000e+00> : vector<1x16xf32>
    %323 = tpu.matmul %320, %322, %cst_71 {dimension_numbers = #tpu.dot_dimension_numbers<[1], [0], [0], [1], [0, 0, 1, 1], [], []>} : vector<1x16xf32>, vector<16x16xf32>, vector<1x16xf32> -> vector<1x16xf32>
    %324 = arith.addf %319, %323 : vector<1x16xf32>
    %325 = vector.extract_strided_slice %3 {offsets = [1, 0], sizes = [1, 16], strides = [1, 1]} : vector<8x16xf32> to vector<1x16xf32>
    %326 = vector.extract_strided_slice %318 {offsets = [1, 0, 0], sizes = [1, 16, 16], strides = [1, 1, 1]} : vector<8x16x16xf32> to vector<1x16x16xf32>
    %327 = vector.shape_cast %326 : vector<1x16x16xf32> to vector<16x16xf32>
    %cst_72 = arith.constant dense<0.000000e+00> : vector<1x16xf32>
    %328 = tpu.matmul %325, %327, %cst_72 {dimension_numbers = #tpu.dot_dimension_numbers<[1], [0], [0], [1], [0, 0, 1, 1], [], []>} : vector<1x16xf32>, vector<16x16xf32>, vector<1x16xf32> -> vector<1x16xf32>
    %329 = arith.addf %324, %328 : vector<1x16xf32>
    %330 = vector.extract_strided_slice %3 {offsets = [2, 0], sizes = [1, 16], strides = [1, 1]} : vector<8x16xf32> to vector<1x16xf32>
    %331 = vector.extract_strided_slice %318 {offsets = [2, 0, 0], sizes = [1, 16, 16], strides = [1, 1, 1]} : vector<8x16x16xf32> to vector<1x16x16xf32>
    %332 = vector.shape_cast %331 : vector<1x16x16xf32> to vector<16x16xf32>
    %cst_73 = arith.constant dense<0.000000e+00> : vector<1x16xf32>
    %333 = tpu.matmul %330, %332, %cst_73 {dimension_numbers = #tpu.dot_dimension_numbers<[1], [0], [0], [1], [0, 0, 1, 1], [], []>} : vector<1x16xf32>, vector<16x16xf32>, vector<1x16xf32> -> vector<1x16xf32>
    %334 = arith.addf %329, %333 : vector<1x16xf32>
    %335 = vector.extract_strided_slice %3 {offsets = [3, 0], sizes = [1, 16], strides = [1, 1]} : vector<8x16xf32> to vector<1x16xf32>
    %336 = vector.extract_strided_slice %318 {offsets = [3, 0, 0], sizes = [1, 16, 16], strides = [1, 1, 1]} : vector<8x16x16xf32> to vector<1x16x16xf32>
    %337 = vector.shape_cast %336 : vector<1x16x16xf32> to vector<16x16xf32>
    %cst_74 = arith.constant dense<0.000000e+00> : vector<1x16xf32>
    %338 = tpu.matmul %335, %337, %cst_74 {dimension_numbers = #tpu.dot_dimension_numbers<[1], [0], [0], [1], [0, 0, 1, 1], [], []>} : vector<1x16xf32>, vector<16x16xf32>, vector<1x16xf32> -> vector<1x16xf32>
    %339 = arith.addf %334, %338 : vector<1x16xf32>
    %340 = vector.extract_strided_slice %3 {offsets = [4, 0], sizes = [1, 16], strides = [1, 1]} : vector<8x16xf32> to vector<1x16xf32>
    %341 = vector.extract_strided_slice %318 {offsets = [4, 0, 0], sizes = [1, 16, 16], strides = [1, 1, 1]} : vector<8x16x16xf32> to vector<1x16x16xf32>
    %342 = vector.shape_cast %341 : vector<1x16x16xf32> to vector<16x16xf32>
    %cst_75 = arith.constant dense<0.000000e+00> : vector<1x16xf32>
    %343 = tpu.matmul %340, %342, %cst_75 {dimension_numbers = #tpu.dot_dimension_numbers<[1], [0], [0], [1], [0, 0, 1, 1], [], []>} : vector<1x16xf32>, vector<16x16xf32>, vector<1x16xf32> -> vector<1x16xf32>
    %344 = arith.addf %339, %343 : vector<1x16xf32>
    %345 = vector.extract_strided_slice %3 {offsets = [5, 0], sizes = [1, 16], strides = [1, 1]} : vector<8x16xf32> to vector<1x16xf32>
    %346 = vector.extract_strided_slice %318 {offsets = [5, 0, 0], sizes = [1, 16, 16], strides = [1, 1, 1]} : vector<8x16x16xf32> to vector<1x16x16xf32>
    %347 = vector.shape_cast %346 : vector<1x16x16xf32> to vector<16x16xf32>
    %cst_76 = arith.constant dense<0.000000e+00> : vector<1x16xf32>
    %348 = tpu.matmul %345, %347, %cst_76 {dimension_numbers = #tpu.dot_dimension_numbers<[1], [0], [0], [1], [0, 0, 1, 1], [], []>} : vector<1x16xf32>, vector<16x16xf32>, vector<1x16xf32> -> vector<1x16xf32>
    %349 = arith.addf %344, %348 : vector<1x16xf32>
    %350 = vector.extract_strided_slice %3 {offsets = [6, 0], sizes = [1, 16], strides = [1, 1]} : vector<8x16xf32> to vector<1x16xf32>
    %351 = vector.extract_strided_slice %318 {offsets = [6, 0, 0], sizes = [1, 16, 16], strides = [1, 1, 1]} : vector<8x16x16xf32> to vector<1x16x16xf32>
    %352 = vector.shape_cast %351 : vector<1x16x16xf32> to vector<16x16xf32>
    %cst_77 = arith.constant dense<0.000000e+00> : vector<1x16xf32>
    %353 = tpu.matmul %350, %352, %cst_77 {dimension_numbers = #tpu.dot_dimension_numbers<[1], [0], [0], [1], [0, 0, 1, 1], [], []>} : vector<1x16xf32>, vector<16x16xf32>, vector<1x16xf32> -> vector<1x16xf32>
    %354 = arith.addf %349, %353 : vector<1x16xf32>
    %355 = vector.extract_strided_slice %3 {offsets = [7, 0], sizes = [1, 16], strides = [1, 1]} : vector<8x16xf32> to vector<1x16xf32>
    %356 = vector.extract_strided_slice %318 {offsets = [7, 0, 0], sizes = [1, 16, 16], strides = [1, 1, 1]} : vector<8x16x16xf32> to vector<1x16x16xf32>
    %357 = vector.shape_cast %356 : vector<1x16x16xf32> to vector<16x16xf32>
    %cst_78 = arith.constant dense<0.000000e+00> : vector<1x16xf32>
    %358 = tpu.matmul %355, %357, %cst_78 {dimension_numbers = #tpu.dot_dimension_numbers<[1], [0], [0], [1], [0, 0, 1, 1], [], []>} : vector<1x16xf32>, vector<16x16xf32>, vector<1x16xf32> -> vector<1x16xf32>
    %359 = arith.addf %354, %358 : vector<1x16xf32>
    %360 = vector.extract_strided_slice %9 {offsets = [0, 7], sizes = [8, 1], strides = [1, 1]} : vector<8x8xf32> to vector<8x1xf32>
    %361 = vector.shape_cast %360 : vector<8x1xf32> to vector<8x1x1xf32>
    %362 = vector.broadcast %361 : vector<8x1x1xf32> to vector<8x16x16xf32>
    %363 = vector.broadcast %5 : vector<1x16x16xf32> to vector<8x16x16xf32>
    %364 = arith.mulf %362, %363 : vector<8x16x16xf32>
    %365 = vector.broadcast %7 : vector<1x16x16xf32> to vector<8x16x16xf32>
    %366 = arith.addf %364, %365 : vector<8x16x16xf32>
    %cst_79 = arith.constant 0.000000e+00 : f32
    %367 = vector.broadcast %cst_79 : f32 to vector<8x16x16xf32>
    %368 = arith.maximumf %366, %367 : vector<8x16x16xf32>
    %cst_80 = arith.constant 0.000000e+00 : f32
    %369 = vector.broadcast %cst_80 : f32 to vector<1x16xf32>
    %370 = vector.extract_strided_slice %3 {offsets = [0, 0], sizes = [1, 16], strides = [1, 1]} : vector<8x16xf32> to vector<1x16xf32>
    %371 = vector.extract_strided_slice %368 {offsets = [0, 0, 0], sizes = [1, 16, 16], strides = [1, 1, 1]} : vector<8x16x16xf32> to vector<1x16x16xf32>
    %372 = vector.shape_cast %371 : vector<1x16x16xf32> to vector<16x16xf32>
    %cst_81 = arith.constant dense<0.000000e+00> : vector<1x16xf32>
    %373 = tpu.matmul %370, %372, %cst_81 {dimension_numbers = #tpu.dot_dimension_numbers<[1], [0], [0], [1], [0, 0, 1, 1], [], []>} : vector<1x16xf32>, vector<16x16xf32>, vector<1x16xf32> -> vector<1x16xf32>
    %374 = arith.addf %369, %373 : vector<1x16xf32>
    %375 = vector.extract_strided_slice %3 {offsets = [1, 0], sizes = [1, 16], strides = [1, 1]} : vector<8x16xf32> to vector<1x16xf32>
    %376 = vector.extract_strided_slice %368 {offsets = [1, 0, 0], sizes = [1, 16, 16], strides = [1, 1, 1]} : vector<8x16x16xf32> to vector<1x16x16xf32>
    %377 = vector.shape_cast %376 : vector<1x16x16xf32> to vector<16x16xf32>
    %cst_82 = arith.constant dense<0.000000e+00> : vector<1x16xf32>
    %378 = tpu.matmul %375, %377, %cst_82 {dimension_numbers = #tpu.dot_dimension_numbers<[1], [0], [0], [1], [0, 0, 1, 1], [], []>} : vector<1x16xf32>, vector<16x16xf32>, vector<1x16xf32> -> vector<1x16xf32>
    %379 = arith.addf %374, %378 : vector<1x16xf32>
    %380 = vector.extract_strided_slice %3 {offsets = [2, 0], sizes = [1, 16], strides = [1, 1]} : vector<8x16xf32> to vector<1x16xf32>
    %381 = vector.extract_strided_slice %368 {offsets = [2, 0, 0], sizes = [1, 16, 16], strides = [1, 1, 1]} : vector<8x16x16xf32> to vector<1x16x16xf32>
    %382 = vector.shape_cast %381 : vector<1x16x16xf32> to vector<16x16xf32>
    %cst_83 = arith.constant dense<0.000000e+00> : vector<1x16xf32>
    %383 = tpu.matmul %380, %382, %cst_83 {dimension_numbers = #tpu.dot_dimension_numbers<[1], [0], [0], [1], [0, 0, 1, 1], [], []>} : vector<1x16xf32>, vector<16x16xf32>, vector<1x16xf32> -> vector<1x16xf32>
    %384 = arith.addf %379, %383 : vector<1x16xf32>
    %385 = vector.extract_strided_slice %3 {offsets = [3, 0], sizes = [1, 16], strides = [1, 1]} : vector<8x16xf32> to vector<1x16xf32>
    %386 = vector.extract_strided_slice %368 {offsets = [3, 0, 0], sizes = [1, 16, 16], strides = [1, 1, 1]} : vector<8x16x16xf32> to vector<1x16x16xf32>
    %387 = vector.shape_cast %386 : vector<1x16x16xf32> to vector<16x16xf32>
    %cst_84 = arith.constant dense<0.000000e+00> : vector<1x16xf32>
    %388 = tpu.matmul %385, %387, %cst_84 {dimension_numbers = #tpu.dot_dimension_numbers<[1], [0], [0], [1], [0, 0, 1, 1], [], []>} : vector<1x16xf32>, vector<16x16xf32>, vector<1x16xf32> -> vector<1x16xf32>
    %389 = arith.addf %384, %388 : vector<1x16xf32>
    %390 = vector.extract_strided_slice %3 {offsets = [4, 0], sizes = [1, 16], strides = [1, 1]} : vector<8x16xf32> to vector<1x16xf32>
    %391 = vector.extract_strided_slice %368 {offsets = [4, 0, 0], sizes = [1, 16, 16], strides = [1, 1, 1]} : vector<8x16x16xf32> to vector<1x16x16xf32>
    %392 = vector.shape_cast %391 : vector<1x16x16xf32> to vector<16x16xf32>
    %cst_85 = arith.constant dense<0.000000e+00> : vector<1x16xf32>
    %393 = tpu.matmul %390, %392, %cst_85 {dimension_numbers = #tpu.dot_dimension_numbers<[1], [0], [0], [1], [0, 0, 1, 1], [], []>} : vector<1x16xf32>, vector<16x16xf32>, vector<1x16xf32> -> vector<1x16xf32>
    %394 = arith.addf %389, %393 : vector<1x16xf32>
    %395 = vector.extract_strided_slice %3 {offsets = [5, 0], sizes = [1, 16], strides = [1, 1]} : vector<8x16xf32> to vector<1x16xf32>
    %396 = vector.extract_strided_slice %368 {offsets = [5, 0, 0], sizes = [1, 16, 16], strides = [1, 1, 1]} : vector<8x16x16xf32> to vector<1x16x16xf32>
    %397 = vector.shape_cast %396 : vector<1x16x16xf32> to vector<16x16xf32>
    %cst_86 = arith.constant dense<0.000000e+00> : vector<1x16xf32>
    %398 = tpu.matmul %395, %397, %cst_86 {dimension_numbers = #tpu.dot_dimension_numbers<[1], [0], [0], [1], [0, 0, 1, 1], [], []>} : vector<1x16xf32>, vector<16x16xf32>, vector<1x16xf32> -> vector<1x16xf32>
    %399 = arith.addf %394, %398 : vector<1x16xf32>
    %400 = vector.extract_strided_slice %3 {offsets = [6, 0], sizes = [1, 16], strides = [1, 1]} : vector<8x16xf32> to vector<1x16xf32>
    %401 = vector.extract_strided_slice %368 {offsets = [6, 0, 0], sizes = [1, 16, 16], strides = [1, 1, 1]} : vector<8x16x16xf32> to vector<1x16x16xf32>
    %402 = vector.shape_cast %401 : vector<1x16x16xf32> to vector<16x16xf32>
    %cst_87 = arith.constant dense<0.000000e+00> : vector<1x16xf32>
    %403 = tpu.matmul %400, %402, %cst_87 {dimension_numbers = #tpu.dot_dimension_numbers<[1], [0], [0], [1], [0, 0, 1, 1], [], []>} : vector<1x16xf32>, vector<16x16xf32>, vector<1x16xf32> -> vector<1x16xf32>
    %404 = arith.addf %399, %403 : vector<1x16xf32>
    %405 = vector.extract_strided_slice %3 {offsets = [7, 0], sizes = [1, 16], strides = [1, 1]} : vector<8x16xf32> to vector<1x16xf32>
    %406 = vector.extract_strided_slice %368 {offsets = [7, 0, 0], sizes = [1, 16, 16], strides = [1, 1, 1]} : vector<8x16x16xf32> to vector<1x16x16xf32>
    %407 = vector.shape_cast %406 : vector<1x16x16xf32> to vector<16x16xf32>
    %cst_88 = arith.constant dense<0.000000e+00> : vector<1x16xf32>
    %408 = tpu.matmul %405, %407, %cst_88 {dimension_numbers = #tpu.dot_dimension_numbers<[1], [0], [0], [1], [0, 0, 1, 1], [], []>} : vector<1x16xf32>, vector<16x16xf32>, vector<1x16xf32> -> vector<1x16xf32>
    %409 = arith.addf %404, %408 : vector<1x16xf32>
    %c0_89 = arith.constant 0 : index
    %c0_90 = arith.constant 0 : index
    %410 = vector.load %arg9[%c0_89, %c0_90] : memref<8x16xf32, #tpu.memory_space<vmem>>, vector<8x16xf32>
    %411 = tpu.concatenate %59, %109, %159, %209, %259, %309, %359, %409 in 0 : vector<1x16xf32>, vector<1x16xf32>, vector<1x16xf32>, vector<1x16xf32>, vector<1x16xf32>, vector<1x16xf32>, vector<1x16xf32>, vector<1x16xf32> -> vector<8x16xf32>
    %412 = arith.addf %410, %411 : vector<8x16xf32>
    %c0_91 = arith.constant 0 : index
    %c0_92 = arith.constant 0 : index
    %413 = vector.load %arg9[%c0_91, %c0_92] : memref<8x16xf32, #tpu.memory_space<vmem>>, vector<8x16xf32>
    tpu.vector_store %arg9[%c0_91, %c0_92], %412 {strides = array<i32>} : memref<8x16xf32, #tpu.memory_space<vmem>>, vector<8x16xf32>,
    %c1_i32 = arith.constant 1 : i32
    %414 = arith.cmpi eq, %arg1, %c1_i32 : i32
    %415 = arith.extui %414 : i1 to i32
    %c0_i32_93 = arith.constant 0 : i32
    %416 = arith.cmpi ne, %415, %c0_i32_93 : i32
    scf.if %416 {
      %c0_94 = arith.constant 0 : index
      %c0_95 = arith.constant 0 : index
      %417 = vector.load %arg9[%c0_94, %c0_95] : memref<8x16xf32, #tpu.memory_space<vmem>>, vector<8x16xf32>
      %c0_96 = arith.constant 0 : index
      %c0_97 = arith.constant 0 : index
      %418 = vector.load %arg6[%c0_96, %c0_97] : memref<1x16xf32, #tpu.memory_space<vmem>>, vector<1x16xf32>
      %419 = vector.broadcast %418 : vector<1x16xf32> to vector<8x16xf32>
      %420 = arith.mulf %417, %419 : vector<8x16xf32>
      %c0_98 = arith.constant 0 : index
      %c0_99 = arith.constant 0 : index
      %421 = vector.load %arg7[%c0_98, %c0_99] : memref<8x16xf32, #tpu.memory_space<vmem>>, vector<8x16xf32>
      %422 = arith.addf %420, %421 : vector<8x16xf32>
      %423 = arith.negf %422 : vector<8x16xf32>
      %424 = math.exp %423 : vector<8x16xf32>
      %cst_100 = arith.constant 1.000000e+00 : f32
      %425 = vector.broadcast %cst_100 : f32 to vector<8x16xf32>
      %426 = arith.addf %425, %424 : vector<8x16xf32>
      %427 = arith.divf %425, %426 : vector<8x16xf32>
      %c0_101 = arith.constant 0 : index
      %c0_102 = arith.constant 0 : index
      %428 = vector.load %arg8[%c0_101, %c0_102] : memref<8x16xf32, #tpu.memory_space<vmem>>, vector<8x16xf32>
      tpu.vector_store %arg8[%c0_101, %c0_102], %427 {strides = array<i32>} : memref<8x16xf32, #tpu.memory_space<vmem>>, vector<8x16xf32>,
    } else {
    }
    return
  }
  func.func @transform_0(%arg0: i32, %arg1: i32) -> (i32, i32) {
    %c0_i32 = arith.constant 0 : i32
    %c0_i32_0 = arith.constant 0 : i32
    return %arg1, %c0_i32 : i32, i32
  }
  func.func @transform_1(%arg0: i32, %arg1: i32) -> (i32, i32, i32, i32) {
    %c0_i32 = arith.constant 0 : i32
    %c0_i32_0 = arith.constant 0 : i32
    %c0_i32_1 = arith.constant 0 : i32
    return %arg1, %arg0, %c0_i32, %c0_i32_0 : i32, i32, i32, i32
  }
  func.func @transform_2(%arg0: i32, %arg1: i32) -> (i32, i32) {
    %c0_i32 = arith.constant 0 : i32
    %c0_i32_0 = arith.constant 0 : i32
    %c0_i32_1 = arith.constant 0 : i32
    return %c0_i32, %c0_i32_0 : i32, i32
  }
  func.func @transform_3(%arg0: i32, %arg1: i32) -> (i32, i32) {
    %c0_i32 = arith.constant 0 : i32
    %c0_i32_0 = arith.constant 0 : i32
    %c0_i32_1 = arith.constant 0 : i32
    return %c0_i32, %c0_i32_0 : i32, i32
  }
  func.func @transform_4(%arg0: i32, %arg1: i32) -> (i32, i32) {
    %c0_i32 = arith.constant 0 : i32
    %c0_i32_0 = arith.constant 0 : i32
    %c0_i32_1 = arith.constant 0 : i32
    return %c0_i32, %c0_i32_0 : i32, i32
  }
  func.func @transform_5(%arg0: i32, %arg1: i32) -> (i32, i32) {
    %c0_i32 = arith.constant 0 : i32
    %c0_i32_0 = arith.constant 0 : i32
    return %arg0, %c0_i32 : i32, i32
  }
  func.func @transform_6(%arg0: i32, %arg1: i32) -> (i32, i32) {
    %c0_i32 = arith.constant 0 : i32
    %c0_i32_0 = arith.constant 0 : i32
    return %arg0, %c0_i32 : i32, i32
  }
}

module attributes {stable_mosaic.version = 11 : i64} {
  func.func @_nnconv_bn_sig_kernel(%arg0: i32, %arg1: i32, %arg2: memref<8x16xf32, #tpu.memory_space<vmem>>, %arg3: memref<1x1x8x8xf32, #tpu.memory_space<vmem>>, %arg4: memref<16x1xf32, #tpu.memory_space<vmem>>, %arg5: memref<16x1xf32, #tpu.memory_space<vmem>>, %arg6: memref<1x1xf32, #tpu.memory_space<vmem>>, %arg7: memref<8x1xf32, #tpu.memory_space<vmem>>, %arg8: memref<8x1xf32, #tpu.memory_space<vmem>>, %arg9: memref<8x1xf32, #tpu.memory_space<vmem>>) attributes {dimension_semantics = [#tpu.dimension_semantics<parallel>, #tpu.dimension_semantics<arbitrary>], iteration_bounds = array<i64: 2, 2>, scalar_prefetch = 0 : i64, scratch_operands = 1 : i64, tpu.core_type = #tpu.core_type<tc>, window_params = [{transform_indices = @transform_0, window_bounds = array<i64: 8, 16>}, {transform_indices = @transform_1, window_bounds = array<i64: 1, 1, 8, 8>}, {pipeline_mode = #tpu.pipeline_mode<synchronous>, transform_indices = @transform_2, window_bounds = array<i64: 16, 1>}, {pipeline_mode = #tpu.pipeline_mode<synchronous>, transform_indices = @transform_3, window_bounds = array<i64: 16, 1>}, {pipeline_mode = #tpu.pipeline_mode<synchronous>, transform_indices = @transform_4, window_bounds = array<i64: 1, 1>}, {transform_indices = @transform_5, window_bounds = array<i64: 8, 1>}, {transform_indices = @transform_6, window_bounds = array<i64: 8, 1>}]} {
    %c0_i32 = arith.constant 0 : i32
    %0 = arith.cmpi eq, %arg1, %c0_i32 : i32
    %1 = arith.extui %0 : i1 to i32
    %c0_i32_0 = arith.constant 0 : i32
    %2 = arith.cmpi ne, %1, %c0_i32_0 : i32
    scf.if %2 {
      %cst_94 = arith.constant 0.000000e+00 : f32
      %417 = vector.broadcast %cst_94 : f32 to vector<8x1xf32>
      %c0_95 = arith.constant 0 : index
      %c0_96 = arith.constant 0 : index
      %418 = vector.load %arg9[%c0_95, %c0_96] : memref<8x1xf32, #tpu.memory_space<vmem>>, vector<8x1xf32>
      tpu.vector_store %arg9[%c0_95, %c0_96], %417 {strides = array<i32>} : memref<8x1xf32, #tpu.memory_space<vmem>>, vector<8x1xf32>,
    } else {
    }
    %c0 = arith.constant 0 : index
    %c0_1 = arith.constant 0 : index
    %3 = vector.load %arg2[%c0, %c0_1] : memref<8x16xf32, #tpu.memory_space<vmem>>, vector<8x16xf32>
    %c0_2 = arith.constant 0 : index
    %c0_3 = arith.constant 0 : index
    %4 = vector.load %arg4[%c0_2, %c0_3] : memref<16x1xf32, #tpu.memory_space<vmem>>, vector<16x1xf32>
    %5 = vector.shape_cast %4 : vector<16x1xf32> to vector<1x16x1xf32>
    %c0_4 = arith.constant 0 : index
    %c0_5 = arith.constant 0 : index
    %6 = vector.load %arg5[%c0_4, %c0_5] : memref<16x1xf32, #tpu.memory_space<vmem>>, vector<16x1xf32>
    %7 = vector.shape_cast %6 : vector<16x1xf32> to vector<1x16x1xf32>
    %c0_6 = arith.constant 0 : index
    %c0_7 = arith.constant 0 : index
    %c0_8 = arith.constant 0 : index
    %c0_9 = arith.constant 0 : index
    %8 = vector.load %arg3[%c0_6, %c0_7, %c0_8, %c0_9] : memref<1x1x8x8xf32, #tpu.memory_space<vmem>>, vector<1x1x8x8xf32>
    %9 = vector.shape_cast %8 : vector<1x1x8x8xf32> to vector<8x8xf32>
    %10 = vector.extract_strided_slice %9 {offsets = [0, 0], sizes = [8, 1], strides = [1, 1]} : vector<8x8xf32> to vector<8x1xf32>
    %11 = vector.shape_cast %10 : vector<8x1xf32> to vector<8x1x1xf32>
    %12 = vector.broadcast %11 : vector<8x1x1xf32> to vector<8x16x1xf32>
    %13 = vector.broadcast %5 : vector<1x16x1xf32> to vector<8x16x1xf32>
    %14 = arith.mulf %12, %13 : vector<8x16x1xf32>
    %15 = vector.broadcast %7 : vector<1x16x1xf32> to vector<8x16x1xf32>
    %16 = arith.addf %14, %15 : vector<8x16x1xf32>
    %cst = arith.constant 0.000000e+00 : f32
    %17 = vector.broadcast %cst : f32 to vector<8x16x1xf32>
    %18 = arith.maximumf %16, %17 : vector<8x16x1xf32>
    %cst_10 = arith.constant 0.000000e+00 : f32
    %19 = vector.broadcast %cst_10 : f32 to vector<1x1xf32>
    %20 = vector.extract_strided_slice %3 {offsets = [0, 0], sizes = [1, 16], strides = [1, 1]} : vector<8x16xf32> to vector<1x16xf32>
    %21 = vector.extract_strided_slice %18 {offsets = [0, 0, 0], sizes = [1, 16, 1], strides = [1, 1, 1]} : vector<8x16x1xf32> to vector<1x16x1xf32>
    %22 = vector.shape_cast %21 : vector<1x16x1xf32> to vector<16x1xf32>
    %cst_11 = arith.constant dense<0.000000e+00> : vector<1x1xf32>
    %23 = tpu.matmul %20, %22, %cst_11 {dimension_numbers = #tpu.dot_dimension_numbers<[1], [0], [0], [1], [0, 0, 1, 1], [], []>} : vector<1x16xf32>, vector<16x1xf32>, vector<1x1xf32> -> vector<1x1xf32>
    %24 = arith.addf %19, %23 : vector<1x1xf32>
    %25 = vector.extract_strided_slice %3 {offsets = [1, 0], sizes = [1, 16], strides = [1, 1]} : vector<8x16xf32> to vector<1x16xf32>
    %26 = vector.extract_strided_slice %18 {offsets = [1, 0, 0], sizes = [1, 16, 1], strides = [1, 1, 1]} : vector<8x16x1xf32> to vector<1x16x1xf32>
    %27 = vector.shape_cast %26 : vector<1x16x1xf32> to vector<16x1xf32>
    %cst_12 = arith.constant dense<0.000000e+00> : vector<1x1xf32>
    %28 = tpu.matmul %25, %27, %cst_12 {dimension_numbers = #tpu.dot_dimension_numbers<[1], [0], [0], [1], [0, 0, 1, 1], [], []>} : vector<1x16xf32>, vector<16x1xf32>, vector<1x1xf32> -> vector<1x1xf32>
    %29 = arith.addf %24, %28 : vector<1x1xf32>
    %30 = vector.extract_strided_slice %3 {offsets = [2, 0], sizes = [1, 16], strides = [1, 1]} : vector<8x16xf32> to vector<1x16xf32>
    %31 = vector.extract_strided_slice %18 {offsets = [2, 0, 0], sizes = [1, 16, 1], strides = [1, 1, 1]} : vector<8x16x1xf32> to vector<1x16x1xf32>
    %32 = vector.shape_cast %31 : vector<1x16x1xf32> to vector<16x1xf32>
    %cst_13 = arith.constant dense<0.000000e+00> : vector<1x1xf32>
    %33 = tpu.matmul %30, %32, %cst_13 {dimension_numbers = #tpu.dot_dimension_numbers<[1], [0], [0], [1], [0, 0, 1, 1], [], []>} : vector<1x16xf32>, vector<16x1xf32>, vector<1x1xf32> -> vector<1x1xf32>
    %34 = arith.addf %29, %33 : vector<1x1xf32>
    %35 = vector.extract_strided_slice %3 {offsets = [3, 0], sizes = [1, 16], strides = [1, 1]} : vector<8x16xf32> to vector<1x16xf32>
    %36 = vector.extract_strided_slice %18 {offsets = [3, 0, 0], sizes = [1, 16, 1], strides = [1, 1, 1]} : vector<8x16x1xf32> to vector<1x16x1xf32>
    %37 = vector.shape_cast %36 : vector<1x16x1xf32> to vector<16x1xf32>
    %cst_14 = arith.constant dense<0.000000e+00> : vector<1x1xf32>
    %38 = tpu.matmul %35, %37, %cst_14 {dimension_numbers = #tpu.dot_dimension_numbers<[1], [0], [0], [1], [0, 0, 1, 1], [], []>} : vector<1x16xf32>, vector<16x1xf32>, vector<1x1xf32> -> vector<1x1xf32>
    %39 = arith.addf %34, %38 : vector<1x1xf32>
    %40 = vector.extract_strided_slice %3 {offsets = [4, 0], sizes = [1, 16], strides = [1, 1]} : vector<8x16xf32> to vector<1x16xf32>
    %41 = vector.extract_strided_slice %18 {offsets = [4, 0, 0], sizes = [1, 16, 1], strides = [1, 1, 1]} : vector<8x16x1xf32> to vector<1x16x1xf32>
    %42 = vector.shape_cast %41 : vector<1x16x1xf32> to vector<16x1xf32>
    %cst_15 = arith.constant dense<0.000000e+00> : vector<1x1xf32>
    %43 = tpu.matmul %40, %42, %cst_15 {dimension_numbers = #tpu.dot_dimension_numbers<[1], [0], [0], [1], [0, 0, 1, 1], [], []>} : vector<1x16xf32>, vector<16x1xf32>, vector<1x1xf32> -> vector<1x1xf32>
    %44 = arith.addf %39, %43 : vector<1x1xf32>
    %45 = vector.extract_strided_slice %3 {offsets = [5, 0], sizes = [1, 16], strides = [1, 1]} : vector<8x16xf32> to vector<1x16xf32>
    %46 = vector.extract_strided_slice %18 {offsets = [5, 0, 0], sizes = [1, 16, 1], strides = [1, 1, 1]} : vector<8x16x1xf32> to vector<1x16x1xf32>
    %47 = vector.shape_cast %46 : vector<1x16x1xf32> to vector<16x1xf32>
    %cst_16 = arith.constant dense<0.000000e+00> : vector<1x1xf32>
    %48 = tpu.matmul %45, %47, %cst_16 {dimension_numbers = #tpu.dot_dimension_numbers<[1], [0], [0], [1], [0, 0, 1, 1], [], []>} : vector<1x16xf32>, vector<16x1xf32>, vector<1x1xf32> -> vector<1x1xf32>
    %49 = arith.addf %44, %48 : vector<1x1xf32>
    %50 = vector.extract_strided_slice %3 {offsets = [6, 0], sizes = [1, 16], strides = [1, 1]} : vector<8x16xf32> to vector<1x16xf32>
    %51 = vector.extract_strided_slice %18 {offsets = [6, 0, 0], sizes = [1, 16, 1], strides = [1, 1, 1]} : vector<8x16x1xf32> to vector<1x16x1xf32>
    %52 = vector.shape_cast %51 : vector<1x16x1xf32> to vector<16x1xf32>
    %cst_17 = arith.constant dense<0.000000e+00> : vector<1x1xf32>
    %53 = tpu.matmul %50, %52, %cst_17 {dimension_numbers = #tpu.dot_dimension_numbers<[1], [0], [0], [1], [0, 0, 1, 1], [], []>} : vector<1x16xf32>, vector<16x1xf32>, vector<1x1xf32> -> vector<1x1xf32>
    %54 = arith.addf %49, %53 : vector<1x1xf32>
    %55 = vector.extract_strided_slice %3 {offsets = [7, 0], sizes = [1, 16], strides = [1, 1]} : vector<8x16xf32> to vector<1x16xf32>
    %56 = vector.extract_strided_slice %18 {offsets = [7, 0, 0], sizes = [1, 16, 1], strides = [1, 1, 1]} : vector<8x16x1xf32> to vector<1x16x1xf32>
    %57 = vector.shape_cast %56 : vector<1x16x1xf32> to vector<16x1xf32>
    %cst_18 = arith.constant dense<0.000000e+00> : vector<1x1xf32>
    %58 = tpu.matmul %55, %57, %cst_18 {dimension_numbers = #tpu.dot_dimension_numbers<[1], [0], [0], [1], [0, 0, 1, 1], [], []>} : vector<1x16xf32>, vector<16x1xf32>, vector<1x1xf32> -> vector<1x1xf32>
    %59 = arith.addf %54, %58 : vector<1x1xf32>
    %60 = vector.extract_strided_slice %9 {offsets = [0, 1], sizes = [8, 1], strides = [1, 1]} : vector<8x8xf32> to vector<8x1xf32>
    %61 = vector.shape_cast %60 : vector<8x1xf32> to vector<8x1x1xf32>
    %62 = vector.broadcast %61 : vector<8x1x1xf32> to vector<8x16x1xf32>
    %63 = vector.broadcast %5 : vector<1x16x1xf32> to vector<8x16x1xf32>
    %64 = arith.mulf %62, %63 : vector<8x16x1xf32>
    %65 = vector.broadcast %7 : vector<1x16x1xf32> to vector<8x16x1xf32>
    %66 = arith.addf %64, %65 : vector<8x16x1xf32>
    %cst_19 = arith.constant 0.000000e+00 : f32
    %67 = vector.broadcast %cst_19 : f32 to vector<8x16x1xf32>
    %68 = arith.maximumf %66, %67 : vector<8x16x1xf32>
    %cst_20 = arith.constant 0.000000e+00 : f32
    %69 = vector.broadcast %cst_20 : f32 to vector<1x1xf32>
    %70 = vector.extract_strided_slice %3 {offsets = [0, 0], sizes = [1, 16], strides = [1, 1]} : vector<8x16xf32> to vector<1x16xf32>
    %71 = vector.extract_strided_slice %68 {offsets = [0, 0, 0], sizes = [1, 16, 1], strides = [1, 1, 1]} : vector<8x16x1xf32> to vector<1x16x1xf32>
    %72 = vector.shape_cast %71 : vector<1x16x1xf32> to vector<16x1xf32>
    %cst_21 = arith.constant dense<0.000000e+00> : vector<1x1xf32>
    %73 = tpu.matmul %70, %72, %cst_21 {dimension_numbers = #tpu.dot_dimension_numbers<[1], [0], [0], [1], [0, 0, 1, 1], [], []>} : vector<1x16xf32>, vector<16x1xf32>, vector<1x1xf32> -> vector<1x1xf32>
    %74 = arith.addf %69, %73 : vector<1x1xf32>
    %75 = vector.extract_strided_slice %3 {offsets = [1, 0], sizes = [1, 16], strides = [1, 1]} : vector<8x16xf32> to vector<1x16xf32>
    %76 = vector.extract_strided_slice %68 {offsets = [1, 0, 0], sizes = [1, 16, 1], strides = [1, 1, 1]} : vector<8x16x1xf32> to vector<1x16x1xf32>
    %77 = vector.shape_cast %76 : vector<1x16x1xf32> to vector<16x1xf32>
    %cst_22 = arith.constant dense<0.000000e+00> : vector<1x1xf32>
    %78 = tpu.matmul %75, %77, %cst_22 {dimension_numbers = #tpu.dot_dimension_numbers<[1], [0], [0], [1], [0, 0, 1, 1], [], []>} : vector<1x16xf32>, vector<16x1xf32>, vector<1x1xf32> -> vector<1x1xf32>
    %79 = arith.addf %74, %78 : vector<1x1xf32>
    %80 = vector.extract_strided_slice %3 {offsets = [2, 0], sizes = [1, 16], strides = [1, 1]} : vector<8x16xf32> to vector<1x16xf32>
    %81 = vector.extract_strided_slice %68 {offsets = [2, 0, 0], sizes = [1, 16, 1], strides = [1, 1, 1]} : vector<8x16x1xf32> to vector<1x16x1xf32>
    %82 = vector.shape_cast %81 : vector<1x16x1xf32> to vector<16x1xf32>
    %cst_23 = arith.constant dense<0.000000e+00> : vector<1x1xf32>
    %83 = tpu.matmul %80, %82, %cst_23 {dimension_numbers = #tpu.dot_dimension_numbers<[1], [0], [0], [1], [0, 0, 1, 1], [], []>} : vector<1x16xf32>, vector<16x1xf32>, vector<1x1xf32> -> vector<1x1xf32>
    %84 = arith.addf %79, %83 : vector<1x1xf32>
    %85 = vector.extract_strided_slice %3 {offsets = [3, 0], sizes = [1, 16], strides = [1, 1]} : vector<8x16xf32> to vector<1x16xf32>
    %86 = vector.extract_strided_slice %68 {offsets = [3, 0, 0], sizes = [1, 16, 1], strides = [1, 1, 1]} : vector<8x16x1xf32> to vector<1x16x1xf32>
    %87 = vector.shape_cast %86 : vector<1x16x1xf32> to vector<16x1xf32>
    %cst_24 = arith.constant dense<0.000000e+00> : vector<1x1xf32>
    %88 = tpu.matmul %85, %87, %cst_24 {dimension_numbers = #tpu.dot_dimension_numbers<[1], [0], [0], [1], [0, 0, 1, 1], [], []>} : vector<1x16xf32>, vector<16x1xf32>, vector<1x1xf32> -> vector<1x1xf32>
    %89 = arith.addf %84, %88 : vector<1x1xf32>
    %90 = vector.extract_strided_slice %3 {offsets = [4, 0], sizes = [1, 16], strides = [1, 1]} : vector<8x16xf32> to vector<1x16xf32>
    %91 = vector.extract_strided_slice %68 {offsets = [4, 0, 0], sizes = [1, 16, 1], strides = [1, 1, 1]} : vector<8x16x1xf32> to vector<1x16x1xf32>
    %92 = vector.shape_cast %91 : vector<1x16x1xf32> to vector<16x1xf32>
    %cst_25 = arith.constant dense<0.000000e+00> : vector<1x1xf32>
    %93 = tpu.matmul %90, %92, %cst_25 {dimension_numbers = #tpu.dot_dimension_numbers<[1], [0], [0], [1], [0, 0, 1, 1], [], []>} : vector<1x16xf32>, vector<16x1xf32>, vector<1x1xf32> -> vector<1x1xf32>
    %94 = arith.addf %89, %93 : vector<1x1xf32>
    %95 = vector.extract_strided_slice %3 {offsets = [5, 0], sizes = [1, 16], strides = [1, 1]} : vector<8x16xf32> to vector<1x16xf32>
    %96 = vector.extract_strided_slice %68 {offsets = [5, 0, 0], sizes = [1, 16, 1], strides = [1, 1, 1]} : vector<8x16x1xf32> to vector<1x16x1xf32>
    %97 = vector.shape_cast %96 : vector<1x16x1xf32> to vector<16x1xf32>
    %cst_26 = arith.constant dense<0.000000e+00> : vector<1x1xf32>
    %98 = tpu.matmul %95, %97, %cst_26 {dimension_numbers = #tpu.dot_dimension_numbers<[1], [0], [0], [1], [0, 0, 1, 1], [], []>} : vector<1x16xf32>, vector<16x1xf32>, vector<1x1xf32> -> vector<1x1xf32>
    %99 = arith.addf %94, %98 : vector<1x1xf32>
    %100 = vector.extract_strided_slice %3 {offsets = [6, 0], sizes = [1, 16], strides = [1, 1]} : vector<8x16xf32> to vector<1x16xf32>
    %101 = vector.extract_strided_slice %68 {offsets = [6, 0, 0], sizes = [1, 16, 1], strides = [1, 1, 1]} : vector<8x16x1xf32> to vector<1x16x1xf32>
    %102 = vector.shape_cast %101 : vector<1x16x1xf32> to vector<16x1xf32>
    %cst_27 = arith.constant dense<0.000000e+00> : vector<1x1xf32>
    %103 = tpu.matmul %100, %102, %cst_27 {dimension_numbers = #tpu.dot_dimension_numbers<[1], [0], [0], [1], [0, 0, 1, 1], [], []>} : vector<1x16xf32>, vector<16x1xf32>, vector<1x1xf32> -> vector<1x1xf32>
    %104 = arith.addf %99, %103 : vector<1x1xf32>
    %105 = vector.extract_strided_slice %3 {offsets = [7, 0], sizes = [1, 16], strides = [1, 1]} : vector<8x16xf32> to vector<1x16xf32>
    %106 = vector.extract_strided_slice %68 {offsets = [7, 0, 0], sizes = [1, 16, 1], strides = [1, 1, 1]} : vector<8x16x1xf32> to vector<1x16x1xf32>
    %107 = vector.shape_cast %106 : vector<1x16x1xf32> to vector<16x1xf32>
    %cst_28 = arith.constant dense<0.000000e+00> : vector<1x1xf32>
    %108 = tpu.matmul %105, %107, %cst_28 {dimension_numbers = #tpu.dot_dimension_numbers<[1], [0], [0], [1], [0, 0, 1, 1], [], []>} : vector<1x16xf32>, vector<16x1xf32>, vector<1x1xf32> -> vector<1x1xf32>
    %109 = arith.addf %104, %108 : vector<1x1xf32>
    %110 = vector.extract_strided_slice %9 {offsets = [0, 2], sizes = [8, 1], strides = [1, 1]} : vector<8x8xf32> to vector<8x1xf32>
    %111 = vector.shape_cast %110 : vector<8x1xf32> to vector<8x1x1xf32>
    %112 = vector.broadcast %111 : vector<8x1x1xf32> to vector<8x16x1xf32>
    %113 = vector.broadcast %5 : vector<1x16x1xf32> to vector<8x16x1xf32>
    %114 = arith.mulf %112, %113 : vector<8x16x1xf32>
    %115 = vector.broadcast %7 : vector<1x16x1xf32> to vector<8x16x1xf32>
    %116 = arith.addf %114, %115 : vector<8x16x1xf32>
    %cst_29 = arith.constant 0.000000e+00 : f32
    %117 = vector.broadcast %cst_29 : f32 to vector<8x16x1xf32>
    %118 = arith.maximumf %116, %117 : vector<8x16x1xf32>
    %cst_30 = arith.constant 0.000000e+00 : f32
    %119 = vector.broadcast %cst_30 : f32 to vector<1x1xf32>
    %120 = vector.extract_strided_slice %3 {offsets = [0, 0], sizes = [1, 16], strides = [1, 1]} : vector<8x16xf32> to vector<1x16xf32>
    %121 = vector.extract_strided_slice %118 {offsets = [0, 0, 0], sizes = [1, 16, 1], strides = [1, 1, 1]} : vector<8x16x1xf32> to vector<1x16x1xf32>
    %122 = vector.shape_cast %121 : vector<1x16x1xf32> to vector<16x1xf32>
    %cst_31 = arith.constant dense<0.000000e+00> : vector<1x1xf32>
    %123 = tpu.matmul %120, %122, %cst_31 {dimension_numbers = #tpu.dot_dimension_numbers<[1], [0], [0], [1], [0, 0, 1, 1], [], []>} : vector<1x16xf32>, vector<16x1xf32>, vector<1x1xf32> -> vector<1x1xf32>
    %124 = arith.addf %119, %123 : vector<1x1xf32>
    %125 = vector.extract_strided_slice %3 {offsets = [1, 0], sizes = [1, 16], strides = [1, 1]} : vector<8x16xf32> to vector<1x16xf32>
    %126 = vector.extract_strided_slice %118 {offsets = [1, 0, 0], sizes = [1, 16, 1], strides = [1, 1, 1]} : vector<8x16x1xf32> to vector<1x16x1xf32>
    %127 = vector.shape_cast %126 : vector<1x16x1xf32> to vector<16x1xf32>
    %cst_32 = arith.constant dense<0.000000e+00> : vector<1x1xf32>
    %128 = tpu.matmul %125, %127, %cst_32 {dimension_numbers = #tpu.dot_dimension_numbers<[1], [0], [0], [1], [0, 0, 1, 1], [], []>} : vector<1x16xf32>, vector<16x1xf32>, vector<1x1xf32> -> vector<1x1xf32>
    %129 = arith.addf %124, %128 : vector<1x1xf32>
    %130 = vector.extract_strided_slice %3 {offsets = [2, 0], sizes = [1, 16], strides = [1, 1]} : vector<8x16xf32> to vector<1x16xf32>
    %131 = vector.extract_strided_slice %118 {offsets = [2, 0, 0], sizes = [1, 16, 1], strides = [1, 1, 1]} : vector<8x16x1xf32> to vector<1x16x1xf32>
    %132 = vector.shape_cast %131 : vector<1x16x1xf32> to vector<16x1xf32>
    %cst_33 = arith.constant dense<0.000000e+00> : vector<1x1xf32>
    %133 = tpu.matmul %130, %132, %cst_33 {dimension_numbers = #tpu.dot_dimension_numbers<[1], [0], [0], [1], [0, 0, 1, 1], [], []>} : vector<1x16xf32>, vector<16x1xf32>, vector<1x1xf32> -> vector<1x1xf32>
    %134 = arith.addf %129, %133 : vector<1x1xf32>
    %135 = vector.extract_strided_slice %3 {offsets = [3, 0], sizes = [1, 16], strides = [1, 1]} : vector<8x16xf32> to vector<1x16xf32>
    %136 = vector.extract_strided_slice %118 {offsets = [3, 0, 0], sizes = [1, 16, 1], strides = [1, 1, 1]} : vector<8x16x1xf32> to vector<1x16x1xf32>
    %137 = vector.shape_cast %136 : vector<1x16x1xf32> to vector<16x1xf32>
    %cst_34 = arith.constant dense<0.000000e+00> : vector<1x1xf32>
    %138 = tpu.matmul %135, %137, %cst_34 {dimension_numbers = #tpu.dot_dimension_numbers<[1], [0], [0], [1], [0, 0, 1, 1], [], []>} : vector<1x16xf32>, vector<16x1xf32>, vector<1x1xf32> -> vector<1x1xf32>
    %139 = arith.addf %134, %138 : vector<1x1xf32>
    %140 = vector.extract_strided_slice %3 {offsets = [4, 0], sizes = [1, 16], strides = [1, 1]} : vector<8x16xf32> to vector<1x16xf32>
    %141 = vector.extract_strided_slice %118 {offsets = [4, 0, 0], sizes = [1, 16, 1], strides = [1, 1, 1]} : vector<8x16x1xf32> to vector<1x16x1xf32>
    %142 = vector.shape_cast %141 : vector<1x16x1xf32> to vector<16x1xf32>
    %cst_35 = arith.constant dense<0.000000e+00> : vector<1x1xf32>
    %143 = tpu.matmul %140, %142, %cst_35 {dimension_numbers = #tpu.dot_dimension_numbers<[1], [0], [0], [1], [0, 0, 1, 1], [], []>} : vector<1x16xf32>, vector<16x1xf32>, vector<1x1xf32> -> vector<1x1xf32>
    %144 = arith.addf %139, %143 : vector<1x1xf32>
    %145 = vector.extract_strided_slice %3 {offsets = [5, 0], sizes = [1, 16], strides = [1, 1]} : vector<8x16xf32> to vector<1x16xf32>
    %146 = vector.extract_strided_slice %118 {offsets = [5, 0, 0], sizes = [1, 16, 1], strides = [1, 1, 1]} : vector<8x16x1xf32> to vector<1x16x1xf32>
    %147 = vector.shape_cast %146 : vector<1x16x1xf32> to vector<16x1xf32>
    %cst_36 = arith.constant dense<0.000000e+00> : vector<1x1xf32>
    %148 = tpu.matmul %145, %147, %cst_36 {dimension_numbers = #tpu.dot_dimension_numbers<[1], [0], [0], [1], [0, 0, 1, 1], [], []>} : vector<1x16xf32>, vector<16x1xf32>, vector<1x1xf32> -> vector<1x1xf32>
    %149 = arith.addf %144, %148 : vector<1x1xf32>
    %150 = vector.extract_strided_slice %3 {offsets = [6, 0], sizes = [1, 16], strides = [1, 1]} : vector<8x16xf32> to vector<1x16xf32>
    %151 = vector.extract_strided_slice %118 {offsets = [6, 0, 0], sizes = [1, 16, 1], strides = [1, 1, 1]} : vector<8x16x1xf32> to vector<1x16x1xf32>
    %152 = vector.shape_cast %151 : vector<1x16x1xf32> to vector<16x1xf32>
    %cst_37 = arith.constant dense<0.000000e+00> : vector<1x1xf32>
    %153 = tpu.matmul %150, %152, %cst_37 {dimension_numbers = #tpu.dot_dimension_numbers<[1], [0], [0], [1], [0, 0, 1, 1], [], []>} : vector<1x16xf32>, vector<16x1xf32>, vector<1x1xf32> -> vector<1x1xf32>
    %154 = arith.addf %149, %153 : vector<1x1xf32>
    %155 = vector.extract_strided_slice %3 {offsets = [7, 0], sizes = [1, 16], strides = [1, 1]} : vector<8x16xf32> to vector<1x16xf32>
    %156 = vector.extract_strided_slice %118 {offsets = [7, 0, 0], sizes = [1, 16, 1], strides = [1, 1, 1]} : vector<8x16x1xf32> to vector<1x16x1xf32>
    %157 = vector.shape_cast %156 : vector<1x16x1xf32> to vector<16x1xf32>
    %cst_38 = arith.constant dense<0.000000e+00> : vector<1x1xf32>
    %158 = tpu.matmul %155, %157, %cst_38 {dimension_numbers = #tpu.dot_dimension_numbers<[1], [0], [0], [1], [0, 0, 1, 1], [], []>} : vector<1x16xf32>, vector<16x1xf32>, vector<1x1xf32> -> vector<1x1xf32>
    %159 = arith.addf %154, %158 : vector<1x1xf32>
    %160 = vector.extract_strided_slice %9 {offsets = [0, 3], sizes = [8, 1], strides = [1, 1]} : vector<8x8xf32> to vector<8x1xf32>
    %161 = vector.shape_cast %160 : vector<8x1xf32> to vector<8x1x1xf32>
    %162 = vector.broadcast %161 : vector<8x1x1xf32> to vector<8x16x1xf32>
    %163 = vector.broadcast %5 : vector<1x16x1xf32> to vector<8x16x1xf32>
    %164 = arith.mulf %162, %163 : vector<8x16x1xf32>
    %165 = vector.broadcast %7 : vector<1x16x1xf32> to vector<8x16x1xf32>
    %166 = arith.addf %164, %165 : vector<8x16x1xf32>
    %cst_39 = arith.constant 0.000000e+00 : f32
    %167 = vector.broadcast %cst_39 : f32 to vector<8x16x1xf32>
    %168 = arith.maximumf %166, %167 : vector<8x16x1xf32>
    %cst_40 = arith.constant 0.000000e+00 : f32
    %169 = vector.broadcast %cst_40 : f32 to vector<1x1xf32>
    %170 = vector.extract_strided_slice %3 {offsets = [0, 0], sizes = [1, 16], strides = [1, 1]} : vector<8x16xf32> to vector<1x16xf32>
    %171 = vector.extract_strided_slice %168 {offsets = [0, 0, 0], sizes = [1, 16, 1], strides = [1, 1, 1]} : vector<8x16x1xf32> to vector<1x16x1xf32>
    %172 = vector.shape_cast %171 : vector<1x16x1xf32> to vector<16x1xf32>
    %cst_41 = arith.constant dense<0.000000e+00> : vector<1x1xf32>
    %173 = tpu.matmul %170, %172, %cst_41 {dimension_numbers = #tpu.dot_dimension_numbers<[1], [0], [0], [1], [0, 0, 1, 1], [], []>} : vector<1x16xf32>, vector<16x1xf32>, vector<1x1xf32> -> vector<1x1xf32>
    %174 = arith.addf %169, %173 : vector<1x1xf32>
    %175 = vector.extract_strided_slice %3 {offsets = [1, 0], sizes = [1, 16], strides = [1, 1]} : vector<8x16xf32> to vector<1x16xf32>
    %176 = vector.extract_strided_slice %168 {offsets = [1, 0, 0], sizes = [1, 16, 1], strides = [1, 1, 1]} : vector<8x16x1xf32> to vector<1x16x1xf32>
    %177 = vector.shape_cast %176 : vector<1x16x1xf32> to vector<16x1xf32>
    %cst_42 = arith.constant dense<0.000000e+00> : vector<1x1xf32>
    %178 = tpu.matmul %175, %177, %cst_42 {dimension_numbers = #tpu.dot_dimension_numbers<[1], [0], [0], [1], [0, 0, 1, 1], [], []>} : vector<1x16xf32>, vector<16x1xf32>, vector<1x1xf32> -> vector<1x1xf32>
    %179 = arith.addf %174, %178 : vector<1x1xf32>
    %180 = vector.extract_strided_slice %3 {offsets = [2, 0], sizes = [1, 16], strides = [1, 1]} : vector<8x16xf32> to vector<1x16xf32>
    %181 = vector.extract_strided_slice %168 {offsets = [2, 0, 0], sizes = [1, 16, 1], strides = [1, 1, 1]} : vector<8x16x1xf32> to vector<1x16x1xf32>
    %182 = vector.shape_cast %181 : vector<1x16x1xf32> to vector<16x1xf32>
    %cst_43 = arith.constant dense<0.000000e+00> : vector<1x1xf32>
    %183 = tpu.matmul %180, %182, %cst_43 {dimension_numbers = #tpu.dot_dimension_numbers<[1], [0], [0], [1], [0, 0, 1, 1], [], []>} : vector<1x16xf32>, vector<16x1xf32>, vector<1x1xf32> -> vector<1x1xf32>
    %184 = arith.addf %179, %183 : vector<1x1xf32>
    %185 = vector.extract_strided_slice %3 {offsets = [3, 0], sizes = [1, 16], strides = [1, 1]} : vector<8x16xf32> to vector<1x16xf32>
    %186 = vector.extract_strided_slice %168 {offsets = [3, 0, 0], sizes = [1, 16, 1], strides = [1, 1, 1]} : vector<8x16x1xf32> to vector<1x16x1xf32>
    %187 = vector.shape_cast %186 : vector<1x16x1xf32> to vector<16x1xf32>
    %cst_44 = arith.constant dense<0.000000e+00> : vector<1x1xf32>
    %188 = tpu.matmul %185, %187, %cst_44 {dimension_numbers = #tpu.dot_dimension_numbers<[1], [0], [0], [1], [0, 0, 1, 1], [], []>} : vector<1x16xf32>, vector<16x1xf32>, vector<1x1xf32> -> vector<1x1xf32>
    %189 = arith.addf %184, %188 : vector<1x1xf32>
    %190 = vector.extract_strided_slice %3 {offsets = [4, 0], sizes = [1, 16], strides = [1, 1]} : vector<8x16xf32> to vector<1x16xf32>
    %191 = vector.extract_strided_slice %168 {offsets = [4, 0, 0], sizes = [1, 16, 1], strides = [1, 1, 1]} : vector<8x16x1xf32> to vector<1x16x1xf32>
    %192 = vector.shape_cast %191 : vector<1x16x1xf32> to vector<16x1xf32>
    %cst_45 = arith.constant dense<0.000000e+00> : vector<1x1xf32>
    %193 = tpu.matmul %190, %192, %cst_45 {dimension_numbers = #tpu.dot_dimension_numbers<[1], [0], [0], [1], [0, 0, 1, 1], [], []>} : vector<1x16xf32>, vector<16x1xf32>, vector<1x1xf32> -> vector<1x1xf32>
    %194 = arith.addf %189, %193 : vector<1x1xf32>
    %195 = vector.extract_strided_slice %3 {offsets = [5, 0], sizes = [1, 16], strides = [1, 1]} : vector<8x16xf32> to vector<1x16xf32>
    %196 = vector.extract_strided_slice %168 {offsets = [5, 0, 0], sizes = [1, 16, 1], strides = [1, 1, 1]} : vector<8x16x1xf32> to vector<1x16x1xf32>
    %197 = vector.shape_cast %196 : vector<1x16x1xf32> to vector<16x1xf32>
    %cst_46 = arith.constant dense<0.000000e+00> : vector<1x1xf32>
    %198 = tpu.matmul %195, %197, %cst_46 {dimension_numbers = #tpu.dot_dimension_numbers<[1], [0], [0], [1], [0, 0, 1, 1], [], []>} : vector<1x16xf32>, vector<16x1xf32>, vector<1x1xf32> -> vector<1x1xf32>
    %199 = arith.addf %194, %198 : vector<1x1xf32>
    %200 = vector.extract_strided_slice %3 {offsets = [6, 0], sizes = [1, 16], strides = [1, 1]} : vector<8x16xf32> to vector<1x16xf32>
    %201 = vector.extract_strided_slice %168 {offsets = [6, 0, 0], sizes = [1, 16, 1], strides = [1, 1, 1]} : vector<8x16x1xf32> to vector<1x16x1xf32>
    %202 = vector.shape_cast %201 : vector<1x16x1xf32> to vector<16x1xf32>
    %cst_47 = arith.constant dense<0.000000e+00> : vector<1x1xf32>
    %203 = tpu.matmul %200, %202, %cst_47 {dimension_numbers = #tpu.dot_dimension_numbers<[1], [0], [0], [1], [0, 0, 1, 1], [], []>} : vector<1x16xf32>, vector<16x1xf32>, vector<1x1xf32> -> vector<1x1xf32>
    %204 = arith.addf %199, %203 : vector<1x1xf32>
    %205 = vector.extract_strided_slice %3 {offsets = [7, 0], sizes = [1, 16], strides = [1, 1]} : vector<8x16xf32> to vector<1x16xf32>
    %206 = vector.extract_strided_slice %168 {offsets = [7, 0, 0], sizes = [1, 16, 1], strides = [1, 1, 1]} : vector<8x16x1xf32> to vector<1x16x1xf32>
    %207 = vector.shape_cast %206 : vector<1x16x1xf32> to vector<16x1xf32>
    %cst_48 = arith.constant dense<0.000000e+00> : vector<1x1xf32>
    %208 = tpu.matmul %205, %207, %cst_48 {dimension_numbers = #tpu.dot_dimension_numbers<[1], [0], [0], [1], [0, 0, 1, 1], [], []>} : vector<1x16xf32>, vector<16x1xf32>, vector<1x1xf32> -> vector<1x1xf32>
    %209 = arith.addf %204, %208 : vector<1x1xf32>
    %210 = vector.extract_strided_slice %9 {offsets = [0, 4], sizes = [8, 1], strides = [1, 1]} : vector<8x8xf32> to vector<8x1xf32>
    %211 = vector.shape_cast %210 : vector<8x1xf32> to vector<8x1x1xf32>
    %212 = vector.broadcast %211 : vector<8x1x1xf32> to vector<8x16x1xf32>
    %213 = vector.broadcast %5 : vector<1x16x1xf32> to vector<8x16x1xf32>
    %214 = arith.mulf %212, %213 : vector<8x16x1xf32>
    %215 = vector.broadcast %7 : vector<1x16x1xf32> to vector<8x16x1xf32>
    %216 = arith.addf %214, %215 : vector<8x16x1xf32>
    %cst_49 = arith.constant 0.000000e+00 : f32
    %217 = vector.broadcast %cst_49 : f32 to vector<8x16x1xf32>
    %218 = arith.maximumf %216, %217 : vector<8x16x1xf32>
    %cst_50 = arith.constant 0.000000e+00 : f32
    %219 = vector.broadcast %cst_50 : f32 to vector<1x1xf32>
    %220 = vector.extract_strided_slice %3 {offsets = [0, 0], sizes = [1, 16], strides = [1, 1]} : vector<8x16xf32> to vector<1x16xf32>
    %221 = vector.extract_strided_slice %218 {offsets = [0, 0, 0], sizes = [1, 16, 1], strides = [1, 1, 1]} : vector<8x16x1xf32> to vector<1x16x1xf32>
    %222 = vector.shape_cast %221 : vector<1x16x1xf32> to vector<16x1xf32>
    %cst_51 = arith.constant dense<0.000000e+00> : vector<1x1xf32>
    %223 = tpu.matmul %220, %222, %cst_51 {dimension_numbers = #tpu.dot_dimension_numbers<[1], [0], [0], [1], [0, 0, 1, 1], [], []>} : vector<1x16xf32>, vector<16x1xf32>, vector<1x1xf32> -> vector<1x1xf32>
    %224 = arith.addf %219, %223 : vector<1x1xf32>
    %225 = vector.extract_strided_slice %3 {offsets = [1, 0], sizes = [1, 16], strides = [1, 1]} : vector<8x16xf32> to vector<1x16xf32>
    %226 = vector.extract_strided_slice %218 {offsets = [1, 0, 0], sizes = [1, 16, 1], strides = [1, 1, 1]} : vector<8x16x1xf32> to vector<1x16x1xf32>
    %227 = vector.shape_cast %226 : vector<1x16x1xf32> to vector<16x1xf32>
    %cst_52 = arith.constant dense<0.000000e+00> : vector<1x1xf32>
    %228 = tpu.matmul %225, %227, %cst_52 {dimension_numbers = #tpu.dot_dimension_numbers<[1], [0], [0], [1], [0, 0, 1, 1], [], []>} : vector<1x16xf32>, vector<16x1xf32>, vector<1x1xf32> -> vector<1x1xf32>
    %229 = arith.addf %224, %228 : vector<1x1xf32>
    %230 = vector.extract_strided_slice %3 {offsets = [2, 0], sizes = [1, 16], strides = [1, 1]} : vector<8x16xf32> to vector<1x16xf32>
    %231 = vector.extract_strided_slice %218 {offsets = [2, 0, 0], sizes = [1, 16, 1], strides = [1, 1, 1]} : vector<8x16x1xf32> to vector<1x16x1xf32>
    %232 = vector.shape_cast %231 : vector<1x16x1xf32> to vector<16x1xf32>
    %cst_53 = arith.constant dense<0.000000e+00> : vector<1x1xf32>
    %233 = tpu.matmul %230, %232, %cst_53 {dimension_numbers = #tpu.dot_dimension_numbers<[1], [0], [0], [1], [0, 0, 1, 1], [], []>} : vector<1x16xf32>, vector<16x1xf32>, vector<1x1xf32> -> vector<1x1xf32>
    %234 = arith.addf %229, %233 : vector<1x1xf32>
    %235 = vector.extract_strided_slice %3 {offsets = [3, 0], sizes = [1, 16], strides = [1, 1]} : vector<8x16xf32> to vector<1x16xf32>
    %236 = vector.extract_strided_slice %218 {offsets = [3, 0, 0], sizes = [1, 16, 1], strides = [1, 1, 1]} : vector<8x16x1xf32> to vector<1x16x1xf32>
    %237 = vector.shape_cast %236 : vector<1x16x1xf32> to vector<16x1xf32>
    %cst_54 = arith.constant dense<0.000000e+00> : vector<1x1xf32>
    %238 = tpu.matmul %235, %237, %cst_54 {dimension_numbers = #tpu.dot_dimension_numbers<[1], [0], [0], [1], [0, 0, 1, 1], [], []>} : vector<1x16xf32>, vector<16x1xf32>, vector<1x1xf32> -> vector<1x1xf32>
    %239 = arith.addf %234, %238 : vector<1x1xf32>
    %240 = vector.extract_strided_slice %3 {offsets = [4, 0], sizes = [1, 16], strides = [1, 1]} : vector<8x16xf32> to vector<1x16xf32>
    %241 = vector.extract_strided_slice %218 {offsets = [4, 0, 0], sizes = [1, 16, 1], strides = [1, 1, 1]} : vector<8x16x1xf32> to vector<1x16x1xf32>
    %242 = vector.shape_cast %241 : vector<1x16x1xf32> to vector<16x1xf32>
    %cst_55 = arith.constant dense<0.000000e+00> : vector<1x1xf32>
    %243 = tpu.matmul %240, %242, %cst_55 {dimension_numbers = #tpu.dot_dimension_numbers<[1], [0], [0], [1], [0, 0, 1, 1], [], []>} : vector<1x16xf32>, vector<16x1xf32>, vector<1x1xf32> -> vector<1x1xf32>
    %244 = arith.addf %239, %243 : vector<1x1xf32>
    %245 = vector.extract_strided_slice %3 {offsets = [5, 0], sizes = [1, 16], strides = [1, 1]} : vector<8x16xf32> to vector<1x16xf32>
    %246 = vector.extract_strided_slice %218 {offsets = [5, 0, 0], sizes = [1, 16, 1], strides = [1, 1, 1]} : vector<8x16x1xf32> to vector<1x16x1xf32>
    %247 = vector.shape_cast %246 : vector<1x16x1xf32> to vector<16x1xf32>
    %cst_56 = arith.constant dense<0.000000e+00> : vector<1x1xf32>
    %248 = tpu.matmul %245, %247, %cst_56 {dimension_numbers = #tpu.dot_dimension_numbers<[1], [0], [0], [1], [0, 0, 1, 1], [], []>} : vector<1x16xf32>, vector<16x1xf32>, vector<1x1xf32> -> vector<1x1xf32>
    %249 = arith.addf %244, %248 : vector<1x1xf32>
    %250 = vector.extract_strided_slice %3 {offsets = [6, 0], sizes = [1, 16], strides = [1, 1]} : vector<8x16xf32> to vector<1x16xf32>
    %251 = vector.extract_strided_slice %218 {offsets = [6, 0, 0], sizes = [1, 16, 1], strides = [1, 1, 1]} : vector<8x16x1xf32> to vector<1x16x1xf32>
    %252 = vector.shape_cast %251 : vector<1x16x1xf32> to vector<16x1xf32>
    %cst_57 = arith.constant dense<0.000000e+00> : vector<1x1xf32>
    %253 = tpu.matmul %250, %252, %cst_57 {dimension_numbers = #tpu.dot_dimension_numbers<[1], [0], [0], [1], [0, 0, 1, 1], [], []>} : vector<1x16xf32>, vector<16x1xf32>, vector<1x1xf32> -> vector<1x1xf32>
    %254 = arith.addf %249, %253 : vector<1x1xf32>
    %255 = vector.extract_strided_slice %3 {offsets = [7, 0], sizes = [1, 16], strides = [1, 1]} : vector<8x16xf32> to vector<1x16xf32>
    %256 = vector.extract_strided_slice %218 {offsets = [7, 0, 0], sizes = [1, 16, 1], strides = [1, 1, 1]} : vector<8x16x1xf32> to vector<1x16x1xf32>
    %257 = vector.shape_cast %256 : vector<1x16x1xf32> to vector<16x1xf32>
    %cst_58 = arith.constant dense<0.000000e+00> : vector<1x1xf32>
    %258 = tpu.matmul %255, %257, %cst_58 {dimension_numbers = #tpu.dot_dimension_numbers<[1], [0], [0], [1], [0, 0, 1, 1], [], []>} : vector<1x16xf32>, vector<16x1xf32>, vector<1x1xf32> -> vector<1x1xf32>
    %259 = arith.addf %254, %258 : vector<1x1xf32>
    %260 = vector.extract_strided_slice %9 {offsets = [0, 5], sizes = [8, 1], strides = [1, 1]} : vector<8x8xf32> to vector<8x1xf32>
    %261 = vector.shape_cast %260 : vector<8x1xf32> to vector<8x1x1xf32>
    %262 = vector.broadcast %261 : vector<8x1x1xf32> to vector<8x16x1xf32>
    %263 = vector.broadcast %5 : vector<1x16x1xf32> to vector<8x16x1xf32>
    %264 = arith.mulf %262, %263 : vector<8x16x1xf32>
    %265 = vector.broadcast %7 : vector<1x16x1xf32> to vector<8x16x1xf32>
    %266 = arith.addf %264, %265 : vector<8x16x1xf32>
    %cst_59 = arith.constant 0.000000e+00 : f32
    %267 = vector.broadcast %cst_59 : f32 to vector<8x16x1xf32>
    %268 = arith.maximumf %266, %267 : vector<8x16x1xf32>
    %cst_60 = arith.constant 0.000000e+00 : f32
    %269 = vector.broadcast %cst_60 : f32 to vector<1x1xf32>
    %270 = vector.extract_strided_slice %3 {offsets = [0, 0], sizes = [1, 16], strides = [1, 1]} : vector<8x16xf32> to vector<1x16xf32>
    %271 = vector.extract_strided_slice %268 {offsets = [0, 0, 0], sizes = [1, 16, 1], strides = [1, 1, 1]} : vector<8x16x1xf32> to vector<1x16x1xf32>
    %272 = vector.shape_cast %271 : vector<1x16x1xf32> to vector<16x1xf32>
    %cst_61 = arith.constant dense<0.000000e+00> : vector<1x1xf32>
    %273 = tpu.matmul %270, %272, %cst_61 {dimension_numbers = #tpu.dot_dimension_numbers<[1], [0], [0], [1], [0, 0, 1, 1], [], []>} : vector<1x16xf32>, vector<16x1xf32>, vector<1x1xf32> -> vector<1x1xf32>
    %274 = arith.addf %269, %273 : vector<1x1xf32>
    %275 = vector.extract_strided_slice %3 {offsets = [1, 0], sizes = [1, 16], strides = [1, 1]} : vector<8x16xf32> to vector<1x16xf32>
    %276 = vector.extract_strided_slice %268 {offsets = [1, 0, 0], sizes = [1, 16, 1], strides = [1, 1, 1]} : vector<8x16x1xf32> to vector<1x16x1xf32>
    %277 = vector.shape_cast %276 : vector<1x16x1xf32> to vector<16x1xf32>
    %cst_62 = arith.constant dense<0.000000e+00> : vector<1x1xf32>
    %278 = tpu.matmul %275, %277, %cst_62 {dimension_numbers = #tpu.dot_dimension_numbers<[1], [0], [0], [1], [0, 0, 1, 1], [], []>} : vector<1x16xf32>, vector<16x1xf32>, vector<1x1xf32> -> vector<1x1xf32>
    %279 = arith.addf %274, %278 : vector<1x1xf32>
    %280 = vector.extract_strided_slice %3 {offsets = [2, 0], sizes = [1, 16], strides = [1, 1]} : vector<8x16xf32> to vector<1x16xf32>
    %281 = vector.extract_strided_slice %268 {offsets = [2, 0, 0], sizes = [1, 16, 1], strides = [1, 1, 1]} : vector<8x16x1xf32> to vector<1x16x1xf32>
    %282 = vector.shape_cast %281 : vector<1x16x1xf32> to vector<16x1xf32>
    %cst_63 = arith.constant dense<0.000000e+00> : vector<1x1xf32>
    %283 = tpu.matmul %280, %282, %cst_63 {dimension_numbers = #tpu.dot_dimension_numbers<[1], [0], [0], [1], [0, 0, 1, 1], [], []>} : vector<1x16xf32>, vector<16x1xf32>, vector<1x1xf32> -> vector<1x1xf32>
    %284 = arith.addf %279, %283 : vector<1x1xf32>
    %285 = vector.extract_strided_slice %3 {offsets = [3, 0], sizes = [1, 16], strides = [1, 1]} : vector<8x16xf32> to vector<1x16xf32>
    %286 = vector.extract_strided_slice %268 {offsets = [3, 0, 0], sizes = [1, 16, 1], strides = [1, 1, 1]} : vector<8x16x1xf32> to vector<1x16x1xf32>
    %287 = vector.shape_cast %286 : vector<1x16x1xf32> to vector<16x1xf32>
    %cst_64 = arith.constant dense<0.000000e+00> : vector<1x1xf32>
    %288 = tpu.matmul %285, %287, %cst_64 {dimension_numbers = #tpu.dot_dimension_numbers<[1], [0], [0], [1], [0, 0, 1, 1], [], []>} : vector<1x16xf32>, vector<16x1xf32>, vector<1x1xf32> -> vector<1x1xf32>
    %289 = arith.addf %284, %288 : vector<1x1xf32>
    %290 = vector.extract_strided_slice %3 {offsets = [4, 0], sizes = [1, 16], strides = [1, 1]} : vector<8x16xf32> to vector<1x16xf32>
    %291 = vector.extract_strided_slice %268 {offsets = [4, 0, 0], sizes = [1, 16, 1], strides = [1, 1, 1]} : vector<8x16x1xf32> to vector<1x16x1xf32>
    %292 = vector.shape_cast %291 : vector<1x16x1xf32> to vector<16x1xf32>
    %cst_65 = arith.constant dense<0.000000e+00> : vector<1x1xf32>
    %293 = tpu.matmul %290, %292, %cst_65 {dimension_numbers = #tpu.dot_dimension_numbers<[1], [0], [0], [1], [0, 0, 1, 1], [], []>} : vector<1x16xf32>, vector<16x1xf32>, vector<1x1xf32> -> vector<1x1xf32>
    %294 = arith.addf %289, %293 : vector<1x1xf32>
    %295 = vector.extract_strided_slice %3 {offsets = [5, 0], sizes = [1, 16], strides = [1, 1]} : vector<8x16xf32> to vector<1x16xf32>
    %296 = vector.extract_strided_slice %268 {offsets = [5, 0, 0], sizes = [1, 16, 1], strides = [1, 1, 1]} : vector<8x16x1xf32> to vector<1x16x1xf32>
    %297 = vector.shape_cast %296 : vector<1x16x1xf32> to vector<16x1xf32>
    %cst_66 = arith.constant dense<0.000000e+00> : vector<1x1xf32>
    %298 = tpu.matmul %295, %297, %cst_66 {dimension_numbers = #tpu.dot_dimension_numbers<[1], [0], [0], [1], [0, 0, 1, 1], [], []>} : vector<1x16xf32>, vector<16x1xf32>, vector<1x1xf32> -> vector<1x1xf32>
    %299 = arith.addf %294, %298 : vector<1x1xf32>
    %300 = vector.extract_strided_slice %3 {offsets = [6, 0], sizes = [1, 16], strides = [1, 1]} : vector<8x16xf32> to vector<1x16xf32>
    %301 = vector.extract_strided_slice %268 {offsets = [6, 0, 0], sizes = [1, 16, 1], strides = [1, 1, 1]} : vector<8x16x1xf32> to vector<1x16x1xf32>
    %302 = vector.shape_cast %301 : vector<1x16x1xf32> to vector<16x1xf32>
    %cst_67 = arith.constant dense<0.000000e+00> : vector<1x1xf32>
    %303 = tpu.matmul %300, %302, %cst_67 {dimension_numbers = #tpu.dot_dimension_numbers<[1], [0], [0], [1], [0, 0, 1, 1], [], []>} : vector<1x16xf32>, vector<16x1xf32>, vector<1x1xf32> -> vector<1x1xf32>
    %304 = arith.addf %299, %303 : vector<1x1xf32>
    %305 = vector.extract_strided_slice %3 {offsets = [7, 0], sizes = [1, 16], strides = [1, 1]} : vector<8x16xf32> to vector<1x16xf32>
    %306 = vector.extract_strided_slice %268 {offsets = [7, 0, 0], sizes = [1, 16, 1], strides = [1, 1, 1]} : vector<8x16x1xf32> to vector<1x16x1xf32>
    %307 = vector.shape_cast %306 : vector<1x16x1xf32> to vector<16x1xf32>
    %cst_68 = arith.constant dense<0.000000e+00> : vector<1x1xf32>
    %308 = tpu.matmul %305, %307, %cst_68 {dimension_numbers = #tpu.dot_dimension_numbers<[1], [0], [0], [1], [0, 0, 1, 1], [], []>} : vector<1x16xf32>, vector<16x1xf32>, vector<1x1xf32> -> vector<1x1xf32>
    %309 = arith.addf %304, %308 : vector<1x1xf32>
    %310 = vector.extract_strided_slice %9 {offsets = [0, 6], sizes = [8, 1], strides = [1, 1]} : vector<8x8xf32> to vector<8x1xf32>
    %311 = vector.shape_cast %310 : vector<8x1xf32> to vector<8x1x1xf32>
    %312 = vector.broadcast %311 : vector<8x1x1xf32> to vector<8x16x1xf32>
    %313 = vector.broadcast %5 : vector<1x16x1xf32> to vector<8x16x1xf32>
    %314 = arith.mulf %312, %313 : vector<8x16x1xf32>
    %315 = vector.broadcast %7 : vector<1x16x1xf32> to vector<8x16x1xf32>
    %316 = arith.addf %314, %315 : vector<8x16x1xf32>
    %cst_69 = arith.constant 0.000000e+00 : f32
    %317 = vector.broadcast %cst_69 : f32 to vector<8x16x1xf32>
    %318 = arith.maximumf %316, %317 : vector<8x16x1xf32>
    %cst_70 = arith.constant 0.000000e+00 : f32
    %319 = vector.broadcast %cst_70 : f32 to vector<1x1xf32>
    %320 = vector.extract_strided_slice %3 {offsets = [0, 0], sizes = [1, 16], strides = [1, 1]} : vector<8x16xf32> to vector<1x16xf32>
    %321 = vector.extract_strided_slice %318 {offsets = [0, 0, 0], sizes = [1, 16, 1], strides = [1, 1, 1]} : vector<8x16x1xf32> to vector<1x16x1xf32>
    %322 = vector.shape_cast %321 : vector<1x16x1xf32> to vector<16x1xf32>
    %cst_71 = arith.constant dense<0.000000e+00> : vector<1x1xf32>
    %323 = tpu.matmul %320, %322, %cst_71 {dimension_numbers = #tpu.dot_dimension_numbers<[1], [0], [0], [1], [0, 0, 1, 1], [], []>} : vector<1x16xf32>, vector<16x1xf32>, vector<1x1xf32> -> vector<1x1xf32>
    %324 = arith.addf %319, %323 : vector<1x1xf32>
    %325 = vector.extract_strided_slice %3 {offsets = [1, 0], sizes = [1, 16], strides = [1, 1]} : vector<8x16xf32> to vector<1x16xf32>
    %326 = vector.extract_strided_slice %318 {offsets = [1, 0, 0], sizes = [1, 16, 1], strides = [1, 1, 1]} : vector<8x16x1xf32> to vector<1x16x1xf32>
    %327 = vector.shape_cast %326 : vector<1x16x1xf32> to vector<16x1xf32>
    %cst_72 = arith.constant dense<0.000000e+00> : vector<1x1xf32>
    %328 = tpu.matmul %325, %327, %cst_72 {dimension_numbers = #tpu.dot_dimension_numbers<[1], [0], [0], [1], [0, 0, 1, 1], [], []>} : vector<1x16xf32>, vector<16x1xf32>, vector<1x1xf32> -> vector<1x1xf32>
    %329 = arith.addf %324, %328 : vector<1x1xf32>
    %330 = vector.extract_strided_slice %3 {offsets = [2, 0], sizes = [1, 16], strides = [1, 1]} : vector<8x16xf32> to vector<1x16xf32>
    %331 = vector.extract_strided_slice %318 {offsets = [2, 0, 0], sizes = [1, 16, 1], strides = [1, 1, 1]} : vector<8x16x1xf32> to vector<1x16x1xf32>
    %332 = vector.shape_cast %331 : vector<1x16x1xf32> to vector<16x1xf32>
    %cst_73 = arith.constant dense<0.000000e+00> : vector<1x1xf32>
    %333 = tpu.matmul %330, %332, %cst_73 {dimension_numbers = #tpu.dot_dimension_numbers<[1], [0], [0], [1], [0, 0, 1, 1], [], []>} : vector<1x16xf32>, vector<16x1xf32>, vector<1x1xf32> -> vector<1x1xf32>
    %334 = arith.addf %329, %333 : vector<1x1xf32>
    %335 = vector.extract_strided_slice %3 {offsets = [3, 0], sizes = [1, 16], strides = [1, 1]} : vector<8x16xf32> to vector<1x16xf32>
    %336 = vector.extract_strided_slice %318 {offsets = [3, 0, 0], sizes = [1, 16, 1], strides = [1, 1, 1]} : vector<8x16x1xf32> to vector<1x16x1xf32>
    %337 = vector.shape_cast %336 : vector<1x16x1xf32> to vector<16x1xf32>
    %cst_74 = arith.constant dense<0.000000e+00> : vector<1x1xf32>
    %338 = tpu.matmul %335, %337, %cst_74 {dimension_numbers = #tpu.dot_dimension_numbers<[1], [0], [0], [1], [0, 0, 1, 1], [], []>} : vector<1x16xf32>, vector<16x1xf32>, vector<1x1xf32> -> vector<1x1xf32>
    %339 = arith.addf %334, %338 : vector<1x1xf32>
    %340 = vector.extract_strided_slice %3 {offsets = [4, 0], sizes = [1, 16], strides = [1, 1]} : vector<8x16xf32> to vector<1x16xf32>
    %341 = vector.extract_strided_slice %318 {offsets = [4, 0, 0], sizes = [1, 16, 1], strides = [1, 1, 1]} : vector<8x16x1xf32> to vector<1x16x1xf32>
    %342 = vector.shape_cast %341 : vector<1x16x1xf32> to vector<16x1xf32>
    %cst_75 = arith.constant dense<0.000000e+00> : vector<1x1xf32>
    %343 = tpu.matmul %340, %342, %cst_75 {dimension_numbers = #tpu.dot_dimension_numbers<[1], [0], [0], [1], [0, 0, 1, 1], [], []>} : vector<1x16xf32>, vector<16x1xf32>, vector<1x1xf32> -> vector<1x1xf32>
    %344 = arith.addf %339, %343 : vector<1x1xf32>
    %345 = vector.extract_strided_slice %3 {offsets = [5, 0], sizes = [1, 16], strides = [1, 1]} : vector<8x16xf32> to vector<1x16xf32>
    %346 = vector.extract_strided_slice %318 {offsets = [5, 0, 0], sizes = [1, 16, 1], strides = [1, 1, 1]} : vector<8x16x1xf32> to vector<1x16x1xf32>
    %347 = vector.shape_cast %346 : vector<1x16x1xf32> to vector<16x1xf32>
    %cst_76 = arith.constant dense<0.000000e+00> : vector<1x1xf32>
    %348 = tpu.matmul %345, %347, %cst_76 {dimension_numbers = #tpu.dot_dimension_numbers<[1], [0], [0], [1], [0, 0, 1, 1], [], []>} : vector<1x16xf32>, vector<16x1xf32>, vector<1x1xf32> -> vector<1x1xf32>
    %349 = arith.addf %344, %348 : vector<1x1xf32>
    %350 = vector.extract_strided_slice %3 {offsets = [6, 0], sizes = [1, 16], strides = [1, 1]} : vector<8x16xf32> to vector<1x16xf32>
    %351 = vector.extract_strided_slice %318 {offsets = [6, 0, 0], sizes = [1, 16, 1], strides = [1, 1, 1]} : vector<8x16x1xf32> to vector<1x16x1xf32>
    %352 = vector.shape_cast %351 : vector<1x16x1xf32> to vector<16x1xf32>
    %cst_77 = arith.constant dense<0.000000e+00> : vector<1x1xf32>
    %353 = tpu.matmul %350, %352, %cst_77 {dimension_numbers = #tpu.dot_dimension_numbers<[1], [0], [0], [1], [0, 0, 1, 1], [], []>} : vector<1x16xf32>, vector<16x1xf32>, vector<1x1xf32> -> vector<1x1xf32>
    %354 = arith.addf %349, %353 : vector<1x1xf32>
    %355 = vector.extract_strided_slice %3 {offsets = [7, 0], sizes = [1, 16], strides = [1, 1]} : vector<8x16xf32> to vector<1x16xf32>
    %356 = vector.extract_strided_slice %318 {offsets = [7, 0, 0], sizes = [1, 16, 1], strides = [1, 1, 1]} : vector<8x16x1xf32> to vector<1x16x1xf32>
    %357 = vector.shape_cast %356 : vector<1x16x1xf32> to vector<16x1xf32>
    %cst_78 = arith.constant dense<0.000000e+00> : vector<1x1xf32>
    %358 = tpu.matmul %355, %357, %cst_78 {dimension_numbers = #tpu.dot_dimension_numbers<[1], [0], [0], [1], [0, 0, 1, 1], [], []>} : vector<1x16xf32>, vector<16x1xf32>, vector<1x1xf32> -> vector<1x1xf32>
    %359 = arith.addf %354, %358 : vector<1x1xf32>
    %360 = vector.extract_strided_slice %9 {offsets = [0, 7], sizes = [8, 1], strides = [1, 1]} : vector<8x8xf32> to vector<8x1xf32>
    %361 = vector.shape_cast %360 : vector<8x1xf32> to vector<8x1x1xf32>
    %362 = vector.broadcast %361 : vector<8x1x1xf32> to vector<8x16x1xf32>
    %363 = vector.broadcast %5 : vector<1x16x1xf32> to vector<8x16x1xf32>
    %364 = arith.mulf %362, %363 : vector<8x16x1xf32>
    %365 = vector.broadcast %7 : vector<1x16x1xf32> to vector<8x16x1xf32>
    %366 = arith.addf %364, %365 : vector<8x16x1xf32>
    %cst_79 = arith.constant 0.000000e+00 : f32
    %367 = vector.broadcast %cst_79 : f32 to vector<8x16x1xf32>
    %368 = arith.maximumf %366, %367 : vector<8x16x1xf32>
    %cst_80 = arith.constant 0.000000e+00 : f32
    %369 = vector.broadcast %cst_80 : f32 to vector<1x1xf32>
    %370 = vector.extract_strided_slice %3 {offsets = [0, 0], sizes = [1, 16], strides = [1, 1]} : vector<8x16xf32> to vector<1x16xf32>
    %371 = vector.extract_strided_slice %368 {offsets = [0, 0, 0], sizes = [1, 16, 1], strides = [1, 1, 1]} : vector<8x16x1xf32> to vector<1x16x1xf32>
    %372 = vector.shape_cast %371 : vector<1x16x1xf32> to vector<16x1xf32>
    %cst_81 = arith.constant dense<0.000000e+00> : vector<1x1xf32>
    %373 = tpu.matmul %370, %372, %cst_81 {dimension_numbers = #tpu.dot_dimension_numbers<[1], [0], [0], [1], [0, 0, 1, 1], [], []>} : vector<1x16xf32>, vector<16x1xf32>, vector<1x1xf32> -> vector<1x1xf32>
    %374 = arith.addf %369, %373 : vector<1x1xf32>
    %375 = vector.extract_strided_slice %3 {offsets = [1, 0], sizes = [1, 16], strides = [1, 1]} : vector<8x16xf32> to vector<1x16xf32>
    %376 = vector.extract_strided_slice %368 {offsets = [1, 0, 0], sizes = [1, 16, 1], strides = [1, 1, 1]} : vector<8x16x1xf32> to vector<1x16x1xf32>
    %377 = vector.shape_cast %376 : vector<1x16x1xf32> to vector<16x1xf32>
    %cst_82 = arith.constant dense<0.000000e+00> : vector<1x1xf32>
    %378 = tpu.matmul %375, %377, %cst_82 {dimension_numbers = #tpu.dot_dimension_numbers<[1], [0], [0], [1], [0, 0, 1, 1], [], []>} : vector<1x16xf32>, vector<16x1xf32>, vector<1x1xf32> -> vector<1x1xf32>
    %379 = arith.addf %374, %378 : vector<1x1xf32>
    %380 = vector.extract_strided_slice %3 {offsets = [2, 0], sizes = [1, 16], strides = [1, 1]} : vector<8x16xf32> to vector<1x16xf32>
    %381 = vector.extract_strided_slice %368 {offsets = [2, 0, 0], sizes = [1, 16, 1], strides = [1, 1, 1]} : vector<8x16x1xf32> to vector<1x16x1xf32>
    %382 = vector.shape_cast %381 : vector<1x16x1xf32> to vector<16x1xf32>
    %cst_83 = arith.constant dense<0.000000e+00> : vector<1x1xf32>
    %383 = tpu.matmul %380, %382, %cst_83 {dimension_numbers = #tpu.dot_dimension_numbers<[1], [0], [0], [1], [0, 0, 1, 1], [], []>} : vector<1x16xf32>, vector<16x1xf32>, vector<1x1xf32> -> vector<1x1xf32>
    %384 = arith.addf %379, %383 : vector<1x1xf32>
    %385 = vector.extract_strided_slice %3 {offsets = [3, 0], sizes = [1, 16], strides = [1, 1]} : vector<8x16xf32> to vector<1x16xf32>
    %386 = vector.extract_strided_slice %368 {offsets = [3, 0, 0], sizes = [1, 16, 1], strides = [1, 1, 1]} : vector<8x16x1xf32> to vector<1x16x1xf32>
    %387 = vector.shape_cast %386 : vector<1x16x1xf32> to vector<16x1xf32>
    %cst_84 = arith.constant dense<0.000000e+00> : vector<1x1xf32>
    %388 = tpu.matmul %385, %387, %cst_84 {dimension_numbers = #tpu.dot_dimension_numbers<[1], [0], [0], [1], [0, 0, 1, 1], [], []>} : vector<1x16xf32>, vector<16x1xf32>, vector<1x1xf32> -> vector<1x1xf32>
    %389 = arith.addf %384, %388 : vector<1x1xf32>
    %390 = vector.extract_strided_slice %3 {offsets = [4, 0], sizes = [1, 16], strides = [1, 1]} : vector<8x16xf32> to vector<1x16xf32>
    %391 = vector.extract_strided_slice %368 {offsets = [4, 0, 0], sizes = [1, 16, 1], strides = [1, 1, 1]} : vector<8x16x1xf32> to vector<1x16x1xf32>
    %392 = vector.shape_cast %391 : vector<1x16x1xf32> to vector<16x1xf32>
    %cst_85 = arith.constant dense<0.000000e+00> : vector<1x1xf32>
    %393 = tpu.matmul %390, %392, %cst_85 {dimension_numbers = #tpu.dot_dimension_numbers<[1], [0], [0], [1], [0, 0, 1, 1], [], []>} : vector<1x16xf32>, vector<16x1xf32>, vector<1x1xf32> -> vector<1x1xf32>
    %394 = arith.addf %389, %393 : vector<1x1xf32>
    %395 = vector.extract_strided_slice %3 {offsets = [5, 0], sizes = [1, 16], strides = [1, 1]} : vector<8x16xf32> to vector<1x16xf32>
    %396 = vector.extract_strided_slice %368 {offsets = [5, 0, 0], sizes = [1, 16, 1], strides = [1, 1, 1]} : vector<8x16x1xf32> to vector<1x16x1xf32>
    %397 = vector.shape_cast %396 : vector<1x16x1xf32> to vector<16x1xf32>
    %cst_86 = arith.constant dense<0.000000e+00> : vector<1x1xf32>
    %398 = tpu.matmul %395, %397, %cst_86 {dimension_numbers = #tpu.dot_dimension_numbers<[1], [0], [0], [1], [0, 0, 1, 1], [], []>} : vector<1x16xf32>, vector<16x1xf32>, vector<1x1xf32> -> vector<1x1xf32>
    %399 = arith.addf %394, %398 : vector<1x1xf32>
    %400 = vector.extract_strided_slice %3 {offsets = [6, 0], sizes = [1, 16], strides = [1, 1]} : vector<8x16xf32> to vector<1x16xf32>
    %401 = vector.extract_strided_slice %368 {offsets = [6, 0, 0], sizes = [1, 16, 1], strides = [1, 1, 1]} : vector<8x16x1xf32> to vector<1x16x1xf32>
    %402 = vector.shape_cast %401 : vector<1x16x1xf32> to vector<16x1xf32>
    %cst_87 = arith.constant dense<0.000000e+00> : vector<1x1xf32>
    %403 = tpu.matmul %400, %402, %cst_87 {dimension_numbers = #tpu.dot_dimension_numbers<[1], [0], [0], [1], [0, 0, 1, 1], [], []>} : vector<1x16xf32>, vector<16x1xf32>, vector<1x1xf32> -> vector<1x1xf32>
    %404 = arith.addf %399, %403 : vector<1x1xf32>
    %405 = vector.extract_strided_slice %3 {offsets = [7, 0], sizes = [1, 16], strides = [1, 1]} : vector<8x16xf32> to vector<1x16xf32>
    %406 = vector.extract_strided_slice %368 {offsets = [7, 0, 0], sizes = [1, 16, 1], strides = [1, 1, 1]} : vector<8x16x1xf32> to vector<1x16x1xf32>
    %407 = vector.shape_cast %406 : vector<1x16x1xf32> to vector<16x1xf32>
    %cst_88 = arith.constant dense<0.000000e+00> : vector<1x1xf32>
    %408 = tpu.matmul %405, %407, %cst_88 {dimension_numbers = #tpu.dot_dimension_numbers<[1], [0], [0], [1], [0, 0, 1, 1], [], []>} : vector<1x16xf32>, vector<16x1xf32>, vector<1x1xf32> -> vector<1x1xf32>
    %409 = arith.addf %404, %408 : vector<1x1xf32>
    %c0_89 = arith.constant 0 : index
    %c0_90 = arith.constant 0 : index
    %410 = vector.load %arg9[%c0_89, %c0_90] : memref<8x1xf32, #tpu.memory_space<vmem>>, vector<8x1xf32>
    %411 = tpu.concatenate %59, %109, %159, %209, %259, %309, %359, %409 in 0 : vector<1x1xf32>, vector<1x1xf32>, vector<1x1xf32>, vector<1x1xf32>, vector<1x1xf32>, vector<1x1xf32>, vector<1x1xf32>, vector<1x1xf32> -> vector<8x1xf32>
    %412 = arith.addf %410, %411 : vector<8x1xf32>
    %c0_91 = arith.constant 0 : index
    %c0_92 = arith.constant 0 : index
    %413 = vector.load %arg9[%c0_91, %c0_92] : memref<8x1xf32, #tpu.memory_space<vmem>>, vector<8x1xf32>
    tpu.vector_store %arg9[%c0_91, %c0_92], %412 {strides = array<i32>} : memref<8x1xf32, #tpu.memory_space<vmem>>, vector<8x1xf32>,
    %c1_i32 = arith.constant 1 : i32
    %414 = arith.cmpi eq, %arg1, %c1_i32 : i32
    %415 = arith.extui %414 : i1 to i32
    %c0_i32_93 = arith.constant 0 : i32
    %416 = arith.cmpi ne, %415, %c0_i32_93 : i32
    scf.if %416 {
      %c0_94 = arith.constant 0 : index
      %c0_95 = arith.constant 0 : index
      %417 = vector.load %arg9[%c0_94, %c0_95] : memref<8x1xf32, #tpu.memory_space<vmem>>, vector<8x1xf32>
      %c0_96 = arith.constant 0 : index
      %c0_97 = arith.constant 0 : index
      %418 = vector.load %arg6[%c0_96, %c0_97] : memref<1x1xf32, #tpu.memory_space<vmem>>, vector<1x1xf32>
      %419 = vector.broadcast %418 : vector<1x1xf32> to vector<8x1xf32>
      %420 = arith.mulf %417, %419 : vector<8x1xf32>
      %c0_98 = arith.constant 0 : index
      %c0_99 = arith.constant 0 : index
      %421 = vector.load %arg7[%c0_98, %c0_99] : memref<8x1xf32, #tpu.memory_space<vmem>>, vector<8x1xf32>
      %422 = arith.addf %420, %421 : vector<8x1xf32>
      %423 = arith.negf %422 : vector<8x1xf32>
      %424 = math.exp %423 : vector<8x1xf32>
      %cst_100 = arith.constant 1.000000e+00 : f32
      %425 = vector.broadcast %cst_100 : f32 to vector<8x1xf32>
      %426 = arith.addf %425, %424 : vector<8x1xf32>
      %427 = arith.divf %425, %426 : vector<8x1xf32>
      %c0_101 = arith.constant 0 : index
      %c0_102 = arith.constant 0 : index
      %428 = vector.load %arg8[%c0_101, %c0_102] : memref<8x1xf32, #tpu.memory_space<vmem>>, vector<8x1xf32>
      tpu.vector_store %arg8[%c0_101, %c0_102], %427 {strides = array<i32>} : memref<8x1xf32, #tpu.memory_space<vmem>>, vector<8x1xf32>,
    } else {
    }
    return
  }
  func.func @transform_0(%arg0: i32, %arg1: i32) -> (i32, i32) {
    %c0_i32 = arith.constant 0 : i32
    %c0_i32_0 = arith.constant 0 : i32
    return %arg1, %c0_i32 : i32, i32
  }
  func.func @transform_1(%arg0: i32, %arg1: i32) -> (i32, i32, i32, i32) {
    %c0_i32 = arith.constant 0 : i32
    %c0_i32_0 = arith.constant 0 : i32
    %c0_i32_1 = arith.constant 0 : i32
    return %arg1, %arg0, %c0_i32, %c0_i32_0 : i32, i32, i32, i32
  }
  func.func @transform_2(%arg0: i32, %arg1: i32) -> (i32, i32) {
    %c0_i32 = arith.constant 0 : i32
    %c0_i32_0 = arith.constant 0 : i32
    %c0_i32_1 = arith.constant 0 : i32
    return %c0_i32, %c0_i32_0 : i32, i32
  }
  func.func @transform_3(%arg0: i32, %arg1: i32) -> (i32, i32) {
    %c0_i32 = arith.constant 0 : i32
    %c0_i32_0 = arith.constant 0 : i32
    %c0_i32_1 = arith.constant 0 : i32
    return %c0_i32, %c0_i32_0 : i32, i32
  }
  func.func @transform_4(%arg0: i32, %arg1: i32) -> (i32, i32) {
    %c0_i32 = arith.constant 0 : i32
    %c0_i32_0 = arith.constant 0 : i32
    %c0_i32_1 = arith.constant 0 : i32
    return %c0_i32, %c0_i32_0 : i32, i32
  }
  func.func @transform_5(%arg0: i32, %arg1: i32) -> (i32, i32) {
    %c0_i32 = arith.constant 0 : i32
    %c0_i32_0 = arith.constant 0 : i32
    return %arg0, %c0_i32 : i32, i32
  }
  func.func @transform_6(%arg0: i32, %arg1: i32) -> (i32, i32) {
    %c0_i32 = arith.constant 0 : i32
    %c0_i32_0 = arith.constant 0 : i32
    return %arg0, %c0_i32 : i32, i32
  }
}

module attributes {stable_mosaic.version = 11 : i64} {
  func.func @_avg_sym_zero_diag_kernel(%arg0: memref<16x16xf32, #tpu.memory_space<vmem>>, %arg1: memref<16x16xf32, #tpu.memory_space<vmem>>, %arg2: memref<16x16xf32, #tpu.memory_space<vmem>>) attributes {dimension_semantics = [], scalar_prefetch = 0 : i64, scratch_operands = 0 : i64, tpu.core_type = #tpu.core_type<tc>} {
    %c0 = arith.constant 0 : index
    %c0_0 = arith.constant 0 : index
    %0 = vector.load %arg0[%c0, %c0_0] : memref<16x16xf32, #tpu.memory_space<vmem>>, vector<16x16xf32>
    %c0_1 = arith.constant 0 : index
    %c0_2 = arith.constant 0 : index
    %1 = vector.load %arg1[%c0_1, %c0_2] : memref<16x16xf32, #tpu.memory_space<vmem>>, vector<16x16xf32>
    %2 = arith.addf %0, %1 : vector<16x16xf32>
    %cst = arith.constant 5.000000e-01 : f32
    %3 = vector.broadcast %cst : f32 to vector<16x16xf32>
    %4 = arith.mulf %2, %3 : vector<16x16xf32>
    %5 = tpu.transpose %4, [1, 0] : vector<16x16xf32> -> vector<16x16xf32>
    %6 = arith.addf %4, %5 : vector<16x16xf32>
    %cst_3 = arith.constant 5.000000e-01 : f32
    %7 = vector.broadcast %cst_3 : f32 to vector<16x16xf32>
    %8 = arith.mulf %6, %7 : vector<16x16xf32>
    %9 = tpu.iota {dimensions = array<i32: 0>} : vector<16x16xi32>
    %10 = tpu.iota {dimensions = array<i32: 1>} : vector<16x16xi32>
    %11 = arith.cmpi eq, %9, %10 : vector<16x16xi32>
    %cst_4 = arith.constant 0.000000e+00 : f32
    %12 = vector.broadcast %cst_4 : f32 to vector<16x16xf32>
    %13 = arith.select %11, %12, %8 : vector<16x16xi1>, vector<16x16xf32>
    %c0_5 = arith.constant 0 : index
    %c0_6 = arith.constant 0 : index
    %14 = vector.load %arg2[%c0_5, %c0_6] : memref<16x16xf32, #tpu.memory_space<vmem>>, vector<16x16xf32>
    tpu.vector_store %arg2[%c0_5, %c0_6], %13 {strides = array<i32>} : memref<16x16xf32, #tpu.memory_space<vmem>>, vector<16x16xf32>,
    return
  }
}

module attributes {stable_mosaic.version = 11 : i64} {
  func.func @_nnconv_bn_sig_kernel(%arg0: i32, %arg1: i32, %arg2: memref<8x1xf32, #tpu.memory_space<vmem>>, %arg3: memref<1x1x8x8xf32, #tpu.memory_space<vmem>>, %arg4: memref<1x16xf32, #tpu.memory_space<vmem>>, %arg5: memref<1x16xf32, #tpu.memory_space<vmem>>, %arg6: memref<1x16xf32, #tpu.memory_space<vmem>>, %arg7: memref<8x16xf32, #tpu.memory_space<vmem>>, %arg8: memref<8x16xf32, #tpu.memory_space<vmem>>, %arg9: memref<8x16xf32, #tpu.memory_space<vmem>>) attributes {dimension_semantics = [#tpu.dimension_semantics<parallel>, #tpu.dimension_semantics<arbitrary>], iteration_bounds = array<i64: 2, 2>, scalar_prefetch = 0 : i64, scratch_operands = 1 : i64, tpu.core_type = #tpu.core_type<tc>, window_params = [{transform_indices = @transform_0, window_bounds = array<i64: 8, 1>}, {transform_indices = @transform_1, window_bounds = array<i64: 1, 1, 8, 8>}, {pipeline_mode = #tpu.pipeline_mode<synchronous>, transform_indices = @transform_2, window_bounds = array<i64: 1, 16>}, {pipeline_mode = #tpu.pipeline_mode<synchronous>, transform_indices = @transform_3, window_bounds = array<i64: 1, 16>}, {pipeline_mode = #tpu.pipeline_mode<synchronous>, transform_indices = @transform_4, window_bounds = array<i64: 1, 16>}, {transform_indices = @transform_5, window_bounds = array<i64: 8, 16>}, {transform_indices = @transform_6, window_bounds = array<i64: 8, 16>}]} {
    %c0_i32 = arith.constant 0 : i32
    %0 = arith.cmpi eq, %arg1, %c0_i32 : i32
    %1 = arith.extui %0 : i1 to i32
    %c0_i32_0 = arith.constant 0 : i32
    %2 = arith.cmpi ne, %1, %c0_i32_0 : i32
    scf.if %2 {
      %cst_94 = arith.constant 0.000000e+00 : f32
      %417 = vector.broadcast %cst_94 : f32 to vector<8x16xf32>
      %c0_95 = arith.constant 0 : index
      %c0_96 = arith.constant 0 : index
      %418 = vector.load %arg9[%c0_95, %c0_96] : memref<8x16xf32, #tpu.memory_space<vmem>>, vector<8x16xf32>
      tpu.vector_store %arg9[%c0_95, %c0_96], %417 {strides = array<i32>} : memref<8x16xf32, #tpu.memory_space<vmem>>, vector<8x16xf32>,
    } else {
    }
    %c0 = arith.constant 0 : index
    %c0_1 = arith.constant 0 : index
    %3 = vector.load %arg2[%c0, %c0_1] : memref<8x1xf32, #tpu.memory_space<vmem>>, vector<8x1xf32>
    %c0_2 = arith.constant 0 : index
    %c0_3 = arith.constant 0 : index
    %4 = vector.load %arg4[%c0_2, %c0_3] : memref<1x16xf32, #tpu.memory_space<vmem>>, vector<1x16xf32>
    %5 = vector.shape_cast %4 : vector<1x16xf32> to vector<1x1x16xf32>
    %c0_4 = arith.constant 0 : index
    %c0_5 = arith.constant 0 : index
    %6 = vector.load %arg5[%c0_4, %c0_5] : memref<1x16xf32, #tpu.memory_space<vmem>>, vector<1x16xf32>
    %7 = vector.shape_cast %6 : vector<1x16xf32> to vector<1x1x16xf32>
    %c0_6 = arith.constant 0 : index
    %c0_7 = arith.constant 0 : index
    %c0_8 = arith.constant 0 : index
    %c0_9 = arith.constant 0 : index
    %8 = vector.load %arg3[%c0_6, %c0_7, %c0_8, %c0_9] : memref<1x1x8x8xf32, #tpu.memory_space<vmem>>, vector<1x1x8x8xf32>
    %9 = vector.shape_cast %8 : vector<1x1x8x8xf32> to vector<8x8xf32>
    %10 = vector.extract_strided_slice %9 {offsets = [0, 0], sizes = [8, 1], strides = [1, 1]} : vector<8x8xf32> to vector<8x1xf32>
    %11 = vector.shape_cast %10 : vector<8x1xf32> to vector<8x1x1xf32>
    %12 = vector.broadcast %11 : vector<8x1x1xf32> to vector<8x1x16xf32>
    %13 = vector.broadcast %5 : vector<1x1x16xf32> to vector<8x1x16xf32>
    %14 = arith.mulf %12, %13 : vector<8x1x16xf32>
    %15 = vector.broadcast %7 : vector<1x1x16xf32> to vector<8x1x16xf32>
    %16 = arith.addf %14, %15 : vector<8x1x16xf32>
    %cst = arith.constant 0.000000e+00 : f32
    %17 = vector.broadcast %cst : f32 to vector<8x1x16xf32>
    %18 = arith.maximumf %16, %17 : vector<8x1x16xf32>
    %cst_10 = arith.constant 0.000000e+00 : f32
    %19 = vector.broadcast %cst_10 : f32 to vector<1x16xf32>
    %20 = vector.extract_strided_slice %3 {offsets = [0, 0], sizes = [1, 1], strides = [1, 1]} : vector<8x1xf32> to vector<1x1xf32>
    %21 = vector.extract_strided_slice %18 {offsets = [0, 0, 0], sizes = [1, 1, 16], strides = [1, 1, 1]} : vector<8x1x16xf32> to vector<1x1x16xf32>
    %22 = vector.shape_cast %21 : vector<1x1x16xf32> to vector<1x16xf32>
    %cst_11 = arith.constant dense<0.000000e+00> : vector<1x16xf32>
    %23 = tpu.matmul %20, %22, %cst_11 {dimension_numbers = #tpu.dot_dimension_numbers<[1], [0], [0], [1], [0, 0, 1, 1], [], []>} : vector<1x1xf32>, vector<1x16xf32>, vector<1x16xf32> -> vector<1x16xf32>
    %24 = arith.addf %19, %23 : vector<1x16xf32>
    %25 = vector.extract_strided_slice %3 {offsets = [1, 0], sizes = [1, 1], strides = [1, 1]} : vector<8x1xf32> to vector<1x1xf32>
    %26 = vector.extract_strided_slice %18 {offsets = [1, 0, 0], sizes = [1, 1, 16], strides = [1, 1, 1]} : vector<8x1x16xf32> to vector<1x1x16xf32>
    %27 = vector.shape_cast %26 : vector<1x1x16xf32> to vector<1x16xf32>
    %cst_12 = arith.constant dense<0.000000e+00> : vector<1x16xf32>
    %28 = tpu.matmul %25, %27, %cst_12 {dimension_numbers = #tpu.dot_dimension_numbers<[1], [0], [0], [1], [0, 0, 1, 1], [], []>} : vector<1x1xf32>, vector<1x16xf32>, vector<1x16xf32> -> vector<1x16xf32>
    %29 = arith.addf %24, %28 : vector<1x16xf32>
    %30 = vector.extract_strided_slice %3 {offsets = [2, 0], sizes = [1, 1], strides = [1, 1]} : vector<8x1xf32> to vector<1x1xf32>
    %31 = vector.extract_strided_slice %18 {offsets = [2, 0, 0], sizes = [1, 1, 16], strides = [1, 1, 1]} : vector<8x1x16xf32> to vector<1x1x16xf32>
    %32 = vector.shape_cast %31 : vector<1x1x16xf32> to vector<1x16xf32>
    %cst_13 = arith.constant dense<0.000000e+00> : vector<1x16xf32>
    %33 = tpu.matmul %30, %32, %cst_13 {dimension_numbers = #tpu.dot_dimension_numbers<[1], [0], [0], [1], [0, 0, 1, 1], [], []>} : vector<1x1xf32>, vector<1x16xf32>, vector<1x16xf32> -> vector<1x16xf32>
    %34 = arith.addf %29, %33 : vector<1x16xf32>
    %35 = vector.extract_strided_slice %3 {offsets = [3, 0], sizes = [1, 1], strides = [1, 1]} : vector<8x1xf32> to vector<1x1xf32>
    %36 = vector.extract_strided_slice %18 {offsets = [3, 0, 0], sizes = [1, 1, 16], strides = [1, 1, 1]} : vector<8x1x16xf32> to vector<1x1x16xf32>
    %37 = vector.shape_cast %36 : vector<1x1x16xf32> to vector<1x16xf32>
    %cst_14 = arith.constant dense<0.000000e+00> : vector<1x16xf32>
    %38 = tpu.matmul %35, %37, %cst_14 {dimension_numbers = #tpu.dot_dimension_numbers<[1], [0], [0], [1], [0, 0, 1, 1], [], []>} : vector<1x1xf32>, vector<1x16xf32>, vector<1x16xf32> -> vector<1x16xf32>
    %39 = arith.addf %34, %38 : vector<1x16xf32>
    %40 = vector.extract_strided_slice %3 {offsets = [4, 0], sizes = [1, 1], strides = [1, 1]} : vector<8x1xf32> to vector<1x1xf32>
    %41 = vector.extract_strided_slice %18 {offsets = [4, 0, 0], sizes = [1, 1, 16], strides = [1, 1, 1]} : vector<8x1x16xf32> to vector<1x1x16xf32>
    %42 = vector.shape_cast %41 : vector<1x1x16xf32> to vector<1x16xf32>
    %cst_15 = arith.constant dense<0.000000e+00> : vector<1x16xf32>
    %43 = tpu.matmul %40, %42, %cst_15 {dimension_numbers = #tpu.dot_dimension_numbers<[1], [0], [0], [1], [0, 0, 1, 1], [], []>} : vector<1x1xf32>, vector<1x16xf32>, vector<1x16xf32> -> vector<1x16xf32>
    %44 = arith.addf %39, %43 : vector<1x16xf32>
    %45 = vector.extract_strided_slice %3 {offsets = [5, 0], sizes = [1, 1], strides = [1, 1]} : vector<8x1xf32> to vector<1x1xf32>
    %46 = vector.extract_strided_slice %18 {offsets = [5, 0, 0], sizes = [1, 1, 16], strides = [1, 1, 1]} : vector<8x1x16xf32> to vector<1x1x16xf32>
    %47 = vector.shape_cast %46 : vector<1x1x16xf32> to vector<1x16xf32>
    %cst_16 = arith.constant dense<0.000000e+00> : vector<1x16xf32>
    %48 = tpu.matmul %45, %47, %cst_16 {dimension_numbers = #tpu.dot_dimension_numbers<[1], [0], [0], [1], [0, 0, 1, 1], [], []>} : vector<1x1xf32>, vector<1x16xf32>, vector<1x16xf32> -> vector<1x16xf32>
    %49 = arith.addf %44, %48 : vector<1x16xf32>
    %50 = vector.extract_strided_slice %3 {offsets = [6, 0], sizes = [1, 1], strides = [1, 1]} : vector<8x1xf32> to vector<1x1xf32>
    %51 = vector.extract_strided_slice %18 {offsets = [6, 0, 0], sizes = [1, 1, 16], strides = [1, 1, 1]} : vector<8x1x16xf32> to vector<1x1x16xf32>
    %52 = vector.shape_cast %51 : vector<1x1x16xf32> to vector<1x16xf32>
    %cst_17 = arith.constant dense<0.000000e+00> : vector<1x16xf32>
    %53 = tpu.matmul %50, %52, %cst_17 {dimension_numbers = #tpu.dot_dimension_numbers<[1], [0], [0], [1], [0, 0, 1, 1], [], []>} : vector<1x1xf32>, vector<1x16xf32>, vector<1x16xf32> -> vector<1x16xf32>
    %54 = arith.addf %49, %53 : vector<1x16xf32>
    %55 = vector.extract_strided_slice %3 {offsets = [7, 0], sizes = [1, 1], strides = [1, 1]} : vector<8x1xf32> to vector<1x1xf32>
    %56 = vector.extract_strided_slice %18 {offsets = [7, 0, 0], sizes = [1, 1, 16], strides = [1, 1, 1]} : vector<8x1x16xf32> to vector<1x1x16xf32>
    %57 = vector.shape_cast %56 : vector<1x1x16xf32> to vector<1x16xf32>
    %cst_18 = arith.constant dense<0.000000e+00> : vector<1x16xf32>
    %58 = tpu.matmul %55, %57, %cst_18 {dimension_numbers = #tpu.dot_dimension_numbers<[1], [0], [0], [1], [0, 0, 1, 1], [], []>} : vector<1x1xf32>, vector<1x16xf32>, vector<1x16xf32> -> vector<1x16xf32>
    %59 = arith.addf %54, %58 : vector<1x16xf32>
    %60 = vector.extract_strided_slice %9 {offsets = [0, 1], sizes = [8, 1], strides = [1, 1]} : vector<8x8xf32> to vector<8x1xf32>
    %61 = vector.shape_cast %60 : vector<8x1xf32> to vector<8x1x1xf32>
    %62 = vector.broadcast %61 : vector<8x1x1xf32> to vector<8x1x16xf32>
    %63 = vector.broadcast %5 : vector<1x1x16xf32> to vector<8x1x16xf32>
    %64 = arith.mulf %62, %63 : vector<8x1x16xf32>
    %65 = vector.broadcast %7 : vector<1x1x16xf32> to vector<8x1x16xf32>
    %66 = arith.addf %64, %65 : vector<8x1x16xf32>
    %cst_19 = arith.constant 0.000000e+00 : f32
    %67 = vector.broadcast %cst_19 : f32 to vector<8x1x16xf32>
    %68 = arith.maximumf %66, %67 : vector<8x1x16xf32>
    %cst_20 = arith.constant 0.000000e+00 : f32
    %69 = vector.broadcast %cst_20 : f32 to vector<1x16xf32>
    %70 = vector.extract_strided_slice %3 {offsets = [0, 0], sizes = [1, 1], strides = [1, 1]} : vector<8x1xf32> to vector<1x1xf32>
    %71 = vector.extract_strided_slice %68 {offsets = [0, 0, 0], sizes = [1, 1, 16], strides = [1, 1, 1]} : vector<8x1x16xf32> to vector<1x1x16xf32>
    %72 = vector.shape_cast %71 : vector<1x1x16xf32> to vector<1x16xf32>
    %cst_21 = arith.constant dense<0.000000e+00> : vector<1x16xf32>
    %73 = tpu.matmul %70, %72, %cst_21 {dimension_numbers = #tpu.dot_dimension_numbers<[1], [0], [0], [1], [0, 0, 1, 1], [], []>} : vector<1x1xf32>, vector<1x16xf32>, vector<1x16xf32> -> vector<1x16xf32>
    %74 = arith.addf %69, %73 : vector<1x16xf32>
    %75 = vector.extract_strided_slice %3 {offsets = [1, 0], sizes = [1, 1], strides = [1, 1]} : vector<8x1xf32> to vector<1x1xf32>
    %76 = vector.extract_strided_slice %68 {offsets = [1, 0, 0], sizes = [1, 1, 16], strides = [1, 1, 1]} : vector<8x1x16xf32> to vector<1x1x16xf32>
    %77 = vector.shape_cast %76 : vector<1x1x16xf32> to vector<1x16xf32>
    %cst_22 = arith.constant dense<0.000000e+00> : vector<1x16xf32>
    %78 = tpu.matmul %75, %77, %cst_22 {dimension_numbers = #tpu.dot_dimension_numbers<[1], [0], [0], [1], [0, 0, 1, 1], [], []>} : vector<1x1xf32>, vector<1x16xf32>, vector<1x16xf32> -> vector<1x16xf32>
    %79 = arith.addf %74, %78 : vector<1x16xf32>
    %80 = vector.extract_strided_slice %3 {offsets = [2, 0], sizes = [1, 1], strides = [1, 1]} : vector<8x1xf32> to vector<1x1xf32>
    %81 = vector.extract_strided_slice %68 {offsets = [2, 0, 0], sizes = [1, 1, 16], strides = [1, 1, 1]} : vector<8x1x16xf32> to vector<1x1x16xf32>
    %82 = vector.shape_cast %81 : vector<1x1x16xf32> to vector<1x16xf32>
    %cst_23 = arith.constant dense<0.000000e+00> : vector<1x16xf32>
    %83 = tpu.matmul %80, %82, %cst_23 {dimension_numbers = #tpu.dot_dimension_numbers<[1], [0], [0], [1], [0, 0, 1, 1], [], []>} : vector<1x1xf32>, vector<1x16xf32>, vector<1x16xf32> -> vector<1x16xf32>
    %84 = arith.addf %79, %83 : vector<1x16xf32>
    %85 = vector.extract_strided_slice %3 {offsets = [3, 0], sizes = [1, 1], strides = [1, 1]} : vector<8x1xf32> to vector<1x1xf32>
    %86 = vector.extract_strided_slice %68 {offsets = [3, 0, 0], sizes = [1, 1, 16], strides = [1, 1, 1]} : vector<8x1x16xf32> to vector<1x1x16xf32>
    %87 = vector.shape_cast %86 : vector<1x1x16xf32> to vector<1x16xf32>
    %cst_24 = arith.constant dense<0.000000e+00> : vector<1x16xf32>
    %88 = tpu.matmul %85, %87, %cst_24 {dimension_numbers = #tpu.dot_dimension_numbers<[1], [0], [0], [1], [0, 0, 1, 1], [], []>} : vector<1x1xf32>, vector<1x16xf32>, vector<1x16xf32> -> vector<1x16xf32>
    %89 = arith.addf %84, %88 : vector<1x16xf32>
    %90 = vector.extract_strided_slice %3 {offsets = [4, 0], sizes = [1, 1], strides = [1, 1]} : vector<8x1xf32> to vector<1x1xf32>
    %91 = vector.extract_strided_slice %68 {offsets = [4, 0, 0], sizes = [1, 1, 16], strides = [1, 1, 1]} : vector<8x1x16xf32> to vector<1x1x16xf32>
    %92 = vector.shape_cast %91 : vector<1x1x16xf32> to vector<1x16xf32>
    %cst_25 = arith.constant dense<0.000000e+00> : vector<1x16xf32>
    %93 = tpu.matmul %90, %92, %cst_25 {dimension_numbers = #tpu.dot_dimension_numbers<[1], [0], [0], [1], [0, 0, 1, 1], [], []>} : vector<1x1xf32>, vector<1x16xf32>, vector<1x16xf32> -> vector<1x16xf32>
    %94 = arith.addf %89, %93 : vector<1x16xf32>
    %95 = vector.extract_strided_slice %3 {offsets = [5, 0], sizes = [1, 1], strides = [1, 1]} : vector<8x1xf32> to vector<1x1xf32>
    %96 = vector.extract_strided_slice %68 {offsets = [5, 0, 0], sizes = [1, 1, 16], strides = [1, 1, 1]} : vector<8x1x16xf32> to vector<1x1x16xf32>
    %97 = vector.shape_cast %96 : vector<1x1x16xf32> to vector<1x16xf32>
    %cst_26 = arith.constant dense<0.000000e+00> : vector<1x16xf32>
    %98 = tpu.matmul %95, %97, %cst_26 {dimension_numbers = #tpu.dot_dimension_numbers<[1], [0], [0], [1], [0, 0, 1, 1], [], []>} : vector<1x1xf32>, vector<1x16xf32>, vector<1x16xf32> -> vector<1x16xf32>
    %99 = arith.addf %94, %98 : vector<1x16xf32>
    %100 = vector.extract_strided_slice %3 {offsets = [6, 0], sizes = [1, 1], strides = [1, 1]} : vector<8x1xf32> to vector<1x1xf32>
    %101 = vector.extract_strided_slice %68 {offsets = [6, 0, 0], sizes = [1, 1, 16], strides = [1, 1, 1]} : vector<8x1x16xf32> to vector<1x1x16xf32>
    %102 = vector.shape_cast %101 : vector<1x1x16xf32> to vector<1x16xf32>
    %cst_27 = arith.constant dense<0.000000e+00> : vector<1x16xf32>
    %103 = tpu.matmul %100, %102, %cst_27 {dimension_numbers = #tpu.dot_dimension_numbers<[1], [0], [0], [1], [0, 0, 1, 1], [], []>} : vector<1x1xf32>, vector<1x16xf32>, vector<1x16xf32> -> vector<1x16xf32>
    %104 = arith.addf %99, %103 : vector<1x16xf32>
    %105 = vector.extract_strided_slice %3 {offsets = [7, 0], sizes = [1, 1], strides = [1, 1]} : vector<8x1xf32> to vector<1x1xf32>
    %106 = vector.extract_strided_slice %68 {offsets = [7, 0, 0], sizes = [1, 1, 16], strides = [1, 1, 1]} : vector<8x1x16xf32> to vector<1x1x16xf32>
    %107 = vector.shape_cast %106 : vector<1x1x16xf32> to vector<1x16xf32>
    %cst_28 = arith.constant dense<0.000000e+00> : vector<1x16xf32>
    %108 = tpu.matmul %105, %107, %cst_28 {dimension_numbers = #tpu.dot_dimension_numbers<[1], [0], [0], [1], [0, 0, 1, 1], [], []>} : vector<1x1xf32>, vector<1x16xf32>, vector<1x16xf32> -> vector<1x16xf32>
    %109 = arith.addf %104, %108 : vector<1x16xf32>
    %110 = vector.extract_strided_slice %9 {offsets = [0, 2], sizes = [8, 1], strides = [1, 1]} : vector<8x8xf32> to vector<8x1xf32>
    %111 = vector.shape_cast %110 : vector<8x1xf32> to vector<8x1x1xf32>
    %112 = vector.broadcast %111 : vector<8x1x1xf32> to vector<8x1x16xf32>
    %113 = vector.broadcast %5 : vector<1x1x16xf32> to vector<8x1x16xf32>
    %114 = arith.mulf %112, %113 : vector<8x1x16xf32>
    %115 = vector.broadcast %7 : vector<1x1x16xf32> to vector<8x1x16xf32>
    %116 = arith.addf %114, %115 : vector<8x1x16xf32>
    %cst_29 = arith.constant 0.000000e+00 : f32
    %117 = vector.broadcast %cst_29 : f32 to vector<8x1x16xf32>
    %118 = arith.maximumf %116, %117 : vector<8x1x16xf32>
    %cst_30 = arith.constant 0.000000e+00 : f32
    %119 = vector.broadcast %cst_30 : f32 to vector<1x16xf32>
    %120 = vector.extract_strided_slice %3 {offsets = [0, 0], sizes = [1, 1], strides = [1, 1]} : vector<8x1xf32> to vector<1x1xf32>
    %121 = vector.extract_strided_slice %118 {offsets = [0, 0, 0], sizes = [1, 1, 16], strides = [1, 1, 1]} : vector<8x1x16xf32> to vector<1x1x16xf32>
    %122 = vector.shape_cast %121 : vector<1x1x16xf32> to vector<1x16xf32>
    %cst_31 = arith.constant dense<0.000000e+00> : vector<1x16xf32>
    %123 = tpu.matmul %120, %122, %cst_31 {dimension_numbers = #tpu.dot_dimension_numbers<[1], [0], [0], [1], [0, 0, 1, 1], [], []>} : vector<1x1xf32>, vector<1x16xf32>, vector<1x16xf32> -> vector<1x16xf32>
    %124 = arith.addf %119, %123 : vector<1x16xf32>
    %125 = vector.extract_strided_slice %3 {offsets = [1, 0], sizes = [1, 1], strides = [1, 1]} : vector<8x1xf32> to vector<1x1xf32>
    %126 = vector.extract_strided_slice %118 {offsets = [1, 0, 0], sizes = [1, 1, 16], strides = [1, 1, 1]} : vector<8x1x16xf32> to vector<1x1x16xf32>
    %127 = vector.shape_cast %126 : vector<1x1x16xf32> to vector<1x16xf32>
    %cst_32 = arith.constant dense<0.000000e+00> : vector<1x16xf32>
    %128 = tpu.matmul %125, %127, %cst_32 {dimension_numbers = #tpu.dot_dimension_numbers<[1], [0], [0], [1], [0, 0, 1, 1], [], []>} : vector<1x1xf32>, vector<1x16xf32>, vector<1x16xf32> -> vector<1x16xf32>
    %129 = arith.addf %124, %128 : vector<1x16xf32>
    %130 = vector.extract_strided_slice %3 {offsets = [2, 0], sizes = [1, 1], strides = [1, 1]} : vector<8x1xf32> to vector<1x1xf32>
    %131 = vector.extract_strided_slice %118 {offsets = [2, 0, 0], sizes = [1, 1, 16], strides = [1, 1, 1]} : vector<8x1x16xf32> to vector<1x1x16xf32>
    %132 = vector.shape_cast %131 : vector<1x1x16xf32> to vector<1x16xf32>
    %cst_33 = arith.constant dense<0.000000e+00> : vector<1x16xf32>
    %133 = tpu.matmul %130, %132, %cst_33 {dimension_numbers = #tpu.dot_dimension_numbers<[1], [0], [0], [1], [0, 0, 1, 1], [], []>} : vector<1x1xf32>, vector<1x16xf32>, vector<1x16xf32> -> vector<1x16xf32>
    %134 = arith.addf %129, %133 : vector<1x16xf32>
    %135 = vector.extract_strided_slice %3 {offsets = [3, 0], sizes = [1, 1], strides = [1, 1]} : vector<8x1xf32> to vector<1x1xf32>
    %136 = vector.extract_strided_slice %118 {offsets = [3, 0, 0], sizes = [1, 1, 16], strides = [1, 1, 1]} : vector<8x1x16xf32> to vector<1x1x16xf32>
    %137 = vector.shape_cast %136 : vector<1x1x16xf32> to vector<1x16xf32>
    %cst_34 = arith.constant dense<0.000000e+00> : vector<1x16xf32>
    %138 = tpu.matmul %135, %137, %cst_34 {dimension_numbers = #tpu.dot_dimension_numbers<[1], [0], [0], [1], [0, 0, 1, 1], [], []>} : vector<1x1xf32>, vector<1x16xf32>, vector<1x16xf32> -> vector<1x16xf32>
    %139 = arith.addf %134, %138 : vector<1x16xf32>
    %140 = vector.extract_strided_slice %3 {offsets = [4, 0], sizes = [1, 1], strides = [1, 1]} : vector<8x1xf32> to vector<1x1xf32>
    %141 = vector.extract_strided_slice %118 {offsets = [4, 0, 0], sizes = [1, 1, 16], strides = [1, 1, 1]} : vector<8x1x16xf32> to vector<1x1x16xf32>
    %142 = vector.shape_cast %141 : vector<1x1x16xf32> to vector<1x16xf32>
    %cst_35 = arith.constant dense<0.000000e+00> : vector<1x16xf32>
    %143 = tpu.matmul %140, %142, %cst_35 {dimension_numbers = #tpu.dot_dimension_numbers<[1], [0], [0], [1], [0, 0, 1, 1], [], []>} : vector<1x1xf32>, vector<1x16xf32>, vector<1x16xf32> -> vector<1x16xf32>
    %144 = arith.addf %139, %143 : vector<1x16xf32>
    %145 = vector.extract_strided_slice %3 {offsets = [5, 0], sizes = [1, 1], strides = [1, 1]} : vector<8x1xf32> to vector<1x1xf32>
    %146 = vector.extract_strided_slice %118 {offsets = [5, 0, 0], sizes = [1, 1, 16], strides = [1, 1, 1]} : vector<8x1x16xf32> to vector<1x1x16xf32>
    %147 = vector.shape_cast %146 : vector<1x1x16xf32> to vector<1x16xf32>
    %cst_36 = arith.constant dense<0.000000e+00> : vector<1x16xf32>
    %148 = tpu.matmul %145, %147, %cst_36 {dimension_numbers = #tpu.dot_dimension_numbers<[1], [0], [0], [1], [0, 0, 1, 1], [], []>} : vector<1x1xf32>, vector<1x16xf32>, vector<1x16xf32> -> vector<1x16xf32>
    %149 = arith.addf %144, %148 : vector<1x16xf32>
    %150 = vector.extract_strided_slice %3 {offsets = [6, 0], sizes = [1, 1], strides = [1, 1]} : vector<8x1xf32> to vector<1x1xf32>
    %151 = vector.extract_strided_slice %118 {offsets = [6, 0, 0], sizes = [1, 1, 16], strides = [1, 1, 1]} : vector<8x1x16xf32> to vector<1x1x16xf32>
    %152 = vector.shape_cast %151 : vector<1x1x16xf32> to vector<1x16xf32>
    %cst_37 = arith.constant dense<0.000000e+00> : vector<1x16xf32>
    %153 = tpu.matmul %150, %152, %cst_37 {dimension_numbers = #tpu.dot_dimension_numbers<[1], [0], [0], [1], [0, 0, 1, 1], [], []>} : vector<1x1xf32>, vector<1x16xf32>, vector<1x16xf32> -> vector<1x16xf32>
    %154 = arith.addf %149, %153 : vector<1x16xf32>
    %155 = vector.extract_strided_slice %3 {offsets = [7, 0], sizes = [1, 1], strides = [1, 1]} : vector<8x1xf32> to vector<1x1xf32>
    %156 = vector.extract_strided_slice %118 {offsets = [7, 0, 0], sizes = [1, 1, 16], strides = [1, 1, 1]} : vector<8x1x16xf32> to vector<1x1x16xf32>
    %157 = vector.shape_cast %156 : vector<1x1x16xf32> to vector<1x16xf32>
    %cst_38 = arith.constant dense<0.000000e+00> : vector<1x16xf32>
    %158 = tpu.matmul %155, %157, %cst_38 {dimension_numbers = #tpu.dot_dimension_numbers<[1], [0], [0], [1], [0, 0, 1, 1], [], []>} : vector<1x1xf32>, vector<1x16xf32>, vector<1x16xf32> -> vector<1x16xf32>
    %159 = arith.addf %154, %158 : vector<1x16xf32>
    %160 = vector.extract_strided_slice %9 {offsets = [0, 3], sizes = [8, 1], strides = [1, 1]} : vector<8x8xf32> to vector<8x1xf32>
    %161 = vector.shape_cast %160 : vector<8x1xf32> to vector<8x1x1xf32>
    %162 = vector.broadcast %161 : vector<8x1x1xf32> to vector<8x1x16xf32>
    %163 = vector.broadcast %5 : vector<1x1x16xf32> to vector<8x1x16xf32>
    %164 = arith.mulf %162, %163 : vector<8x1x16xf32>
    %165 = vector.broadcast %7 : vector<1x1x16xf32> to vector<8x1x16xf32>
    %166 = arith.addf %164, %165 : vector<8x1x16xf32>
    %cst_39 = arith.constant 0.000000e+00 : f32
    %167 = vector.broadcast %cst_39 : f32 to vector<8x1x16xf32>
    %168 = arith.maximumf %166, %167 : vector<8x1x16xf32>
    %cst_40 = arith.constant 0.000000e+00 : f32
    %169 = vector.broadcast %cst_40 : f32 to vector<1x16xf32>
    %170 = vector.extract_strided_slice %3 {offsets = [0, 0], sizes = [1, 1], strides = [1, 1]} : vector<8x1xf32> to vector<1x1xf32>
    %171 = vector.extract_strided_slice %168 {offsets = [0, 0, 0], sizes = [1, 1, 16], strides = [1, 1, 1]} : vector<8x1x16xf32> to vector<1x1x16xf32>
    %172 = vector.shape_cast %171 : vector<1x1x16xf32> to vector<1x16xf32>
    %cst_41 = arith.constant dense<0.000000e+00> : vector<1x16xf32>
    %173 = tpu.matmul %170, %172, %cst_41 {dimension_numbers = #tpu.dot_dimension_numbers<[1], [0], [0], [1], [0, 0, 1, 1], [], []>} : vector<1x1xf32>, vector<1x16xf32>, vector<1x16xf32> -> vector<1x16xf32>
    %174 = arith.addf %169, %173 : vector<1x16xf32>
    %175 = vector.extract_strided_slice %3 {offsets = [1, 0], sizes = [1, 1], strides = [1, 1]} : vector<8x1xf32> to vector<1x1xf32>
    %176 = vector.extract_strided_slice %168 {offsets = [1, 0, 0], sizes = [1, 1, 16], strides = [1, 1, 1]} : vector<8x1x16xf32> to vector<1x1x16xf32>
    %177 = vector.shape_cast %176 : vector<1x1x16xf32> to vector<1x16xf32>
    %cst_42 = arith.constant dense<0.000000e+00> : vector<1x16xf32>
    %178 = tpu.matmul %175, %177, %cst_42 {dimension_numbers = #tpu.dot_dimension_numbers<[1], [0], [0], [1], [0, 0, 1, 1], [], []>} : vector<1x1xf32>, vector<1x16xf32>, vector<1x16xf32> -> vector<1x16xf32>
    %179 = arith.addf %174, %178 : vector<1x16xf32>
    %180 = vector.extract_strided_slice %3 {offsets = [2, 0], sizes = [1, 1], strides = [1, 1]} : vector<8x1xf32> to vector<1x1xf32>
    %181 = vector.extract_strided_slice %168 {offsets = [2, 0, 0], sizes = [1, 1, 16], strides = [1, 1, 1]} : vector<8x1x16xf32> to vector<1x1x16xf32>
    %182 = vector.shape_cast %181 : vector<1x1x16xf32> to vector<1x16xf32>
    %cst_43 = arith.constant dense<0.000000e+00> : vector<1x16xf32>
    %183 = tpu.matmul %180, %182, %cst_43 {dimension_numbers = #tpu.dot_dimension_numbers<[1], [0], [0], [1], [0, 0, 1, 1], [], []>} : vector<1x1xf32>, vector<1x16xf32>, vector<1x16xf32> -> vector<1x16xf32>
    %184 = arith.addf %179, %183 : vector<1x16xf32>
    %185 = vector.extract_strided_slice %3 {offsets = [3, 0], sizes = [1, 1], strides = [1, 1]} : vector<8x1xf32> to vector<1x1xf32>
    %186 = vector.extract_strided_slice %168 {offsets = [3, 0, 0], sizes = [1, 1, 16], strides = [1, 1, 1]} : vector<8x1x16xf32> to vector<1x1x16xf32>
    %187 = vector.shape_cast %186 : vector<1x1x16xf32> to vector<1x16xf32>
    %cst_44 = arith.constant dense<0.000000e+00> : vector<1x16xf32>
    %188 = tpu.matmul %185, %187, %cst_44 {dimension_numbers = #tpu.dot_dimension_numbers<[1], [0], [0], [1], [0, 0, 1, 1], [], []>} : vector<1x1xf32>, vector<1x16xf32>, vector<1x16xf32> -> vector<1x16xf32>
    %189 = arith.addf %184, %188 : vector<1x16xf32>
    %190 = vector.extract_strided_slice %3 {offsets = [4, 0], sizes = [1, 1], strides = [1, 1]} : vector<8x1xf32> to vector<1x1xf32>
    %191 = vector.extract_strided_slice %168 {offsets = [4, 0, 0], sizes = [1, 1, 16], strides = [1, 1, 1]} : vector<8x1x16xf32> to vector<1x1x16xf32>
    %192 = vector.shape_cast %191 : vector<1x1x16xf32> to vector<1x16xf32>
    %cst_45 = arith.constant dense<0.000000e+00> : vector<1x16xf32>
    %193 = tpu.matmul %190, %192, %cst_45 {dimension_numbers = #tpu.dot_dimension_numbers<[1], [0], [0], [1], [0, 0, 1, 1], [], []>} : vector<1x1xf32>, vector<1x16xf32>, vector<1x16xf32> -> vector<1x16xf32>
    %194 = arith.addf %189, %193 : vector<1x16xf32>
    %195 = vector.extract_strided_slice %3 {offsets = [5, 0], sizes = [1, 1], strides = [1, 1]} : vector<8x1xf32> to vector<1x1xf32>
    %196 = vector.extract_strided_slice %168 {offsets = [5, 0, 0], sizes = [1, 1, 16], strides = [1, 1, 1]} : vector<8x1x16xf32> to vector<1x1x16xf32>
    %197 = vector.shape_cast %196 : vector<1x1x16xf32> to vector<1x16xf32>
    %cst_46 = arith.constant dense<0.000000e+00> : vector<1x16xf32>
    %198 = tpu.matmul %195, %197, %cst_46 {dimension_numbers = #tpu.dot_dimension_numbers<[1], [0], [0], [1], [0, 0, 1, 1], [], []>} : vector<1x1xf32>, vector<1x16xf32>, vector<1x16xf32> -> vector<1x16xf32>
    %199 = arith.addf %194, %198 : vector<1x16xf32>
    %200 = vector.extract_strided_slice %3 {offsets = [6, 0], sizes = [1, 1], strides = [1, 1]} : vector<8x1xf32> to vector<1x1xf32>
    %201 = vector.extract_strided_slice %168 {offsets = [6, 0, 0], sizes = [1, 1, 16], strides = [1, 1, 1]} : vector<8x1x16xf32> to vector<1x1x16xf32>
    %202 = vector.shape_cast %201 : vector<1x1x16xf32> to vector<1x16xf32>
    %cst_47 = arith.constant dense<0.000000e+00> : vector<1x16xf32>
    %203 = tpu.matmul %200, %202, %cst_47 {dimension_numbers = #tpu.dot_dimension_numbers<[1], [0], [0], [1], [0, 0, 1, 1], [], []>} : vector<1x1xf32>, vector<1x16xf32>, vector<1x16xf32> -> vector<1x16xf32>
    %204 = arith.addf %199, %203 : vector<1x16xf32>
    %205 = vector.extract_strided_slice %3 {offsets = [7, 0], sizes = [1, 1], strides = [1, 1]} : vector<8x1xf32> to vector<1x1xf32>
    %206 = vector.extract_strided_slice %168 {offsets = [7, 0, 0], sizes = [1, 1, 16], strides = [1, 1, 1]} : vector<8x1x16xf32> to vector<1x1x16xf32>
    %207 = vector.shape_cast %206 : vector<1x1x16xf32> to vector<1x16xf32>
    %cst_48 = arith.constant dense<0.000000e+00> : vector<1x16xf32>
    %208 = tpu.matmul %205, %207, %cst_48 {dimension_numbers = #tpu.dot_dimension_numbers<[1], [0], [0], [1], [0, 0, 1, 1], [], []>} : vector<1x1xf32>, vector<1x16xf32>, vector<1x16xf32> -> vector<1x16xf32>
    %209 = arith.addf %204, %208 : vector<1x16xf32>
    %210 = vector.extract_strided_slice %9 {offsets = [0, 4], sizes = [8, 1], strides = [1, 1]} : vector<8x8xf32> to vector<8x1xf32>
    %211 = vector.shape_cast %210 : vector<8x1xf32> to vector<8x1x1xf32>
    %212 = vector.broadcast %211 : vector<8x1x1xf32> to vector<8x1x16xf32>
    %213 = vector.broadcast %5 : vector<1x1x16xf32> to vector<8x1x16xf32>
    %214 = arith.mulf %212, %213 : vector<8x1x16xf32>
    %215 = vector.broadcast %7 : vector<1x1x16xf32> to vector<8x1x16xf32>
    %216 = arith.addf %214, %215 : vector<8x1x16xf32>
    %cst_49 = arith.constant 0.000000e+00 : f32
    %217 = vector.broadcast %cst_49 : f32 to vector<8x1x16xf32>
    %218 = arith.maximumf %216, %217 : vector<8x1x16xf32>
    %cst_50 = arith.constant 0.000000e+00 : f32
    %219 = vector.broadcast %cst_50 : f32 to vector<1x16xf32>
    %220 = vector.extract_strided_slice %3 {offsets = [0, 0], sizes = [1, 1], strides = [1, 1]} : vector<8x1xf32> to vector<1x1xf32>
    %221 = vector.extract_strided_slice %218 {offsets = [0, 0, 0], sizes = [1, 1, 16], strides = [1, 1, 1]} : vector<8x1x16xf32> to vector<1x1x16xf32>
    %222 = vector.shape_cast %221 : vector<1x1x16xf32> to vector<1x16xf32>
    %cst_51 = arith.constant dense<0.000000e+00> : vector<1x16xf32>
    %223 = tpu.matmul %220, %222, %cst_51 {dimension_numbers = #tpu.dot_dimension_numbers<[1], [0], [0], [1], [0, 0, 1, 1], [], []>} : vector<1x1xf32>, vector<1x16xf32>, vector<1x16xf32> -> vector<1x16xf32>
    %224 = arith.addf %219, %223 : vector<1x16xf32>
    %225 = vector.extract_strided_slice %3 {offsets = [1, 0], sizes = [1, 1], strides = [1, 1]} : vector<8x1xf32> to vector<1x1xf32>
    %226 = vector.extract_strided_slice %218 {offsets = [1, 0, 0], sizes = [1, 1, 16], strides = [1, 1, 1]} : vector<8x1x16xf32> to vector<1x1x16xf32>
    %227 = vector.shape_cast %226 : vector<1x1x16xf32> to vector<1x16xf32>
    %cst_52 = arith.constant dense<0.000000e+00> : vector<1x16xf32>
    %228 = tpu.matmul %225, %227, %cst_52 {dimension_numbers = #tpu.dot_dimension_numbers<[1], [0], [0], [1], [0, 0, 1, 1], [], []>} : vector<1x1xf32>, vector<1x16xf32>, vector<1x16xf32> -> vector<1x16xf32>
    %229 = arith.addf %224, %228 : vector<1x16xf32>
    %230 = vector.extract_strided_slice %3 {offsets = [2, 0], sizes = [1, 1], strides = [1, 1]} : vector<8x1xf32> to vector<1x1xf32>
    %231 = vector.extract_strided_slice %218 {offsets = [2, 0, 0], sizes = [1, 1, 16], strides = [1, 1, 1]} : vector<8x1x16xf32> to vector<1x1x16xf32>
    %232 = vector.shape_cast %231 : vector<1x1x16xf32> to vector<1x16xf32>
    %cst_53 = arith.constant dense<0.000000e+00> : vector<1x16xf32>
    %233 = tpu.matmul %230, %232, %cst_53 {dimension_numbers = #tpu.dot_dimension_numbers<[1], [0], [0], [1], [0, 0, 1, 1], [], []>} : vector<1x1xf32>, vector<1x16xf32>, vector<1x16xf32> -> vector<1x16xf32>
    %234 = arith.addf %229, %233 : vector<1x16xf32>
    %235 = vector.extract_strided_slice %3 {offsets = [3, 0], sizes = [1, 1], strides = [1, 1]} : vector<8x1xf32> to vector<1x1xf32>
    %236 = vector.extract_strided_slice %218 {offsets = [3, 0, 0], sizes = [1, 1, 16], strides = [1, 1, 1]} : vector<8x1x16xf32> to vector<1x1x16xf32>
    %237 = vector.shape_cast %236 : vector<1x1x16xf32> to vector<1x16xf32>
    %cst_54 = arith.constant dense<0.000000e+00> : vector<1x16xf32>
    %238 = tpu.matmul %235, %237, %cst_54 {dimension_numbers = #tpu.dot_dimension_numbers<[1], [0], [0], [1], [0, 0, 1, 1], [], []>} : vector<1x1xf32>, vector<1x16xf32>, vector<1x16xf32> -> vector<1x16xf32>
    %239 = arith.addf %234, %238 : vector<1x16xf32>
    %240 = vector.extract_strided_slice %3 {offsets = [4, 0], sizes = [1, 1], strides = [1, 1]} : vector<8x1xf32> to vector<1x1xf32>
    %241 = vector.extract_strided_slice %218 {offsets = [4, 0, 0], sizes = [1, 1, 16], strides = [1, 1, 1]} : vector<8x1x16xf32> to vector<1x1x16xf32>
    %242 = vector.shape_cast %241 : vector<1x1x16xf32> to vector<1x16xf32>
    %cst_55 = arith.constant dense<0.000000e+00> : vector<1x16xf32>
    %243 = tpu.matmul %240, %242, %cst_55 {dimension_numbers = #tpu.dot_dimension_numbers<[1], [0], [0], [1], [0, 0, 1, 1], [], []>} : vector<1x1xf32>, vector<1x16xf32>, vector<1x16xf32> -> vector<1x16xf32>
    %244 = arith.addf %239, %243 : vector<1x16xf32>
    %245 = vector.extract_strided_slice %3 {offsets = [5, 0], sizes = [1, 1], strides = [1, 1]} : vector<8x1xf32> to vector<1x1xf32>
    %246 = vector.extract_strided_slice %218 {offsets = [5, 0, 0], sizes = [1, 1, 16], strides = [1, 1, 1]} : vector<8x1x16xf32> to vector<1x1x16xf32>
    %247 = vector.shape_cast %246 : vector<1x1x16xf32> to vector<1x16xf32>
    %cst_56 = arith.constant dense<0.000000e+00> : vector<1x16xf32>
    %248 = tpu.matmul %245, %247, %cst_56 {dimension_numbers = #tpu.dot_dimension_numbers<[1], [0], [0], [1], [0, 0, 1, 1], [], []>} : vector<1x1xf32>, vector<1x16xf32>, vector<1x16xf32> -> vector<1x16xf32>
    %249 = arith.addf %244, %248 : vector<1x16xf32>
    %250 = vector.extract_strided_slice %3 {offsets = [6, 0], sizes = [1, 1], strides = [1, 1]} : vector<8x1xf32> to vector<1x1xf32>
    %251 = vector.extract_strided_slice %218 {offsets = [6, 0, 0], sizes = [1, 1, 16], strides = [1, 1, 1]} : vector<8x1x16xf32> to vector<1x1x16xf32>
    %252 = vector.shape_cast %251 : vector<1x1x16xf32> to vector<1x16xf32>
    %cst_57 = arith.constant dense<0.000000e+00> : vector<1x16xf32>
    %253 = tpu.matmul %250, %252, %cst_57 {dimension_numbers = #tpu.dot_dimension_numbers<[1], [0], [0], [1], [0, 0, 1, 1], [], []>} : vector<1x1xf32>, vector<1x16xf32>, vector<1x16xf32> -> vector<1x16xf32>
    %254 = arith.addf %249, %253 : vector<1x16xf32>
    %255 = vector.extract_strided_slice %3 {offsets = [7, 0], sizes = [1, 1], strides = [1, 1]} : vector<8x1xf32> to vector<1x1xf32>
    %256 = vector.extract_strided_slice %218 {offsets = [7, 0, 0], sizes = [1, 1, 16], strides = [1, 1, 1]} : vector<8x1x16xf32> to vector<1x1x16xf32>
    %257 = vector.shape_cast %256 : vector<1x1x16xf32> to vector<1x16xf32>
    %cst_58 = arith.constant dense<0.000000e+00> : vector<1x16xf32>
    %258 = tpu.matmul %255, %257, %cst_58 {dimension_numbers = #tpu.dot_dimension_numbers<[1], [0], [0], [1], [0, 0, 1, 1], [], []>} : vector<1x1xf32>, vector<1x16xf32>, vector<1x16xf32> -> vector<1x16xf32>
    %259 = arith.addf %254, %258 : vector<1x16xf32>
    %260 = vector.extract_strided_slice %9 {offsets = [0, 5], sizes = [8, 1], strides = [1, 1]} : vector<8x8xf32> to vector<8x1xf32>
    %261 = vector.shape_cast %260 : vector<8x1xf32> to vector<8x1x1xf32>
    %262 = vector.broadcast %261 : vector<8x1x1xf32> to vector<8x1x16xf32>
    %263 = vector.broadcast %5 : vector<1x1x16xf32> to vector<8x1x16xf32>
    %264 = arith.mulf %262, %263 : vector<8x1x16xf32>
    %265 = vector.broadcast %7 : vector<1x1x16xf32> to vector<8x1x16xf32>
    %266 = arith.addf %264, %265 : vector<8x1x16xf32>
    %cst_59 = arith.constant 0.000000e+00 : f32
    %267 = vector.broadcast %cst_59 : f32 to vector<8x1x16xf32>
    %268 = arith.maximumf %266, %267 : vector<8x1x16xf32>
    %cst_60 = arith.constant 0.000000e+00 : f32
    %269 = vector.broadcast %cst_60 : f32 to vector<1x16xf32>
    %270 = vector.extract_strided_slice %3 {offsets = [0, 0], sizes = [1, 1], strides = [1, 1]} : vector<8x1xf32> to vector<1x1xf32>
    %271 = vector.extract_strided_slice %268 {offsets = [0, 0, 0], sizes = [1, 1, 16], strides = [1, 1, 1]} : vector<8x1x16xf32> to vector<1x1x16xf32>
    %272 = vector.shape_cast %271 : vector<1x1x16xf32> to vector<1x16xf32>
    %cst_61 = arith.constant dense<0.000000e+00> : vector<1x16xf32>
    %273 = tpu.matmul %270, %272, %cst_61 {dimension_numbers = #tpu.dot_dimension_numbers<[1], [0], [0], [1], [0, 0, 1, 1], [], []>} : vector<1x1xf32>, vector<1x16xf32>, vector<1x16xf32> -> vector<1x16xf32>
    %274 = arith.addf %269, %273 : vector<1x16xf32>
    %275 = vector.extract_strided_slice %3 {offsets = [1, 0], sizes = [1, 1], strides = [1, 1]} : vector<8x1xf32> to vector<1x1xf32>
    %276 = vector.extract_strided_slice %268 {offsets = [1, 0, 0], sizes = [1, 1, 16], strides = [1, 1, 1]} : vector<8x1x16xf32> to vector<1x1x16xf32>
    %277 = vector.shape_cast %276 : vector<1x1x16xf32> to vector<1x16xf32>
    %cst_62 = arith.constant dense<0.000000e+00> : vector<1x16xf32>
    %278 = tpu.matmul %275, %277, %cst_62 {dimension_numbers = #tpu.dot_dimension_numbers<[1], [0], [0], [1], [0, 0, 1, 1], [], []>} : vector<1x1xf32>, vector<1x16xf32>, vector<1x16xf32> -> vector<1x16xf32>
    %279 = arith.addf %274, %278 : vector<1x16xf32>
    %280 = vector.extract_strided_slice %3 {offsets = [2, 0], sizes = [1, 1], strides = [1, 1]} : vector<8x1xf32> to vector<1x1xf32>
    %281 = vector.extract_strided_slice %268 {offsets = [2, 0, 0], sizes = [1, 1, 16], strides = [1, 1, 1]} : vector<8x1x16xf32> to vector<1x1x16xf32>
    %282 = vector.shape_cast %281 : vector<1x1x16xf32> to vector<1x16xf32>
    %cst_63 = arith.constant dense<0.000000e+00> : vector<1x16xf32>
    %283 = tpu.matmul %280, %282, %cst_63 {dimension_numbers = #tpu.dot_dimension_numbers<[1], [0], [0], [1], [0, 0, 1, 1], [], []>} : vector<1x1xf32>, vector<1x16xf32>, vector<1x16xf32> -> vector<1x16xf32>
    %284 = arith.addf %279, %283 : vector<1x16xf32>
    %285 = vector.extract_strided_slice %3 {offsets = [3, 0], sizes = [1, 1], strides = [1, 1]} : vector<8x1xf32> to vector<1x1xf32>
    %286 = vector.extract_strided_slice %268 {offsets = [3, 0, 0], sizes = [1, 1, 16], strides = [1, 1, 1]} : vector<8x1x16xf32> to vector<1x1x16xf32>
    %287 = vector.shape_cast %286 : vector<1x1x16xf32> to vector<1x16xf32>
    %cst_64 = arith.constant dense<0.000000e+00> : vector<1x16xf32>
    %288 = tpu.matmul %285, %287, %cst_64 {dimension_numbers = #tpu.dot_dimension_numbers<[1], [0], [0], [1], [0, 0, 1, 1], [], []>} : vector<1x1xf32>, vector<1x16xf32>, vector<1x16xf32> -> vector<1x16xf32>
    %289 = arith.addf %284, %288 : vector<1x16xf32>
    %290 = vector.extract_strided_slice %3 {offsets = [4, 0], sizes = [1, 1], strides = [1, 1]} : vector<8x1xf32> to vector<1x1xf32>
    %291 = vector.extract_strided_slice %268 {offsets = [4, 0, 0], sizes = [1, 1, 16], strides = [1, 1, 1]} : vector<8x1x16xf32> to vector<1x1x16xf32>
    %292 = vector.shape_cast %291 : vector<1x1x16xf32> to vector<1x16xf32>
    %cst_65 = arith.constant dense<0.000000e+00> : vector<1x16xf32>
    %293 = tpu.matmul %290, %292, %cst_65 {dimension_numbers = #tpu.dot_dimension_numbers<[1], [0], [0], [1], [0, 0, 1, 1], [], []>} : vector<1x1xf32>, vector<1x16xf32>, vector<1x16xf32> -> vector<1x16xf32>
    %294 = arith.addf %289, %293 : vector<1x16xf32>
    %295 = vector.extract_strided_slice %3 {offsets = [5, 0], sizes = [1, 1], strides = [1, 1]} : vector<8x1xf32> to vector<1x1xf32>
    %296 = vector.extract_strided_slice %268 {offsets = [5, 0, 0], sizes = [1, 1, 16], strides = [1, 1, 1]} : vector<8x1x16xf32> to vector<1x1x16xf32>
    %297 = vector.shape_cast %296 : vector<1x1x16xf32> to vector<1x16xf32>
    %cst_66 = arith.constant dense<0.000000e+00> : vector<1x16xf32>
    %298 = tpu.matmul %295, %297, %cst_66 {dimension_numbers = #tpu.dot_dimension_numbers<[1], [0], [0], [1], [0, 0, 1, 1], [], []>} : vector<1x1xf32>, vector<1x16xf32>, vector<1x16xf32> -> vector<1x16xf32>
    %299 = arith.addf %294, %298 : vector<1x16xf32>
    %300 = vector.extract_strided_slice %3 {offsets = [6, 0], sizes = [1, 1], strides = [1, 1]} : vector<8x1xf32> to vector<1x1xf32>
    %301 = vector.extract_strided_slice %268 {offsets = [6, 0, 0], sizes = [1, 1, 16], strides = [1, 1, 1]} : vector<8x1x16xf32> to vector<1x1x16xf32>
    %302 = vector.shape_cast %301 : vector<1x1x16xf32> to vector<1x16xf32>
    %cst_67 = arith.constant dense<0.000000e+00> : vector<1x16xf32>
    %303 = tpu.matmul %300, %302, %cst_67 {dimension_numbers = #tpu.dot_dimension_numbers<[1], [0], [0], [1], [0, 0, 1, 1], [], []>} : vector<1x1xf32>, vector<1x16xf32>, vector<1x16xf32> -> vector<1x16xf32>
    %304 = arith.addf %299, %303 : vector<1x16xf32>
    %305 = vector.extract_strided_slice %3 {offsets = [7, 0], sizes = [1, 1], strides = [1, 1]} : vector<8x1xf32> to vector<1x1xf32>
    %306 = vector.extract_strided_slice %268 {offsets = [7, 0, 0], sizes = [1, 1, 16], strides = [1, 1, 1]} : vector<8x1x16xf32> to vector<1x1x16xf32>
    %307 = vector.shape_cast %306 : vector<1x1x16xf32> to vector<1x16xf32>
    %cst_68 = arith.constant dense<0.000000e+00> : vector<1x16xf32>
    %308 = tpu.matmul %305, %307, %cst_68 {dimension_numbers = #tpu.dot_dimension_numbers<[1], [0], [0], [1], [0, 0, 1, 1], [], []>} : vector<1x1xf32>, vector<1x16xf32>, vector<1x16xf32> -> vector<1x16xf32>
    %309 = arith.addf %304, %308 : vector<1x16xf32>
    %310 = vector.extract_strided_slice %9 {offsets = [0, 6], sizes = [8, 1], strides = [1, 1]} : vector<8x8xf32> to vector<8x1xf32>
    %311 = vector.shape_cast %310 : vector<8x1xf32> to vector<8x1x1xf32>
    %312 = vector.broadcast %311 : vector<8x1x1xf32> to vector<8x1x16xf32>
    %313 = vector.broadcast %5 : vector<1x1x16xf32> to vector<8x1x16xf32>
    %314 = arith.mulf %312, %313 : vector<8x1x16xf32>
    %315 = vector.broadcast %7 : vector<1x1x16xf32> to vector<8x1x16xf32>
    %316 = arith.addf %314, %315 : vector<8x1x16xf32>
    %cst_69 = arith.constant 0.000000e+00 : f32
    %317 = vector.broadcast %cst_69 : f32 to vector<8x1x16xf32>
    %318 = arith.maximumf %316, %317 : vector<8x1x16xf32>
    %cst_70 = arith.constant 0.000000e+00 : f32
    %319 = vector.broadcast %cst_70 : f32 to vector<1x16xf32>
    %320 = vector.extract_strided_slice %3 {offsets = [0, 0], sizes = [1, 1], strides = [1, 1]} : vector<8x1xf32> to vector<1x1xf32>
    %321 = vector.extract_strided_slice %318 {offsets = [0, 0, 0], sizes = [1, 1, 16], strides = [1, 1, 1]} : vector<8x1x16xf32> to vector<1x1x16xf32>
    %322 = vector.shape_cast %321 : vector<1x1x16xf32> to vector<1x16xf32>
    %cst_71 = arith.constant dense<0.000000e+00> : vector<1x16xf32>
    %323 = tpu.matmul %320, %322, %cst_71 {dimension_numbers = #tpu.dot_dimension_numbers<[1], [0], [0], [1], [0, 0, 1, 1], [], []>} : vector<1x1xf32>, vector<1x16xf32>, vector<1x16xf32> -> vector<1x16xf32>
    %324 = arith.addf %319, %323 : vector<1x16xf32>
    %325 = vector.extract_strided_slice %3 {offsets = [1, 0], sizes = [1, 1], strides = [1, 1]} : vector<8x1xf32> to vector<1x1xf32>
    %326 = vector.extract_strided_slice %318 {offsets = [1, 0, 0], sizes = [1, 1, 16], strides = [1, 1, 1]} : vector<8x1x16xf32> to vector<1x1x16xf32>
    %327 = vector.shape_cast %326 : vector<1x1x16xf32> to vector<1x16xf32>
    %cst_72 = arith.constant dense<0.000000e+00> : vector<1x16xf32>
    %328 = tpu.matmul %325, %327, %cst_72 {dimension_numbers = #tpu.dot_dimension_numbers<[1], [0], [0], [1], [0, 0, 1, 1], [], []>} : vector<1x1xf32>, vector<1x16xf32>, vector<1x16xf32> -> vector<1x16xf32>
    %329 = arith.addf %324, %328 : vector<1x16xf32>
    %330 = vector.extract_strided_slice %3 {offsets = [2, 0], sizes = [1, 1], strides = [1, 1]} : vector<8x1xf32> to vector<1x1xf32>
    %331 = vector.extract_strided_slice %318 {offsets = [2, 0, 0], sizes = [1, 1, 16], strides = [1, 1, 1]} : vector<8x1x16xf32> to vector<1x1x16xf32>
    %332 = vector.shape_cast %331 : vector<1x1x16xf32> to vector<1x16xf32>
    %cst_73 = arith.constant dense<0.000000e+00> : vector<1x16xf32>
    %333 = tpu.matmul %330, %332, %cst_73 {dimension_numbers = #tpu.dot_dimension_numbers<[1], [0], [0], [1], [0, 0, 1, 1], [], []>} : vector<1x1xf32>, vector<1x16xf32>, vector<1x16xf32> -> vector<1x16xf32>
    %334 = arith.addf %329, %333 : vector<1x16xf32>
    %335 = vector.extract_strided_slice %3 {offsets = [3, 0], sizes = [1, 1], strides = [1, 1]} : vector<8x1xf32> to vector<1x1xf32>
    %336 = vector.extract_strided_slice %318 {offsets = [3, 0, 0], sizes = [1, 1, 16], strides = [1, 1, 1]} : vector<8x1x16xf32> to vector<1x1x16xf32>
    %337 = vector.shape_cast %336 : vector<1x1x16xf32> to vector<1x16xf32>
    %cst_74 = arith.constant dense<0.000000e+00> : vector<1x16xf32>
    %338 = tpu.matmul %335, %337, %cst_74 {dimension_numbers = #tpu.dot_dimension_numbers<[1], [0], [0], [1], [0, 0, 1, 1], [], []>} : vector<1x1xf32>, vector<1x16xf32>, vector<1x16xf32> -> vector<1x16xf32>
    %339 = arith.addf %334, %338 : vector<1x16xf32>
    %340 = vector.extract_strided_slice %3 {offsets = [4, 0], sizes = [1, 1], strides = [1, 1]} : vector<8x1xf32> to vector<1x1xf32>
    %341 = vector.extract_strided_slice %318 {offsets = [4, 0, 0], sizes = [1, 1, 16], strides = [1, 1, 1]} : vector<8x1x16xf32> to vector<1x1x16xf32>
    %342 = vector.shape_cast %341 : vector<1x1x16xf32> to vector<1x16xf32>
    %cst_75 = arith.constant dense<0.000000e+00> : vector<1x16xf32>
    %343 = tpu.matmul %340, %342, %cst_75 {dimension_numbers = #tpu.dot_dimension_numbers<[1], [0], [0], [1], [0, 0, 1, 1], [], []>} : vector<1x1xf32>, vector<1x16xf32>, vector<1x16xf32> -> vector<1x16xf32>
    %344 = arith.addf %339, %343 : vector<1x16xf32>
    %345 = vector.extract_strided_slice %3 {offsets = [5, 0], sizes = [1, 1], strides = [1, 1]} : vector<8x1xf32> to vector<1x1xf32>
    %346 = vector.extract_strided_slice %318 {offsets = [5, 0, 0], sizes = [1, 1, 16], strides = [1, 1, 1]} : vector<8x1x16xf32> to vector<1x1x16xf32>
    %347 = vector.shape_cast %346 : vector<1x1x16xf32> to vector<1x16xf32>
    %cst_76 = arith.constant dense<0.000000e+00> : vector<1x16xf32>
    %348 = tpu.matmul %345, %347, %cst_76 {dimension_numbers = #tpu.dot_dimension_numbers<[1], [0], [0], [1], [0, 0, 1, 1], [], []>} : vector<1x1xf32>, vector<1x16xf32>, vector<1x16xf32> -> vector<1x16xf32>
    %349 = arith.addf %344, %348 : vector<1x16xf32>
    %350 = vector.extract_strided_slice %3 {offsets = [6, 0], sizes = [1, 1], strides = [1, 1]} : vector<8x1xf32> to vector<1x1xf32>
    %351 = vector.extract_strided_slice %318 {offsets = [6, 0, 0], sizes = [1, 1, 16], strides = [1, 1, 1]} : vector<8x1x16xf32> to vector<1x1x16xf32>
    %352 = vector.shape_cast %351 : vector<1x1x16xf32> to vector<1x16xf32>
    %cst_77 = arith.constant dense<0.000000e+00> : vector<1x16xf32>
    %353 = tpu.matmul %350, %352, %cst_77 {dimension_numbers = #tpu.dot_dimension_numbers<[1], [0], [0], [1], [0, 0, 1, 1], [], []>} : vector<1x1xf32>, vector<1x16xf32>, vector<1x16xf32> -> vector<1x16xf32>
    %354 = arith.addf %349, %353 : vector<1x16xf32>
    %355 = vector.extract_strided_slice %3 {offsets = [7, 0], sizes = [1, 1], strides = [1, 1]} : vector<8x1xf32> to vector<1x1xf32>
    %356 = vector.extract_strided_slice %318 {offsets = [7, 0, 0], sizes = [1, 1, 16], strides = [1, 1, 1]} : vector<8x1x16xf32> to vector<1x1x16xf32>
    %357 = vector.shape_cast %356 : vector<1x1x16xf32> to vector<1x16xf32>
    %cst_78 = arith.constant dense<0.000000e+00> : vector<1x16xf32>
    %358 = tpu.matmul %355, %357, %cst_78 {dimension_numbers = #tpu.dot_dimension_numbers<[1], [0], [0], [1], [0, 0, 1, 1], [], []>} : vector<1x1xf32>, vector<1x16xf32>, vector<1x16xf32> -> vector<1x16xf32>
    %359 = arith.addf %354, %358 : vector<1x16xf32>
    %360 = vector.extract_strided_slice %9 {offsets = [0, 7], sizes = [8, 1], strides = [1, 1]} : vector<8x8xf32> to vector<8x1xf32>
    %361 = vector.shape_cast %360 : vector<8x1xf32> to vector<8x1x1xf32>
    %362 = vector.broadcast %361 : vector<8x1x1xf32> to vector<8x1x16xf32>
    %363 = vector.broadcast %5 : vector<1x1x16xf32> to vector<8x1x16xf32>
    %364 = arith.mulf %362, %363 : vector<8x1x16xf32>
    %365 = vector.broadcast %7 : vector<1x1x16xf32> to vector<8x1x16xf32>
    %366 = arith.addf %364, %365 : vector<8x1x16xf32>
    %cst_79 = arith.constant 0.000000e+00 : f32
    %367 = vector.broadcast %cst_79 : f32 to vector<8x1x16xf32>
    %368 = arith.maximumf %366, %367 : vector<8x1x16xf32>
    %cst_80 = arith.constant 0.000000e+00 : f32
    %369 = vector.broadcast %cst_80 : f32 to vector<1x16xf32>
    %370 = vector.extract_strided_slice %3 {offsets = [0, 0], sizes = [1, 1], strides = [1, 1]} : vector<8x1xf32> to vector<1x1xf32>
    %371 = vector.extract_strided_slice %368 {offsets = [0, 0, 0], sizes = [1, 1, 16], strides = [1, 1, 1]} : vector<8x1x16xf32> to vector<1x1x16xf32>
    %372 = vector.shape_cast %371 : vector<1x1x16xf32> to vector<1x16xf32>
    %cst_81 = arith.constant dense<0.000000e+00> : vector<1x16xf32>
    %373 = tpu.matmul %370, %372, %cst_81 {dimension_numbers = #tpu.dot_dimension_numbers<[1], [0], [0], [1], [0, 0, 1, 1], [], []>} : vector<1x1xf32>, vector<1x16xf32>, vector<1x16xf32> -> vector<1x16xf32>
    %374 = arith.addf %369, %373 : vector<1x16xf32>
    %375 = vector.extract_strided_slice %3 {offsets = [1, 0], sizes = [1, 1], strides = [1, 1]} : vector<8x1xf32> to vector<1x1xf32>
    %376 = vector.extract_strided_slice %368 {offsets = [1, 0, 0], sizes = [1, 1, 16], strides = [1, 1, 1]} : vector<8x1x16xf32> to vector<1x1x16xf32>
    %377 = vector.shape_cast %376 : vector<1x1x16xf32> to vector<1x16xf32>
    %cst_82 = arith.constant dense<0.000000e+00> : vector<1x16xf32>
    %378 = tpu.matmul %375, %377, %cst_82 {dimension_numbers = #tpu.dot_dimension_numbers<[1], [0], [0], [1], [0, 0, 1, 1], [], []>} : vector<1x1xf32>, vector<1x16xf32>, vector<1x16xf32> -> vector<1x16xf32>
    %379 = arith.addf %374, %378 : vector<1x16xf32>
    %380 = vector.extract_strided_slice %3 {offsets = [2, 0], sizes = [1, 1], strides = [1, 1]} : vector<8x1xf32> to vector<1x1xf32>
    %381 = vector.extract_strided_slice %368 {offsets = [2, 0, 0], sizes = [1, 1, 16], strides = [1, 1, 1]} : vector<8x1x16xf32> to vector<1x1x16xf32>
    %382 = vector.shape_cast %381 : vector<1x1x16xf32> to vector<1x16xf32>
    %cst_83 = arith.constant dense<0.000000e+00> : vector<1x16xf32>
    %383 = tpu.matmul %380, %382, %cst_83 {dimension_numbers = #tpu.dot_dimension_numbers<[1], [0], [0], [1], [0, 0, 1, 1], [], []>} : vector<1x1xf32>, vector<1x16xf32>, vector<1x16xf32> -> vector<1x16xf32>
    %384 = arith.addf %379, %383 : vector<1x16xf32>
    %385 = vector.extract_strided_slice %3 {offsets = [3, 0], sizes = [1, 1], strides = [1, 1]} : vector<8x1xf32> to vector<1x1xf32>
    %386 = vector.extract_strided_slice %368 {offsets = [3, 0, 0], sizes = [1, 1, 16], strides = [1, 1, 1]} : vector<8x1x16xf32> to vector<1x1x16xf32>
    %387 = vector.shape_cast %386 : vector<1x1x16xf32> to vector<1x16xf32>
    %cst_84 = arith.constant dense<0.000000e+00> : vector<1x16xf32>
    %388 = tpu.matmul %385, %387, %cst_84 {dimension_numbers = #tpu.dot_dimension_numbers<[1], [0], [0], [1], [0, 0, 1, 1], [], []>} : vector<1x1xf32>, vector<1x16xf32>, vector<1x16xf32> -> vector<1x16xf32>
    %389 = arith.addf %384, %388 : vector<1x16xf32>
    %390 = vector.extract_strided_slice %3 {offsets = [4, 0], sizes = [1, 1], strides = [1, 1]} : vector<8x1xf32> to vector<1x1xf32>
    %391 = vector.extract_strided_slice %368 {offsets = [4, 0, 0], sizes = [1, 1, 16], strides = [1, 1, 1]} : vector<8x1x16xf32> to vector<1x1x16xf32>
    %392 = vector.shape_cast %391 : vector<1x1x16xf32> to vector<1x16xf32>
    %cst_85 = arith.constant dense<0.000000e+00> : vector<1x16xf32>
    %393 = tpu.matmul %390, %392, %cst_85 {dimension_numbers = #tpu.dot_dimension_numbers<[1], [0], [0], [1], [0, 0, 1, 1], [], []>} : vector<1x1xf32>, vector<1x16xf32>, vector<1x16xf32> -> vector<1x16xf32>
    %394 = arith.addf %389, %393 : vector<1x16xf32>
    %395 = vector.extract_strided_slice %3 {offsets = [5, 0], sizes = [1, 1], strides = [1, 1]} : vector<8x1xf32> to vector<1x1xf32>
    %396 = vector.extract_strided_slice %368 {offsets = [5, 0, 0], sizes = [1, 1, 16], strides = [1, 1, 1]} : vector<8x1x16xf32> to vector<1x1x16xf32>
    %397 = vector.shape_cast %396 : vector<1x1x16xf32> to vector<1x16xf32>
    %cst_86 = arith.constant dense<0.000000e+00> : vector<1x16xf32>
    %398 = tpu.matmul %395, %397, %cst_86 {dimension_numbers = #tpu.dot_dimension_numbers<[1], [0], [0], [1], [0, 0, 1, 1], [], []>} : vector<1x1xf32>, vector<1x16xf32>, vector<1x16xf32> -> vector<1x16xf32>
    %399 = arith.addf %394, %398 : vector<1x16xf32>
    %400 = vector.extract_strided_slice %3 {offsets = [6, 0], sizes = [1, 1], strides = [1, 1]} : vector<8x1xf32> to vector<1x1xf32>
    %401 = vector.extract_strided_slice %368 {offsets = [6, 0, 0], sizes = [1, 1, 16], strides = [1, 1, 1]} : vector<8x1x16xf32> to vector<1x1x16xf32>
    %402 = vector.shape_cast %401 : vector<1x1x16xf32> to vector<1x16xf32>
    %cst_87 = arith.constant dense<0.000000e+00> : vector<1x16xf32>
    %403 = tpu.matmul %400, %402, %cst_87 {dimension_numbers = #tpu.dot_dimension_numbers<[1], [0], [0], [1], [0, 0, 1, 1], [], []>} : vector<1x1xf32>, vector<1x16xf32>, vector<1x16xf32> -> vector<1x16xf32>
    %404 = arith.addf %399, %403 : vector<1x16xf32>
    %405 = vector.extract_strided_slice %3 {offsets = [7, 0], sizes = [1, 1], strides = [1, 1]} : vector<8x1xf32> to vector<1x1xf32>
    %406 = vector.extract_strided_slice %368 {offsets = [7, 0, 0], sizes = [1, 1, 16], strides = [1, 1, 1]} : vector<8x1x16xf32> to vector<1x1x16xf32>
    %407 = vector.shape_cast %406 : vector<1x1x16xf32> to vector<1x16xf32>
    %cst_88 = arith.constant dense<0.000000e+00> : vector<1x16xf32>
    %408 = tpu.matmul %405, %407, %cst_88 {dimension_numbers = #tpu.dot_dimension_numbers<[1], [0], [0], [1], [0, 0, 1, 1], [], []>} : vector<1x1xf32>, vector<1x16xf32>, vector<1x16xf32> -> vector<1x16xf32>
    %409 = arith.addf %404, %408 : vector<1x16xf32>
    %c0_89 = arith.constant 0 : index
    %c0_90 = arith.constant 0 : index
    %410 = vector.load %arg9[%c0_89, %c0_90] : memref<8x16xf32, #tpu.memory_space<vmem>>, vector<8x16xf32>
    %411 = tpu.concatenate %59, %109, %159, %209, %259, %309, %359, %409 in 0 : vector<1x16xf32>, vector<1x16xf32>, vector<1x16xf32>, vector<1x16xf32>, vector<1x16xf32>, vector<1x16xf32>, vector<1x16xf32>, vector<1x16xf32> -> vector<8x16xf32>
    %412 = arith.addf %410, %411 : vector<8x16xf32>
    %c0_91 = arith.constant 0 : index
    %c0_92 = arith.constant 0 : index
    %413 = vector.load %arg9[%c0_91, %c0_92] : memref<8x16xf32, #tpu.memory_space<vmem>>, vector<8x16xf32>
    tpu.vector_store %arg9[%c0_91, %c0_92], %412 {strides = array<i32>} : memref<8x16xf32, #tpu.memory_space<vmem>>, vector<8x16xf32>,
    %c1_i32 = arith.constant 1 : i32
    %414 = arith.cmpi eq, %arg1, %c1_i32 : i32
    %415 = arith.extui %414 : i1 to i32
    %c0_i32_93 = arith.constant 0 : i32
    %416 = arith.cmpi ne, %415, %c0_i32_93 : i32
    scf.if %416 {
      %c0_94 = arith.constant 0 : index
      %c0_95 = arith.constant 0 : index
      %417 = vector.load %arg9[%c0_94, %c0_95] : memref<8x16xf32, #tpu.memory_space<vmem>>, vector<8x16xf32>
      %c0_96 = arith.constant 0 : index
      %c0_97 = arith.constant 0 : index
      %418 = vector.load %arg6[%c0_96, %c0_97] : memref<1x16xf32, #tpu.memory_space<vmem>>, vector<1x16xf32>
      %419 = vector.broadcast %418 : vector<1x16xf32> to vector<8x16xf32>
      %420 = arith.mulf %417, %419 : vector<8x16xf32>
      %c0_98 = arith.constant 0 : index
      %c0_99 = arith.constant 0 : index
      %421 = vector.load %arg7[%c0_98, %c0_99] : memref<8x16xf32, #tpu.memory_space<vmem>>, vector<8x16xf32>
      %422 = arith.addf %420, %421 : vector<8x16xf32>
      %423 = arith.negf %422 : vector<8x16xf32>
      %424 = math.exp %423 : vector<8x16xf32>
      %cst_100 = arith.constant 1.000000e+00 : f32
      %425 = vector.broadcast %cst_100 : f32 to vector<8x16xf32>
      %426 = arith.addf %425, %424 : vector<8x16xf32>
      %427 = arith.divf %425, %426 : vector<8x16xf32>
      %c0_101 = arith.constant 0 : index
      %c0_102 = arith.constant 0 : index
      %428 = vector.load %arg8[%c0_101, %c0_102] : memref<8x16xf32, #tpu.memory_space<vmem>>, vector<8x16xf32>
      tpu.vector_store %arg8[%c0_101, %c0_102], %427 {strides = array<i32>} : memref<8x16xf32, #tpu.memory_space<vmem>>, vector<8x16xf32>,
    } else {
    }
    return
  }
  func.func @transform_0(%arg0: i32, %arg1: i32) -> (i32, i32) {
    %c0_i32 = arith.constant 0 : i32
    %c0_i32_0 = arith.constant 0 : i32
    return %arg1, %c0_i32 : i32, i32
  }
  func.func @transform_1(%arg0: i32, %arg1: i32) -> (i32, i32, i32, i32) {
    %c0_i32 = arith.constant 0 : i32
    %c0_i32_0 = arith.constant 0 : i32
    %c0_i32_1 = arith.constant 0 : i32
    return %arg1, %arg0, %c0_i32, %c0_i32_0 : i32, i32, i32, i32
  }
  func.func @transform_2(%arg0: i32, %arg1: i32) -> (i32, i32) {
    %c0_i32 = arith.constant 0 : i32
    %c0_i32_0 = arith.constant 0 : i32
    %c0_i32_1 = arith.constant 0 : i32
    return %c0_i32, %c0_i32_0 : i32, i32
  }
  func.func @transform_3(%arg0: i32, %arg1: i32) -> (i32, i32) {
    %c0_i32 = arith.constant 0 : i32
    %c0_i32_0 = arith.constant 0 : i32
    %c0_i32_1 = arith.constant 0 : i32
    return %c0_i32, %c0_i32_0 : i32, i32
  }
  func.func @transform_4(%arg0: i32, %arg1: i32) -> (i32, i32) {
    %c0_i32 = arith.constant 0 : i32
    %c0_i32_0 = arith.constant 0 : i32
    %c0_i32_1 = arith.constant 0 : i32
    return %c0_i32, %c0_i32_0 : i32, i32
  }
  func.func @transform_5(%arg0: i32, %arg1: i32) -> (i32, i32) {
    %c0_i32 = arith.constant 0 : i32
    %c0_i32_0 = arith.constant 0 : i32
    return %arg0, %c0_i32 : i32, i32
  }
  func.func @transform_6(%arg0: i32, %arg1: i32) -> (i32, i32) {
    %c0_i32 = arith.constant 0 : i32
    %c0_i32_0 = arith.constant 0 : i32
    return %arg0, %c0_i32 : i32, i32
  }
}

</mosaic_0001>

<bundles_post_ra>
// kernel: generator_forward.6
= control target key start
LH: loop header
LB: loop body
LE: loop exit
PB: predicated region body
PF: predicated region fallthrough
CT: control target
= control target key end

     0   :  { %v46_v2 = vlaneseq  ;;  %vm55_vm1 = vcmask 130048   ;;  %s85_s0 = inlined_call_operand.vmem [shape: f32[16,16], index: 0, kind: input, shape index: {}]   ;;  %s86_s1 = inlined_call_operand.vmem [shape: f32[16,16], index: 1, kind: output, shape index: {}]  }
   0x1   :  { %v8_v0 = vld [vmem:[%s85_s0] sm:$0xff]  ;;  %v9_v1 = vld [vmem:[%s85_s0 + $0x8] sm:$0xff] }
   0x2   :  { %10 = vxpose.xlu0.b32.start [1/2] (short) (narrow) %v8_v0, 16  ;;  %v47_v3 = vshrl.u32 %v46_v2, 7  ;;  %v50_v4 = vand.u32 127, %v46_v2 }
   0x4   :  { %vm51_vm0 = vcmp.eq.s32.totalorder %v47_v3, %v50_v4  ;;  %v48_v7 = vadd.s32 8, %v47_v3 }
   0x6   :  { %11 = vxpose.xlu0.b32.end [2/2] (short) (narrow) %v9_v1, 16  ;;  %vm52_vm2 = vcmp.eq.s32.totalorder %v48_v7, %v50_v4 }
  0x82   :  { %v26_v5 = vpop.trf.xlu0 }
  0x83   :  { %v42_v6 = vadd.f32 %v26_v5, %v8_v0 }
  0x85   :  { %v44_v8 = vmul.f32 0.5, %v42_v6 }
  0x86   :  { %v27_v9 = vpop.trf.xlu0 }
  0x87   :  { %v53_v10 = vsel %vm51_vm0, 0.0, %v44_v8  ;;  %v43_v11 = vadd.f32 %v27_v9, %v9_v1 }
  0x88   :  { %56 = vst.msk [vmem:[%s86_s1] sm:$0xff] %vm55_vm1, %v53_v10 }
  0x89   :  { %v45_v12 = vmul.f32 0.5, %v43_v11 }
  0x8b   :  { %v54_v13 = vsel %vm52_vm2, 0.0, %v45_v12 }
  0x8c   :  { %57 = vst.msk [vmem:[%s86_s1 + $0x8] sm:$0xff] %vm55_vm1, %v54_v13 }

// kernel: generator_forward.9
= control target key start
LH: loop header
LB: loop body
LE: loop exit
PB: predicated region body
PF: predicated region fallthrough
CT: control target
= control target key end

     0   :  { %s154_s0 = inlined_call_operand.vmem [shape: f32[16,16], index: 0, kind: input, shape index: {}]   ;;  %s155_s1 = inlined_call_operand.vmem [shape: f32[16,16], index: 1, kind: input, shape index: {}]   ;;  %s156_s2 = inlined_call_operand.hbm [shape: f32[16,16], index: 2, kind: output, shape index: {}]  }
   0x1   :  { %v12_v0 = vld [vmem:[%s154_s0] sm:$0xff]  ;;  %v13_v2 = vld [vmem:[%s154_s0 + $0x8] sm:$0xff] }
   0x2   :  { %v14_v1 = vld [vmem:[%s155_s1] sm:$0xff]  ;;  %v15_v4 = vld [vmem:[%s155_s1 + $0x8] sm:$0xff] }
   0x3   :  { %v16_v3 = vadd.f32 %v14_v1, %v12_v0 }
   0x4   :  { %7 = vsyncpa [#allocation3], 0  ;;  %v17_v5 = vadd.f32 %v15_v4, %v13_v2  ;;  %v56_v8 = vlaneseq  ;;  %vm65_vm1 = vcmask 130048   ;;  %s112_s0 = smov [#allocation2]  }
   0x5   :  { %v18_v6 = vmul.f32 0.5, %v16_v3  ;;  %s73_s17 = sshll.u32 %s112_s0, 4  ;;  %s74_s17 = int_to_ptr.vmem [resolvable:$true] %s73_s17 }
   0x6   :  { %v19_v7 = vmul.f32 0.5, %v17_v5  ;;  %v57_v9 = vshrl.u32 %v56_v8, 7  ;;  %v60_v10 = vand.u32 127, %v56_v8  ;;  %s88_s1 = scalar_lea.vmem %s74_s17, 256  ;;  %p93_p1 = scmp.lt.s32.totalorder %s74_s17, %s74_s17 }
   0x7   :  { %20 = vxpose.xlu0.b32.start [1/2] (short) (narrow) %v18_v6, 16  ;;  %p89_p0 = scmp.ne.s32.totalorder %s74_s17, %s88_s1  ;;  %p94_p2 = scmp.lt.s32.totalorder %s88_s1, %s88_s1 }
   0x8   :  { %vm61_vm0 = vcmp.eq.s32.totalorder %v57_v9, %v60_v10  ;;  %v58_v13 = vadd.s32 8, %v57_v9 }
   0x9   :  { %p95_p3 = por %p94_p2, %p93_p1 }
   0xa   :  { %vm62_vm2 = vcmp.eq.s32.totalorder %v58_v13, %v60_v10 }
   0xb   :  { %21 = vxpose.xlu0.b32.end [2/2] (short) (narrow) %v19_v7, 16  ;;  %p96_p4 = pnand %p95_p3, %p89_p0 }
  0x87   :  { %v36_v11 = vpop.trf.xlu0 }
  0x88   :  { %v52_v12 = vadd.f32 %v36_v11, %v18_v6 }
  0x8a   :  { %v54_v14 = vmul.f32 0.5, %v52_v12 }
  0x8b   :  { %v37_v15 = vpop.trf.xlu0 }
  0x8c   :  { %v63_v16 = vsel %vm61_vm0, 0.0, %v54_v14  ;;  %v53_v17 = vadd.f32 %v37_v15, %v19_v7 }
  0x8d   :  { %66 = vst.msk [vmem:[#allocation2] sm:$0xff] %vm65_vm1, %v63_v16 }
  0x8e   :  { %v55_v18 = vmul.f32 0.5, %v53_v17 }
  0x90   :  { %v64_v19 = vsel %vm62_vm2, 0.0, %v55_v18 }
  0x91   :  { %67 = vst.msk [vmem:[#allocation2 + $0x8] sm:$0xff] %vm65_vm1, %v64_v19 }
  0x92   :  { %99 = shalt.err (!%p96_p4)
}
  0x93   :  { %s100_s20 = scalar_lea.hbm %s156_s2, 256 }
  0x94   :  { %p101_p5 = scmp.ne.s32.totalorder %s156_s2, %s100_s20  ;;  %p104_p6 = scmp.lt.u32.totalorder %s100_s20, %s156_s2 }
  0x96   :  { %p106_p7 = pnand %p104_p6, %p101_p5 }
  0x98   :  { %109 = shalt.err (!%p106_p7)
}
  0x99   :  { %s113_s25 = smov 128   ;;  %s114_s26 = smov 8  }
  0x9a   :  { %79 = dma.vmem_to_hbm [thread:$0]  %s74_s17, 256, %s156_s2, [#allocation3], %s113_s25, %s113_s25, %s114_s26  }
  0x9b   :  { %110 = dma.done.wait [#allocation3], 256  }
  0x9c   :  { %111 = vsyncadd [#allocation3], 4294967040 }
  0x9d   :  { %83 = vsyncpa [#allocation3], 1 }

// kernel: generator_forward.5
= control target key start
LH: loop header
LB: loop body
LE: loop exit
PB: predicated region body
PF: predicated region fallthrough
CT: control target
= control target key end

     0   :  { %s6963_s21 = smov 0   ;;  %s6965_s22 = smov 0   ;;  %s7770_s0 = inlined_call_operand.vmem [shape: f32[16,16], index: 0, kind: input, shape index: {}]   ;;  %s7771_s1 = inlined_call_operand.vmem [shape: f32[2,2,8,8], index: 1, kind: input, shape index: {}]   ;;  %s7772_s2 = inlined_call_operand.vmem [shape: f32[16,16], index: 2, kind: input, shape index: {}]   ;;  %s7773_s3 = inlined_call_operand.vmem [shape: f32[16,16], index: 3, kind: input, shape index: {}]   ;;  %s7774_s4 = inlined_call_operand.vmem [shape: f32[1,16], index: 4, kind: input, shape index: {}]   ;;  %s7775_s5 = inlined_call_operand.vmem [shape: f32[16,16], index: 5, kind: input, shape index: {}]   ;;  %s7776_s6 = inlined_call_operand.vmem [shape: f32[16,16], index: 6, kind: output, shape index: {}]  }
   0x1   :  { %s6967_s23 = smov 0   ;;  %s6969_s24 = smov 0  }
   0x2   :  { %s6971_s25 = smov 0  }
   0x3 LB: > { %s25_s26 = sadd.s32 1, %s6905_s23  ;;  %s28_s27 = sadd.s32 1, %s6909_s24  ;;  %s6913_s25 = sphi %s6971_s25, %s16_s25   ;;  %s6909_s24 = sphi %s6969_s24, %s7780_s24   ;;  %s6905_s23 = sphi %s6967_s23, %s7779_s23   ;;  %s6901_s22 = sphi %s6965_s22, %s7778_s22   ;;  %s6897_s21 = sphi %s6963_s21, %s7777_s21  }
   0x4   : > { %p26_p0 = scmp.ge.s32.totalorder %s25_s26, 2  ;;  %p5752_p1 = scmp.ge.s32.totalorder %s6913_s25, 1 }
   0x5   : > { %p247_p2 = scmp.lt.s32.totalorder %s6913_s25, 5 }
   0x6   : > { %s7782_s26 = smov (%p26_p0, %s25_s26), 0  ;;  %s7784_s27 = smov (!%p26_p0, %s28_s27), %s6909_s24 }
   0x7   : > { %p248_p3 = pnand %p5752_p1, %p247_p2  ;;  %p30_p4 = scmp.ge.s32.totalorder %s7784_s27, 2 }
   0x8   : > { %p287_p5 = scmp.lt.s32.totalorder (!%p248_p3), %s6897_s21, 1  ;;  %p293_p6 = scmp.lt.s32.totalorder (!%p248_p3), %s6901_s22, 1 }
   0x9   : > { %s7786_s27 = smov (%p30_p4, %s7784_s27), 0  ;;  %251 = sbr.rel (%p248_p3) target bundleno = 676 (0x2a4), region = 44 }
   0xa   : > { %p5758_p7 = scmp.ne.s32.totalorder (!%p248_p3), %s6897_s21, 0 }
  0x10   : > { %s288_s28 = scalar_select %p287_p5, %s6897_s21, 1 }
  0x11   : > { %s7788_s22 = smov (!%p293_p6, %s6901_s22), 1  ;;  %310 = sbr.rel (%p5758_p7) target bundleno = 24 (0x18), region = 48 }
  0x12   : > { %s5753_s29 = sshll.u32 %s288_s28, 3  ;;  %s5754_s30 = sshll.u32 %s288_s28, 1  ;;  %vm311_vm0 = vcmask (!%p5758_p7), 130048   ;;  %v6915_v0 = vmov (!%p5758_p7), 0.0  }
  0x13   : > { %s7000_s9 = scalar_lea.vmem %s7770_s0, %s5753_s29  ;;  %s296_s10 = sadd.s32 %s5754_s30, %s7788_s22  ;;  %312 = vst.msk [vmem:[#allocation2] sm:$0xff] (!%p5758_p7), %vm311_vm0, %v6915_v0 }
  0x14   : > { %s5755_s11 = sshll.u32 %s296_s10, 3  ;;  %s5756_s12 = sshll.u32 %s7788_s22, 3 }
  0x15   : > { %s298_s15 = scalar_lea.vmem %s7771_s1, %s5755_s11  ;;  %s7008_s18 = scalar_lea.vmem %s7775_s5, %s5756_s12 }
  0x16   : > { %s7013_s28 = scalar_lea.vmem %s7776_s6, %s5756_s12 }
  0x18 PF: > { %v324_v1 = vlaneseq  ;;  %v6916_v2 = vmov 0   ;;  %v6917_v3 = vmov 1966171168   ;;  %v318_v7 = vld [vmem:[%s298_s15] sm:$0xff]  ;;  %v6918_v18 = vmov 1   ;;  %v7105_v42 = vld [vmem:[%s7772_s2 + $0x8] sm:$0xff] }
  0x19   : > { %6827 = vset.pattern.permute.xlu1 %v6916_v2  ;;  %v322_v4 = vunpack.c.l.s4 %v6917_v3  ;;  %6825 = vset.pattern.permute.xlu0 %v6916_v2  ;;  %v320_v17 = vcombine.high %v318_v7, %v318_v7  ;;  %v6919_v22 = vmov 0.0|0.0   ;;  %vm6920_vm1 = vmmov 0   ;;  %v7100_v41 = vld [vmem:[%s7772_s2] sm:$0xff]  ;;  %v7117_v46 = vld [vmem:[%s7773_s3 + $0x8] sm:$0xff]  ;;  %p5823_p8 = scmp.ne.s32.totalorder %s6897_s21, 1 }
  0x1a   : > { %v325_v5 = vshrl.u32 %v324_v1, 7  ;;  %6468 = vmatprep.subr.bf16.mxu0 %v6919_v22  ;;  %6492 = vmatprep.subr.bf16.mxu1 %v6919_v22  ;;  %v6921_v26 = vmov 0.0   ;;  %v6922_v34 = vmov 2   ;;  %v6923_v35 = vmov 3   ;;  %v7112_v45 = vld [vmem:[%s7773_s3] sm:$0xff] }
  0x1b   : > { %v323_v6 = vunpack.c.0.s8 %v322_v4  ;;  %6024 = vmatprep.mubr.msk.f32.mxu0 %vm6920_vm1, %v6921_v26  ;;  %6080 = vmatprep.mubr.msk.f32.mxu1 %vm6920_vm1, %v6921_v26  ;;  %v6924_v36 = vmov 4   ;;  %v6925_v37 = vmov 5   ;;  %v6926_v38 = vmov 6   ;;  %v7130_v57 = vld [vmem:[%s7000_s9] sm:$0xff] }
  0x1c   : > { %v371_v10 = vsub.s32 0, %v325_v5  ;;  %v6927_v39 = vmov 7   ;;  %vm483_vm2 = vcmask 130048   ;;  %vm5616_vm3 = vcmask 1040384  }
  0x1d   : > { %v326_v8 = vsub.s32 %v323_v6, %v325_v5  ;;  %vm5618_vm4 = vcmask 1041408   ;;  %vm5620_vm5 = vcmask 1042432   ;;  %vm5622_vm6 = vcmask 1043456  }
  0x1e   : > { %vm5624_vm7 = vcmask 1044480   ;;  %vm5626_vm8 = vcmask 1045504   ;;  %vm5628_vm9 = vcmask 1046528  }
  0x1f   : > { %v327_v9 = vrot.slane %v318_v7, %v326_v8  ;;  %v334_v21 = vrot.slane %v320_v17, %v326_v8 }
  0x21   : > { %v343_v11 = vrot.slane %v327_v9, %v326_v8  ;;  %v335_v12 = vcombine.high %v327_v9, %v327_v9  ;;  %v350_v24 = vrot.slane %v334_v21, %v326_v8  ;;  %v336_v25 = vcombine.high %v334_v21, %v334_v21 }
  0x23   : > { %v7016_v13 = vrot.slane %v343_v11, %v371_v10  ;;  %v357_v14 = vrot.slane %v335_v12, %v326_v8  ;;  %v365_v16 = vcombine.high %v343_v11, %v343_v11  ;;  %v7037_v27 = vrot.slane %v350_v24, %v371_v10 }
  0x24   : > { %v364_v28 = vrot.slane %v336_v25, %v326_v8  ;;  %v366_v30 = vcombine.high %v350_v24, %v350_v24 }
  0x25   : > { %402 = vperm.xlu1 %6827, %v7016_v13   ;;  %v7019_v15 = vrot.slane %v357_v14, %v371_v10  ;;  %v7023_v19 = vrot.slane %v365_v16, %v371_v10  ;;  %v367_v20 = vcombine.high %v357_v14, %v357_v14 }
  0x26   : > { %v7041_v29 = vrot.slane %v364_v28, %v371_v10  ;;  %v7045_v31 = vrot.slane %v366_v30, %v371_v10  ;;  %v368_v32 = vcombine.high %v364_v28, %v364_v28 }
  0x27   : > { %406 = vperm.xlu0 %6825, %v7019_v15   ;;  %v7028_v23 = vrot.slane %v367_v20, %v371_v10 }
  0x28   : > { %v7049_v33 = vrot.slane %v368_v32, %v371_v10 }
  0x29   : > { %6828 = vset.pattern.permute.xlu1 %v6918_v18 }
  0x2a   : > { %1073 = vperm.xlu1 %6828, %v7016_v13  }
  0x2b   : > { %6826 = vset.pattern.permute.xlu0 %v6918_v18 }
  0x2c   : > { %1077 = vperm.xlu0 %6826, %v7019_v15  }
  0x2e   : > { %6829 = vset.pattern.permute.xlu1 %v6916_v2  ;;  %v7136_v2 = vrot.slane %v7130_v57, 1 }
  0x2f   : > { %410 = vperm.xlu1 %6829, %v7023_v19  }
  0x30   : > { %1081 = vperm.xlu0 %6826, %v7023_v19  }
  0x33   : > { %414 = vperm.xlu1 %6829, %v7028_v23  }
  0x34   : > { %1085 = vperm.xlu0 %6826, %v7028_v23  }
  0x37   : > { %418 = vperm.xlu1 %6829, %v7037_v27  }
  0x38   : > { %1089 = vperm.xlu0 %6826, %v7037_v27  }
  0x3b   : > { %422 = vperm.xlu1 %6829, %v7041_v29  }
  0x3c   : > { %1093 = vperm.xlu0 %6826, %v7041_v29  }
  0x3f   : > { %426 = vperm.xlu1 %6829, %v7045_v31  }
  0x40   : > { %1097 = vperm.xlu0 %6826, %v7045_v31  }
  0x43   : > { %430 = vperm.xlu1 %6829, %v7049_v33  }
  0x44   : > { %1101 = vperm.xlu0 %6826, %v7049_v33  }
  0x47   : > { %6830 = vset.pattern.permute.xlu1 %v6922_v34 }
  0x48   : > { %1723 = vperm.xlu1 %6830, %v7019_v15   ;;  %6831 = vset.pattern.permute.xlu0 %v6923_v35 }
  0x49   : > { %2369 = vperm.xlu0 %6831, %v7019_v15  }
  0x4c   : > { %1719 = vperm.xlu1 %6830, %v7016_v13  }
  0x4d   : > { %6833 = vset.pattern.permute.xlu0 %v6922_v34 }
  0x4e   : > { %1727 = vperm.xlu0 %6833, %v7023_v19  }
  0x50   : > { %6832 = vset.pattern.permute.xlu1 %v6923_v35 }
  0x51   : > { %2365 = vperm.xlu1 %6832, %v7016_v13  }
  0x52   : > { %6835 = vset.pattern.permute.xlu0 %v6923_v35 }
  0x53   : > { %2377 = vperm.xlu0 %6835, %v7028_v23  }
  0x55   : > { %2373 = vperm.xlu1 %6832, %v7023_v19  }
  0x57   : > { %6837 = vset.pattern.permute.xlu0 %v6922_v34 }
  0x58   : > { %1739 = vperm.xlu0 %6837, %v7041_v29  }
  0x59   : > { %6834 = vset.pattern.permute.xlu1 %v6922_v34 }
  0x5a   : > { %1731 = vperm.xlu1 %6834, %v7028_v23  }
  0x5c   : > { %6839 = vset.pattern.permute.xlu0 %v6923_v35 }
  0x5d   : > { %2389 = vperm.xlu0 %6839, %v7045_v31  }
  0x5e   : > { %1735 = vperm.xlu1 %6834, %v7037_v27  }
  0x61   : > { %6841 = vset.pattern.permute.xlu0 %v6924_v36 }
  0x62   : > { %6836 = vset.pattern.permute.xlu1 %v6923_v35  ;;  %3015 = vperm.xlu0 %6841, %v7019_v15  }
  0x63   : > { %2381 = vperm.xlu1 %6836, %v7037_v27  }
  0x66   : > { %6844 = vset.pattern.permute.xlu0 %v6925_v37 }
  0x67   : > { %2385 = vperm.xlu1 %6836, %v7041_v29   ;;  %3657 = vperm.xlu0 %6844, %v7016_v13  }
  0x6b   : > { %6838 = vset.pattern.permute.xlu1 %v6922_v34  ;;  %6846 = vset.pattern.permute.xlu0 %v6924_v36 }
  0x6c   : > { %1743 = vperm.xlu1 %6838, %v7045_v31   ;;  %3023 = vperm.xlu0 %6846, %v7028_v23  }
  0x70   : > { %1747 = vperm.xlu1 %6838, %v7049_v33   ;;  %6848 = vset.pattern.permute.xlu0 %v6925_v37 }
  0x71   : > { %3673 = vperm.xlu0 %6848, %v7037_v27  }
  0x74   : > { %6840 = vset.pattern.permute.xlu1 %v6923_v35 }
  0x75   : > { %2393 = vperm.xlu1 %6840, %v7049_v33   ;;  %6850 = vset.pattern.permute.xlu0 %v6924_v36 }
  0x76   : > { %3035 = vperm.xlu0 %6850, %v7045_v31  }
  0x79   : > { %6842 = vset.pattern.permute.xlu1 %v6925_v37 }
  0x7a   : > { %3661 = vperm.xlu1 %6842, %v7019_v15   ;;  %6852 = vset.pattern.permute.xlu0 %v6925_v37 }
  0x7b   : > { %3685 = vperm.xlu0 %6852, %v7049_v33  }
  0x7e   : > { %6843 = vset.pattern.permute.xlu1 %v6924_v36 }
  0x7f   : > { %3011 = vperm.xlu1 %6843, %v7016_v13   ;;  %6855 = vset.pattern.permute.xlu0 %v6926_v38 }
  0x80   : > { %4303 = vperm.xlu0 %6855, %v7016_v13  }
  0x83   : > { %3019 = vperm.xlu1 %6843, %v7023_v19  }
  0x84   : > { %6857 = vset.pattern.permute.xlu0 %v6927_v39 }
  0x85   : > { %4957 = vperm.xlu0 %6857, %v7023_v19  }
  0x87   : > { %6845 = vset.pattern.permute.xlu1 %v6925_v37 }
  0x88   : > { %3665 = vperm.xlu1 %6845, %v7023_v19  }
  0x89   : > { %6859 = vset.pattern.permute.xlu0 %v6926_v38 }
  0x8a   : > { %4319 = vperm.xlu0 %6859, %v7037_v27  }
  0x8c   : > { %3669 = vperm.xlu1 %6845, %v7028_v23  }
  0x8e   : > { %6861 = vset.pattern.permute.xlu0 %v6927_v39 }
  0x8f   : > { %4969 = vperm.xlu0 %6861, %v7041_v29  }
  0x90   : > { %6847 = vset.pattern.permute.xlu1 %v6924_v36 }
  0x91   : > { %3027 = vperm.xlu1 %6847, %v7037_v27  }
  0x93   : > { %6863 = vset.pattern.permute.xlu0 %v6926_v38 }
  0x94   : > { %4331 = vperm.xlu0 %6863, %v7049_v33  }
  0x95   : > { %3031 = vperm.xlu1 %6847, %v7041_v29  }
  0x98   : > { %6864 = vset.pattern.permute.xlu0 %v6927_v39 }
  0x99   : > { %6849 = vset.pattern.permute.xlu1 %v6925_v37 }
  0x9a   : > { %3677 = vperm.xlu1 %6849, %v7041_v29  }
  0x9e   : > { %3681 = vperm.xlu1 %6849, %v7045_v31  }
  0xa2   : > { %6851 = vset.pattern.permute.xlu1 %v6924_v36 }
  0xa3   : > { %3039 = vperm.xlu1 %6851, %v7049_v33  }
  0xa4   : > { %v403_v40 = vpop.permute.xlu1 %402 }
  0xa5   : > { %v433_v43 = vmul.f32 %v403_v40, %v7100_v41  ;;  %v434_v44 = vmul.f32 %v403_v40, %v7105_v42 }
  0xa6   : > { %v407_v47 = vpop.permute.xlu0 %406 }
  0xa7   : > { %v449_v48 = vadd.f32 %v433_v43, %v7112_v45  ;;  %v450_v49 = vadd.f32 %v434_v44, %v7117_v46  ;;  %v435_v50 = vmul.f32 %v407_v47, %v7100_v41  ;;  %v436_v51 = vmul.f32 %v407_v47, %v7105_v42  ;;  %6853 = vset.pattern.permute.xlu1 %v6926_v38 }
  0xa8   : > { %4307 = vperm.xlu1 %6853, %v7019_v15  }
  0xa9   : > { %v451_v52 = vadd.f32 %v435_v50, %v7112_v45  ;;  %v452_v53 = vadd.f32 %v436_v51, %v7117_v46  ;;  %v1074_v54 = vpop.permute.xlu1 %1073  ;;  %v465_v58 = vmax.f32 %v449_v48, 0.0  ;;  %v466_v59 = vmax.f32 %v450_v49, 0.0 }
  0xaa   : > { %v1104_v55 = vmul.f32 %v1074_v54, %v7100_v41  ;;  %v1105_v56 = vmul.f32 %v1074_v54, %v7105_v42 }
  0xab   : > { %v1078_v60 = vpop.permute.xlu0 %1077  ;;  %v467_v61 = vmax.f32 %v451_v52, 0.0  ;;  %v468_v62 = vmax.f32 %v452_v53, 0.0  ;;  %v6472_v8 = vpack.c.bf16 %v466_v59, %v465_v58 }
  0xac   : > { %v1106_v63 = vmul.f32 %v1078_v60, %v7100_v41  ;;  %v1107_v0 = vmul.f32 %v1078_v60, %v7105_v42  ;;  %6854 = vset.pattern.permute.xlu1 %v6927_v39  ;;  %v1120_v3 = vadd.f32 %v1104_v55, %v7112_v45  ;;  %v1121_v4 = vadd.f32 %v1105_v56, %v7117_v46 }
  0xad   : > { %v6469_v1 = vpack.c.bf16 %v468_v62, %v467_v61  ;;  %4953 = vperm.xlu1 %6854, %v7019_v15   ;;  %v7180_v55 = vrot.slane %v7130_v57, 2 }
  0xae   : > { %v1122_v5 = vadd.f32 %v1106_v63, %v7112_v45  ;;  %v1123_v6 = vadd.f32 %v1107_v0, %v7117_v46  ;;  %v411_v7 = vpop.permute.xlu1 %410  ;;  %v1136_v16 = vmax.f32 %v1120_v3, 0.0  ;;  %v1137_v17 = vmax.f32 %v1121_v4, 0.0 }
  0xaf   : > { %v437_v9 = vmul.f32 %v411_v7, %v7100_v41  ;;  %v438_v10 = vmul.f32 %v411_v7, %v7105_v42  ;;  %6470 = vmatpush3.bf16.msra.mxu0 %v6469_v1  ;;  %v1082_v18 = vpop.permute.xlu0 %1081 }
  0xb0   : > { %6471 = vmatprep.subr.bf16.mxu0 %v6919_v22  ;;  %v1138_v14 = vmax.f32 %v1122_v5, 0.0  ;;  %v1139_v15 = vmax.f32 %v1123_v6, 0.0  ;;  %v1109_v30 = vmul.f32 %v1082_v18, %v7105_v42  ;;  %v6496_v34 = vpack.c.bf16 %v1137_v17, %v1136_v16 }
  0xb1   : > { %v453_v11 = vadd.f32 %v437_v9, %v7112_v45  ;;  %v454_v12 = vadd.f32 %v438_v10, %v7117_v46  ;;  %4949 = vperm.xlu1 %6854, %v7016_v13   ;;  %v1108_v13 = vmul.f32 %v1082_v18, %v7100_v41  ;;  %v7202_v10 = vrot.slane %v7130_v57, 3 }
  0xb2   : > { %v415_v20 = vpop.permute.xlu1 %414  ;;  %6025 = vmatmul.mubr.msk.f32.vlgmr.msra.gmra.mrb[0].mxu0 %vm483_vm2, %v7136_v2  ;;  %v6493_v32 = vpack.c.bf16 %v1139_v15, %v1138_v14  ;;  %v1125_v43 = vadd.f32 %v1109_v30, %v7117_v46 }
  0xb3   : > { %v469_v21 = vmax.f32 %v453_v11, 0.0  ;;  %v470_v24 = vmax.f32 %v454_v12, 0.0  ;;  %v439_v25 = vmul.f32 %v415_v20, %v7100_v41  ;;  %v440_v28 = vmul.f32 %v415_v20, %v7105_v42  ;;  %6473 = vmatpush3.bf16.msra.mxu0 %v6472_v8  ;;  %6031 = vmatprep.mubr.msk.f32.mxu0 %vm6920_vm1, %v6921_v26  ;;  %v1086_v44 = vpop.permute.xlu0 %1085 }
  0xb4   : > { %6474 = vmatprep.subr.bf16.mxu0 %v6919_v22  ;;  %6494 = vmatpush3.bf16.msra.mxu1 %v6493_v32  ;;  %v1124_v40 = vadd.f32 %v1108_v13, %v7112_v45  ;;  %v1110_v48 = vmul.f32 %v1086_v44, %v7100_v41  ;;  %v1111_v49 = vmul.f32 %v1086_v44, %v7105_v42  ;;  %v1141_v52 = vmax.f32 %v1125_v43, 0.0 }
  0xb5   : > { %6856 = vset.pattern.permute.xlu1 %v6926_v38  ;;  %v6475_v35 = vpack.c.bf16 %v470_v24, %v469_v21  ;;  %v455_v36 = vadd.f32 %v439_v25, %v7112_v45  ;;  %v456_v37 = vadd.f32 %v440_v28, %v7117_v46  ;;  %6495 = vmatprep.subr.bf16.mxu1 %v6919_v22 }
  0xb6   : > { %4311 = vperm.xlu1 %6856, %v7023_v19   ;;  %v419_v50 = vpop.permute.xlu1 %418  ;;  %v1140_v51 = vmax.f32 %v1124_v40, 0.0  ;;  %v1126_v58 = vadd.f32 %v1110_v48, %v7112_v45  ;;  %v1127_v59 = vadd.f32 %v1111_v49, %v7117_v46 }
  0xb7   : > { %6081 = vmatmul.mubr.msk.f32.vlgmr.msra.gmra.mrb[0].mxu1 %vm483_vm2, %v7136_v2  ;;  %v471_v19 = vmax.f32 %v455_v36, 0.0  ;;  %v472_v47 = vmax.f32 %v456_v37, 0.0  ;;  %v441_v53 = vmul.f32 %v419_v50, %v7100_v41  ;;  %v442_v54 = vmul.f32 %v419_v50, %v7105_v42  ;;  %v1090_v63 = vpop.permute.xlu0 %1089 }
  0xb8   : > { %6497 = vmatpush3.bf16.msra.mxu1 %v6496_v34  ;;  %6087 = vmatprep.mubr.msk.f32.mxu1 %vm6920_vm1, %v6921_v26  ;;  %v6499_v60 = vpack.c.bf16 %v1141_v52, %v1140_v51  ;;  %v1142_v1 = vmax.f32 %v1126_v58, 0.0  ;;  %v1143_v3 = vmax.f32 %v1127_v59, 0.0  ;;  %v1112_v4 = vmul.f32 %v1090_v63, %v7100_v41 }
  0xb9   : > { %6498 = vmatprep.subr.bf16.mxu1 %v6919_v22  ;;  %v6478_v56 = vpack.c.bf16 %v472_v47, %v471_v19  ;;  %v457_v61 = vadd.f32 %v441_v53, %v7112_v45  ;;  %v458_v62 = vadd.f32 %v442_v54, %v7117_v46  ;;  %v1113_v5 = vmul.f32 %v1090_v63, %v7105_v42 }
  0xba   : > { %6032 = vmatmul.mubr.msk.f32.vlgmr.msra.gmra.mrb[0].mxu0 %vm483_vm2, %v7130_v57  ;;  %4315 = vperm.xlu1 %6856, %v7028_v23   ;;  %v423_v0 = vpop.permute.xlu1 %422  ;;  %v1128_v11 = vadd.f32 %v1112_v4, %v7112_v45  ;;  %v6502_v14 = vpack.c.bf16 %v1143_v3, %v1142_v1  ;;  %v7225_v34 = vrot.slane %v7130_v57, 4 }
  0xbb   : > { %6476 = vmatpush3.bf16.msra.mxu0 %v6475_v35  ;;  %6038 = vmatprep.mubr.msk.f32.mxu0 %vm6920_vm1, %v6921_v26  ;;  %v473_v6 = vmax.f32 %v457_v61, 0.0  ;;  %v474_v7 = vmax.f32 %v458_v62, 0.0  ;;  %v443_v8 = vmul.f32 %v423_v0, %v7100_v41  ;;  %v444_v9 = vmul.f32 %v423_v0, %v7105_v42  ;;  %v1094_v18 = vpop.permute.xlu0 %1093 }
  0xbc   : > { %6477 = vmatprep.subr.bf16.mxu0 %v6919_v22  ;;  %v1129_v12 = vadd.f32 %v1113_v5, %v7117_v46  ;;  %v1114_v24 = vmul.f32 %v1094_v18, %v7100_v41  ;;  %v1115_v25 = vmul.f32 %v1094_v18, %v7105_v42 }
  0xbd   : > { %v6481_v15 = vpack.c.bf16 %v474_v7, %v473_v6  ;;  %v459_v16 = vadd.f32 %v443_v8, %v7112_v45  ;;  %v460_v17 = vadd.f32 %v444_v9, %v7117_v46 }
  0xbe   : > { %6858 = vset.pattern.permute.xlu1 %v6927_v39  ;;  %v427_v20 = vpop.permute.xlu1 %426  ;;  %v1145_v21 = vmax.f32 %v1129_v12, 0.0  ;;  %v1130_v35 = vadd.f32 %v1114_v24, %v7112_v45  ;;  %v1131_v36 = vadd.f32 %v1115_v25, %v7117_v46 }
  0xbf   : > { %6088 = vmatmul.mubr.msk.f32.vlgmr.msra.gmra.mrb[0].mxu1 %vm483_vm2, %v7130_v57  ;;  %4961 = vperm.xlu1 %6858, %v7028_v23   ;;  %v1144_v23 = vmax.f32 %v1128_v11, 0.0  ;;  %v475_v28 = vmax.f32 %v459_v16, 0.0  ;;  %v476_v13 = vmax.f32 %v460_v17, 0.0  ;;  %v445_v30 = vmul.f32 %v427_v20, %v7100_v41  ;;  %v1098_v19 = vpop.permute.xlu0 %1097 }
  0xc0   : > { %6500 = vmatpush3.bf16.msra.mxu1 %v6499_v60  ;;  %6094 = vmatprep.mubr.msk.f32.mxu1 %vm6920_vm1, %v6921_v26  ;;  %v446_v32 = vmul.f32 %v427_v20, %v7105_v42  ;;  %v1147_v48 = vmax.f32 %v1131_v36, 0.0  ;;  %v1116_v49 = vmul.f32 %v1098_v19, %v7100_v41  ;;  %v1117_v50 = vmul.f32 %v1098_v19, %v7105_v42 }
  0xc1   : > { %6501 = vmatprep.subr.bf16.mxu1 %v6919_v22  ;;  %v6505_v37 = vpack.c.bf16 %v1145_v21, %v1144_v23  ;;  %v6484_v40 = vpack.c.bf16 %v476_v13, %v475_v28  ;;  %v461_v43 = vadd.f32 %v445_v30, %v7112_v45 }
  0xc2   : > { %6039 = vmatmul.mubr.msk.f32.vlgmr.msra.gmra.mrb[0].mxu0 %vm483_vm2, %v7180_v55  ;;  %v462_v44 = vadd.f32 %v446_v32, %v7117_v46  ;;  %v431_v47 = vpop.permute.xlu1 %430  ;;  %v1132_v59 = vadd.f32 %v1116_v49, %v7112_v45  ;;  %v1133_v60 = vadd.f32 %v1117_v50, %v7117_v46 }
  0xc3   : > { %6479 = vmatpush3.bf16.msra.mxu0 %v6478_v56  ;;  %6045 = vmatprep.mubr.msk.f32.mxu0 %vm6920_vm1, %v6921_v26  ;;  %v477_v51 = vmax.f32 %v461_v43, 0.0  ;;  %v447_v53 = vmul.f32 %v431_v47, %v7100_v41  ;;  %v448_v54 = vmul.f32 %v431_v47, %v7105_v42  ;;  %v7247_v56 = vrot.slane %v7130_v57, 5  ;;  %v1102_v1 = vpop.permute.xlu0 %1101 }
  0xc4   : > { %6480 = vmatprep.subr.bf16.mxu0 %v6919_v22  ;;  %4965 = vperm.xlu1 %6858, %v7037_v27   ;;  %v1146_v27 = vmax.f32 %v1130_v35, 0.0  ;;  %v478_v52 = vmax.f32 %v462_v44, 0.0  ;;  %v1148_v3 = vmax.f32 %v1132_v59, 0.0  ;;  %v1149_v4 = vmax.f32 %v1133_v60, 0.0 }
  0xc5   : > { %v463_v63 = vadd.f32 %v447_v53, %v7112_v45  ;;  %v464_v0 = vadd.f32 %v448_v54, %v7117_v46  ;;  %v1118_v8 = vmul.f32 %v1102_v1, %v7100_v41  ;;  %v1119_v9 = vmul.f32 %v1102_v1, %v7105_v42 }
  0xc6   : > { %v6508_v61 = vpack.c.bf16 %v1147_v48, %v1146_v27  ;;  %v6487_v62 = vpack.c.bf16 %v478_v52, %v477_v51  ;;  %v6511_v18 = vpack.c.bf16 %v1149_v4, %v1148_v3  ;;  %v7296_v47 = vrot.slane %v7130_v57, 7 }
  0xc7   : > { %6095 = vmatmul.mubr.msk.f32.vlgmr.msra.gmra.mrb[0].mxu1 %vm483_vm2, %v7180_v55  ;;  %v1724_v58 = vpop.permute.xlu1 %1723  ;;  %v479_v6 = vmax.f32 %v463_v63, 0.0  ;;  %v480_v7 = vmax.f32 %v464_v0, 0.0  ;;  %v1134_v23 = vadd.f32 %v1118_v8, %v7112_v45  ;;  %v1135_v21 = vadd.f32 %v1119_v9, %v7117_v46 }
  0xc8   : > { %6503 = vmatpush3.bf16.msra.mxu1 %v6502_v14  ;;  %6101 = vmatprep.mubr.msk.f32.mxu1 %vm6920_vm1, %v6921_v26  ;;  %v7272_v14 = vrot.slane %v7130_v57, 6  ;;  %v2370_v17 = vpop.permute.xlu0 %2369 }
  0xc9   : > { %6504 = vmatprep.subr.bf16.mxu1 %v6919_v22  ;;  %6860 = vset.pattern.permute.xlu1 %v6926_v38  ;;  %v1752_v38 = vmul.f32 %v1724_v58, %v7100_v41  ;;  %v6490_v20 = vpack.c.bf16 %v480_v7, %v479_v6  ;;  %v2398_v28 = vmul.f32 %v2370_v17, %v7100_v41  ;;  %v1150_v36 = vmax.f32 %v1134_v23, 0.0 }
  0xca   : > { %6046 = vmatmul.mubr.msk.f32.vlgmr.msra.gmra.mrb[0].mxu0 %vm483_vm2, %v7202_v10  ;;  %4323 = vperm.xlu1 %6860, %v7041_v29   ;;  %v1753_v29 = vmul.f32 %v1724_v58, %v7105_v42  ;;  %v2399_v13 = vmul.f32 %v2370_v17, %v7105_v42 }
  0xcb   : > { %6482 = vmatpush3.bf16.msra.mxu0 %v6481_v15  ;;  %6052 = vmatprep.mubr.msk.f32.mxu0 %vm6920_vm1, %v6921_v26  ;;  %v1720_v5 = vpop.permute.xlu1 %1719  ;;  %v1768_v11 = vadd.f32 %v1752_v38, %v7112_v45  ;;  %v2414_v44 = vadd.f32 %v2398_v28, %v7112_v45 }
  0xcc   : > { %6483 = vmatprep.subr.bf16.mxu0 %v6919_v22  ;;  %v1769_v12 = vadd.f32 %v1753_v29, %v7117_v46  ;;  %v1750_v15 = vmul.f32 %v1720_v5, %v7100_v41  ;;  %v1751_v16 = vmul.f32 %v1720_v5, %v7105_v42  ;;  %v2415_v19 = vadd.f32 %v2399_v13, %v7117_v46 }
  0xcd   : > { %v1784_v24 = vmax.f32 %v1768_v11, 0.0  ;;  %v2430_v58 = vmax.f32 %v2414_v44, 0.0 }
  0xce   : > { %4327 = vperm.xlu1 %6860, %v7045_v31   ;;  %v1785_v25 = vmax.f32 %v1769_v12, 0.0  ;;  %v1766_v32 = vadd.f32 %v1750_v15, %v7112_v45  ;;  %v1767_v35 = vadd.f32 %v1751_v16, %v7117_v46  ;;  %v2431_v59 = vmax.f32 %v2415_v19, 0.0 }
  0xcf   : > { %6102 = vmatmul.mubr.msk.f32.vlgmr.msra.gmra.mrb[0].mxu1 %vm483_vm2, %v7202_v10 }
  0xd0   : > { %6506 = vmatpush3.bf16.msra.mxu1 %v6505_v37  ;;  %6108 = vmatprep.mubr.msk.f32.mxu1 %vm6920_vm1, %v6921_v26  ;;  %v2366_v30 = vpop.permute.xlu1 %2365  ;;  %v1151_v37 = vmax.f32 %v1135_v21, 0.0  ;;  %v6517_v43 = vpack.c.bf16 %v1785_v25, %v1784_v24  ;;  %v1782_v27 = vmax.f32 %v1766_v32, 0.0  ;;  %v1783_v48 = vmax.f32 %v1767_v35, 0.0 }
  0xd1   : > { %6507 = vmatprep.subr.bf16.mxu1 %v6919_v22  ;;  %v2396_v49 = vmul.f32 %v2366_v30, %v7100_v41  ;;  %v2397_v50 = vmul.f32 %v2366_v30, %v7105_v42  ;;  %v6541_v0 = vpack.c.bf16 %v2431_v59, %v2430_v58 }
  0xd2   : > { %6053 = vmatmul.mubr.msk.f32.vlgmr.msra.gmra.mrb[0].mxu0 %vm483_vm2, %v7225_v34  ;;  %6862 = vset.pattern.permute.xlu1 %v6927_v39  ;;  %v6514_v54 = vpack.c.bf16 %v1151_v37, %v1150_v36  ;;  %v6520_v39 = vpack.c.bf16 %v1783_v48, %v1782_v27 }
  0xd3   : > { %6485 = vmatpush3.bf16.msra.mxu0 %v6484_v40  ;;  %6059 = vmatprep.mubr.msk.f32.mxu0 %vm6920_vm1, %v6921_v26  ;;  %v1728_v40 = vpop.permute.xlu0 %1727  ;;  %v2412_v60 = vadd.f32 %v2396_v49, %v7112_v45 }
  0xd4   : > { %6486 = vmatprep.subr.bf16.mxu0 %v6919_v22  ;;  %4973 = vperm.xlu1 %6862, %v7045_v31   ;;  %v2374_v51 = vpop.permute.xlu1 %2373  ;;  %v1754_v52 = vmul.f32 %v1728_v40, %v7100_v41  ;;  %v1755_v53 = vmul.f32 %v1728_v40, %v7105_v42 }
  0xd5   : > { %v2428_v1 = vmax.f32 %v2412_v60, 0.0  ;;  %v2400_v6 = vmul.f32 %v2374_v51, %v7100_v41  ;;  %v2401_v7 = vmul.f32 %v2374_v51, %v7105_v42 }
  0xd6   : > { %v1770_v31 = vadd.f32 %v1754_v52, %v7112_v45 }
  0xd7   : > { %6109 = vmatmul.mubr.msk.f32.vlgmr.msra.gmra.mrb[0].mxu1 %vm483_vm2, %v7225_v34  ;;  %v2378_v12 = vpop.permute.xlu0 %2377  ;;  %v2416_v16 = vadd.f32 %v2400_v6, %v7112_v45  ;;  %v2417_v17 = vadd.f32 %v2401_v7, %v7117_v46 }
  0xd8   : > { %6509 = vmatpush3.bf16.msra.mxu1 %v6508_v61  ;;  %6115 = vmatprep.mubr.msk.f32.mxu1 %vm6920_vm1, %v6921_v26  ;;  %v2413_v61 = vadd.f32 %v2397_v50, %v7117_v46  ;;  %v1786_v4 = vmax.f32 %v1770_v31, 0.0 }
  0xd9   : > { %6510 = vmatprep.subr.bf16.mxu1 %v6919_v22  ;;  %v1732_v63 = vpop.permute.xlu1 %1731  ;;  %4977 = vperm.xlu1 %6862, %v7049_v33   ;;  %v2432_v13 = vmax.f32 %v2416_v16, 0.0  ;;  %v2433_v30 = vmax.f32 %v2417_v17, 0.0 }
  0xda   : > { %6060 = vmatmul.mubr.msk.f32.vlgmr.msra.gmra.mrb[0].mxu0 %vm483_vm2, %v7247_v56  ;;  %v2429_v38 = vmax.f32 %v2413_v61, 0.0  ;;  %v1756_v29 = vmul.f32 %v1732_v63, %v7100_v41  ;;  %v1757_v3 = vmul.f32 %v1732_v63, %v7105_v42 }
  0xdb   : > { %6488 = vmatpush3.bf16.msra.mxu0 %v6487_v62  ;;  %6066 = vmatprep.mubr.msk.f32.mxu0 %vm6920_vm1, %v6921_v26  ;;  %v1771_v62 = vadd.f32 %v1755_v53, %v7117_v46  ;;  %v1740_v44 = vpop.permute.xlu0 %1739 }
  0xdc   : > { %6489 = vmatprep.subr.bf16.mxu0 %v6919_v22  ;;  %v6544_v8 = vpack.c.bf16 %v2429_v38, %v2428_v1  ;;  %v1772_v9 = vadd.f32 %v1756_v29, %v7112_v45  ;;  %v1773_v11 = vadd.f32 %v1757_v3, %v7117_v46  ;;  %v1760_v53 = vmul.f32 %v1740_v44, %v7100_v41 }
  0xdd   : > { %v1787_v5 = vmax.f32 %v1771_v62, 0.0  ;;  %v1736_v33 = vpop.permute.xlu1 %1735 }
  0xde   : > { %v1788_v23 = vmax.f32 %v1772_v9, 0.0  ;;  %v1789_v21 = vmax.f32 %v1773_v11, 0.0  ;;  %v1758_v24 = vmul.f32 %v1736_v33, %v7100_v41  ;;  %v1759_v25 = vmul.f32 %v1736_v33, %v7105_v42 }
  0xdf   : > { %6116 = vmatmul.mubr.msk.f32.vlgmr.msra.gmra.mrb[0].mxu1 %vm483_vm2, %v7247_v56  ;;  %v6523_v15 = vpack.c.bf16 %v1787_v5, %v1786_v4  ;;  %v1776_v31 = vadd.f32 %v1760_v53, %v7112_v45  ;;  %v2390_v9 = vpop.permute.xlu0 %2389 }
  0xe0   : > { %6512 = vmatpush3.bf16.msra.mxu1 %v6511_v18  ;;  %6122 = vmatprep.mubr.msk.f32.mxu1 %vm6920_vm1, %v6921_v26  ;;  %v2402_v18 = vmul.f32 %v2378_v12, %v7100_v41  ;;  %v6526_v36 = vpack.c.bf16 %v1789_v21, %v1788_v23  ;;  %v1774_v37 = vadd.f32 %v1758_v24, %v7112_v45 }
  0xe1   : > { %6513 = vmatprep.subr.bf16.mxu1 %v6919_v22  ;;  %v1775_v40 = vadd.f32 %v1759_v25, %v7117_v46  ;;  %v1792_v29 = vmax.f32 %v1776_v31, 0.0  ;;  %v2408_v17 = vmul.f32 %v2390_v9, %v7100_v41 }
  0xe2   : > { %6067 = vmatmul.mubr.msk.f32.vlgmr.msra.gmra.mrb[0].mxu0 %vm483_vm2, %v7272_v14  ;;  %v2382_v28 = vpop.permute.xlu1 %2381  ;;  %v2418_v32 = vadd.f32 %v2402_v18, %v7112_v45  ;;  %v1790_v49 = vmax.f32 %v1774_v37, 0.0  ;;  %v2409_v18 = vmul.f32 %v2390_v9, %v7105_v42 }
  0xe3   : > { %6491 = vmatpush3.bf16.msra.mxu0 %v6490_v20  ;;  %6073 = vmatprep.mubr.msk.f32.mxu0 %vm6920_vm1, %v6921_v26  ;;  %v2403_v20 = vmul.f32 %v2378_v12, %v7105_v42  ;;  %v1791_v50 = vmax.f32 %v1775_v40, 0.0  ;;  %v2404_v51 = vmul.f32 %v2382_v28, %v7100_v41  ;;  %v2405_v52 = vmul.f32 %v2382_v28, %v7105_v42 }
  0xe4   : > { %6516 = vmatprep.subr.bf16.mxu0 %v6919_v22  ;;  %v2434_v19 = vmax.f32 %v2418_v32, 0.0  ;;  %v2425_v40 = vadd.f32 %v2409_v18, %v7117_v46 }
  0xe5   : > { %v2419_v35 = vadd.f32 %v2403_v20, %v7117_v46  ;;  %v6529_v59 = vpack.c.bf16 %v1791_v50, %v1790_v49  ;;  %v2420_v60 = vadd.f32 %v2404_v51, %v7112_v45  ;;  %v2421_v61 = vadd.f32 %v2405_v52, %v7117_v46 }
  0xe6   : > { %v2386_v48 = vpop.permute.xlu1 %2385  ;;  %v2441_v52 = vmax.f32 %v2425_v40, 0.0 }
  0xe7   : > { %6123 = vmatmul.mubr.msk.f32.vlgmr.msra.gmra.mrb[0].mxu1 %vm483_vm2, %v7272_v14  ;;  %v2435_v27 = vmax.f32 %v2419_v35, 0.0  ;;  %v2436_v63 = vmax.f32 %v2420_v60, 0.0  ;;  %v2406_v5 = vmul.f32 %v2386_v48, %v7100_v41  ;;  %v2407_v6 = vmul.f32 %v2386_v48, %v7105_v42 }
  0xe8   : > { %6515 = vmatpush3.bf16.msra.mxu1 %v6514_v54  ;;  %6129 = vmatprep.mubr.msk.f32.mxu1 %vm6920_vm1, %v6921_v26  ;;  %v1761_v54 = vmul.f32 %v1740_v44, %v7105_v42 }
  0xe9   : > { %6540 = vmatprep.subr.bf16.mxu1 %v6919_v22  ;;  %v2423_v16 = vadd.f32 %v2407_v6, %v7117_v46 }
  0xea   : > { %6074 = vmatmul.mubr.msk.f32.vlgmr.msra.gmra.mrb[0].mxu0 %vm483_vm2, %v7296_v47  ;;  %v1777_v62 = vadd.f32 %v1761_v54, %v7117_v46 }
  0xeb   : > { %6518 = vmatpush3.bf16.msra.mxu0 %v6517_v43  ;;  %6136 = vmatprep.mubr.msk.f32.mxu0 %vm6920_vm1, %v6921_v26  ;;  %v6547_v43 = vpack.c.bf16 %v2433_v30, %v2432_v13  ;;  %v1744_v58 = vpop.permute.xlu1 %1743  ;;  %v2439_v28 = vmax.f32 %v2423_v16, 0.0  ;;  %v2424_v13 = vadd.f32 %v2408_v17, %v7112_v45  ;;  %v3016_v30 = vpop.permute.xlu0 %3015 }
  0xec   : > { %6519 = vmatprep.subr.bf16.mxu0 %v6919_v22  ;;  %v1762_v1 = vmul.f32 %v1744_v58, %v7100_v41  ;;  %v1763_v38 = vmul.f32 %v1744_v58, %v7105_v42  ;;  %v1793_v3 = vmax.f32 %v1777_v62, 0.0  ;;  %v3044_v44 = vmul.f32 %v3016_v30, %v7100_v41 }
  0xed   : > { %v2440_v51 = vmax.f32 %v2424_v13, 0.0 }
  0xee   : > { %6137 = vmatmul.mubr.msk.f32.vlgmr.msra.gmra.mrb[2].mxu0 %vm483_vm2, %v7136_v2  ;;  %v1778_v33 = vadd.f32 %v1762_v1, %v7112_v45  ;;  %v6532_v11 = vpack.c.bf16 %v1793_v3, %v1792_v29  ;;  %v3060_v54 = vadd.f32 %v3044_v44, %v7112_v45 }
  0xef   : > { %6521 = vmatpush3.bf16.msra.mxu0 %v6520_v39  ;;  %6143 = vmatprep.mubr.msk.f32.mxu0 %vm6920_vm1, %v6921_v26  ;;  %v6550_v39 = vpack.c.bf16 %v2435_v27, %v2434_v19  ;;  %v1748_v4 = vpop.permute.xlu1 %1747  ;;  %v3045_v19 = vmul.f32 %v3016_v30, %v7105_v42 }
  0xf0   : > { %6522 = vmatprep.subr.bf16.mxu0 %v6919_v22  ;;  %6130 = vmatmul.mubr.msk.f32.vlgmr.msra.gmra.mrb[0].mxu1 %vm483_vm2, %v7296_v47  ;;  %v1794_v20 = vmax.f32 %v1778_v33, 0.0  ;;  %v1764_v21 = vmul.f32 %v1748_v4, %v7100_v41  ;;  %v1765_v24 = vmul.f32 %v1748_v4, %v7105_v42  ;;  %v3658_v4 = vpop.permute.xlu0 %3657 }
  0xf1   : > { %6542 = vmatpush3.bf16.msra.mxu1 %v6541_v0  ;;  %6192 = vmatprep.mubr.msk.f32.mxu1 %vm6920_vm1, %v6921_v26  ;;  %v2437_v0 = vmax.f32 %v2421_v61, 0.0  ;;  %v3061_v58 = vadd.f32 %v3045_v19, %v7117_v46  ;;  %v6559_v61 = vpack.c.bf16 %v2441_v52, %v2440_v51 }
  0xf2   : > { %6543 = vmatprep.subr.bf16.mxu1 %v6919_v22  ;;  %v1781_v37 = vadd.f32 %v1765_v24, %v7117_v46 }
  0xf3   : > { %v6553_v7 = vpack.c.bf16 %v2437_v0, %v2436_v63  ;;  %v3076_v63 = vmax.f32 %v3060_v54, 0.0  ;;  %v3077_v0 = vmax.f32 %v3061_v58, 0.0 }
  0xf4   : > { %6193 = vmatmul.mubr.msk.f32.vlgmr.msra.gmra.mrb[2].mxu1 %vm483_vm2, %v7136_v2  ;;  %v2394_v12 = vpop.permute.xlu1 %2393  ;;  %v1797_v50 = vmax.f32 %v1781_v37, 0.0 }
  0xf5   : > { %6545 = vmatpush3.bf16.msra.mxu1 %v6544_v8  ;;  %6199 = vmatprep.mubr.msk.f32.mxu1 %vm6920_vm1, %v6921_v26  ;;  %v1779_v8 = vadd.f32 %v1763_v38, %v7117_v46  ;;  %v2410_v27 = vmul.f32 %v2394_v12, %v7100_v41  ;;  %v2411_v48 = vmul.f32 %v2394_v12, %v7105_v42 }
  0xf6   : > { %6144 = vmatmul.mubr.msk.f32.vlgmr.msra.gmra.mrb[2].mxu0 %vm483_vm2, %v7130_v57  ;;  %6546 = vmatprep.subr.bf16.mxu1 %v6919_v22  ;;  %v6565_v33 = vpack.c.bf16 %v3077_v0, %v3076_v63 }
  0xf7   : > { %6524 = vmatpush3.bf16.msra.mxu0 %v6523_v15  ;;  %6150 = vmatprep.mubr.msk.f32.mxu0 %vm6920_vm1, %v6921_v26  ;;  %v2422_v15 = vadd.f32 %v2406_v5, %v7112_v45  ;;  %v1795_v23 = vmax.f32 %v1779_v8, 0.0  ;;  %v3688_v8 = vmul.f32 %v3658_v4, %v7100_v41 }
  0xf8   : > { %6525 = vmatprep.subr.bf16.mxu0 %v6919_v22 }
  0xf9   : > { %v2438_v25 = vmax.f32 %v2422_v15, 0.0  ;;  %v3662_v32 = vpop.permute.xlu1 %3661  ;;  %v6535_v35 = vpack.c.bf16 %v1795_v23, %v1794_v20  ;;  %v3689_v15 = vmul.f32 %v3658_v4, %v7105_v42  ;;  %v3704_v24 = vadd.f32 %v3688_v8, %v7112_v45 }
  0xfa   : > { %v3690_v29 = vmul.f32 %v3662_v32, %v7100_v41  ;;  %v3691_v3 = vmul.f32 %v3662_v32, %v7105_v42 }
  0xfb   : > { %v3720_v37 = vmax.f32 %v3704_v24, 0.0 }
  0xfc   : > { %6200 = vmatmul.mubr.msk.f32.vlgmr.msra.gmra.mrb[2].mxu1 %vm483_vm2, %v7130_v57  ;;  %v3707_v12 = vadd.f32 %v3691_v3, %v7117_v46 }
  0xfd   : > { %6548 = vmatpush3.bf16.msra.mxu1 %v6547_v43  ;;  %6206 = vmatprep.mubr.msk.f32.mxu1 %vm6920_vm1, %v6921_v26  ;;  %v6556_v43 = vpack.c.bf16 %v2439_v28, %v2438_v25  ;;  %v3705_v25 = vadd.f32 %v3689_v15, %v7117_v46 }
  0xfe   : > { %6151 = vmatmul.mubr.msk.f32.vlgmr.msra.gmra.mrb[2].mxu0 %vm483_vm2, %v7180_v55  ;;  %6549 = vmatprep.subr.bf16.mxu1 %v6919_v22  ;;  %v3012_v53 = vpop.permute.xlu1 %3011 }
  0xff   : > { %6527 = vmatpush3.bf16.msra.mxu0 %v6526_v36  ;;  %6157 = vmatprep.mubr.msk.f32.mxu0 %vm6920_vm1, %v6921_v26  ;;  %v1780_v36 = vadd.f32 %v1764_v21, %v7112_v45  ;;  %v3042_v31 = vmul.f32 %v3012_v53, %v7100_v41  ;;  %v3043_v62 = vmul.f32 %v3012_v53, %v7105_v42  ;;  %v3723_v21 = vmax.f32 %v3707_v12, 0.0 }
 0x100   : > { %6528 = vmatprep.subr.bf16.mxu0 %v6919_v22  ;;  %v3721_v40 = vmax.f32 %v3705_v25, 0.0  ;;  %v7524_v25 = vld [vmem:[%s7773_s3 + $0x8] sm:$0xff] }
 0x101   : > { %v1796_v49 = vmax.f32 %v1780_v36, 0.0  ;;  %v3058_v5 = vadd.f32 %v3042_v31, %v7112_v45  ;;  %v3059_v6 = vadd.f32 %v3043_v62, %v7117_v46 }
 0x102   : > { %v6592_v51 = vpack.c.bf16 %v3721_v40, %v3720_v37  ;;  %v7534_v37 = vld [vmem:[%s7772_s2] sm:$0xff] }
 0x103   : > { %v6538_v60 = vpack.c.bf16 %v1797_v50, %v1796_v49  ;;  %v3074_v16 = vmax.f32 %v3058_v5, 0.0  ;;  %v3075_v17 = vmax.f32 %v3059_v6, 0.0 }
 0x104   : > { %6207 = vmatmul.mubr.msk.f32.vlgmr.msra.gmra.mrb[2].mxu1 %vm483_vm2, %v7180_v55 }
 0x105   : > { %6551 = vmatpush3.bf16.msra.mxu1 %v6550_v39  ;;  %6213 = vmatprep.mubr.msk.f32.mxu1 %vm6920_vm1, %v6921_v26  ;;  %v2427_v39 = vadd.f32 %v2411_v48, %v7117_v46  ;;  %v6568_v13 = vpack.c.bf16 %v3075_v17, %v3074_v16 }
 0x106   : > { %6158 = vmatmul.mubr.msk.f32.vlgmr.msra.gmra.mrb[2].mxu0 %vm483_vm2, %v7202_v10  ;;  %6552 = vmatprep.subr.bf16.mxu1 %v6919_v22 }
 0x107   : > { %6530 = vmatpush3.bf16.msra.mxu0 %v6529_v59  ;;  %6164 = vmatprep.mubr.msk.f32.mxu0 %vm6920_vm1, %v6921_v26  ;;  %v2426_v59 = vadd.f32 %v2410_v27, %v7112_v45  ;;  %v2443_v38 = vmax.f32 %v2427_v39, 0.0 }
 0x108   : > { %6531 = vmatprep.subr.bf16.mxu0 %v6919_v22 }
 0x109   : > { %v2442_v1 = vmax.f32 %v2426_v59, 0.0 }
 0x10b   : > { %v6562_v9 = vpack.c.bf16 %v2443_v38, %v2442_v1 }
 0x10c   : > { %6214 = vmatmul.mubr.msk.f32.vlgmr.msra.gmra.mrb[2].mxu1 %vm483_vm2, %v7202_v10 }
 0x10d   : > { %6554 = vmatpush3.bf16.msra.mxu1 %v6553_v7  ;;  %6220 = vmatprep.mubr.msk.f32.mxu1 %vm6920_vm1, %v6921_v26  ;;  %v3020_v7 = vpop.permute.xlu1 %3019 }
 0x10e   : > { %6165 = vmatmul.mubr.msk.f32.vlgmr.msra.gmra.mrb[2].mxu0 %vm483_vm2, %v7225_v34  ;;  %6555 = vmatprep.subr.bf16.mxu1 %v6919_v22  ;;  %v3046_v18 = vmul.f32 %v3020_v7, %v7100_v41  ;;  %v3047_v20 = vmul.f32 %v3020_v7, %v7105_v42 }
 0x10f   : > { %6533 = vmatpush3.bf16.msra.mxu0 %v6532_v11  ;;  %6171 = vmatprep.mubr.msk.f32.mxu0 %vm6920_vm1, %v6921_v26  ;;  %v3706_v11 = vadd.f32 %v3690_v29, %v7112_v45 }
 0x110   : > { %6534 = vmatprep.subr.bf16.mxu0 %v6919_v22  ;;  %v3062_v30 = vadd.f32 %v3046_v18, %v7112_v45  ;;  %v3063_v32 = vadd.f32 %v3047_v20, %v7117_v46 }
 0x111   : > { %v3722_v23 = vmax.f32 %v3706_v11, 0.0  ;;  %v3666_v28 = vpop.permute.xlu1 %3665 }
 0x112   : > { %v3079_v44 = vmax.f32 %v3063_v32, 0.0  ;;  %v3692_v19 = vmul.f32 %v3666_v28, %v7100_v41  ;;  %v3693_v27 = vmul.f32 %v3666_v28, %v7105_v42 }
 0x113   : > { %v6589_v36 = vpack.c.bf16 %v3723_v21, %v3722_v23 }
 0x114   : > { %6221 = vmatmul.mubr.msk.f32.vlgmr.msra.gmra.mrb[2].mxu1 %vm483_vm2, %v7225_v34  ;;  %v3708_v53 = vadd.f32 %v3692_v19, %v7112_v45  ;;  %v3709_v54 = vadd.f32 %v3693_v27, %v7117_v46 }
 0x115   : > { %6557 = vmatpush3.bf16.msra.mxu1 %v6556_v43  ;;  %6227 = vmatprep.mubr.msk.f32.mxu1 %vm6920_vm1, %v6921_v26  ;;  %v3078_v43 = vmax.f32 %v3062_v30, 0.0  ;;  %v3670_v48 = vpop.permute.xlu1 %3669 }
 0x116   : > { %6172 = vmatmul.mubr.msk.f32.vlgmr.msra.gmra.mrb[2].mxu0 %vm483_vm2, %v7247_v56  ;;  %6558 = vmatprep.subr.bf16.mxu1 %v6919_v22  ;;  %v3694_v1 = vmul.f32 %v3670_v48, %v7100_v41  ;;  %v3695_v38 = vmul.f32 %v3670_v48, %v7105_v42 }
 0x117   : > { %6536 = vmatpush3.bf16.msra.mxu0 %v6535_v35  ;;  %6178 = vmatprep.mubr.msk.f32.mxu0 %vm6920_vm1, %v6921_v26  ;;  %v3024_v35 = vpop.permute.xlu0 %3023  ;;  %v6571_v52 = vpack.c.bf16 %v3079_v44, %v3078_v43  ;;  %v7540_v43 = vld [vmem:[%s7772_s2 + $0x8] sm:$0xff] }
 0x118   : > { %6537 = vmatprep.subr.bf16.mxu0 %v6919_v22  ;;  %v3048_v49 = vmul.f32 %v3024_v35, %v7100_v41  ;;  %v3049_v50 = vmul.f32 %v3024_v35, %v7105_v42  ;;  %v3711_v8 = vadd.f32 %v3695_v38, %v7117_v46 }
 0x119   : > { %v3028_v39 = vpop.permute.xlu1 %3027 }
 0x11a   : > { %v3064_v58 = vadd.f32 %v3048_v49, %v7112_v45  ;;  %v3065_v59 = vadd.f32 %v3049_v50, %v7117_v46  ;;  %v3050_v31 = vmul.f32 %v3028_v39, %v7100_v41  ;;  %v3051_v62 = vmul.f32 %v3028_v39, %v7105_v42 }
 0x11b   : > { %v3674_v6 = vpop.permute.xlu0 %3673  ;;  %v3727_v20 = vmax.f32 %v3711_v8, 0.0 }
 0x11c   : > { %6228 = vmatmul.mubr.msk.f32.vlgmr.msra.gmra.mrb[2].mxu1 %vm483_vm2, %v7247_v56  ;;  %v3080_v63 = vmax.f32 %v3064_v58, 0.0  ;;  %v3081_v0 = vmax.f32 %v3065_v59, 0.0  ;;  %v3066_v4 = vadd.f32 %v3050_v31, %v7112_v45  ;;  %v3067_v5 = vadd.f32 %v3051_v62, %v7117_v46 }
 0x11d   : > { %6560 = vmatpush3.bf16.msra.mxu1 %v6559_v61  ;;  %6234 = vmatprep.mubr.msk.f32.mxu1 %vm6920_vm1, %v6921_v26  ;;  %v3725_v61 = vmax.f32 %v3709_v54, 0.0  ;;  %v3032_v29 = vpop.permute.xlu1 %3031  ;;  %v3697_v11 = vmul.f32 %v3674_v6, %v7105_v42 }
 0x11e   : > { %6179 = vmatmul.mubr.msk.f32.vlgmr.msra.gmra.mrb[2].mxu0 %vm483_vm2, %v7272_v14  ;;  %6561 = vmatprep.subr.bf16.mxu1 %v6919_v22  ;;  %v6574_v7 = vpack.c.bf16 %v3081_v0, %v3080_v63  ;;  %v3082_v12 = vmax.f32 %v3066_v4, 0.0  ;;  %v3083_v15 = vmax.f32 %v3067_v5, 0.0  ;;  %v3052_v16 = vmul.f32 %v3032_v29, %v7100_v41 }
 0x11f   : > { %6539 = vmatpush3.bf16.msra.mxu0 %v6538_v60  ;;  %6185 = vmatprep.mubr.msk.f32.mxu0 %vm6920_vm1, %v6921_v26  ;;  %v3724_v60 = vmax.f32 %v3708_v53, 0.0  ;;  %v3053_v17 = vmul.f32 %v3032_v29, %v7105_v42  ;;  %v7518_v42 = vld [vmem:[%s7773_s3] sm:$0xff]  ;;  %v3036_v30 = vpop.permute.xlu0 %3035 }
 0x120   : > { %6564 = vmatprep.subr.bf16.mxu0 %v6919_v22  ;;  %v6577_v21 = vpack.c.bf16 %v3083_v15, %v3082_v12  ;;  %v3068_v24 = vadd.f32 %v7518_v42, %v3052_v16  ;;  %v3054_v19 = vmul.f32 %v7534_v37, %v3036_v30  ;;  %v3055_v27 = vmul.f32 %v7540_v43, %v3036_v30 }
 0x121   : > { %v6595_v3 = vpack.c.bf16 %v3725_v61, %v3724_v60  ;;  %v3069_v28 = vadd.f32 %v7524_v25, %v3053_v17 }
 0x122   : > { %v3084_v35 = vmax.f32 %v3068_v24, 0.0  ;;  %v3070_v53 = vadd.f32 %v7518_v42, %v3054_v19  ;;  %v3071_v54 = vadd.f32 %v7524_v25, %v3055_v27 }
 0x124   : > { %6235 = vmatmul.mubr.msk.f32.vlgmr.msra.gmra.mrb[2].mxu1 %vm483_vm2, %v7272_v14  ;;  %v3086_v61 = vmax.f32 %v3070_v53, 0.0  ;;  %v3087_v31 = vmax.f32 %v3071_v54, 0.0 }
 0x125   : > { %6563 = vmatpush3.bf16.msra.mxu1 %v6562_v9  ;;  %6241 = vmatprep.mubr.msk.f32.mxu1 %vm6920_vm1, %v6921_v26  ;;  %v3696_v9 = vmul.f32 %v3674_v6, %v7100_v41  ;;  %v3713_v41 = vadd.f32 %v3697_v11, %v7117_v46 }
 0x126   : > { %6186 = vmatmul.mubr.msk.f32.vlgmr.msra.gmra.mrb[2].mxu0 %vm483_vm2, %v7296_v47  ;;  %6588 = vmatprep.subr.bf16.mxu1 %v6919_v22  ;;  %v6583_v4 = vpack.c.bf16 %v3087_v31, %v3086_v61 }
 0x127   : > { %6566 = vmatpush3.bf16.msra.mxu0 %v6565_v33  ;;  %6248 = vmatprep.mubr.msk.f32.mxu0 %vm6920_vm1, %v6921_v26  ;;  %v3710_v33 = vadd.f32 %v3694_v1, %v7112_v45  ;;  %v3712_v23 = vadd.f32 %v3696_v9, %v7112_v45  ;;  %v3729_v32 = vmax.f32 %v3713_v41, 0.0  ;;  %v3686_v1 = vpop.permute.xlu0 %3685 }
 0x128   : > { %6567 = vmatprep.subr.bf16.mxu0 %v6919_v22 }
 0x129   : > { %v3726_v18 = vmax.f32 %v3710_v33, 0.0  ;;  %v3728_v45 = vmax.f32 %v3712_v23, 0.0  ;;  %v3703_v33 = vmul.f32 %v7540_v43, %v3686_v1 }
 0x12a   : > { %6249 = vmatmul.mubr.msk.f32.vlgmr.msra.gmra.mrb[4].mxu0 %vm483_vm2, %v7136_v2 }
 0x12b   : > { %6569 = vmatpush3.bf16.msra.mxu0 %v6568_v13  ;;  %6255 = vmatprep.mubr.msk.f32.mxu0 %vm6920_vm1, %v6921_v26  ;;  %v6598_v13 = vpack.c.bf16 %v3727_v20, %v3726_v18  ;;  %v6601_v50 = vpack.c.bf16 %v3729_v32, %v3728_v45  ;;  %v4304_v16 = vpop.permute.xlu0 %4303  ;;  %v3719_v20 = vadd.f32 %v7524_v25, %v3703_v33 }
 0x12c   : > { %6570 = vmatprep.subr.bf16.mxu0 %v6919_v22  ;;  %6242 = vmatmul.mubr.msk.f32.vlgmr.msra.gmra.mrb[2].mxu1 %vm483_vm2, %v7296_v47  ;;  %v4334_v23 = vmul.f32 %v7534_v37, %v4304_v16 }
 0x12d   : > { %6590 = vmatpush3.bf16.msra.mxu1 %v6589_v36  ;;  %6304 = vmatprep.mubr.msk.f32.mxu1 %vm6920_vm1, %v6921_v26  ;;  %v3085_v36 = vmax.f32 %v3069_v28, 0.0  ;;  %v4335_v28 = vmul.f32 %v7540_v43, %v4304_v16  ;;  %v3735_v32 = vmax.f32 %v3719_v20, 0.0 }
 0x12e   : > { %6591 = vmatprep.subr.bf16.mxu1 %v6919_v22 }
 0x12f   : > { %v6580_v49 = vpack.c.bf16 %v3085_v36, %v3084_v35  ;;  %v4350_v36 = vadd.f32 %v7518_v42, %v4334_v23  ;;  %v4351_v19 = vadd.f32 %v7524_v25, %v4335_v28 }
 0x130   : > { %6305 = vmatmul.mubr.msk.f32.vlgmr.msra.gmra.mrb[4].mxu1 %vm483_vm2, %v7136_v2 }
 0x131   : > { %6593 = vmatpush3.bf16.msra.mxu1 %v6592_v51  ;;  %6311 = vmatprep.mubr.msk.f32.mxu1 %vm6920_vm1, %v6921_v26  ;;  %v4367_v53 = vmax.f32 %v4351_v19, 0.0 }
 0x132   : > { %6256 = vmatmul.mubr.msk.f32.vlgmr.msra.gmra.mrb[4].mxu0 %vm483_vm2, %v7130_v57  ;;  %6594 = vmatprep.subr.bf16.mxu1 %v6919_v22 }
 0x133   : > { %6572 = vmatpush3.bf16.msra.mxu0 %v6571_v52  ;;  %6262 = vmatprep.mubr.msk.f32.mxu0 %vm6920_vm1, %v6921_v26 }
 0x134   : > { %6573 = vmatprep.subr.bf16.mxu0 %v6919_v22 }
 0x138   : > { %6312 = vmatmul.mubr.msk.f32.vlgmr.msra.gmra.mrb[4].mxu1 %vm483_vm2, %v7130_v57  ;;  %v3678_v57 = vpop.permute.xlu1 %3677 }
 0x139   : > { %6596 = vmatpush3.bf16.msra.mxu1 %v6595_v3  ;;  %6318 = vmatprep.mubr.msk.f32.mxu1 %vm6920_vm1, %v6921_v26  ;;  %v3698_v40 = vmul.f32 %v7534_v37, %v3678_v57  ;;  %v3699_v44 = vmul.f32 %v7540_v43, %v3678_v57 }
 0x13a   : > { %6263 = vmatmul.mubr.msk.f32.vlgmr.msra.gmra.mrb[4].mxu0 %vm483_vm2, %v7180_v55  ;;  %6597 = vmatprep.subr.bf16.mxu1 %v6919_v22 }
 0x13b   : > { %6575 = vmatpush3.bf16.msra.mxu0 %v6574_v7  ;;  %6269 = vmatprep.mubr.msk.f32.mxu0 %vm6920_vm1, %v6921_v26  ;;  %v3714_v51 = vadd.f32 %v7518_v42, %v3698_v40  ;;  %v3715_v52 = vadd.f32 %v7524_v25, %v3699_v44  ;;  %v3702_v7 = vmul.f32 %v7534_v37, %v3686_v1 }
 0x13c   : > { %6576 = vmatprep.subr.bf16.mxu0 %v6919_v22  ;;  %v3682_v46 = vpop.permute.xlu1 %3681 }
 0x13d   : > { %v3730_v58 = vmax.f32 %v3714_v51, 0.0  ;;  %v3731_v59 = vmax.f32 %v3715_v52, 0.0  ;;  %v3700_v63 = vmul.f32 %v7534_v37, %v3682_v46  ;;  %v3701_v0 = vmul.f32 %v7540_v43, %v3682_v46 }
 0x13e   : > { %v3718_v18 = vadd.f32 %v7518_v42, %v3702_v7  ;;  %v4366_v51 = vmax.f32 %v4350_v36, 0.0 }
 0x13f   : > { %v6604_v38 = vpack.c.bf16 %v3731_v59, %v3730_v58  ;;  %v3716_v5 = vadd.f32 %v7518_v42, %v3700_v63  ;;  %v3717_v6 = vadd.f32 %v7524_v25, %v3701_v0  ;;  %v4958_v0 = vpop.permute.xlu0 %4957 }
 0x140   : > { %6319 = vmatmul.mubr.msk.f32.vlgmr.msra.gmra.mrb[4].mxu1 %vm483_vm2, %v7180_v55  ;;  %v3040_v48 = vpop.permute.xlu1 %3039  ;;  %v3734_v45 = vmax.f32 %v3718_v18, 0.0  ;;  %v6616_v31 = vpack.c.bf16 %v4367_v53, %v4366_v51 }
 0x141   : > { %6599 = vmatpush3.bf16.msra.mxu1 %v6598_v13  ;;  %6325 = vmatprep.mubr.msk.f32.mxu1 %vm6920_vm1, %v6921_v26  ;;  %v3056_v39 = vmul.f32 %v7534_v37, %v3040_v48  ;;  %v3057_v60 = vmul.f32 %v7540_v43, %v3040_v48  ;;  %v3732_v17 = vmax.f32 %v3716_v5, 0.0  ;;  %v3733_v57 = vmax.f32 %v3717_v6, 0.0 }
 0x142   : > { %6270 = vmatmul.mubr.msk.f32.vlgmr.msra.gmra.mrb[4].mxu0 %vm483_vm2, %v7202_v10  ;;  %6600 = vmatprep.subr.bf16.mxu1 %v6919_v22  ;;  %v6610_v48 = vpack.c.bf16 %v3735_v32, %v3734_v45  ;;  %v4985_v5 = vmul.f32 %v7540_v43, %v4958_v0 }
 0x143   : > { %6578 = vmatpush3.bf16.msra.mxu0 %v6577_v21  ;;  %6276 = vmatprep.mubr.msk.f32.mxu0 %vm6920_vm1, %v6921_v26  ;;  %v3072_v29 = vadd.f32 %v7518_v42, %v3056_v39  ;;  %v3073_v3 = vadd.f32 %v7524_v25, %v3057_v60  ;;  %v6607_v30 = vpack.c.bf16 %v3733_v57, %v3732_v17  ;;  %v4320_v23 = vpop.permute.xlu0 %4319 }
 0x144   : > { %6579 = vmatprep.subr.bf16.mxu0 %v6919_v22  ;;  %v4308_v62 = vpop.permute.xlu1 %4307 }
 0x145   : > { %v3088_v9 = vmax.f32 %v3072_v29, 0.0  ;;  %v3089_v11 = vmax.f32 %v3073_v3, 0.0  ;;  %v4336_v12 = vmul.f32 %v7534_v37, %v4308_v62  ;;  %v4337_v15 = vmul.f32 %v7540_v43, %v4308_v62 }
 0x147   : > { %v6586_v41 = vpack.c.bf16 %v3089_v11, %v3088_v9  ;;  %v4352_v21 = vadd.f32 %v7518_v42, %v4336_v12  ;;  %v4353_v24 = vadd.f32 %v7524_v25, %v4337_v15  ;;  %v5001_v15 = vadd.f32 %v7524_v25, %v4985_v5 }
 0x148   : > { %6326 = vmatmul.mubr.msk.f32.vlgmr.msra.gmra.mrb[4].mxu1 %vm483_vm2, %v7202_v10  ;;  %v4954_v8 = vpop.permute.xlu1 %4953 }
 0x149   : > { %6602 = vmatpush3.bf16.msra.mxu1 %v6601_v50  ;;  %6332 = vmatprep.mubr.msk.f32.mxu1 %vm6920_vm1, %v6921_v26  ;;  %v4982_v46 = vmul.f32 %v7534_v37, %v4954_v8  ;;  %v4983_v35 = vmul.f32 %v7540_v43, %v4954_v8  ;;  %v4368_v40 = vmax.f32 %v4352_v21, 0.0  ;;  %v4369_v44 = vmax.f32 %v4353_v24, 0.0  ;;  %v6870_v24 = vld [vmem:[%s7000_s9] sm:$0xff] }
 0x14a   : > { %6277 = vmatmul.mubr.msk.f32.vlgmr.msra.gmra.mrb[4].mxu0 %vm483_vm2, %v7225_v34  ;;  %6603 = vmatprep.subr.bf16.mxu1 %v6919_v22  ;;  %v5017_v21 = vmax.f32 %v5001_v15, 0.0 }
 0x14b   : > { %6581 = vmatpush3.bf16.msra.mxu0 %v6580_v49  ;;  %6283 = vmatprep.mubr.msk.f32.mxu0 %vm6920_vm1, %v6921_v26  ;;  %v4998_v49 = vadd.f32 %v7518_v42, %v4982_v46  ;;  %v4999_v50 = vadd.f32 %v7524_v25, %v4983_v35  ;;  %v6613_v52 = vpack.c.bf16 %v4369_v44, %v4368_v40 }
 0x14c   : > { %6582 = vmatprep.subr.bf16.mxu0 %v6919_v22  ;;  %v4950_v13 = vpop.permute.xlu1 %4949  ;;  %v4342_v46 = vmul.f32 %v7534_v37, %v4320_v23 }
 0x14d   : > { %v4980_v59 = vmul.f32 %v7534_v37, %v4950_v13  ;;  %v4981_v39 = vmul.f32 %v7540_v43, %v4950_v13  ;;  %v5014_v60 = vmax.f32 %v4998_v49, 0.0  ;;  %v5015_v61 = vmax.f32 %v4999_v50, 0.0 }
 0x14e   : > { %v4358_v19 = vadd.f32 %v7518_v42, %v4342_v46 }
 0x14f   : > { %v4997_v29 = vadd.f32 %v7524_v25, %v4981_v39  ;;  %v6637_v3 = vpack.c.bf16 %v5015_v61, %v5014_v60 }
 0x150   : > { %6333 = vmatmul.mubr.msk.f32.vlgmr.msra.gmra.mrb[4].mxu1 %vm483_vm2, %v7225_v34  ;;  %v4312_v27 = vpop.permute.xlu1 %4311  ;;  %v4374_v53 = vmax.f32 %v4358_v19, 0.0 }
 0x151   : > { %6605 = vmatpush3.bf16.msra.mxu1 %v6604_v38  ;;  %6339 = vmatprep.mubr.msk.f32.mxu1 %vm6920_vm1, %v6921_v26  ;;  %v4338_v54 = vmul.f32 %v7534_v37, %v4312_v27  ;;  %v4339_v58 = vmul.f32 %v7540_v43, %v4312_v27  ;;  %v4996_v38 = vadd.f32 %v7518_v42, %v4980_v59  ;;  %v5013_v11 = vmax.f32 %v4997_v29, 0.0 }
 0x152   : > { %6284 = vmatmul.mubr.msk.f32.vlgmr.msra.gmra.mrb[4].mxu0 %vm483_vm2, %v7247_v56  ;;  %6606 = vmatprep.subr.bf16.mxu1 %v6919_v22 }
 0x153   : > { %6584 = vmatpush3.bf16.msra.mxu0 %v6583_v4  ;;  %6290 = vmatprep.mubr.msk.f32.mxu0 %vm6920_vm1, %v6921_v26  ;;  %v4354_v62 = vadd.f32 %v7518_v42, %v4338_v54  ;;  %v4355_v63 = vadd.f32 %v7524_v25, %v4339_v58  ;;  %v4984_v4 = vmul.f32 %v7534_v37, %v4958_v0  ;;  %v5012_v9 = vmax.f32 %v4996_v38, 0.0 }
 0x154   : > { %6585 = vmatprep.subr.bf16.mxu0 %v6919_v22  ;;  %v4316_v1 = vpop.permute.xlu1 %4315 }
 0x155   : > { %v4370_v6 = vmax.f32 %v4354_v62, 0.0  ;;  %v4371_v7 = vmax.f32 %v4355_v63, 0.0  ;;  %v4340_v33 = vmul.f32 %v7534_v37, %v4316_v1  ;;  %v4341_v8 = vmul.f32 %v7540_v43, %v4316_v1 }
 0x156   : > { %v5000_v12 = vadd.f32 %v7518_v42, %v4984_v4  ;;  %v6640_v20 = vpack.c.bf16 %v5013_v11, %v5012_v9 }
 0x157   : > { %v6619_v17 = vpack.c.bf16 %v4371_v7, %v4370_v6  ;;  %v4356_v57 = vadd.f32 %v7518_v42, %v4340_v33  ;;  %v4357_v18 = vadd.f32 %v7524_v25, %v4341_v8 }
 0x158   : > { %6340 = vmatmul.mubr.msk.f32.vlgmr.msra.gmra.mrb[4].mxu1 %vm483_vm2, %v7247_v56  ;;  %v4962_v16 = vpop.permute.xlu1 %4961 }
 0x159   : > { %6608 = vmatpush3.bf16.msra.mxu1 %v6607_v30  ;;  %6346 = vmatprep.mubr.msk.f32.mxu1 %vm6920_vm1, %v6921_v26  ;;  %v4372_v28 = vmax.f32 %v4356_v57, 0.0  ;;  %v4373_v13 = vmax.f32 %v4357_v18, 0.0  ;;  %v4986_v30 = vmul.f32 %v7534_v37, %v4962_v16  ;;  %v4987_v45 = vmul.f32 %v7540_v43, %v4962_v16 }
 0x15a   : > { %6291 = vmatmul.mubr.msk.f32.vlgmr.msra.gmra.mrb[4].mxu0 %vm483_vm2, %v7272_v14  ;;  %6609 = vmatprep.subr.bf16.mxu1 %v6919_v22 }
 0x15b   : > { %6587 = vmatpush3.bf16.msra.mxu0 %v6586_v41  ;;  %6297 = vmatprep.mubr.msk.f32.mxu0 %vm6920_vm1, %v6921_v26  ;;  %v5016_v41 = vmax.f32 %v5000_v12, 0.0  ;;  %v6622_v35 = vpack.c.bf16 %v4373_v13, %v4372_v28  ;;  %v5002_v40 = vadd.f32 %v7518_v42, %v4986_v30  ;;  %v5003_v44 = vadd.f32 %v7524_v25, %v4987_v45 }
 0x15c   : > { %6612 = vmatprep.subr.bf16.mxu0 %v6919_v22  ;;  %v4966_v32 = vpop.permute.xlu1 %4965 }
 0x15d   : > { %v6643_v36 = vpack.c.bf16 %v5017_v21, %v5016_v41  ;;  %v5018_v49 = vmax.f32 %v5002_v40, 0.0  ;;  %v5019_v50 = vmax.f32 %v5003_v44, 0.0  ;;  %v4988_v58 = vmul.f32 %v7534_v37, %v4966_v32 }
 0x15e   : > { %v4989_v59 = vmul.f32 %v7540_v43, %v4966_v32 }
 0x15f   : > { %v6646_v39 = vpack.c.bf16 %v5019_v50, %v5018_v49  ;;  %v5004_v0 = vadd.f32 %v7518_v42, %v4988_v58 }
 0x160   : > { %6347 = vmatmul.mubr.msk.f32.vlgmr.msra.gmra.mrb[4].mxu1 %vm483_vm2, %v7272_v14  ;;  %v5005_v1 = vadd.f32 %v7524_v25, %v4989_v59 }
 0x161   : > { %6611 = vmatpush3.bf16.msra.mxu1 %v6610_v48  ;;  %6353 = vmatprep.mubr.msk.f32.mxu1 %vm6920_vm1, %v6921_v26  ;;  %v4324_v48 = vpop.permute.xlu1 %4323 }
 0x162   : > { %6298 = vmatmul.mubr.msk.f32.vlgmr.msra.gmra.mrb[4].mxu0 %vm483_vm2, %v7296_v47  ;;  %6636 = vmatprep.subr.bf16.mxu1 %v6919_v22  ;;  %v4344_v51 = vmul.f32 %v7534_v37, %v4324_v48  ;;  %v5021_v7 = vmax.f32 %v5005_v1, 0.0 }
 0x163   : > { %6614 = vmatpush3.bf16.msra.mxu0 %v6613_v52  ;;  %6360 = vmatprep.mubr.msk.f32.mxu0 %vm6920_vm1, %v6921_v26  ;;  %v4345_v52 = vmul.f32 %v7540_v43, %v4324_v48 }
 0x164   : > { %6615 = vmatprep.subr.bf16.mxu0 %v6919_v22  ;;  %v4360_v60 = vadd.f32 %v7518_v42, %v4344_v51 }
 0x165   : > { %v4361_v61 = vadd.f32 %v7524_v25, %v4345_v52  ;;  %v4328_v63 = vpop.permute.xlu1 %4327 }
 0x166   : > { %6361 = vmatmul.mubr.msk.f32.vlgmr.msra.gmra.mrb[6].mxu0 %vm483_vm2, %v7136_v2  ;;  %v4346_v5 = vmul.f32 %v7534_v37, %v4328_v63  ;;  %v4347_v6 = vmul.f32 %v7540_v43, %v4328_v63 }
 0x167   : > { %6617 = vmatpush3.bf16.msra.mxu0 %v6616_v31  ;;  %6367 = vmatprep.mubr.msk.f32.mxu0 %vm6920_vm1, %v6921_v26  ;;  %v4970_v31 = vpop.permute.xlu0 %4969  ;;  %v4377_v4 = vmax.f32 %v4361_v61, 0.0 }
 0x168   : > { %6618 = vmatprep.subr.bf16.mxu0 %v6919_v22  ;;  %6354 = vmatmul.mubr.msk.f32.vlgmr.msra.gmra.mrb[4].mxu1 %vm483_vm2, %v7296_v47  ;;  %v4990_v38 = vmul.f32 %v7534_v37, %v4970_v31  ;;  %v4991_v29 = vmul.f32 %v7540_v43, %v4970_v31  ;;  %v4362_v11 = vadd.f32 %v7518_v42, %v4346_v5 }
 0x169   : > { %6638 = vmatpush3.bf16.msra.mxu1 %v6637_v3  ;;  %6416 = vmatprep.mubr.msk.f32.mxu1 %vm6920_vm1, %v6921_v26  ;;  %v4376_v3 = vmax.f32 %v4360_v60, 0.0  ;;  %v4363_v12 = vadd.f32 %v7524_v25, %v4347_v6  ;;  %v4974_v18 = vpop.permute.xlu1 %4973 }
 0x16a   : > { %6639 = vmatprep.subr.bf16.mxu1 %v6919_v22  ;;  %v5006_v33 = vadd.f32 %v7518_v42, %v4990_v38  ;;  %v5007_v8 = vadd.f32 %v7524_v25, %v4991_v29  ;;  %v4992_v41 = vmul.f32 %v7534_v37, %v4974_v18  ;;  %v4993_v21 = vmul.f32 %v7540_v43, %v4974_v18 }
 0x16b   : > { %v6628_v9 = vpack.c.bf16 %v4377_v4, %v4376_v3  ;;  %v4332_v16 = vpop.permute.xlu0 %4331 }
 0x16c   : > { %6417 = vmatmul.mubr.msk.f32.vlgmr.msra.gmra.mrb[6].mxu1 %vm483_vm2, %v7136_v2  ;;  %v4343_v2 = vmul.f32 %v7540_v43, %v4320_v23  ;;  %v5023_v57 = vmax.f32 %v5007_v8, 0.0  ;;  %v4379_v23 = vmax.f32 %v4363_v12, 0.0  ;;  %v5008_v30 = vadd.f32 %v7518_v42, %v4992_v41 }
 0x16d   : > { %6641 = vmatpush3.bf16.msra.mxu1 %v6640_v20  ;;  %6423 = vmatprep.mubr.msk.f32.mxu1 %vm6920_vm1, %v6921_v26  ;;  %v4378_v20 = vmax.f32 %v4362_v11, 0.0  ;;  %v5009_v45 = vadd.f32 %v7524_v25, %v4993_v21 }
 0x16e   : > { %6368 = vmatmul.mubr.msk.f32.vlgmr.msra.gmra.mrb[6].mxu0 %vm483_vm2, %v6870_v24  ;;  %6642 = vmatprep.subr.bf16.mxu1 %v6919_v22  ;;  %v4359_v27 = vadd.f32 %v7524_v25, %v4343_v2  ;;  %v4978_v2 = vpop.permute.xlu1 %4977 }
 0x16f   : > { %6620 = vmatpush3.bf16.msra.mxu0 %v6619_v17  ;;  %6374 = vmatprep.mubr.msk.f32.mxu0 %vm6920_vm1, %v6921_v26  ;;  %v5022_v17 = vmax.f32 %v5006_v33, 0.0  ;;  %v6631_v28 = vpack.c.bf16 %v4379_v23, %v4378_v20  ;;  %v4994_v19 = vmul.f32 %v7534_v37, %v4978_v2 }
 0x170   : > { %6621 = vmatprep.subr.bf16.mxu0 %v6919_v22  ;;  %v4375_v54 = vmax.f32 %v4359_v27, 0.0  ;;  %v4995_v27 = vmul.f32 %v7540_v43, %v4978_v2 }
 0x171   : > { %v6652_v13 = vpack.c.bf16 %v5023_v57, %v5022_v17  ;;  %v5010_v49 = vadd.f32 %v7518_v42, %v4994_v19 }
 0x172   : > { %v6625_v62 = vpack.c.bf16 %v4375_v54, %v4374_v53  ;;  %v5011_v50 = vadd.f32 %v7524_v25, %v4995_v27 }
 0x174   : > { %6424 = vmatmul.mubr.msk.f32.vlgmr.msra.gmra.mrb[6].mxu1 %vm483_vm2, %v6870_v24  ;;  %v4348_v24 = vmul.f32 %v7534_v37, %v4332_v16  ;;  %v5026_v37 = vmax.f32 %v5010_v49, 0.0 }
 0x175   : > { %6644 = vmatpush3.bf16.msra.mxu1 %v6643_v36  ;;  %6430 = vmatprep.mubr.msk.f32.mxu1 %vm6920_vm1, %v6921_v26  ;;  %v5025_v36 = vmax.f32 %v5009_v45, 0.0 }
 0x176   : > { %6375 = vmatmul.mubr.msk.f32.vlgmr.msra.gmra.mrb[6].mxu0 %vm483_vm2, %v7180_v55  ;;  %6645 = vmatprep.subr.bf16.mxu1 %v6919_v22  ;;  %v4364_v32 = vadd.f32 %v7518_v42, %v4348_v24 }
 0x177   : > { %6623 = vmatpush3.bf16.msra.mxu0 %v6622_v35  ;;  %6381 = vmatprep.mubr.msk.f32.mxu0 %vm6920_vm1, %v6921_v26  ;;  %v5024_v35 = vmax.f32 %v5008_v30, 0.0 }
 0x178   : > { %6624 = vmatprep.subr.bf16.mxu0 %v6919_v22  ;;  %v4380_v40 = vmax.f32 %v4364_v32, 0.0 }
 0x17c   : > { %6431 = vmatmul.mubr.msk.f32.vlgmr.msra.gmra.mrb[6].mxu1 %vm483_vm2, %v7180_v55  ;;  %v5020_v55 = vmax.f32 %v5004_v0, 0.0 }
 0x17d   : > { %6647 = vmatpush3.bf16.msra.mxu1 %v6646_v39  ;;  %6437 = vmatprep.mubr.msk.f32.mxu1 %vm6920_vm1, %v6921_v26 }
 0x17e   : > { %6382 = vmatmul.mubr.msk.f32.vlgmr.msra.gmra.mrb[6].mxu0 %vm483_vm2, %v7202_v10  ;;  %6648 = vmatprep.subr.bf16.mxu1 %v6919_v22  ;;  %v6649_v15 = vpack.c.bf16 %v5021_v7, %v5020_v55  ;;  %v5594_v7 = vld [vmem:[#allocation2] sm:$0xff] }
 0x17f   : > { %6626 = vmatpush3.bf16.msra.mxu0 %v6625_v62  ;;  %6388 = vmatprep.mubr.msk.f32.mxu0 %vm6920_vm1, %v6921_v26 }
 0x180   : > { %6627 = vmatprep.subr.bf16.mxu0 %v6919_v22 }
 0x184   : > { %6438 = vmatmul.mubr.msk.f32.vlgmr.msra.gmra.mrb[6].mxu1 %vm483_vm2, %v7202_v10  ;;  %v4349_v10 = vmul.f32 %v7540_v43, %v4332_v16  ;;  %v5027_v43 = vmax.f32 %v5011_v50, 0.0  ;;  %v5645_v16 = vld [vmem:[%s7008_s18] sm:$0xff] (!%p5823_p8) }
 0x185   : > { %6650 = vmatpush3.bf16.msra.mxu1 %v6649_v15  ;;  %6444 = vmatprep.mubr.msk.f32.mxu1 %vm6920_vm1, %v6921_v26  ;;  %v5824_v15 = vld [vmem:[%s7774_s4] ss:$0 sm:$0xff] (!%p5823_p8) }
 0x186   : > { %6389 = vmatmul.mubr.msk.f32.vlgmr.msra.gmra.mrb[6].mxu0 %vm483_vm2, %v7225_v34  ;;  %6651 = vmatprep.subr.bf16.mxu1 %v6919_v22  ;;  %v4365_v46 = vadd.f32 %v7524_v25, %v4349_v10  ;;  %v6658_v42 = vpack.c.bf16 %v5027_v43, %v5026_v37 }
 0x187   : > { %6629 = vmatpush3.bf16.msra.mxu0 %v6628_v9  ;;  %6395 = vmatprep.mubr.msk.f32.mxu0 %vm6920_vm1, %v6921_v26 }
 0x188   : > { %6630 = vmatprep.subr.bf16.mxu0 %v6919_v22  ;;  %v4381_v44 = vmax.f32 %v4365_v46, 0.0 }
 0x18a   : > { %v6634_v48 = vpack.c.bf16 %v4381_v44, %v4380_v40 }
 0x18c   : > { %6445 = vmatmul.mubr.msk.f32.vlgmr.msra.gmra.mrb[6].mxu1 %vm483_vm2, %v7225_v34  ;;  %v6655_v34 = vpack.c.bf16 %v5025_v36, %v5024_v35 }
 0x18d   : > { %6653 = vmatpush3.bf16.msra.mxu1 %v6652_v13  ;;  %6451 = vmatprep.mubr.msk.f32.mxu1 %vm6920_vm1, %v6921_v26 }
 0x18e   : > { %6396 = vmatmul.mubr.msk.f32.vlgmr.msra.gmra.mrb[6].mxu0 %vm483_vm2, %v7247_v56  ;;  %6654 = vmatprep.subr.bf16.mxu1 %v6919_v22 }
 0x18f   : > { %6632 = vmatpush3.bf16.msra.mxu0 %v6631_v28  ;;  %6402 = vmatprep.mubr.msk.f32.mxu0 %vm6920_vm1, %v6921_v26 }
 0x190   : > { %6633 = vmatprep.subr.bf16.mxu0 %v6919_v22 }
 0x194   : > { %6452 = vmatmul.mubr.msk.f32.vlgmr.msra.gmra.mrb[6].mxu1 %vm483_vm2, %v7247_v56 }
 0x195   : > { %6656 = vmatpush3.bf16.msra.mxu1 %v6655_v34  ;;  %6458 = vmatprep.mubr.msk.f32.mxu1 %vm6920_vm1, %v6921_v26 }
 0x196   : > { %6403 = vmatmul.mubr.msk.f32.vlgmr.msra.gmra.mrb[6].mxu0 %vm483_vm2, %v7272_v14  ;;  %6657 = vmatprep.subr.bf16.mxu1 %v6919_v22 }
 0x197   : > { %6635 = vmatpush3.bf16.msra.mxu0 %v6634_v48  ;;  %6409 = vmatprep.mubr.msk.f32.mxu0 %vm6920_vm1, %v6921_v26 }
 0x19c   : > { %6459 = vmatmul.mubr.msk.f32.vlgmr.msra.gmra.mrb[6].mxu1 %vm483_vm2, %v7272_v14 }
 0x19d   : > { %6659 = vmatpush3.bf16.msra.mxu1 %v6658_v42  ;;  %6465 = vmatprep.mubr.msk.f32.mxu1 %vm6920_vm1, %v6921_v26 }
 0x19e   : > { %6410 = vmatmul.mubr.msk.f32.vlgmr.msra.gmra.mrb[6].mxu0 %vm483_vm2, %v7296_v47 }
 0x1a4   : > { %6466 = vmatmul.mubr.msk.f32.vlgmr.msra.gmra.mrb[6].mxu1 %vm483_vm2, %v7296_v47 }
 0x1bd   : > { %v1067_v22 = vpop.f32.mrb[0].mxu0 }
 0x1be   : > { %v6075_v56 = vpop.f32.mrb[1].mxu0 }
 0x1c3   : > { %v1713_v25 = vpop.f32.mrb[0].mxu1 }
 0x1c4   : > { %v5596_v51 = vrot.slane %v1713_v25, 7  ;;  %v6131_v52 = vpop.f32.mrb[1].mxu1 }
 0x1c6   : > { %v5617_v53 = vsel %vm5616_vm3, %v1067_v22, %v5596_v51 }
 0x1f9   : > { %v2359_v54 = vpop.f32.mrb[2].mxu0 }
 0x1fa   : > { %v5599_v14 = vrot.slane %v2359_v54, 6  ;;  %v6187_v58 = vpop.f32.mrb[3].mxu0 }
 0x1fc   : > { %v5619_v59 = vsel %vm5618_vm4, %v5617_v53, %v5599_v14 }
 0x1ff   : > { %v3005_v39 = vpop.f32.mrb[2].mxu1 }
 0x200   : > { %v5602_v60 = vrot.slane %v3005_v39, 5  ;;  %v6243_v61 = vpop.f32.mrb[3].mxu1 }
 0x202   : > { %v5621_v26 = vsel %vm5620_vm5, %v5619_v59, %v5602_v60 }
 0x235   : > { %v3651_v31 = vpop.f32.mrb[4].mxu0 }
 0x236   : > { %v5605_v47 = vrot.slane %v3651_v31, 4  ;;  %v6299_v62 = vpop.f32.mrb[5].mxu0 }
 0x238   : > { %v5623_v63 = vsel %vm5622_vm6, %v5621_v26, %v5605_v47 }
 0x23b   : > { %v4297_v0 = vpop.f32.mrb[4].mxu1 }
 0x23c   : > { %v5608_v1 = vrot.slane %v4297_v0, 3  ;;  %v6355_v38 = vpop.f32.mrb[5].mxu1 }
 0x23e   : > { %v5625_v29 = vsel %vm5624_vm7, %v5623_v63, %v5608_v1 }
 0x271   : > { %v4943_v3 = vpop.f32.mrb[6].mxu0 }
 0x272   : > { %v5611_v4 = vrot.slane %v4943_v3, 2  ;;  %v6411_v5 = vpop.f32.mrb[7].mxu0 }
 0x274   : > { %v5627_v6 = vsel %vm5626_vm8, %v5625_v29, %v5611_v4 }
 0x277   : > { %v5589_v55 = vpop.f32.mrb[6].mxu1  ;;  %5635 = sbr.rel (%p5823_p8) target bundleno = 676 (0x2a4), region = 52 }
 0x278   : > { %v5614_v33 = vrot.slane %v5589_v55, 1  ;;  %v6467_v8 = vpop.f32.mrb[7].mxu1 }
 0x27a   : > { %v5629_v9 = vsel %vm5628_vm9, %v5627_v6, %v5614_v33 }
 0x27b   : > { %v5630_v11 = vadd.f32 %v5629_v9, %v5594_v7 }
 0x27d   : > { %5631 = vst.msk [vmem:[#allocation2] sm:$0xff] %vm483_vm2, %v5630_v11 }
 0x284   : > { %v5636_v12 = vld [vmem:[#allocation2] sm:$0xff] }
 0x285   : > { %v5644_v17 = vmul.f32 %v5824_v15, %v5636_v12 }
 0x287   : > { %v5646_v57 = vadd.f32 %v5645_v16, %v5644_v17 }
 0x289   : > { %v5825_v18 = vmul.f32 -1.442695, %v5646_v57 }
 0x28b   : > { %6871 = vpow2.f32 %v5825_v18 }
 0x295   : > { %v6872_v20 = vpop.eup %6871 }
 0x296   : > { %v5650_v23 = vadd.f32 1.0, %v6872_v20 }
 0x298   : > { %6873 = vrcp.f32 %v5650_v23 }
 0x2a2   : > { %v6874_v41 = vpop.eup %6873 }
 0x2a3   : > { %5653 = vst.msk [vmem:[%s7013_s28] sm:$0xff] %vm483_vm2, %v6874_v41 }
 0x2a4 PF: > { %s16_s25 = sadd.s32 1, %s6913_s25   ;;  %s7777_s21 = smov %s6905_s23 }
 0x2a5   : > { %p13_p9 = scmp.ge.s32.totalorder %s16_s25, 6   ;;  %s7778_s22 = smov %s6909_s24 }
 0x2a6   : > { %s7779_s23 = smov %s7782_s26  ;;  %s7780_s24 = smov %s7786_s27 }
 0x2a7   :  { %15 = sbr.rel (!%p13_p9) target bundleno = 3 (0x3), region = 88 }

// kernel: generator_forward.7
= control target key start
LH: loop header
LB: loop body
LE: loop exit
PB: predicated region body
PF: predicated region fallthrough
CT: control target
= control target key end

     0   :  { %s7505_s23 = smov 0   ;;  %s7507_s24 = smov 0   ;;  %s8580_s0 = inlined_call_operand.vmem [shape: f32[16,16], index: 0, kind: input, shape index: {}]   ;;  %s8581_s1 = inlined_call_operand.vmem [shape: f32[2,2,8,8], index: 1, kind: input, shape index: {}]   ;;  %s8582_s2 = inlined_call_operand.vmem [shape: f32[16,1], index: 2, kind: input, shape index: {}]   ;;  %s8583_s3 = inlined_call_operand.vmem [shape: f32[16,1], index: 3, kind: input, shape index: {}]   ;;  %s8584_s4 = inlined_call_operand.<no memory space> [shape: f32[1,1], index: 4, kind: input, shape index: {}]   ;;  %s8585_s5 = inlined_call_operand.vmem [shape: f32[16,1], index: 5, kind: input, shape index: {}]   ;;  %s8586_s6 = inlined_call_operand.vmem [shape: f32[16,1], index: 6, kind: output, shape index: {}]  }
   0x1   :  { %v11_v0 = vstv %s8584_s4  ;;  %s7509_s25 = smov 0   ;;  %s7511_s26 = smov 0  }
   0x2   :  { %12 = vst [vmem:[#allocation3] sm:$0x1] %v11_v0  ;;  %s7513_s27 = smov 0  }
   0x3 LB: > { %s27_s4 = sadd.s32 1, %s7438_s25  ;;  %s30_s28 = sadd.s32 1, %s7442_s26  ;;  %s7446_s27 = sphi %s7513_s27, %s18_s27   ;;  %s7442_s26 = sphi %s7511_s26, %s8590_s26   ;;  %s7438_s25 = sphi %s7509_s25, %s8589_s25   ;;  %s7434_s24 = sphi %s7507_s24, %s8588_s24   ;;  %s7430_s23 = sphi %s7505_s23, %s8587_s23  }
   0x4   : > { %p28_p0 = scmp.ge.s32.totalorder %s27_s4, 2  ;;  %p6043_p1 = scmp.ge.s32.totalorder %s7446_s27, 1 }
   0x5   : > { %p249_p2 = scmp.lt.s32.totalorder %s7446_s27, 5 }
   0x6   : > { %s8592_s4 = smov (%p28_p0, %s27_s4), 0  ;;  %s8594_s28 = smov (!%p28_p0, %s30_s28), %s7442_s26 }
   0x7   : > { %p250_p3 = pnand %p6043_p1, %p249_p2  ;;  %p32_p4 = scmp.ge.s32.totalorder %s8594_s28, 2 }
   0x8   : > { %p289_p5 = scmp.lt.s32.totalorder (!%p250_p3), %s7430_s23, 1  ;;  %p295_p6 = scmp.lt.s32.totalorder (!%p250_p3), %s7434_s24, 1 }
   0x9   : > { %s8596_s28 = smov (%p32_p4, %s8594_s28), 0  ;;  %253 = sbr.rel (%p250_p3) target bundleno = 796 (0x31c), region = 44 }
   0xa   : > { %p6049_p7 = scmp.ne.s32.totalorder (!%p250_p3), %s7430_s23, 0 }
  0x10   : > { %s290_s29 = scalar_select %p289_p5, %s7430_s23, 1 }
  0x11   : > { %s8598_s24 = smov (!%p295_p6, %s7434_s24), 1  ;;  %312 = sbr.rel (%p6049_p7) target bundleno = 24 (0x18), region = 48 }
  0x12   : > { %s6044_s30 = sshll.u32 %s290_s29, 3  ;;  %s6045_s7 = sshll.u32 %s290_s29, 1  ;;  %vm313_vm0 = vcmask (!%p6049_p7), 7168   ;;  %v7448_v1 = vmov (!%p6049_p7), 0.0  }
  0x13   : > { %s7542_s10 = scalar_lea.vmem %s8580_s0, %s6044_s30  ;;  %s298_s11 = sadd.s32 %s6045_s7, %s8598_s24  ;;  %314 = vst.msk [vmem:[#allocation2] sm:$0xff] (!%p6049_p7), %vm313_vm0, %v7448_v1 }
  0x14   : > { %s6046_s12 = sshll.u32 %s298_s11, 3  ;;  %s6047_s13 = sshll.u32 %s8598_s24, 3 }
  0x15   : > { %s7547_s16 = scalar_lea.vmem %s8581_s1, %s6046_s12  ;;  %s7552_s19 = scalar_lea.vmem %s8585_s5, %s6047_s13 }
  0x16   : > { %s7557_s22 = scalar_lea.vmem %s8586_s6, %s6047_s13 }
  0x18 PF: > { %v7563_v2 = vld [vmem:[%s8582_s2] sm:$0xff]  ;;  %s7449_s8 = smov 1   ;;  %v7575_v4 = vld [vmem:[%s8582_s2 + $0x8] sm:$0xff]  ;;  %s7450_s14 = smov 2   ;;  %v7452_v6 = vmov 1966171168   ;;  %v326_v8 = vlaneseq }
  0x19   : > { %v7568_v3 = vld [vmem:[%s8583_s3] sm:$0xff]  ;;  %1052 = vrot.lane.b32.xlu0 %v7563_v2, %s7449_s8  ;;  %v7580_v5 = vld [vmem:[%s8583_s3 + $0x8] sm:$0xff]  ;;  %s7451_s15 = smov 3   ;;  %v324_v7 = vunpack.c.l.s4 %v7452_v6  ;;  %v7453_v24 = vmov 0.0|0.0   ;;  %vm7454_vm1 = vmmov 0   ;;  %v7455_v28 = vmov 0.0  }
  0x1a   : > { %1076 = vrot.lane.b32.xlu1 %v7568_v3, %s7449_s8  ;;  %v327_v10 = vshrl.u32 %v326_v8, 7  ;;  %v320_v12 = vld [vmem:[%s7547_s16] sm:$0xff]  ;;  %6759 = vmatprep.subr.bf16.mxu0 %v7453_v24  ;;  %vm461_vm2 = vcmask 130048   ;;  %s7456_s16 = smov 127   ;;  %s7457_s17 = smov 4   ;;  %vm5906_vm3 = vcmask 1040384  }
  0x1b   : > { %v325_v9 = vunpack.c.0.s8 %v324_v7  ;;  %6783 = vmatprep.subr.bf16.mxu1 %v7453_v24  ;;  %6315 = vmatprep.mubr.msk.f32.mxu0 %vm7454_vm1, %v7455_v28  ;;  %v7629_v34 = vld [vmem:[%s7542_s10] sm:$0xff]  ;;  %v322_v48 = vcombine.high %v320_v12, %v320_v12  ;;  %s7458_s18 = smov 5   ;;  %s7459_s20 = smov 126   ;;  %vm5908_vm4 = vcmask 1041408   ;;  %vm5910_vm5 = vcmask 1042432  }
  0x1c   : > { %v7597_v16 = vsub.s32 0, %v327_v10  ;;  %6371 = vmatprep.mubr.msk.f32.mxu1 %vm7454_vm1, %v7455_v28  ;;  %v7635_v40 = vrot.slane %v7629_v34, 1  ;;  %v7651_v47 = vrot.slane %v7629_v34, 2  ;;  %s7460_s21 = smov 125   ;;  %s7461_s24 = smov 6   ;;  %vm5912_vm6 = vcmask 1043456  }
  0x1d   : > { %1054 = vrot.lane.b32.xlu0 %v7575_v4, %s7449_s8  ;;  %v7592_v11 = vsub.s32 %v325_v9, %v327_v10  ;;  %s7462_s29 = smov 7   ;;  %s7463_s30 = smov 124   ;;  %vm5914_vm7 = vcmask 1044480   ;;  %vm5916_vm8 = vcmask 1045504   ;;  %vm5918_vm9 = vcmask 1046528  }
  0x1e   : > { %1078 = vrot.lane.b32.xlu1 %v7580_v5, %s7449_s8  ;;  %s7464_s7 = smov 123   ;;  %s7465_s8 = smov 122   ;;  %vm5921_vm10 = vcmask 7168  }
  0x1f   : > { %v329_v13 = vrot.slane %v320_v12, %v7592_v11  ;;  %v336_v50 = vrot.slane %v322_v48, %v7592_v11  ;;  %p6114_p8 = scmp.ne.s32.totalorder %s7430_s23, 1 }
  0x21   : > { %1744 = vrot.lane.b32.xlu0 %v7563_v2, %s7450_s14  ;;  %v337_v14 = vcombine.high %v329_v13, %v329_v13  ;;  %v345_v15 = vrot.slane %v329_v13, %v7592_v11  ;;  %v338_v54 = vcombine.high %v336_v50, %v336_v50  ;;  %v352_v57 = vrot.slane %v336_v50, %v7592_v11 }
  0x22   : > { %1746 = vrot.lane.b32.xlu1 %v7575_v4, %s7450_s14 }
  0x23   : > { %v359_v17 = vrot.slane %v337_v14, %v7592_v11  ;;  %v367_v18 = vcombine.high %v345_v15, %v345_v15  ;;  %v7604_v20 = vrot.slane %v345_v15, %v7597_v16  ;;  %v7671_v58 = vrot.slane %v352_v57, %v7597_v16 }
  0x24   : > { %v366_v63 = vrot.slane %v338_v54, %v7592_v11 }
  0x25   : > { %2434 = vrot.lane.b32.xlu0 %v7563_v2, %s7451_s15  ;;  %v7601_v19 = vrot.slane %v359_v17, %v7597_v16  ;;  %v7611_v23 = vrot.slane %v367_v18, %v7597_v16  ;;  %v411_v25 = vmul.f32 %v7604_v20, %v7563_v2  ;;  %v412_v29 = vmul.f32 %v7604_v20, %v7575_v4 }
  0x26   : > { %2436 = vrot.lane.b32.xlu1 %v7575_v4, %s7451_s15  ;;  %v369_v49 = vcombine.high %v359_v17, %v359_v17  ;;  %v7693_v10 = vrot.slane %v366_v63, %v7597_v16 }
  0x27   : > { %v413_v21 = vmul.f32 %v7601_v19, %v7563_v2  ;;  %v414_v22 = vmul.f32 %v7601_v19, %v7575_v4  ;;  %v427_v30 = vadd.f32 %v411_v25, %v7568_v3  ;;  %v415_v31 = vmul.f32 %v7611_v23, %v7563_v2 }
  0x28   : > { %v428_v35 = vadd.f32 %v412_v29, %v7580_v5  ;;  %v416_v36 = vmul.f32 %v7611_v23, %v7575_v4  ;;  %v7663_v53 = vrot.slane %v369_v49, %v7597_v16 }
  0x29   : > { %1766 = vrot.lane.b32.xlu0 %v7568_v3, %s7450_s14  ;;  %v429_v26 = vadd.f32 %v413_v21, %v7568_v3  ;;  %v430_v27 = vadd.f32 %v414_v22, %v7580_v5  ;;  %v443_v37 = vmax.f32 %v427_v30, 0.0  ;;  %v431_v42 = vadd.f32 %v415_v31, %v7568_v3 }
  0x2a   : > { %1768 = vrot.lane.b32.xlu1 %v7580_v5, %s7450_s14  ;;  %v444_v39 = vmax.f32 %v428_v35, 0.0  ;;  %v432_v43 = vadd.f32 %v416_v36, %v7580_v5 }
  0x2b   : > { %v445_v32 = vmax.f32 %v429_v26, 0.0  ;;  %v446_v33 = vmax.f32 %v430_v27, 0.0  ;;  %v447_v44 = vmax.f32 %v431_v42, 0.0 }
  0x2c   : > { %v6763_v41 = vpack.c.bf16 %v444_v39, %v443_v37  ;;  %v448_v45 = vmax.f32 %v432_v43, 0.0 }
  0x2d   : > { %2456 = vrot.lane.b32.xlu0 %v7568_v3, %s7451_s15  ;;  %v6760_v38 = vpack.c.bf16 %v446_v33, %v445_v32 }
  0x2e   : > { %2458 = vrot.lane.b32.xlu1 %v7580_v5, %s7451_s15  ;;  %v6766_v46 = vpack.c.bf16 %v448_v45, %v447_v44 }
  0x2f   : > { %6761 = vmatpush3.bf16.msra.mxu0 %v6760_v38  ;;  %v368_v38 = vcombine.high %v352_v57, %v352_v57  ;;  %v370_v57 = vcombine.high %v366_v63, %v366_v63 }
  0x30   : > { %6762 = vmatprep.subr.bf16.mxu0 %v7453_v24 }
  0x32   : > { %6316 = vmatmul.mubr.msk.f32.vlgmr.msra.gmra.mrb[0].mxu0 %vm461_vm2, %v7635_v40 }
  0x33   : > { %6764 = vmatpush3.bf16.msra.mxu0 %v6763_v41  ;;  %6322 = vmatprep.mubr.msk.f32.mxu0 %vm7454_vm1, %v7455_v28 }
  0x34   : > { %6765 = vmatprep.subr.bf16.mxu0 %v7453_v24 }
  0x3a   : > { %6323 = vmatmul.mubr.msk.f32.vlgmr.msra.gmra.mrb[0].mxu0 %vm461_vm2, %v7629_v34 }
  0x3b   : > { %6767 = vmatpush3.bf16.msra.mxu0 %v6766_v46  ;;  %6329 = vmatprep.mubr.msk.f32.mxu0 %vm7454_vm1, %v7455_v28 }
  0x3c   : > { %6768 = vmatprep.subr.bf16.mxu0 %v7453_v24 }
  0x42   : > { %6330 = vmatmul.mubr.msk.f32.vlgmr.msra.gmra.mrb[0].mxu0 %vm461_vm2, %v7651_v47 }
  0x43   : > { %6336 = vmatprep.mubr.msk.f32.mxu0 %vm7454_vm1, %v7455_v28 }
  0x8b   : > { %v7658_v51 = vpop.permute.xlu0 %1052 }
  0x8c   : > { %v7660_v52 = vpop.permute.xlu1 %1076  ;;  %v1060_v55 = vmul.f32 %v7658_v51, %v7601_v19  ;;  %v1058_v56 = vmul.f32 %v7658_v51, %v7604_v20  ;;  %v1062_v61 = vmul.f32 %v7658_v51, %v7611_v23  ;;  %v1064_v62 = vmul.f32 %v7658_v51, %v7663_v53 }
  0x8d   : > { %v1066_v13 = vmul.f32 %v7658_v51, %v7671_v58  ;;  %v1068_v43 = vmul.f32 %v7658_v51, %v7693_v10 }
  0x8e   : > { %v1084_v1 = vadd.f32 %v7660_v52, %v1060_v55  ;;  %v1082_v7 = vadd.f32 %v7660_v52, %v1058_v56  ;;  %v1086_v15 = vadd.f32 %v7660_v52, %v1062_v61  ;;  %v1088_v18 = vadd.f32 %v7660_v52, %v1064_v62 }
  0x8f   : > { %v7673_v59 = vpop.permute.xlu0 %1054  ;;  %v1090_v42 = vadd.f32 %v7660_v52, %v1066_v13  ;;  %v1092_v50 = vadd.f32 %v7660_v52, %v1068_v43  ;;  %v7726_v56 = vrot.slane %v368_v38, %v7597_v16 }
  0x90   : > { %v7675_v60 = vpop.permute.xlu1 %1078  ;;  %v1061_v0 = vmul.f32 %v7673_v59, %v7601_v19  ;;  %v1059_v6 = vmul.f32 %v7673_v59, %v7604_v20  ;;  %v1063_v8 = vmul.f32 %v7673_v59, %v7611_v23  ;;  %v1065_v9 = vmul.f32 %v7673_v59, %v7663_v53 }
  0x91   : > { %v1067_v14 = vmul.f32 %v7673_v59, %v7671_v58  ;;  %v1100_v22 = vmax.f32 %v1084_v1, 0.0  ;;  %v1098_v26 = vmax.f32 %v1082_v7, 0.0  ;;  %v1069_v30 = vmul.f32 %v7673_v59, %v7693_v10 }
  0x92   : > { %v1085_v11 = vadd.f32 %v7675_v60, %v1061_v0  ;;  %v1083_v12 = vadd.f32 %v7675_v60, %v1059_v6  ;;  %v1087_v17 = vadd.f32 %v7675_v60, %v1063_v8  ;;  %v1089_v21 = vadd.f32 %v7675_v60, %v1065_v9 }
  0x93   : > { %v1091_v29 = vadd.f32 %v7675_v60, %v1067_v14  ;;  %v7710_v37 = vpop.permute.xlu0 %1744  ;;  %v1102_v39 = vmax.f32 %v1086_v15, 0.0  ;;  %v1104_v41 = vmax.f32 %v1088_v18, 0.0  ;;  %v1093_v48 = vadd.f32 %v7675_v60, %v1069_v30 }
  0x94   : > { %v1101_v25 = vmax.f32 %v1085_v11, 0.0  ;;  %v1099_v27 = vmax.f32 %v1083_v12, 0.0  ;;  %v1103_v33 = vmax.f32 %v1087_v17, 0.0  ;;  %v1105_v35 = vmax.f32 %v1089_v21, 0.0  ;;  %v7708_v36 = vpop.permute.xlu1 %1746 }
  0x95   : > { %v1107_v46 = vmax.f32 %v1091_v29, 0.0  ;;  %v1106_v49 = vmax.f32 %v1090_v42, 0.0  ;;  %v1109_v62 = vmax.f32 %v1093_v48, 0.0  ;;  %v1071_v0 = vmul.f32 %v7673_v59, %v7726_v56 }
  0x96   : > { %v7122_v31 = vpack.i.bf16 %v1101_v25, %v1100_v22  ;;  %v7127_v32 = vpack.i.bf16 %v1099_v27, %v1098_v26  ;;  %v7132_v44 = vpack.i.bf16 %v1103_v33, %v1102_v39  ;;  %v7137_v45 = vpack.i.bf16 %v1105_v35, %v1104_v41 }
  0x97   : > { %v7723_v55 = vpop.permute.xlu0 %2434  ;;  %v7142_v61 = vpack.i.bf16 %v1107_v46, %v1106_v49  ;;  %v1108_v1 = vmax.f32 %v1092_v50, 0.0  ;;  %v1070_v6 = vmul.f32 %v7658_v51, %v7726_v56  ;;  %v7736_v7 = vrot.slane %v370_v57, %v7597_v16 }
  0x98   : > { %7123 = vrot.lane.b32.xlu0 %v7122_v31, %s7456_s16  ;;  %7128 = vrot.lane.b32.xlu1 %v7127_v32, %s7456_s16  ;;  %v7721_v54 = vpop.permute.xlu1 %2436  ;;  %v1095_v63 = vadd.f32 %v7675_v60, %v1071_v0  ;;  %v1752_v14 = vmul.f32 %v7710_v37, %v7601_v19  ;;  %v1753_v17 = vmul.f32 %v7708_v36, %v7601_v19 }
  0x99   : > { %v7147_v8 = vpack.i.bf16 %v1109_v62, %v1108_v1  ;;  %v1094_v12 = vadd.f32 %v7660_v52, %v1070_v6  ;;  %v1072_v13 = vmul.f32 %v7658_v51, %v7736_v7  ;;  %v1073_v16 = vmul.f32 %v7673_v59, %v7736_v7 }
  0x9a   : > { %v1111_v15 = vmax.f32 %v1095_v63, 0.0  ;;  %v1750_v18 = vmul.f32 %v7710_v37, %v7604_v20  ;;  %v1751_v21 = vmul.f32 %v7708_v36, %v7604_v20  ;;  %v2442_v22 = vmul.f32 %v7723_v55, %v7601_v19 }
  0x9b   : > { %v7741_v11 = vpop.permute.xlu0 %1766  ;;  %v2443_v51 = vmul.f32 %v7721_v54, %v7601_v19  ;;  %v1110_v59 = vmax.f32 %v1094_v12, 0.0  ;;  %v1096_v27 = vadd.f32 %v7660_v52, %v1072_v13  ;;  %v1097_v29 = vadd.f32 %v7675_v60, %v1073_v16 }
  0x9c   : > { %7133 = vrot.lane.b32.xlu0 %v7132_v44, %s7456_s16  ;;  %7138 = vrot.lane.b32.xlu1 %v7137_v45, %s7456_s16  ;;  %v7739_v9 = vpop.permute.xlu1 %1768  ;;  %v1774_v30 = vadd.f32 %v7741_v11, %v1752_v14  ;;  %v1754_v31 = vmul.f32 %v7710_v37, %v7611_v23  ;;  %v1772_v35 = vadd.f32 %v7741_v11, %v1750_v18 }
  0x9d   : > { %v7152_v32 = vpack.i.bf16 %v1111_v15, %v1110_v59  ;;  %v1775_v33 = vadd.f32 %v7739_v9, %v1753_v17  ;;  %v1773_v38 = vadd.f32 %v7739_v9, %v1751_v21  ;;  %v2440_v52 = vmul.f32 %v7723_v55, %v7604_v20 }
  0x9e   : > { %v2441_v60 = vmul.f32 %v7721_v54, %v7604_v20  ;;  %v1112_v42 = vmax.f32 %v1096_v27, 0.0  ;;  %v1755_v43 = vmul.f32 %v7708_v36, %v7611_v23  ;;  %v1113_v44 = vmax.f32 %v1097_v29, 0.0 }
  0x9f   : > { %v7769_v26 = vpop.permute.xlu0 %2456  ;;  %v1790_v45 = vmax.f32 %v1774_v30, 0.0  ;;  %v1776_v46 = vadd.f32 %v7741_v11, %v1754_v31  ;;  %v2444_v48 = vmul.f32 %v7723_v55, %v7611_v23  ;;  %v1791_v49 = vmax.f32 %v1775_v33, 0.0 }
  0xa0   : > { %7143 = vrot.lane.b32.xlu0 %v7142_v61, %s7456_s16  ;;  %3124 = vrot.lane.b32.xlu1 %v7563_v2, %s7457_s17  ;;  %v7767_v25 = vpop.permute.xlu1 %2458  ;;  %v2464_v39 = vadd.f32 %v7769_v26, %v2442_v22  ;;  %v1788_v50 = vmax.f32 %v1772_v35, 0.0  ;;  %v1789_v57 = vmax.f32 %v1773_v38, 0.0  ;;  %v2445_v61 = vmul.f32 %v7721_v54, %v7611_v23 }
  0xa1   : > { %v2465_v41 = vadd.f32 %v7767_v25, %v2443_v51  ;;  %v2462_v1 = vadd.f32 %v7769_v26, %v2440_v52  ;;  %v2463_v6 = vadd.f32 %v7767_v25, %v2441_v60  ;;  %v417_v63 = vmul.f32 %v7663_v53, %v7563_v2 }
  0xa2   : > { %v2480_v62 = vmax.f32 %v2464_v39, 0.0  ;;  %v418_v12 = vmul.f32 %v7663_v53, %v7575_v4  ;;  %v7157_v13 = vpack.i.bf16 %v1113_v44, %v1112_v42  ;;  %v2466_v16 = vadd.f32 %v7769_v26, %v2444_v48 }
  0xa3   : > { %v2481_v0 = vmax.f32 %v2465_v41, 0.0  ;;  %v7162_v14 = vpack.i.bf16 %v1791_v49, %v1790_v45  ;;  %v7172_v15 = vpack.i.bf16 %v1789_v57, %v1788_v50  ;;  %v1792_v17 = vmax.f32 %v1776_v46, 0.0 }
  0xa4   : > { %3126 = vrot.lane.b32.xlu0 %v7575_v4, %s7457_s17  ;;  %7148 = vrot.lane.b32.xlu1 %v7147_v8, %s7456_s16  ;;  %v1777_v8 = vadd.f32 %v7739_v9, %v1755_v43  ;;  %v2467_v18 = vadd.f32 %v7767_v25, %v2445_v61  ;;  %v2478_v22 = vmax.f32 %v2462_v1, 0.0  ;;  %v2479_v51 = vmax.f32 %v2463_v6, 0.0 }
  0xa5   : > { %v7167_v21 = vpack.i.bf16 %v2481_v0, %v2480_v62  ;;  %v1756_v59 = vmul.f32 %v7710_v37, %v7663_v53  ;;  %v1757_v29 = vmul.f32 %v7708_v36, %v7663_v53  ;;  %v433_v30 = vadd.f32 %v417_v63, %v7568_v3 }
  0xa6   : > { %v1793_v27 = vmax.f32 %v1777_v8, 0.0  ;;  %v434_v31 = vadd.f32 %v418_v12, %v7580_v5  ;;  %v2446_v33 = vmul.f32 %v7723_v55, %v7663_v53  ;;  %v2447_v35 = vmul.f32 %v7721_v54, %v7663_v53 }
  0xa7   : > { %v419_v38 = vmul.f32 %v7671_v58, %v7563_v2  ;;  %v2483_v39 = vmax.f32 %v2467_v18, 0.0  ;;  %v449_v41 = vmax.f32 %v433_v30, 0.0  ;;  %v420_v60 = vmul.f32 %v7671_v58, %v7575_v4 }
  0xa8   : > { %3814 = vrot.lane.b32.xlu0 %v7563_v2, %s7458_s18  ;;  %3816 = vrot.lane.b32.xlu1 %v7575_v4, %s7458_s18  ;;  %v450_v52 = vmax.f32 %v434_v31, 0.0  ;;  %v7177_v42 = vpack.i.bf16 %v2479_v51, %v2478_v22  ;;  %v1778_v43 = vadd.f32 %v7741_v11, %v1756_v59  ;;  %v421_v45 = vmul.f32 %v7693_v10, %v7563_v2 }
  0xa9   : > { %v435_v44 = vadd.f32 %v419_v38, %v7568_v3  ;;  %v1779_v46 = vadd.f32 %v7739_v9, %v1757_v29  ;;  %v7833_v49 = vrot.slane %v7629_v34, 3  ;;  %v436_v50 = vadd.f32 %v420_v60, %v7580_v5 }
  0xaa   : > { %v6769_v48 = vpack.c.bf16 %v450_v52, %v449_v41  ;;  %v2468_v57 = vadd.f32 %v7769_v26, %v2446_v33  ;;  %v2469_v61 = vadd.f32 %v7767_v25, %v2447_v35  ;;  %v422_v0 = vmul.f32 %v7693_v10, %v7575_v4 }
  0xab   : > { %v451_v62 = vmax.f32 %v435_v44, 0.0  ;;  %v452_v1 = vmax.f32 %v436_v50, 0.0  ;;  %v437_v6 = vadd.f32 %v421_v45, %v7568_v3  ;;  %v7182_v8 = vpack.i.bf16 %v1793_v27, %v1792_v17 }
  0xac   : > { %7153 = vrot.lane.b32.xlu0 %v7152_v32, %s7456_s16  ;;  %3148 = vrot.lane.b32.xlu1 %v7580_v5, %s7457_s17  ;;  %v2482_v32 = vmax.f32 %v2466_v16, 0.0  ;;  %v1758_v12 = vmul.f32 %v7710_v37, %v7671_v58  ;;  %v1794_v16 = vmax.f32 %v1778_v43, 0.0  ;;  %v2448_v18 = vmul.f32 %v7723_v55, %v7671_v58 }
  0xad   : > { %6770 = vmatpush3.bf16.msra.mxu0 %v6769_v48  ;;  %v6772_v17 = vpack.c.bf16 %v452_v1, %v451_v62  ;;  %v2484_v22 = vmax.f32 %v2468_v57, 0.0  ;;  %v2485_v51 = vmax.f32 %v2469_v61, 0.0  ;;  %v2449_v59 = vmul.f32 %v7721_v54, %v7671_v58 }
  0xae   : > { %v7187_v63 = vpack.i.bf16 %v2483_v39, %v2482_v32  ;;  %6771 = vmatprep.subr.bf16.mxu0 %v7453_v24  ;;  %v423_v29 = vmul.f32 %v7726_v56, %v7563_v2  ;;  %v424_v30 = vmul.f32 %v7726_v56, %v7575_v4  ;;  %v1780_v31 = vadd.f32 %v7741_v11, %v1758_v12 }
  0xaf   : > { %v2470_v33 = vadd.f32 %v7769_v26, %v2448_v18  ;;  %v2471_v38 = vadd.f32 %v7767_v25, %v2449_v59  ;;  %v7869_v39 = vrot.slane %v7629_v34, 4  ;;  %v7197_v41 = vpack.i.bf16 %v2485_v51, %v2484_v22 }
  0xb0   : > { %3146 = vrot.lane.b32.xlu0 %v7568_v3, %s7457_s17  ;;  %3838 = vrot.lane.b32.xlu1 %v7580_v5, %s7458_s18  ;;  %v439_v60 = vadd.f32 %v423_v29, %v7568_v3  ;;  %v1796_v43 = vmax.f32 %v1780_v31, 0.0  ;;  %v1761_v50 = vmul.f32 %v7708_v36, %v7693_v10  ;;  %v2450_v57 = vmul.f32 %v7723_v55, %v7693_v10 }
  0xb1   : > { %6337 = vmatmul.mubr.msk.f32.vlgmr.msra.gmra.mrb[0].mxu0 %vm461_vm2, %v7833_v49  ;;  %v2486_v45 = vmax.f32 %v2470_v33, 0.0  ;;  %v2487_v48 = vmax.f32 %v2471_v38, 0.0  ;;  %v2451_v61 = vmul.f32 %v7721_v54, %v7693_v10  ;;  %v425_v1 = vmul.f32 %v7736_v7, %v7563_v2 }
  0xb2   : > { %6773 = vmatpush3.bf16.msra.mxu0 %v6772_v17  ;;  %6343 = vmatprep.mubr.msk.f32.mxu0 %vm7454_vm1, %v7455_v28  ;;  %v455_v62 = vmax.f32 %v439_v60, 0.0  ;;  %v1762_v59 = vmul.f32 %v7710_v37, %v7726_v56  ;;  %v2452_v29 = vmul.f32 %v7723_v55, %v7726_v56  ;;  %v7928_v60 = vrot.slane %v7629_v34, 6 }
  0xb3   : > { %6774 = vmatprep.subr.bf16.mxu0 %v7453_v24  ;;  %v7207_v12 = vpack.i.bf16 %v2487_v48, %v2486_v45  ;;  %v2473_v18 = vadd.f32 %v7767_v25, %v2451_v61  ;;  %v1764_v48 = vmul.f32 %v7710_v37, %v7736_v7  ;;  %v2454_v61 = vmul.f32 %v7723_v55, %v7736_v7 }
  0xb4   : > { %3836 = vrot.lane.b32.xlu0 %v7568_v3, %s7458_s18  ;;  %7158 = vrot.lane.b32.xlu1 %v7157_v13, %s7456_s16  ;;  %v438_v13 = vadd.f32 %v422_v0, %v7580_v5  ;;  %v1784_v38 = vadd.f32 %v7741_v11, %v1762_v59  ;;  %v7952_v55 = vrot.slane %v7629_v34, 7 }
  0xb6   : > { %v454_v27 = vmax.f32 %v438_v13, 0.0  ;;  %v1783_v13 = vadd.f32 %v7739_v9, %v1761_v50 }
  0xb8   : > { %7163 = vrot.lane.b32.xlu0 %v7162_v14, %s7459_s20  ;;  %7168 = vrot.lane.b32.xlu1 %v7167_v21, %s7460_s21  ;;  %v1759_v14 = vmul.f32 %v7708_v36, %v7671_v58  ;;  %v1795_v21 = vmax.f32 %v1779_v46, 0.0  ;;  %v1760_v46 = vmul.f32 %v7710_v37, %v7693_v10 }
  0xb9   : > { %6344 = vmatmul.mubr.msk.f32.vlgmr.msra.gmra.mrb[0].mxu0 %vm461_vm2, %v7869_v39 }
  0xba   : > { %v1781_v32 = vadd.f32 %v7739_v9, %v1759_v14  ;;  %v7192_v35 = vpack.i.bf16 %v1795_v21, %v1794_v16  ;;  %6350 = vmatprep.mubr.msk.f32.mxu0 %vm7454_vm1, %v7455_v28  ;;  %v2472_v16 = vadd.f32 %v7769_v26, %v2450_v57  ;;  %v7900_v14 = vrot.slane %v7629_v34, 5 }
  0xbb   : > { %v441_v21 = vadd.f32 %v425_v1, %v7568_v3  ;;  %v1765_v57 = vmul.f32 %v7708_v36, %v7736_v7  ;;  %v2476_v1 = vadd.f32 %v7769_v26, %v2454_v61 }
  0xbc   : > { %7173 = vrot.lane.b32.xlu0 %v7172_v15, %s7459_s20  ;;  %7178 = vrot.lane.b32.xlu1 %v7177_v42, %s7460_s21  ;;  %v453_v15 = vmax.f32 %v437_v6, 0.0  ;;  %v440_v42 = vadd.f32 %v424_v30, %v7580_v5  ;;  %v1797_v44 = vmax.f32 %v1781_v32, 0.0  ;;  %v426_v6 = vmul.f32 %v7736_v7, %v7575_v4 }
  0xbd   : > { %v2453_v30 = vmul.f32 %v7721_v54, %v7726_v56  ;;  %v2488_v31 = vmax.f32 %v2472_v16, 0.0  ;;  %v2489_v32 = vmax.f32 %v2473_v18, 0.0  ;;  %v457_v33 = vmax.f32 %v441_v21, 0.0 }
  0xbe   : > { %v6775_v52 = vpack.c.bf16 %v454_v27, %v453_v15  ;;  %v456_v0 = vmax.f32 %v440_v42, 0.0  ;;  %v442_v22 = vadd.f32 %v426_v6, %v7580_v5  ;;  %v1799_v15 = vmax.f32 %v1783_v13, 0.0 }
  0xbf   : > { %v1763_v27 = vmul.f32 %v7708_v36, %v7726_v56  ;;  %v1786_v36 = vadd.f32 %v7741_v11, %v1764_v48 }
  0xc0   : > { %7183 = vrot.lane.b32.xlu0 %v7182_v8, %s7459_s20  ;;  %7188 = vrot.lane.b32.xlu1 %v7187_v63, %s7460_s21  ;;  %v7202_v8 = vpack.i.bf16 %v1797_v44, %v1796_v43  ;;  %v1782_v63 = vadd.f32 %v7741_v11, %v1760_v46  ;;  %v6778_v17 = vpack.c.bf16 %v456_v0, %v455_v62  ;;  %v2492_v11 = vmax.f32 %v2476_v1, 0.0 }
  0xc1   : > { %6776 = vmatpush3.bf16.msra.mxu0 %v6775_v52  ;;  %v2474_v52 = vadd.f32 %v7769_v26, %v2452_v29  ;;  %v7217_v43 = vpack.i.bf16 %v2489_v32, %v2488_v31  ;;  %v2475_v44 = vadd.f32 %v7767_v25, %v2453_v30  ;;  %v2455_v62 = vmul.f32 %v7721_v54, %v7736_v7 }
  0xc2   : > { %6777 = vmatprep.subr.bf16.mxu0 %v7453_v24  ;;  %v1798_v51 = vmax.f32 %v1782_v63, 0.0  ;;  %v1787_v54 = vadd.f32 %v7739_v9, %v1765_v57 }
  0xc3   : > { %v2490_v46 = vmax.f32 %v2474_v52, 0.0  ;;  %v2491_v50 = vmax.f32 %v2475_v44, 0.0  ;;  %v2477_v6 = vadd.f32 %v7767_v25, %v2455_v62 }
  0xc4   : > { %7193 = vrot.lane.b32.xlu0 %v7192_v35, %s7459_s20  ;;  %7198 = vrot.lane.b32.xlu1 %v7197_v41, %s7460_s21  ;;  %v458_v35 = vmax.f32 %v442_v22, 0.0  ;;  %v1785_v41 = vadd.f32 %v7739_v9, %v1763_v27  ;;  %v7212_v42 = vpack.i.bf16 %v1799_v15, %v1798_v51  ;;  %v1803_v63 = vmax.f32 %v1787_v54, 0.0 }
  0xc5   : > { %6351 = vmatmul.mubr.msk.f32.vlgmr.msra.gmra.mrb[0].mxu0 %vm461_vm2, %v7900_v14  ;;  %v7227_v0 = vpack.i.bf16 %v2491_v50, %v2490_v46 }
  0xc6   : > { %6779 = vmatpush3.bf16.msra.mxu0 %v6778_v17  ;;  %6357 = vmatprep.mubr.msk.f32.mxu0 %vm7454_vm1, %v7455_v28  ;;  %v6781_v45 = vpack.c.bf16 %v458_v35, %v457_v33 }
  0xc7   : > { %6780 = vmatprep.subr.bf16.mxu0 %v7453_v24 }
  0xc8   : > { %4506 = vrot.lane.b32.xlu0 %v7575_v4, %s7461_s24  ;;  %4504 = vrot.lane.b32.xlu1 %v7563_v2, %s7461_s24 }
  0xcc   : > { %7203 = vrot.lane.b32.xlu0 %v7202_v8, %s7459_s20  ;;  %7208 = vrot.lane.b32.xlu1 %v7207_v12, %s7460_s21  ;;  %v1802_v8 = vmax.f32 %v1786_v36, 0.0  ;;  %v2493_v12 = vmax.f32 %v2477_v6, 0.0 }
  0xcd   : > { %6358 = vmatmul.mubr.msk.f32.vlgmr.msra.gmra.mrb[0].mxu0 %vm461_vm2, %v7928_v60 }
  0xce   : > { %6782 = vmatpush3.bf16.msra.mxu0 %v6781_v45  ;;  %6364 = vmatprep.mubr.msk.f32.mxu0 %vm7454_vm1, %v7455_v28  ;;  %v7232_v9 = vpack.i.bf16 %v1803_v63, %v1802_v8  ;;  %v7237_v25 = vpack.i.bf16 %v2493_v12, %v2492_v11 }
  0xcf   : > { %6807 = vmatprep.subr.bf16.mxu0 %v7453_v24 }
  0xd0   : > { %5194 = vrot.lane.b32.xlu0 %v7563_v2, %s7462_s29  ;;  %5196 = vrot.lane.b32.xlu1 %v7575_v4, %s7462_s29  ;;  %v1800_v2 = vmax.f32 %v1784_v38, 0.0  ;;  %v1801_v4 = vmax.f32 %v1785_v41, 0.0 }
  0xd2   : > { %v7222_v37 = vpack.i.bf16 %v1801_v4, %v1800_v2 }
  0xd4   : > { %7213 = vrot.lane.b32.xlu0 %v7212_v42, %s7459_s20  ;;  %7218 = vrot.lane.b32.xlu1 %v7217_v43, %s7460_s21 }
  0xd5   : > { %6365 = vmatmul.mubr.msk.f32.vlgmr.msra.gmra.mrb[0].mxu0 %vm461_vm2, %v7952_v55 }
  0xd6   : > { %6427 = vmatprep.mubr.msk.f32.mxu0 %vm7454_vm1, %v7455_v28 }
  0xd8   : > { %4526 = vrot.lane.b32.xlu0 %v7568_v3, %s7461_s24  ;;  %4528 = vrot.lane.b32.xlu1 %v7580_v5, %s7461_s24 }
  0xdc   : > { %7223 = vrot.lane.b32.xlu0 %v7222_v37, %s7459_s20  ;;  %7228 = vrot.lane.b32.xlu1 %v7227_v0, %s7460_s21 }
  0xe0   : > { %5216 = vrot.lane.b32.xlu0 %v7568_v3, %s7462_s29  ;;  %5218 = vrot.lane.b32.xlu1 %v7580_v5, %s7462_s29 }
  0xe4   : > { %7233 = vrot.lane.b32.xlu0 %v7232_v9, %s7459_s20  ;;  %7238 = vrot.lane.b32.xlu1 %v7237_v25, %s7460_s21 }
 0x10a   : > { %v7129_v26 = vpop.permute.xlu1 %7128  ;;  %v7124_v13 = vpop.permute.xlu0 %7123 }
 0x10b   : > { %v7126_v16 = vunpack.i.h.bf16 %v7124_v13  ;;  %v7125_v18 = vunpack.i.l.bf16 %v7124_v13  ;;  %v7131_v17 = vunpack.i.h.bf16 %v7129_v26  ;;  %v7130_v21 = vunpack.i.l.bf16 %v7129_v26 }
 0x10d   : > { %v6784_v22 = vpack.c.bf16 %v7126_v16, %v7125_v18  ;;  %v6787_v3 = vpack.c.bf16 %v7131_v17, %v7130_v21 }
 0x10e   : > { %v7139_v51 = vpop.permute.xlu1 %7138  ;;  %v7134_v59 = vpop.permute.xlu0 %7133 }
 0x10f   : > { %6785 = vmatpush3.bf16.msra.mxu1 %v6784_v22  ;;  %v7136_v27 = vunpack.i.h.bf16 %v7134_v59  ;;  %v7135_v29 = vunpack.i.l.bf16 %v7134_v59  ;;  %v7141_v38 = vunpack.i.h.bf16 %v7139_v51  ;;  %v7140_v41 = vunpack.i.l.bf16 %v7139_v51 }
 0x110   : > { %6786 = vmatprep.subr.bf16.mxu1 %v7453_v24 }
 0x111   : > { %v6790_v32 = vpack.c.bf16 %v7136_v27, %v7135_v29  ;;  %v6793_v2 = vpack.c.bf16 %v7141_v38, %v7140_v41 }
 0x112   : > { %v3125_v5 = vpop.permute.xlu1 %3124  ;;  %v7144_v15 = vpop.permute.xlu0 %7143  ;;  %6372 = vmatmul.mubr.msk.f32.vlgmr.msra.gmra.mrb[0].mxu1 %vm461_vm2, %v7635_v40 }
 0x113   : > { %6788 = vmatpush3.bf16.msra.mxu1 %v6787_v3  ;;  %6378 = vmatprep.mubr.msk.f32.mxu1 %vm7454_vm1, %v7455_v28  ;;  %v7146_v44 = vunpack.i.h.bf16 %v7144_v15  ;;  %v7145_v45 = vunpack.i.l.bf16 %v7144_v15  ;;  %v3132_v4 = vmul.f32 %v3125_v5, %v7601_v19  ;;  %v3130_v48 = vmul.f32 %v3125_v5, %v7604_v20 }
 0x114   : > { %6789 = vmatprep.subr.bf16.mxu1 %v7453_v24  ;;  %v3134_v61 = vmul.f32 %v3125_v5, %v7611_v23  ;;  %v3136_v62 = vmul.f32 %v3125_v5, %v7663_v53  ;;  %v8006_v37 = vmul.f32 %v3125_v5, %v7671_v58  ;;  %v8018_v8 = vmul.f32 %v3125_v5, %v7693_v10 }
 0x115   : > { %v6796_v1 = vpack.c.bf16 %v7146_v44, %v7145_v45  ;;  %v8021_v63 = vmul.f32 %v3125_v5, %v7726_v56  ;;  %v8025_v25 = vmul.f32 %v3125_v5, %v7736_v7 }
 0x116   : > { %v7975_v30 = vpop.permute.xlu1 %7148  ;;  %v7977_v31 = vpop.permute.xlu0 %3126 }
 0x117   : > { %v3133_v43 = vmul.f32 %v7977_v31, %v7601_v19  ;;  %v3131_v0 = vmul.f32 %v7977_v31, %v7604_v20  ;;  %v7151_v26 = vunpack.i.h.bf16 %v7975_v30  ;;  %v3135_v59 = vmul.f32 %v7977_v31, %v7611_v23 }
 0x118   : > { %v7150_v5 = vunpack.i.l.bf16 %v7975_v30  ;;  %v3137_v41 = vmul.f32 %v7977_v31, %v7663_v53 }
 0x11a   : > { %v7979_v33 = vpop.permute.xlu1 %3816  ;;  %v7981_v35 = vpop.permute.xlu0 %3814  ;;  %6379 = vmatmul.mubr.msk.f32.vlgmr.msra.gmra.mrb[0].mxu1 %vm461_vm2, %v7629_v34 }
 0x11b   : > { %6791 = vmatpush3.bf16.msra.mxu1 %v6790_v32  ;;  %6385 = vmatprep.mubr.msk.f32.mxu1 %vm7454_vm1, %v7455_v28  ;;  %v3823_v6 = vmul.f32 %v7979_v33, %v7601_v19  ;;  %v3822_v18 = vmul.f32 %v7981_v35, %v7601_v19  ;;  %v3820_v21 = vmul.f32 %v7981_v35, %v7604_v20 }
 0x11c   : > { %6792 = vmatprep.subr.bf16.mxu1 %v7453_v24  ;;  %v3821_v27 = vmul.f32 %v7979_v33, %v7604_v20 }
 0x11e   : > { %v7988_v52 = vpop.permute.xlu1 %3148  ;;  %v7990_v42 = vpop.permute.xlu0 %7153 }
 0x11f   : > { %v3155_v46 = vadd.f32 %v7988_v52, %v3133_v43  ;;  %v3153_v9 = vadd.f32 %v7988_v52, %v3131_v0  ;;  %v3157_v38 = vadd.f32 %v7988_v52, %v3135_v59  ;;  %v3824_v43 = vmul.f32 %v7981_v35, %v7611_v23 }
 0x121   : > { %v3171_v12 = vmax.f32 %v3155_v46, 0.0  ;;  %v3169_v32 = vmax.f32 %v3153_v9, 0.0 }
 0x122   : > { %v7997_v50 = vpop.permute.xlu1 %3838  ;;  %v7999_v57 = vpop.permute.xlu0 %3146  ;;  %6386 = vmatmul.mubr.msk.f32.vlgmr.msra.gmra.mrb[0].mxu1 %vm461_vm2, %v7651_v47 }
 0x123   : > { %6794 = vmatpush3.bf16.msra.mxu1 %v6793_v2  ;;  %v3154_v36 = vadd.f32 %v7999_v57, %v3132_v4  ;;  %6392 = vmatprep.mubr.msk.f32.mxu1 %vm7454_vm1, %v7455_v28  ;;  %v3152_v54 = vadd.f32 %v7999_v57, %v3130_v48  ;;  %v3845_v17 = vadd.f32 %v7997_v50, %v3823_v6 }
 0x124   : > { %6795 = vmatprep.subr.bf16.mxu1 %v7453_v24  ;;  %v3156_v3 = vadd.f32 %v7999_v57, %v3134_v61  ;;  %v3843_v4 = vadd.f32 %v7997_v50, %v3821_v27  ;;  %v3158_v46 = vadd.f32 %v7999_v57, %v3136_v62  ;;  %v3173_v62 = vmax.f32 %v3157_v38, 0.0 }
 0x125   : > { %v3170_v11 = vmax.f32 %v3154_v36, 0.0  ;;  %v3168_v51 = vmax.f32 %v3152_v54, 0.0  ;;  %v3861_v2 = vmax.f32 %v3845_v17, 0.0  ;;  %v3160_v59 = vadd.f32 %v7999_v57, %v8006_v37 }
 0x126   : > { %v8028_v13 = vpop.permute.xlu1 %7158  ;;  %v8030_v16 = vpop.permute.xlu0 %3836  ;;  %v3172_v0 = vmax.f32 %v3156_v3, 0.0  ;;  %v3826_v3 = vmul.f32 %v7981_v35, %v7663_v53 }
 0x127   : > { %v7242_v22 = vpack.i.bf16 %v3171_v12, %v3170_v11  ;;  %v3844_v15 = vadd.f32 %v8030_v16, %v3822_v18  ;;  %v3842_v29 = vadd.f32 %v8030_v16, %v3820_v21  ;;  %v7252_v36 = vpack.i.bf16 %v3169_v32, %v3168_v51 }
 0x128   : > { %v3825_v11 = vmul.f32 %v7979_v33, %v7611_v23  ;;  %v3846_v12 = vadd.f32 %v8030_v16, %v3824_v43  ;;  %v3139_v18 = vmul.f32 %v7977_v31, %v7671_v58  ;;  %v3174_v32 = vmax.f32 %v3158_v46, 0.0 }
 0x129   : > { %7243 = vrot.lane.b32.xlu0 %v7242_v22, %s7463_s30  ;;  %v3860_v45 = vmax.f32 %v3844_v15, 0.0  ;;  %v3858_v6 = vmax.f32 %v3842_v29, 0.0  ;;  %v3859_v22 = vmax.f32 %v3843_v4, 0.0  ;;  %v7262_v29 = vpack.i.bf16 %v3173_v62, %v3172_v0 }
 0x12a   : > { %v8051_v30 = vpop.permute.xlu1 %7168  ;;  %v7164_v44 = vpop.permute.xlu0 %7163  ;;  %6393 = vmatmul.mubr.msk.f32.vlgmr.msra.gmra.mrb[0].mxu1 %vm461_vm2, %v7833_v49  ;;  %v3847_v51 = vadd.f32 %v7997_v50, %v3825_v11  ;;  %v3827_v43 = vmul.f32 %v7979_v33, %v7663_v53  ;;  %v3161_v4 = vadd.f32 %v7988_v52, %v3139_v18  ;;  %v3829_v11 = vmul.f32 %v7979_v33, %v7671_v58 }
 0x12b   : > { %v7166_v48 = vunpack.i.h.bf16 %v7164_v44  ;;  %v7165_v61 = vunpack.i.l.bf16 %v7164_v44  ;;  %6797 = vmatpush3.bf16.msra.mxu1 %v6796_v1  ;;  %6399 = vmatprep.mubr.msk.f32.mxu1 %vm7454_vm1, %v7455_v28  ;;  %v7247_v54 = vpack.i.bf16 %v3861_v2, %v3860_v45  ;;  %v3159_v1 = vadd.f32 %v7988_v52, %v3137_v41 }
 0x12c   : > { %6798 = vmatprep.subr.bf16.mxu1 %v7453_v24  ;;  %v7257_v38 = vpack.i.bf16 %v3859_v22, %v3858_v6  ;;  %v3862_v41 = vmax.f32 %v3846_v12, 0.0  ;;  %v3848_v44 = vadd.f32 %v8030_v16, %v3826_v3  ;;  %v6799_v45 = vpack.c.bf16 %v7151_v26, %v7150_v5 }
 0x12d   : > { %v6808_v9 = vpack.c.bf16 %v7166_v48, %v7165_v61  ;;  %7253 = vrot.lane.b32.xlu0 %v7252_v36, %s7463_s30  ;;  %7248 = vrot.lane.b32.xlu1 %v7247_v54, %s7464_s7  ;;  %v3175_v37 = vmax.f32 %v3159_v1, 0.0  ;;  %v3863_v61 = vmax.f32 %v3847_v51, 0.0  ;;  %v3849_v36 = vadd.f32 %v7997_v50, %v3827_v43 }
 0x12e   : > { %v8068_v17 = vpop.permute.xlu1 %7178  ;;  %v7174_v21 = vpop.permute.xlu0 %7173  ;;  %v3141_v26 = vmul.f32 %v7977_v31, %v7693_v10  ;;  %v3828_v5 = vmul.f32 %v7981_v35, %v7671_v58  ;;  %v3176_v54 = vmax.f32 %v3160_v59, 0.0  ;;  %v3162_v6 = vadd.f32 %v7999_v57, %v8018_v8 }
 0x12f   : > { %v7176_v15 = vunpack.i.h.bf16 %v7174_v21  ;;  %v7175_v27 = vunpack.i.l.bf16 %v7174_v21  ;;  %6809 = vmatpush3.bf16.msra.mxu0 %v6808_v9  ;;  %v7272_v0 = vpack.i.bf16 %v3175_v37, %v3174_v32  ;;  %v7267_v12 = vpack.i.bf16 %v3863_v61, %v3862_v41 }
 0x130   : > { %6810 = vmatprep.subr.bf16.mxu0 %v7453_v24  ;;  %v3864_v9 = vmax.f32 %v3848_v44, 0.0  ;;  %v3850_v62 = vadd.f32 %v8030_v16, %v3828_v5  ;;  %v3830_v1 = vmul.f32 %v7981_v35, %v7693_v10  ;;  %v7156_v18 = vunpack.i.h.bf16 %v7990_v42 }
 0x131   : > { %v6811_v2 = vpack.c.bf16 %v7176_v15, %v7175_v27  ;;  %7263 = vrot.lane.b32.xlu0 %v7262_v29, %s7463_s30  ;;  %7258 = vrot.lane.b32.xlu1 %v7257_v38, %s7464_s7  ;;  %v7155_v21 = vunpack.i.l.bf16 %v7990_v42  ;;  %v3177_v8 = vmax.f32 %v3161_v4, 0.0  ;;  %v3163_v22 = vadd.f32 %v7988_v52, %v3141_v26 }
 0x132   : > { %v8082_v48 = vpop.permute.xlu1 %7188  ;;  %v7184_v46 = vpop.permute.xlu0 %7183  ;;  %6400 = vmatmul.mubr.msk.f32.vlgmr.msra.gmra.mrb[0].mxu1 %vm461_vm2, %v7869_v39  ;;  %6428 = vmatmul.mubr.msk.f32.vlgmr.msra.gmra.mrb[2].mxu0 %vm461_vm2, %v7635_v40  ;;  %v3865_v27 = vmax.f32 %v3849_v36, 0.0  ;;  %v3851_v42 = vadd.f32 %v7997_v50, %v3829_v11  ;;  %v3178_v32 = vmax.f32 %v3162_v6, 0.0  ;;  %v3143_v38 = vmul.f32 %v7977_v31, %v7726_v56 }
 0x133   : > { %6800 = vmatpush3.bf16.msra.mxu1 %v6799_v45  ;;  %6812 = vmatpush3.bf16.msra.mxu0 %v6811_v2  ;;  %v7186_v51 = vunpack.i.h.bf16 %v7184_v46  ;;  %v7185_v59 = vunpack.i.l.bf16 %v7184_v46  ;;  %v7282_v29 = vpack.i.bf16 %v3177_v8, %v3176_v54  ;;  %v3164_v41 = vadd.f32 %v7999_v57, %v8021_v63 }
 0x134   : > { %6406 = vmatprep.mubr.msk.f32.mxu1 %vm7454_vm1, %v7455_v28  ;;  %6801 = vmatprep.subr.bf16.mxu1 %v7453_v24  ;;  %v7277_v43 = vpack.i.bf16 %v3865_v27, %v3864_v9  ;;  %v3866_v44 = vmax.f32 %v3850_v62, 0.0  ;;  %v3831_v45 = vmul.f32 %v7979_v33, %v7693_v10  ;;  %v3852_v2 = vadd.f32 %v8030_v16, %v3830_v1 }
 0x135   : > { %7273 = vrot.lane.b32.xlu0 %v7272_v0, %s7463_s30  ;;  %7268 = vrot.lane.b32.xlu1 %v7267_v12, %s7464_s7  ;;  %v6802_v37 = vpack.c.bf16 %v7156_v18, %v7155_v21  ;;  %v3179_v4 = vmax.f32 %v3163_v22, 0.0  ;;  %v3165_v46 = vadd.f32 %v7988_v52, %v3143_v38  ;;  %v3145_v61 = vmul.f32 %v7977_v31, %v7736_v7 }
 0x136   : > { %v8108_v3 = vpop.permute.xlu1 %7198  ;;  %v8110_v15 = vpop.permute.xlu0 %7193  ;;  %6434 = vmatprep.mubr.msk.f32.mxu0 %vm7454_vm1, %v7455_v28  ;;  %6813 = vmatprep.subr.bf16.mxu0 %v7453_v24  ;;  %v6814_v36 = vpack.c.bf16 %v7186_v51, %v7185_v59  ;;  %v3867_v5 = vmax.f32 %v3851_v42, 0.0  ;;  %v3853_v0 = vadd.f32 %v7997_v50, %v3831_v45  ;;  %v3832_v54 = vmul.f32 %v7981_v35, %v7726_v56 }
 0x137   : > { %v7292_v31 = vpack.i.bf16 %v3179_v4, %v3178_v32  ;;  %v3180_v6 = vmax.f32 %v3164_v41, 0.0  ;;  %v3166_v11 = vadd.f32 %v7999_v57, %v8025_v25  ;;  %v3833_v12 = vmul.f32 %v7979_v33, %v7726_v56 }
 0x138   : > { %v7287_v9 = vpack.i.bf16 %v3867_v5, %v3866_v44  ;;  %v3868_v62 = vmax.f32 %v3852_v2, 0.0  ;;  %v3854_v1 = vadd.f32 %v8030_v16, %v3832_v54  ;;  %v3834_v18 = vmul.f32 %v7981_v35, %v7736_v7 }
 0x139   : > { %7283 = vrot.lane.b32.xlu0 %v7282_v29, %s7463_s30  ;;  %7278 = vrot.lane.b32.xlu1 %v7277_v43, %s7464_s7  ;;  %v7160_v21 = vunpack.i.l.bf16 %v8028_v13  ;;  %v3181_v57 = vmax.f32 %v3165_v46, 0.0  ;;  %v3167_v25 = vadd.f32 %v7988_v52, %v3145_v61  ;;  %v7196_v8 = vunpack.i.h.bf16 %v8110_v15 }
 0x13a   : > { %v8128_v63 = vpop.permute.xlu1 %4504  ;;  %v8130_v26 = vpop.permute.xlu0 %4506  ;;  %6407 = vmatmul.mubr.msk.f32.vlgmr.msra.gmra.mrb[0].mxu1 %vm461_vm2, %v7900_v14  ;;  %6435 = vmatmul.mubr.msk.f32.vlgmr.msra.gmra.mrb[2].mxu0 %vm461_vm2, %v7629_v34  ;;  %v7161_v34 = vunpack.i.h.bf16 %v8028_v13  ;;  %v7195_v22 = vunpack.i.l.bf16 %v8110_v15  ;;  %v3869_v59 = vmax.f32 %v3853_v0, 0.0  ;;  %v3855_v13 = vadd.f32 %v7997_v50, %v3833_v12 }
 0x13b   : > { %6803 = vmatpush3.bf16.msra.mxu1 %v6802_v37  ;;  %6815 = vmatpush3.bf16.msra.mxu0 %v6814_v36  ;;  %v7302_v27 = vpack.i.bf16 %v3181_v57, %v3180_v6  ;;  %v3182_v42 = vmax.f32 %v3166_v11, 0.0  ;;  %v3870_v29 = vmax.f32 %v3854_v1, 0.0  ;;  %v3835_v15 = vmul.f32 %v7979_v33, %v7736_v7 }
 0x13c   : > { %6413 = vmatprep.mubr.msk.f32.mxu1 %vm7454_vm1, %v7455_v28  ;;  %6804 = vmatprep.subr.bf16.mxu1 %v7453_v24  ;;  %v7297_v52 = vpack.i.bf16 %v3869_v59, %v3868_v62  ;;  %v3856_v32 = vadd.f32 %v8030_v16, %v3834_v18  ;;  %v6805_v38 = vpack.c.bf16 %v7161_v34, %v7160_v21  ;;  %v3183_v41 = vmax.f32 %v3167_v25, 0.0 }
 0x13d   : > { %7293 = vrot.lane.b32.xlu0 %v7292_v31, %s7463_s30  ;;  %7288 = vrot.lane.b32.xlu1 %v7287_v9, %s7464_s7  ;;  %v6817_v43 = vpack.c.bf16 %v7196_v8, %v7195_v22  ;;  %v3871_v2 = vmax.f32 %v3855_v13, 0.0  ;;  %v3857_v37 = vadd.f32 %v7997_v50, %v3835_v15  ;;  %v7171_v33 = vunpack.i.h.bf16 %v8051_v30 }
 0x13e   : > { %v8156_v51 = vpop.permute.xlu1 %7208  ;;  %v7204_v35 = vpop.permute.xlu0 %7203  ;;  %6441 = vmatprep.mubr.msk.f32.mxu0 %vm7454_vm1, %v7455_v28  ;;  %6816 = vmatprep.subr.bf16.mxu0 %v7453_v24  ;;  %v7170_v16 = vunpack.i.l.bf16 %v8051_v30  ;;  %v7312_v4 = vpack.i.bf16 %v3183_v41, %v3182_v42  ;;  %v7181_v46 = vunpack.i.h.bf16 %v8068_v17  ;;  %v7180_v61 = vunpack.i.l.bf16 %v8068_v17 }
 0x13f   : > { %v7307_v36 = vpack.i.bf16 %v3871_v2, %v3870_v29  ;;  %v3872_v5 = vmax.f32 %v3856_v32, 0.0  ;;  %v7191_v50 = vunpack.i.h.bf16 %v8082_v48  ;;  %v7190_v0 = vunpack.i.l.bf16 %v8082_v48 }
 0x140   : > { %v7201_v30 = vunpack.i.h.bf16 %v8108_v3  ;;  %v7200_v54 = vunpack.i.l.bf16 %v8108_v3  ;;  %v7206_v17 = vunpack.i.h.bf16 %v7204_v35  ;;  %v7205_v31 = vunpack.i.l.bf16 %v7204_v35 }
 0x141   : > { %7303 = vrot.lane.b32.xlu0 %v7302_v27, %s7463_s30  ;;  %7298 = vrot.lane.b32.xlu1 %v7297_v52, %s7464_s7  ;;  %v3873_v12 = vmax.f32 %v3857_v37, 0.0  ;;  %v4512_v48 = vmul.f32 %v8128_v63, %v7601_v19  ;;  %v4513_v3 = vmul.f32 %v8130_v26, %v7601_v19  ;;  %v4510_v62 = vmul.f32 %v8128_v63, %v7604_v20 }
 0x142   : > { %v8167_v44 = vpop.permute.xlu1 %5196  ;;  %v8169_v45 = vpop.permute.xlu0 %5194  ;;  %6414 = vmatmul.mubr.msk.f32.vlgmr.msra.gmra.mrb[0].mxu1 %vm461_vm2, %v7928_v60  ;;  %6442 = vmatmul.mubr.msk.f32.vlgmr.msra.gmra.mrb[2].mxu0 %vm461_vm2, %v7651_v47  ;;  %v4511_v1 = vmul.f32 %v8130_v26, %v7604_v20  ;;  %v6832_v18 = vpack.c.bf16 %v7171_v33, %v7170_v16  ;;  %v6835_v34 = vpack.c.bf16 %v7181_v46, %v7180_v61 }
 0x143   : > { %6806 = vmatpush3.bf16.msra.mxu1 %v6805_v38  ;;  %6818 = vmatpush3.bf16.msra.mxu0 %v6817_v43  ;;  %v7317_v9 = vpack.i.bf16 %v3873_v12, %v3872_v5  ;;  %v8202_v21 = vpack.c.bf16 %v7191_v50, %v7190_v0  ;;  %v8204_v57 = vpack.c.bf16 %v7201_v30, %v7200_v54 }
 0x144   : > { %6420 = vmatprep.mubr.msk.f32.mxu1 %vm7454_vm1, %v7455_v28  ;;  %6448 = vmatprep.mubr.msk.f32.mxu0 %vm7454_vm1, %v7455_v28  ;;  %v6820_v25 = vpack.c.bf16 %v7206_v17, %v7205_v31  ;;  %v4514_v35 = vmul.f32 %v8128_v63, %v7611_v23  ;;  %v4515_v59 = vmul.f32 %v8130_v26, %v7611_v23 }
 0x145   : > { %7313 = vrot.lane.b32.xlu0 %v7312_v4, %s7463_s30  ;;  %7308 = vrot.lane.b32.xlu1 %v7307_v36, %s7464_s7  ;;  %v4516_v42 = vmul.f32 %v8128_v63, %v7663_v53  ;;  %v4517_v15 = vmul.f32 %v8130_v26, %v7663_v53  ;;  %v4518_v41 = vmul.f32 %v8128_v63, %v7671_v58 }
 0x146   : > { %v8190_v6 = vpop.permute.xlu1 %7218  ;;  %v7214_v11 = vpop.permute.xlu0 %7213  ;;  %6819 = vmatprep.subr.bf16.mxu0 %v7453_v24  ;;  %6831 = vmatprep.subr.bf16.mxu1 %v7453_v24  ;;  %v4519_v43 = vmul.f32 %v8130_v26, %v7671_v58  ;;  %v5202_v4 = vmul.f32 %v8169_v45, %v7601_v19  ;;  %v5203_v46 = vmul.f32 %v8167_v44, %v7601_v19 }
 0x147   : > { %v7216_v2 = vunpack.i.h.bf16 %v7214_v11  ;;  %v7215_v37 = vunpack.i.l.bf16 %v7214_v11  ;;  %v5200_v36 = vmul.f32 %v8169_v45, %v7604_v20  ;;  %v5201_v5 = vmul.f32 %v8167_v44, %v7604_v20 }
 0x148   : > { %v5204_v19 = vmul.f32 %v8169_v45, %v7611_v23  ;;  %v4520_v17 = vmul.f32 %v8128_v63, %v7693_v10  ;;  %v4521_v31 = vmul.f32 %v8130_v26, %v7693_v10  ;;  %v8262_v11 = vmul.f32 %v8128_v63, %v7726_v56 }
 0x149   : > { %7318 = vrot.lane.b32.xlu1 %v7317_v9, %s7464_s7  ;;  %v6823_v20 = vpack.c.bf16 %v7216_v2, %v7215_v37  ;;  %v5207_v37 = vmul.f32 %v8167_v44, %v7663_v53 }
 0x14a   : > { %v8207_v8 = vpop.permute.xlu1 %4528  ;;  %v8209_v22 = vpop.permute.xlu0 %4526  ;;  %6421 = vmatmul.mubr.msk.f32.vlgmr.msra.gmra.mrb[0].mxu1 %vm461_vm2, %v7952_v55  ;;  %6449 = vmatmul.mubr.msk.f32.vlgmr.msra.gmra.mrb[2].mxu0 %vm461_vm2, %v7833_v49 }
 0x14b   : > { %6833 = vmatpush3.bf16.msra.mxu1 %v6832_v18  ;;  %v4534_v13 = vadd.f32 %v8209_v22, %v4512_v48  ;;  %v4535_v27 = vadd.f32 %v8207_v8, %v4513_v3  ;;  %6821 = vmatpush3.bf16.msra.mxu0 %v6820_v25  ;;  %v4532_v52 = vadd.f32 %v8209_v22, %v4510_v62 }
 0x14c   : > { %6483 = vmatprep.mubr.msk.f32.mxu1 %vm7454_vm1, %v7455_v28  ;;  %v4533_v29 = vadd.f32 %v8207_v8, %v4511_v1  ;;  %6834 = vmatprep.subr.bf16.mxu1 %v7453_v24  ;;  %v4536_v61 = vadd.f32 %v8209_v22, %v4514_v35  ;;  %v4537_v54 = vadd.f32 %v8207_v8, %v4515_v59 }
 0x14d   : > { %v4550_v32 = vmax.f32 %v4534_v13, 0.0  ;;  %v4551_v38 = vmax.f32 %v4535_v27, 0.0  ;;  %6455 = vmatprep.mubr.msk.f32.mxu0 %vm7454_vm1, %v7455_v28  ;;  %6822 = vmatprep.subr.bf16.mxu0 %v7453_v24  ;;  %v4548_v0 = vmax.f32 %v4532_v52, 0.0  ;;  %v4538_v3 = vadd.f32 %v8209_v22, %v4516_v42 }
 0x14e   : > { %v8236_v33 = vpop.permute.xlu1 %7228  ;;  %v7224_v16 = vpop.permute.xlu0 %7223  ;;  %6484 = vmatmul.mubr.msk.f32.vlgmr.msra.gmra.mrb[2].mxu1 %vm461_vm2, %v7635_v40  ;;  %v4549_v30 = vmax.f32 %v4533_v29, 0.0  ;;  %v4539_v9 = vadd.f32 %v8207_v8, %v4517_v15  ;;  %v5205_v62 = vmul.f32 %v8167_v44, %v7611_v23  ;;  %v4552_v1 = vmax.f32 %v4536_v61, 0.0  ;;  %v8286_v15 = vld [vmem:[%s7542_s10] sm:$0xff]  ;;  %s7466_s10 = smov 121  }
 0x14f   : > { %6836 = vmatpush3.bf16.msra.mxu1 %v6835_v34  ;;  %6490 = vmatprep.mubr.msk.f32.mxu1 %vm7454_vm1, %v7455_v28  ;;  %v7322_v50 = vpack.i.bf16 %v4551_v38, %v4550_v32  ;;  %v5206_v25 = vmul.f32 %v8169_v45, %v7663_v53  ;;  %v4553_v59 = vmax.f32 %v4537_v54, 0.0  ;;  %v7226_v27 = vunpack.i.h.bf16 %v7224_v16 }
 0x150   : > { %6837 = vmatprep.subr.bf16.mxu1 %v7453_v24  ;;  %v7332_v35 = vpack.i.bf16 %v4549_v30, %v4548_v0  ;;  %v7225_v42 = vunpack.i.l.bf16 %v7224_v16  ;;  %v4554_v32 = vmax.f32 %v4538_v3, 0.0  ;;  %v4555_v38 = vmax.f32 %v4539_v9, 0.0 }
 0x151   : > { %7323 = vrot.lane.b32.xlu0 %v7322_v50, %s7465_s8  ;;  %v4540_v2 = vadd.f32 %v8209_v22, %v4518_v41  ;;  %v4541_v16 = vadd.f32 %v8207_v8, %v4519_v43  ;;  %v7342_v61 = vpack.i.bf16 %v4553_v59, %v4552_v1  ;;  %v4523_v53 = vmul.f32 %v8130_v26, %v7726_v56 }
 0x152   : > { %v8265_v12 = vpop.permute.xlu1 %5218  ;;  %v8267_v48 = vpop.permute.xlu0 %5216  ;;  %6456 = vmatmul.mubr.msk.f32.vlgmr.msra.gmra.mrb[2].mxu0 %vm461_vm2, %v7869_v39  ;;  %v6826_v41 = vpack.c.bf16 %v7226_v27, %v7225_v42  ;;  %v5209_v43 = vmul.f32 %v8167_v44, %v7671_v58  ;;  %v7352_v0 = vpack.i.bf16 %v4555_v38, %v4554_v32  ;;  %v4542_v30 = vadd.f32 %v8209_v22, %v4520_v17 }
 0x153   : > { %v5224_v18 = vadd.f32 %v8267_v48, %v5202_v4  ;;  %v5225_v34 = vadd.f32 %v8265_v12, %v5203_v46  ;;  %6824 = vmatpush3.bf16.msra.mxu0 %v6823_v20  ;;  %6462 = vmatprep.mubr.msk.f32.mxu0 %vm7454_vm1, %v7455_v28  ;;  %v5222_v23 = vadd.f32 %v8267_v48, %v5200_v36  ;;  %v4556_v20 = vmax.f32 %v4540_v2, 0.0 }
 0x154   : > { %v5223_v13 = vadd.f32 %v8265_v12, %v5201_v5  ;;  %6825 = vmatprep.subr.bf16.mxu0 %v7453_v24  ;;  %v5226_v4 = vadd.f32 %v8267_v48, %v5204_v19  ;;  %v5227_v46 = vadd.f32 %v8265_v12, %v5205_v62  ;;  %v4543_v54 = vadd.f32 %v8207_v8, %v4521_v31 }
 0x155   : > { %v5240_v52 = vmax.f32 %v5224_v18, 0.0  ;;  %v5241_v29 = vmax.f32 %v5225_v34, 0.0  ;;  %7333 = vrot.lane.b32.xlu0 %v7332_v35, %s7465_s8  ;;  %v5238_v5 = vmax.f32 %v5222_v23, 0.0  ;;  %v4557_v3 = vmax.f32 %v4541_v16, 0.0 }
 0x156   : > { %6491 = vmatmul.mubr.msk.f32.vlgmr.msra.gmra.mrb[2].mxu1 %vm461_vm2, %v8286_v15  ;;  %v5239_v50 = vmax.f32 %v5223_v13, 0.0  ;;  %v7234_v19 = vpop.permute.xlu0 %7233  ;;  %v5242_v9 = vmax.f32 %v5226_v4, 0.0  ;;  %v5243_v62 = vmax.f32 %v5227_v46, 0.0  ;;  %v5228_v1 = vadd.f32 %v8267_v48, %v5206_v25 }
 0x157   : > { %6839 = vmatpush3.bf16.msra.mxu1 %v8202_v21  ;;  %6497 = vmatprep.mubr.msk.f32.mxu1 %vm7454_vm1, %v7455_v28  ;;  %v7327_v36 = vpack.i.bf16 %v5241_v29, %v5240_v52  ;;  %v5208_v21 = vmul.f32 %v8169_v45, %v7671_v58  ;;  %v5229_v18 = vadd.f32 %v8265_v12, %v5207_v37  ;;  %v7236_v59 = vunpack.i.h.bf16 %v7234_v19 }
 0x158   : > { %6840 = vmatprep.subr.bf16.mxu1 %v7453_v24  ;;  %v7337_v58 = vpack.i.bf16 %v5239_v50, %v5238_v5  ;;  %v4544_v17 = vadd.f32 %v8209_v22, %v8262_v11  ;;  %v4524_v31 = vmul.f32 %v8128_v63, %v7736_v7  ;;  %v4525_v34 = vmul.f32 %v8130_v26, %v7736_v7 }
 0x159   : > { %7343 = vrot.lane.b32.xlu0 %v7342_v61, %s7465_s8  ;;  %7328 = vrot.lane.b32.xlu1 %v7327_v36, %s7466_s10  ;;  %v5210_v35 = vmul.f32 %v8169_v45, %v7693_v10  ;;  %v7235_v23 = vunpack.i.l.bf16 %v7234_v19  ;;  %v4558_v25 = vmax.f32 %v4542_v30, 0.0  ;;  %v4559_v13 = vmax.f32 %v4543_v54, 0.0 }
 0x15a   : > { %6463 = vmatmul.mubr.msk.f32.vlgmr.msra.gmra.mrb[2].mxu0 %vm461_vm2, %v7900_v14  ;;  %v7362_v11 = vpack.i.bf16 %v4557_v3, %v4556_v20  ;;  %v7347_v27 = vpack.i.bf16 %v5243_v62, %v5242_v9  ;;  %v4545_v63 = vadd.f32 %v8207_v8, %v4523_v53  ;;  %v5211_v26 = vmul.f32 %v8167_v44, %v7693_v10 }
 0x15b   : > { %6827 = vmatpush3.bf16.msra.mxu0 %v6826_v41  ;;  %6469 = vmatprep.mubr.msk.f32.mxu0 %vm7454_vm1, %v7455_v28  ;;  %v5244_v42 = vmax.f32 %v5228_v1, 0.0  ;;  %v5245_v52 = vmax.f32 %v5229_v18, 0.0  ;;  %v5230_v29 = vadd.f32 %v8267_v48, %v5208_v21  ;;  %v5231_v32 = vadd.f32 %v8265_v12, %v5209_v43 }
 0x15c   : > { %6828 = vmatprep.subr.bf16.mxu0 %v7453_v24  ;;  %v7211_v38 = vunpack.i.h.bf16 %v8156_v51  ;;  %v7210_v2 = vunpack.i.l.bf16 %v8156_v51  ;;  %v5212_v10 = vmul.f32 %v8169_v45, %v7726_v56  ;;  %v6829_v37 = vpack.c.bf16 %v7236_v59, %v7235_v23  ;;  %v7239_v23 = vpop.permute.xlu1 %7238 }
 0x15d   : > { %7353 = vrot.lane.b32.xlu0 %v7352_v0, %s7465_s8  ;;  %7338 = vrot.lane.b32.xlu1 %v7337_v58, %s7466_s10  ;;  %v4560_v16 = vmax.f32 %v4544_v17, 0.0  ;;  %v5213_v4 = vmul.f32 %v8167_v44, %v7726_v56  ;;  %v4561_v46 = vmax.f32 %v4545_v63, 0.0  ;;  %v4546_v51 = vadd.f32 %v8209_v22, %v4524_v31 }
 0x15e   : > { %6498 = vmatmul.mubr.msk.f32.vlgmr.msra.gmra.mrb[2].mxu1 %vm461_vm2, %v7651_v47  ;;  %v4547_v61 = vadd.f32 %v8207_v8, %v4525_v34  ;;  %v5232_v36 = vadd.f32 %v8267_v48, %v5210_v35  ;;  %v7357_v5 = vpack.i.bf16 %v5245_v52, %v5244_v42  ;;  %v5246_v50 = vmax.f32 %v5230_v29, 0.0 }
 0x15f   : > { %6842 = vmatpush3.bf16.msra.mxu1 %v8204_v57  ;;  %6504 = vmatprep.mubr.msk.f32.mxu1 %vm7454_vm1, %v7455_v28  ;;  %v7372_v57 = vpack.i.bf16 %v4559_v13, %v4558_v25  ;;  %v5247_v41 = vmax.f32 %v5231_v32, 0.0  ;;  %v5233_v53 = vadd.f32 %v8265_v12, %v5211_v26  ;;  %v6844_v56 = vpack.c.bf16 %v7211_v38, %v7210_v2 }
 0x160   : > { %6843 = vmatprep.subr.bf16.mxu1 %v7453_v24  ;;  %v5214_v8 = vmul.f32 %v8169_v45, %v7736_v7  ;;  %v5215_v22 = vmul.f32 %v8167_v44, %v7736_v7  ;;  %v7382_v21 = vpack.i.bf16 %v4561_v46, %v4560_v16  ;;  %v4562_v43 = vmax.f32 %v4546_v51, 0.0 }
 0x161   : > { %7363 = vrot.lane.b32.xlu0 %v7362_v11, %s7465_s8  ;;  %7348 = vrot.lane.b32.xlu1 %v7347_v27, %s7466_s10  ;;  %v4563_v0 = vmax.f32 %v4547_v61, 0.0  ;;  %v5248_v30 = vmax.f32 %v5232_v36, 0.0  ;;  %v7367_v54 = vpack.i.bf16 %v5247_v41, %v5246_v50  ;;  %v5249_v19 = vmax.f32 %v5233_v53, 0.0 }
 0x162   : > { %6470 = vmatmul.mubr.msk.f32.vlgmr.msra.gmra.mrb[2].mxu0 %vm461_vm2, %v7928_v60  ;;  %v5234_v20 = vadd.f32 %v8267_v48, %v5212_v10  ;;  %v5235_v45 = vadd.f32 %v8265_v12, %v5213_v4  ;;  %v7221_v7 = vunpack.i.h.bf16 %v8190_v6  ;;  %v7220_v44 = vunpack.i.l.bf16 %v8190_v6 }
 0x163   : > { %6830 = vmatpush3.bf16.msra.mxu0 %v6829_v37  ;;  %6476 = vmatprep.mubr.msk.f32.mxu0 %vm7454_vm1, %v7455_v28  ;;  %v7392_v3 = vpack.i.bf16 %v4563_v0, %v4562_v43  ;;  %v5236_v9 = vadd.f32 %v8267_v48, %v5214_v8  ;;  %v7377_v62 = vpack.i.bf16 %v5249_v19, %v5248_v30  ;;  %v7230_v34 = vunpack.i.l.bf16 %v8236_v33 }
 0x164   : > { %6855 = vmatprep.subr.bf16.mxu0 %v7453_v24  ;;  %v5250_v58 = vmax.f32 %v5234_v20, 0.0  ;;  %v5251_v1 = vmax.f32 %v5235_v45, 0.0  ;;  %v5237_v18 = vadd.f32 %v8265_v12, %v5215_v22  ;;  %v6847_v17 = vpack.c.bf16 %v7221_v7, %v7220_v44 }
 0x165   : > { %7373 = vrot.lane.b32.xlu0 %v7372_v57, %s7465_s8  ;;  %7358 = vrot.lane.b32.xlu1 %v7357_v5, %s7466_s10  ;;  %v5252_v31 = vmax.f32 %v5236_v9, 0.0  ;;  %v7231_v12 = vunpack.i.h.bf16 %v8236_v33  ;;  %v7241_v25 = vunpack.i.h.bf16 %v7239_v23  ;;  %v7240_v13 = vunpack.i.l.bf16 %v7239_v23 }
 0x166   : > { %6505 = vmatmul.mubr.msk.f32.vlgmr.msra.gmra.mrb[2].mxu1 %vm461_vm2, %v7833_v49  ;;  %v7387_v6 = vpack.i.bf16 %v5251_v1, %v5250_v58  ;;  %v5253_v48 = vmax.f32 %v5237_v18, 0.0 }
 0x167   : > { %6845 = vmatpush3.bf16.msra.mxu1 %v6844_v56  ;;  %6511 = vmatprep.mubr.msk.f32.mxu1 %vm7454_vm1, %v7455_v28  ;;  %v6850_v59 = vpack.c.bf16 %v7231_v12, %v7230_v34  ;;  %v6853_v11 = vpack.c.bf16 %v7241_v25, %v7240_v13 }
 0x168   : > { %6846 = vmatprep.subr.bf16.mxu1 %v7453_v24  ;;  %v7397_v35 = vpack.i.bf16 %v5253_v48, %v5252_v31 }
 0x169   : > { %7383 = vrot.lane.b32.xlu0 %v7382_v21, %s7465_s8  ;;  %7368 = vrot.lane.b32.xlu1 %v7367_v54, %s7466_s10 }
 0x16a   : > { %6477 = vmatmul.mubr.msk.f32.vlgmr.msra.gmra.mrb[2].mxu0 %vm461_vm2, %v7952_v55 }
 0x16b   : > { %6539 = vmatprep.mubr.msk.f32.mxu0 %vm7454_vm1, %v7455_v28 }
 0x16d   : > { %7393 = vrot.lane.b32.xlu0 %v7392_v3, %s7465_s8  ;;  %7378 = vrot.lane.b32.xlu1 %v7377_v62, %s7466_s10 }
 0x16e   : > { %6512 = vmatmul.mubr.msk.f32.vlgmr.msra.gmra.mrb[2].mxu1 %vm461_vm2, %v7869_v39 }
 0x16f   : > { %6848 = vmatpush3.bf16.msra.mxu1 %v6847_v17  ;;  %6518 = vmatprep.mubr.msk.f32.mxu1 %vm7454_vm1, %v7455_v28 }
 0x170   : > { %6849 = vmatprep.subr.bf16.mxu1 %v7453_v24 }
 0x171   : > { %7388 = vrot.lane.b32.xlu1 %v7387_v6, %s7466_s10 }
 0x175   : > { %7398 = vrot.lane.b32.xlu1 %v7397_v35, %s7466_s10 }
 0x176   : > { %6519 = vmatmul.mubr.msk.f32.vlgmr.msra.gmra.mrb[2].mxu1 %vm461_vm2, %v7900_v14 }
 0x177   : > { %6851 = vmatpush3.bf16.msra.mxu1 %v6850_v59  ;;  %6525 = vmatprep.mubr.msk.f32.mxu1 %vm7454_vm1, %v7455_v28 }
 0x178   : > { %6852 = vmatprep.subr.bf16.mxu1 %v7453_v24 }
 0x17e   : > { %6526 = vmatmul.mubr.msk.f32.vlgmr.msra.gmra.mrb[2].mxu1 %vm461_vm2, %v7928_v60 }
 0x17f   : > { %6854 = vmatpush3.bf16.msra.mxu1 %v6853_v11  ;;  %6532 = vmatprep.mubr.msk.f32.mxu1 %vm7454_vm1, %v7455_v28 }
 0x180   : > { %6879 = vmatprep.subr.bf16.mxu1 %v7453_v24 }
 0x186   : > { %6533 = vmatmul.mubr.msk.f32.vlgmr.msra.gmra.mrb[2].mxu1 %vm461_vm2, %v7952_v55 }
 0x187   : > { %6595 = vmatprep.mubr.msk.f32.mxu1 %vm7454_vm1, %v7455_v28 }
 0x19b   : > { %v7244_v33 = vpop.permute.xlu0 %7243 }
 0x19c   : > { %v7246_v27 = vunpack.i.h.bf16 %v7244_v33  ;;  %v7245_v63 = vunpack.i.l.bf16 %v7244_v33 }
 0x19e   : > { %v6856_v26 = vpack.c.bf16 %v7246_v27, %v7245_v63 }
 0x19f   : > { %v7254_v42 = vpop.permute.xlu0 %7253  ;;  %v7249_v52 = vpop.permute.xlu1 %7248 }
 0x1a0   : > { %v7256_v29 = vunpack.i.h.bf16 %v7254_v42  ;;  %v7255_v32 = vunpack.i.l.bf16 %v7254_v42  ;;  %6857 = vmatpush3.bf16.msra.mxu0 %v6856_v26  ;;  %v7251_v38 = vunpack.i.h.bf16 %v7249_v52  ;;  %v7250_v2 = vunpack.i.l.bf16 %v7249_v52 }
 0x1a1   : > { %6858 = vmatprep.subr.bf16.mxu0 %v7453_v24 }
 0x1a2   : > { %v6859_v10 = vpack.c.bf16 %v7256_v29, %v7255_v32  ;;  %v6880_v37 = vpack.c.bf16 %v7251_v38, %v7250_v2 }
 0x1a3   : > { %v7264_v57 = vpop.permute.xlu0 %7263  ;;  %6540 = vmatmul.mubr.msk.f32.vlgmr.msra.gmra.mrb[4].mxu0 %vm461_vm2, %v7635_v40  ;;  %v7259_v16 = vpop.permute.xlu1 %7258 }
 0x1a4   : > { %6860 = vmatpush3.bf16.msra.mxu0 %v6859_v10  ;;  %6546 = vmatprep.mubr.msk.f32.mxu0 %vm7454_vm1, %v7455_v28  ;;  %v7261_v4 = vunpack.i.h.bf16 %v7259_v16  ;;  %v7260_v46 = vunpack.i.l.bf16 %v7259_v16  ;;  %v7266_v51 = vunpack.i.h.bf16 %v7264_v57  ;;  %v7265_v61 = vunpack.i.l.bf16 %v7264_v57 }
 0x1a5   : > { %6881 = vmatpush3.bf16.msra.mxu1 %v6880_v37  ;;  %6861 = vmatprep.subr.bf16.mxu0 %v7453_v24 }
 0x1a6   : > { %6882 = vmatprep.subr.bf16.mxu1 %v7453_v24  ;;  %v6883_v36 = vpack.c.bf16 %v7261_v4, %v7260_v46  ;;  %v6862_v50 = vpack.c.bf16 %v7266_v51, %v7265_v61 }
 0x1a7   : > { %v7269_v5 = vpop.permute.xlu1 %7268  ;;  %v7274_v56 = vpop.permute.xlu0 %7273 }
 0x1a8   : > { %6596 = vmatmul.mubr.msk.f32.vlgmr.msra.gmra.mrb[4].mxu1 %vm461_vm2, %v7635_v40  ;;  %v7271_v41 = vunpack.i.h.bf16 %v7269_v5  ;;  %v7270_v53 = vunpack.i.l.bf16 %v7269_v5  ;;  %v7276_v8 = vunpack.i.h.bf16 %v7274_v56  ;;  %v7275_v22 = vunpack.i.l.bf16 %v7274_v56  ;;  %v8422_v0 = vpop.f32.mrb[0].mxu0 }
 0x1a9   : > { %6884 = vmatpush3.bf16.msra.mxu1 %v6883_v36  ;;  %6602 = vmatprep.mubr.msk.f32.mxu1 %vm7454_vm1, %v7455_v28  ;;  %v6366_v30 = vpop.f32.mrb[1].mxu0 }
 0x1aa   : > { %6885 = vmatprep.subr.bf16.mxu1 %v7453_v24  ;;  %v6886_v21 = vpack.c.bf16 %v7271_v41, %v7270_v53  ;;  %v6865_v54 = vpack.c.bf16 %v7276_v8, %v7275_v22 }
 0x1ab   : > { %6547 = vmatmul.mubr.msk.f32.vlgmr.msra.gmra.mrb[4].mxu0 %vm461_vm2, %v8286_v15  ;;  %v7279_v43 = vpop.permute.xlu1 %7278  ;;  %v7284_v45 = vpop.permute.xlu0 %7283 }
 0x1ac   : > { %6863 = vmatpush3.bf16.msra.mxu0 %v6862_v50  ;;  %6553 = vmatprep.mubr.msk.f32.mxu0 %vm7454_vm1, %v7455_v28  ;;  %v7281_v19 = vunpack.i.h.bf16 %v7279_v43  ;;  %v7280_v20 = vunpack.i.l.bf16 %v7279_v43  ;;  %v7286_v7 = vunpack.i.h.bf16 %v7284_v45  ;;  %v7285_v44 = vunpack.i.l.bf16 %v7284_v45 }
 0x1ad   : > { %6864 = vmatprep.subr.bf16.mxu0 %v7453_v24 }
 0x1ae   : > { %v6889_v3 = vpack.c.bf16 %v7281_v19, %v7280_v20  ;;  %v6868_v62 = vpack.c.bf16 %v7286_v7, %v7285_v44 }
 0x1af   : > { %v7289_v9 = vpop.permute.xlu1 %7288  ;;  %v7294_v18 = vpop.permute.xlu0 %7293 }
 0x1b0   : > { %6603 = vmatmul.mubr.msk.f32.vlgmr.msra.gmra.mrb[4].mxu1 %vm461_vm2, %v8286_v15  ;;  %v7291_v58 = vunpack.i.h.bf16 %v7289_v9  ;;  %v7290_v1 = vunpack.i.l.bf16 %v7289_v9  ;;  %v7296_v17 = vunpack.i.h.bf16 %v7294_v18  ;;  %v7295_v6 = vunpack.i.l.bf16 %v7294_v18 }
 0x1b1   : > { %6887 = vmatpush3.bf16.msra.mxu1 %v6886_v21  ;;  %6609 = vmatprep.mubr.msk.f32.mxu1 %vm7454_vm1, %v7455_v28 }
 0x1b2   : > { %6888 = vmatprep.subr.bf16.mxu1 %v7453_v24  ;;  %v6892_v31 = vpack.c.bf16 %v7291_v58, %v7290_v1  ;;  %v6871_v12 = vpack.c.bf16 %v7296_v17, %v7295_v6 }
 0x1b3   : > { %6554 = vmatmul.mubr.msk.f32.vlgmr.msra.gmra.mrb[4].mxu0 %vm461_vm2, %v7651_v47  ;;  %v7299_v48 = vpop.permute.xlu1 %7298  ;;  %v7304_v59 = vpop.permute.xlu0 %7303 }
 0x1b4   : > { %6866 = vmatpush3.bf16.msra.mxu0 %v6865_v54  ;;  %6560 = vmatprep.mubr.msk.f32.mxu0 %vm7454_vm1, %v7455_v28  ;;  %v7301_v34 = vunpack.i.h.bf16 %v7299_v48  ;;  %v7300_v35 = vunpack.i.l.bf16 %v7299_v48  ;;  %v7306_v23 = vunpack.i.h.bf16 %v7304_v59  ;;  %v7305_v25 = vunpack.i.l.bf16 %v7304_v59 }
 0x1b5   : > { %6867 = vmatprep.subr.bf16.mxu0 %v7453_v24 }
 0x1b6   : > { %v6895_v13 = vpack.c.bf16 %v7301_v34, %v7300_v35  ;;  %v6874_v33 = vpack.c.bf16 %v7306_v23, %v7305_v25 }
 0x1b7   : > { %v7309_v11 = vpop.permute.xlu1 %7308  ;;  %v7314_v26 = vpop.permute.xlu0 %7313 }
 0x1b8   : > { %6610 = vmatmul.mubr.msk.f32.vlgmr.msra.gmra.mrb[4].mxu1 %vm461_vm2, %v7651_v47  ;;  %v7311_v27 = vunpack.i.h.bf16 %v7309_v11  ;;  %v7310_v63 = vunpack.i.l.bf16 %v7309_v11  ;;  %v7316_v42 = vunpack.i.h.bf16 %v7314_v26  ;;  %v7315_v52 = vunpack.i.l.bf16 %v7314_v26 }
 0x1b9   : > { %6890 = vmatpush3.bf16.msra.mxu1 %v6889_v3  ;;  %6616 = vmatprep.mubr.msk.f32.mxu1 %vm7454_vm1, %v7455_v28 }
 0x1ba   : > { %6891 = vmatprep.subr.bf16.mxu1 %v7453_v24  ;;  %v6898_v29 = vpack.c.bf16 %v7311_v27, %v7310_v63  ;;  %v6877_v2 = vpack.c.bf16 %v7316_v42, %v7315_v52 }
 0x1bb   : > { %6561 = vmatmul.mubr.msk.f32.vlgmr.msra.gmra.mrb[4].mxu0 %vm461_vm2, %v7833_v49  ;;  %v7319_v32 = vpop.permute.xlu1 %7318 }
 0x1bc   : > { %6869 = vmatpush3.bf16.msra.mxu0 %v6868_v62  ;;  %6567 = vmatprep.mubr.msk.f32.mxu0 %vm7454_vm1, %v7455_v28  ;;  %v7321_v10 = vunpack.i.h.bf16 %v7319_v32  ;;  %v7320_v37 = vunpack.i.l.bf16 %v7319_v32 }
 0x1bd   : > { %6870 = vmatprep.subr.bf16.mxu0 %v7453_v24 }
 0x1be   : > { %v6901_v46 = vpack.c.bf16 %v7321_v10, %v7320_v37 }
 0x1c0   : > { %6617 = vmatmul.mubr.msk.f32.vlgmr.msra.gmra.mrb[4].mxu1 %vm461_vm2, %v7833_v49 }
 0x1c1   : > { %6893 = vmatpush3.bf16.msra.mxu1 %v6892_v31  ;;  %6623 = vmatprep.mubr.msk.f32.mxu1 %vm7454_vm1, %v7455_v28 }
 0x1c2   : > { %6894 = vmatprep.subr.bf16.mxu1 %v7453_v24 }
 0x1c3   : > { %6568 = vmatmul.mubr.msk.f32.vlgmr.msra.gmra.mrb[4].mxu0 %vm461_vm2, %v7869_v39  ;;  %v7324_v38 = vpop.permute.xlu0 %7323 }
 0x1c4   : > { %6872 = vmatpush3.bf16.msra.mxu0 %v6871_v12  ;;  %6574 = vmatprep.mubr.msk.f32.mxu0 %vm7454_vm1, %v7455_v28  ;;  %v7326_v57 = vunpack.i.h.bf16 %v7324_v38  ;;  %v7325_v16 = vunpack.i.l.bf16 %v7324_v38 }
 0x1c5   : > { %6873 = vmatprep.subr.bf16.mxu0 %v7453_v24 }
 0x1c6   : > { %v6904_v61 = vpack.c.bf16 %v7326_v57, %v7325_v16 }
 0x1c7   : > { %v7334_v51 = vpop.permute.xlu0 %7333 }
 0x1c8   : > { %6624 = vmatmul.mubr.msk.f32.vlgmr.msra.gmra.mrb[4].mxu1 %vm461_vm2, %v7869_v39  ;;  %v7336_v36 = vunpack.i.h.bf16 %v7334_v51  ;;  %v7335_v5 = vunpack.i.l.bf16 %v7334_v51 }
 0x1c9   : > { %6896 = vmatpush3.bf16.msra.mxu1 %v6895_v13  ;;  %6630 = vmatprep.mubr.msk.f32.mxu1 %vm7454_vm1, %v7455_v28 }
 0x1ca   : > { %6897 = vmatprep.subr.bf16.mxu1 %v7453_v24  ;;  %v6907_v56 = vpack.c.bf16 %v7336_v36, %v7335_v5 }
 0x1cb   : > { %6575 = vmatmul.mubr.msk.f32.vlgmr.msra.gmra.mrb[4].mxu0 %vm461_vm2, %v7900_v14  ;;  %v7329_v4 = vpop.permute.xlu1 %7328  ;;  %v7344_v22 = vpop.permute.xlu0 %7343 }
 0x1cc   : > { %6875 = vmatpush3.bf16.msra.mxu0 %v6874_v33  ;;  %6581 = vmatprep.mubr.msk.f32.mxu0 %vm7454_vm1, %v7455_v28  ;;  %v7331_v50 = vunpack.i.h.bf16 %v7329_v4  ;;  %v7330_v41 = vunpack.i.l.bf16 %v7329_v4  ;;  %v7346_v30 = vunpack.i.h.bf16 %v7344_v22  ;;  %v7345_v54 = vunpack.i.l.bf16 %v7344_v22 }
 0x1cd   : > { %6876 = vmatprep.subr.bf16.mxu0 %v7453_v24 }
 0x1ce   : > { %v6928_v8 = vpack.c.bf16 %v7331_v50, %v7330_v41  ;;  %v6910_v45 = vpack.c.bf16 %v7346_v30, %v7345_v54 }
 0x1cf   : > { %v7339_v53 = vpop.permute.xlu1 %7338  ;;  %v7354_v7 = vpop.permute.xlu0 %7353 }
 0x1d0   : > { %6631 = vmatmul.mubr.msk.f32.vlgmr.msra.gmra.mrb[4].mxu1 %vm461_vm2, %v7900_v14  ;;  %v7341_v21 = vunpack.i.h.bf16 %v7339_v53  ;;  %v7340_v43 = vunpack.i.l.bf16 %v7339_v53  ;;  %v7355_v9 = vunpack.i.l.bf16 %v7354_v7 }
 0x1d1   : > { %6899 = vmatpush3.bf16.msra.mxu1 %v6898_v29  ;;  %6637 = vmatprep.mubr.msk.f32.mxu1 %vm7454_vm1, %v7455_v28 }
 0x1d2   : > { %6900 = vmatprep.subr.bf16.mxu1 %v7453_v24  ;;  %v6931_v19 = vpack.c.bf16 %v7341_v21, %v7340_v43 }
 0x1d3   : > { %6582 = vmatmul.mubr.msk.f32.vlgmr.msra.gmra.mrb[4].mxu0 %vm461_vm2, %v7928_v60  ;;  %v7349_v20 = vpop.permute.xlu1 %7348  ;;  %v7364_v18 = vpop.permute.xlu0 %7363 }
 0x1d4   : > { %6878 = vmatpush3.bf16.msra.mxu0 %v6877_v2  ;;  %6588 = vmatprep.mubr.msk.f32.mxu0 %vm7454_vm1, %v7455_v28  ;;  %v7351_v44 = vunpack.i.h.bf16 %v7349_v20  ;;  %v7350_v3 = vunpack.i.l.bf16 %v7349_v20  ;;  %v7365_v31 = vunpack.i.l.bf16 %v7364_v18 }
 0x1d5   : > { %6903 = vmatprep.subr.bf16.mxu0 %v7453_v24 }
 0x1d6   : > { %v6934_v62 = vpack.c.bf16 %v7351_v44, %v7350_v3 }
 0x1d7   : > { %v7359_v58 = vpop.permute.xlu1 %7358  ;;  %v7374_v35 = vpop.permute.xlu0 %7373 }
 0x1d8   : > { %6638 = vmatmul.mubr.msk.f32.vlgmr.msra.gmra.mrb[4].mxu1 %vm461_vm2, %v7928_v60  ;;  %v7361_v17 = vunpack.i.h.bf16 %v7359_v58  ;;  %v7360_v6 = vunpack.i.l.bf16 %v7359_v58  ;;  %v7375_v25 = vunpack.i.l.bf16 %v7374_v35 }
 0x1d9   : > { %6902 = vmatpush3.bf16.msra.mxu1 %v6901_v46  ;;  %6644 = vmatprep.mubr.msk.f32.mxu1 %vm7454_vm1, %v7455_v28 }
 0x1da   : > { %6927 = vmatprep.subr.bf16.mxu1 %v7453_v24  ;;  %v6937_v48 = vpack.c.bf16 %v7361_v17, %v7360_v6  ;;  %v6115_v6 = vld [vmem:[#allocation3] ss:$0 sm:$0xff] (!%p6114_p8) }
 0x1db   : > { %6589 = vmatmul.mubr.msk.f32.vlgmr.msra.gmra.mrb[4].mxu0 %vm461_vm2, %v7952_v55  ;;  %v7369_v12 = vpop.permute.xlu1 %7368  ;;  %v7384_v27 = vpop.permute.xlu0 %7383 }
 0x1dc   : > { %6905 = vmatpush3.bf16.msra.mxu0 %v6904_v61  ;;  %6651 = vmatprep.mubr.msk.f32.mxu0 %vm7454_vm1, %v7455_v28  ;;  %v7371_v59 = vunpack.i.h.bf16 %v7369_v12  ;;  %v7370_v23 = vunpack.i.l.bf16 %v7369_v12  ;;  %v7385_v42 = vunpack.i.l.bf16 %v7384_v27 }
 0x1dd   : > { %6906 = vmatprep.subr.bf16.mxu0 %v7453_v24 }
 0x1de   : > { %v6940_v13 = vpack.c.bf16 %v7371_v59, %v7370_v23 }
 0x1df   : > { %6652 = vmatmul.mubr.msk.f32.vlgmr.msra.gmra.mrb[6].mxu0 %vm461_vm2, %v7635_v40  ;;  %v7379_v11 = vpop.permute.xlu1 %7378  ;;  %v7394_v38 = vpop.permute.xlu0 %7393 }
 0x1e0   : > { %6645 = vmatmul.mubr.msk.f32.vlgmr.msra.gmra.mrb[4].mxu1 %vm461_vm2, %v7952_v55  ;;  %6908 = vmatpush3.bf16.msra.mxu0 %v6907_v56  ;;  %v7381_v63 = vunpack.i.h.bf16 %v7379_v11  ;;  %v7380_v26 = vunpack.i.l.bf16 %v7379_v11  ;;  %v7395_v37 = vunpack.i.l.bf16 %v7394_v38 }
 0x1e1   : > { %6929 = vmatpush3.bf16.msra.mxu1 %v6928_v8  ;;  %6707 = vmatprep.mubr.msk.f32.mxu1 %vm7454_vm1, %v7455_v28 }
 0x1e2   : > { %6930 = vmatprep.subr.bf16.mxu1 %v7453_v24  ;;  %6658 = vmatprep.mubr.msk.f32.mxu0 %vm7454_vm1, %v7455_v28  ;;  %v6943_v52 = vpack.c.bf16 %v7381_v63, %v7380_v26 }
 0x1e3   : > { %6909 = vmatprep.subr.bf16.mxu0 %v7453_v24  ;;  %v7389_v29 = vpop.permute.xlu1 %7388 }
 0x1e4   : > { %6708 = vmatmul.mubr.msk.f32.vlgmr.msra.gmra.mrb[6].mxu1 %vm461_vm2, %v7635_v40  ;;  %v7356_v40 = vunpack.i.h.bf16 %v7354_v7  ;;  %v7391_v2 = vunpack.i.h.bf16 %v7389_v29  ;;  %v7390_v10 = vunpack.i.l.bf16 %v7389_v29 }
 0x1e5   : > { %6932 = vmatpush3.bf16.msra.mxu1 %v6931_v19  ;;  %6714 = vmatprep.mubr.msk.f32.mxu1 %vm7454_vm1, %v7455_v28 }
 0x1e6   : > { %6933 = vmatprep.subr.bf16.mxu1 %v7453_v24  ;;  %v6913_v1 = vpack.c.bf16 %v7356_v40, %v7355_v9  ;;  %v6946_v57 = vpack.c.bf16 %v7391_v2, %v7390_v10  ;;  %v5884_v9 = vld [vmem:[#allocation2] sm:$0xff] }
 0x1e7   : > { %6659 = vmatmul.mubr.msk.f32.vlgmr.msra.gmra.mrb[6].mxu0 %vm461_vm2, %v8286_v15  ;;  %v7399_v16 = vpop.permute.xlu1 %7398 }
 0x1e8   : > { %6911 = vmatpush3.bf16.msra.mxu0 %v6910_v45  ;;  %6665 = vmatprep.mubr.msk.f32.mxu0 %vm7454_vm1, %v7455_v28  ;;  %v7401_v46 = vunpack.i.h.bf16 %v7399_v16  ;;  %v7400_v51 = vunpack.i.l.bf16 %v7399_v16 }
 0x1e9   : > { %6912 = vmatprep.subr.bf16.mxu0 %v7453_v24 }
 0x1ea   : > { %v6949_v61 = vpack.c.bf16 %v7401_v46, %v7400_v51 }
 0x1ec   : > { %6715 = vmatmul.mubr.msk.f32.vlgmr.msra.gmra.mrb[6].mxu1 %vm461_vm2, %v8286_v15  ;;  %v7366_v15 = vunpack.i.h.bf16 %v7364_v18 }
 0x1ed   : > { %6935 = vmatpush3.bf16.msra.mxu1 %v6934_v62  ;;  %6721 = vmatprep.mubr.msk.f32.mxu1 %vm7454_vm1, %v7455_v28 }
 0x1ee   : > { %6936 = vmatprep.subr.bf16.mxu1 %v7453_v24  ;;  %v6916_v34 = vpack.c.bf16 %v7366_v15, %v7365_v31  ;;  %v5936_v15 = vld [vmem:[%s7552_s19] sm:$0xff] (!%p6114_p8) }
 0x1ef   : > { %6666 = vmatmul.mubr.msk.f32.vlgmr.msra.gmra.mrb[6].mxu0 %vm461_vm2, %v7651_v47 }
 0x1f0   : > { %6914 = vmatpush3.bf16.msra.mxu0 %v6913_v1  ;;  %6672 = vmatprep.mubr.msk.f32.mxu0 %vm7454_vm1, %v7455_v28 }
 0x1f1   : > { %6915 = vmatprep.subr.bf16.mxu0 %v7453_v24 }
 0x1f4   : > { %6722 = vmatmul.mubr.msk.f32.vlgmr.msra.gmra.mrb[6].mxu1 %vm461_vm2, %v7651_v47  ;;  %v7376_v47 = vunpack.i.h.bf16 %v7374_v35 }
 0x1f5   : > { %6938 = vmatpush3.bf16.msra.mxu1 %v6937_v48  ;;  %6728 = vmatprep.mubr.msk.f32.mxu1 %vm7454_vm1, %v7455_v28 }
 0x1f6   : > { %6939 = vmatprep.subr.bf16.mxu1 %v7453_v24  ;;  %v6919_v33 = vpack.c.bf16 %v7376_v47, %v7375_v25 }
 0x1f7   : > { %6673 = vmatmul.mubr.msk.f32.vlgmr.msra.gmra.mrb[6].mxu0 %vm461_vm2, %v7833_v49 }
 0x1f8   : > { %6917 = vmatpush3.bf16.msra.mxu0 %v6916_v34  ;;  %6679 = vmatprep.mubr.msk.f32.mxu0 %vm7454_vm1, %v7455_v28 }
 0x1f9   : > { %6918 = vmatprep.subr.bf16.mxu0 %v7453_v24 }
 0x1fc   : > { %6729 = vmatmul.mubr.msk.f32.vlgmr.msra.gmra.mrb[6].mxu1 %vm461_vm2, %v7833_v49  ;;  %v7386_v49 = vunpack.i.h.bf16 %v7384_v27 }
 0x1fd   : > { %6941 = vmatpush3.bf16.msra.mxu1 %v6940_v13  ;;  %6735 = vmatprep.mubr.msk.f32.mxu1 %vm7454_vm1, %v7455_v28 }
 0x1fe   : > { %6942 = vmatprep.subr.bf16.mxu1 %v7453_v24  ;;  %v6922_v32 = vpack.c.bf16 %v7386_v49, %v7385_v42 }
 0x1ff   : > { %6680 = vmatmul.mubr.msk.f32.vlgmr.msra.gmra.mrb[6].mxu0 %vm461_vm2, %v7869_v39 }
 0x200   : > { %6920 = vmatpush3.bf16.msra.mxu0 %v6919_v33  ;;  %6686 = vmatprep.mubr.msk.f32.mxu0 %vm7454_vm1, %v7455_v28 }
 0x201   : > { %6921 = vmatprep.subr.bf16.mxu0 %v7453_v24 }
 0x204   : > { %6736 = vmatmul.mubr.msk.f32.vlgmr.msra.gmra.mrb[6].mxu1 %vm461_vm2, %v7869_v39  ;;  %v7396_v39 = vunpack.i.h.bf16 %v7394_v38 }
 0x205   : > { %6944 = vmatpush3.bf16.msra.mxu1 %v6943_v52  ;;  %6742 = vmatprep.mubr.msk.f32.mxu1 %vm7454_vm1, %v7455_v28 }
 0x206   : > { %6945 = vmatprep.subr.bf16.mxu1 %v7453_v24  ;;  %v6925_v4 = vpack.c.bf16 %v7396_v39, %v7395_v37 }
 0x207   : > { %6687 = vmatmul.mubr.msk.f32.vlgmr.msra.gmra.mrb[6].mxu0 %vm461_vm2, %v7900_v14 }
 0x208   : > { %6923 = vmatpush3.bf16.msra.mxu0 %v6922_v32  ;;  %6693 = vmatprep.mubr.msk.f32.mxu0 %vm7454_vm1, %v7455_v28 }
 0x209   : > { %6924 = vmatprep.subr.bf16.mxu0 %v7453_v24 }
 0x20c   : > { %6743 = vmatmul.mubr.msk.f32.vlgmr.msra.gmra.mrb[6].mxu1 %vm461_vm2, %v7900_v14 }
 0x20d   : > { %6947 = vmatpush3.bf16.msra.mxu1 %v6946_v57  ;;  %6749 = vmatprep.mubr.msk.f32.mxu1 %vm7454_vm1, %v7455_v28 }
 0x20e   : > { %6948 = vmatprep.subr.bf16.mxu1 %v7453_v24 }
 0x20f   : > { %6694 = vmatmul.mubr.msk.f32.vlgmr.msra.gmra.mrb[6].mxu0 %vm461_vm2, %v7928_v60 }
 0x210   : > { %6926 = vmatpush3.bf16.msra.mxu0 %v6925_v4  ;;  %6700 = vmatprep.mubr.msk.f32.mxu0 %vm7454_vm1, %v7455_v28 }
 0x214   : > { %6750 = vmatmul.mubr.msk.f32.vlgmr.msra.gmra.mrb[6].mxu1 %vm461_vm2, %v7928_v60 }
 0x215   : > { %6950 = vmatpush3.bf16.msra.mxu1 %v6949_v61  ;;  %6756 = vmatprep.mubr.msk.f32.mxu1 %vm7454_vm1, %v7455_v28 }
 0x217   : > { %6701 = vmatmul.mubr.msk.f32.vlgmr.msra.gmra.mrb[6].mxu0 %vm461_vm2, %v7952_v55 }
 0x21c   : > { %6757 = vmatmul.mubr.msk.f32.vlgmr.msra.gmra.mrb[6].mxu1 %vm461_vm2, %v7952_v55 }
 0x21d   : > { %v1739_v24 = vpop.f32.mrb[0].mxu1 }
 0x21e   : > { %v5886_v14 = vrot.slane %v1739_v24, 7  ;;  %v6422_v36 = vpop.f32.mrb[1].mxu1 }
 0x220   : > { %v5907_v5 = vsel %vm5906_vm3, %v8422_v0, %v5886_v14 }
 0x23d   : > { %v2429_v50 = vpop.f32.mrb[2].mxu0 }
 0x23e   : > { %v5889_v41 = vrot.slane %v2429_v50, 6  ;;  %v6478_v60 = vpop.f32.mrb[3].mxu0 }
 0x240   : > { %v5909_v53 = vsel %vm5908_vm4, %v5907_v5, %v5889_v41 }
 0x259   : > { %v3119_v56 = vpop.f32.mrb[2].mxu1 }
 0x25a   : > { %v5892_v28 = vrot.slane %v3119_v56, 5  ;;  %v6534_v8 = vpop.f32.mrb[3].mxu1 }
 0x25c   : > { %v5911_v22 = vsel %vm5910_vm5, %v5909_v53, %v5892_v28 }
 0x2ae   : > { %v3809_v21 = vpop.f32.mrb[4].mxu0 }
 0x2af   : > { %v5895_v43 = vrot.slane %v3809_v21, 4  ;;  %v6590_v55 = vpop.f32.mrb[5].mxu0 }
 0x2b1   : > { %v5913_v30 = vsel %vm5912_vm6, %v5911_v22, %v5895_v43 }
 0x2b3   : > { %v4499_v54 = vpop.f32.mrb[4].mxu1 }
 0x2b4   : > { %v5898_v19 = vrot.slane %v4499_v54, 3  ;;  %v6646_v20 = vpop.f32.mrb[5].mxu1 }
 0x2b6   : > { %v5915_v0 = vsel %vm5914_vm7, %v5913_v30, %v5898_v19 }
 0x2ea   : > { %v5189_v45 = vpop.f32.mrb[6].mxu0 }
 0x2eb   : > { %v5901_v7 = vrot.slane %v5189_v45, 2  ;;  %v6702_v44 = vpop.f32.mrb[7].mxu0 }
 0x2ed   : > { %v5917_v3 = vsel %vm5916_vm8, %v5915_v0, %v5901_v7 }
 0x2ef   : > { %v5879_v40 = vpop.f32.mrb[6].mxu1  ;;  %5926 = sbr.rel (%p6114_p8) target bundleno = 796 (0x31c), region = 52 }
 0x2f0   : > { %v5904_v62 = vrot.slane %v5879_v40, 1  ;;  %v6758_v58 = vpop.f32.mrb[7].mxu1 }
 0x2f2   : > { %v5919_v1 = vsel %vm5918_vm9, %v5917_v3, %v5904_v62 }
 0x2f3   : > { %v5920_v18 = vadd.f32 %v5919_v1, %v5884_v9 }
 0x2f5   : > { %5922 = vst.msk [vmem:[#allocation2] sm:$0xff] %vm5921_vm10, %v5920_v18 }
 0x2fc   : > { %v5927_v17 = vld [vmem:[#allocation2] sm:$0xff] }
 0x2fd   : > { %v5935_v31 = vmul.f32 %v6115_v6, %v5927_v17 }
 0x2ff   : > { %v5937_v48 = vadd.f32 %v5936_v15, %v5935_v31 }
 0x301   : > { %v6116_v12 = vmul.f32 -1.442695, %v5937_v48 }
 0x303   : > { %7404 = vpow2.f32 %v6116_v12 }
 0x30d   : > { %v7405_v34 = vpop.eup %7404 }
 0x30e   : > { %v5941_v35 = vadd.f32 1.0, %v7405_v34 }
 0x310   : > { %7406 = vrcp.f32 %v5941_v35 }
 0x31a   : > { %v7407_v59 = vpop.eup %7406 }
 0x31b   : > { %5944 = vst.msk [vmem:[%s7557_s22] sm:$0xff] %vm5921_vm10, %v7407_v59 }
 0x31c PF: > { %s18_s27 = sadd.s32 1, %s7446_s27   ;;  %s8587_s23 = smov %s7438_s25 }
 0x31d   : > { %p15_p9 = scmp.ge.s32.totalorder %s18_s27, 6   ;;  %s8588_s24 = smov %s7442_s26 }
 0x31e   : > { %s8589_s25 = smov %s8592_s4  ;;  %s8590_s26 = smov %s8596_s28 }
 0x31f   :  { %17 = sbr.rel (!%p15_p9) target bundleno = 3 (0x3), region = 88 }

// kernel: generator_forward.8
= control target key start
LH: loop header
LB: loop body
LE: loop exit
PB: predicated region body
PF: predicated region fallthrough
CT: control target
= control target key end

     0   :  { %s6861_s21 = smov 0   ;;  %s6863_s22 = smov 0   ;;  %s7664_s0 = inlined_call_operand.vmem [shape: f32[16,1], index: 0, kind: input, shape index: {}]   ;;  %s7665_s1 = inlined_call_operand.vmem [shape: f32[2,2,8,8], index: 1, kind: input, shape index: {}]   ;;  %s7666_s2 = inlined_call_operand.vmem [shape: f32[1,16], index: 2, kind: input, shape index: {}]   ;;  %s7667_s3 = inlined_call_operand.vmem [shape: f32[1,16], index: 3, kind: input, shape index: {}]   ;;  %s7668_s4 = inlined_call_operand.vmem [shape: f32[1,16], index: 4, kind: input, shape index: {}]   ;;  %s7669_s5 = inlined_call_operand.vmem [shape: f32[16,16], index: 5, kind: input, shape index: {}]   ;;  %s7670_s6 = inlined_call_operand.vmem [shape: f32[16,16], index: 6, kind: output, shape index: {}]  }
   0x1   :  { %s6865_s23 = smov 0   ;;  %s6867_s24 = smov 0  }
   0x2   :  { %s6869_s25 = smov 0  }
   0x3 LB: > { %s25_s26 = sadd.s32 1, %s6804_s23  ;;  %s28_s27 = sadd.s32 1, %s6808_s24  ;;  %s6812_s25 = sphi %s6869_s25, %s16_s25   ;;  %s6808_s24 = sphi %s6867_s24, %s7674_s24   ;;  %s6804_s23 = sphi %s6865_s23, %s7673_s23   ;;  %s6800_s22 = sphi %s6863_s22, %s7672_s22   ;;  %s6796_s21 = sphi %s6861_s21, %s7671_s21  }
   0x4   : > { %p26_p0 = scmp.ge.s32.totalorder %s25_s26, 2  ;;  %p5975_p1 = scmp.ge.s32.totalorder %s6812_s25, 1 }
   0x5   : > { %p247_p2 = scmp.lt.s32.totalorder %s6812_s25, 5 }
   0x6   : > { %s7676_s26 = smov (%p26_p0, %s25_s26), 0  ;;  %s7678_s27 = smov (!%p26_p0, %s28_s27), %s6808_s24 }
   0x7   : > { %p248_p3 = pnand %p5975_p1, %p247_p2  ;;  %p30_p4 = scmp.ge.s32.totalorder %s7678_s27, 2 }
   0x8   : > { %p287_p5 = scmp.lt.s32.totalorder (!%p248_p3), %s6796_s21, 1  ;;  %p293_p6 = scmp.lt.s32.totalorder (!%p248_p3), %s6800_s22, 1 }
   0x9   : > { %s7680_s27 = smov (%p30_p4, %s7678_s27), 0  ;;  %251 = sbr.rel (%p248_p3) target bundleno = 671 (0x29f), region = 44 }
   0xa   : > { %p5981_p7 = scmp.ne.s32.totalorder (!%p248_p3), %s6796_s21, 0 }
  0x10   : > { %s288_s28 = scalar_select %p287_p5, %s6796_s21, 1 }
  0x11   : > { %s7682_s22 = smov (!%p293_p6, %s6800_s22), 1  ;;  %310 = sbr.rel (%p5981_p7) target bundleno = 24 (0x18), region = 48 }
  0x12   : > { %s5976_s29 = sshll.u32 %s288_s28, 3  ;;  %s5977_s30 = sshll.u32 %s288_s28, 1  ;;  %vm311_vm0 = vcmask (!%p5981_p7), 130048   ;;  %v6814_v0 = vmov (!%p5981_p7), 0.0  }
  0x13   : > { %s6898_s9 = scalar_lea.vmem %s7664_s0, %s5976_s29  ;;  %s296_s10 = sadd.s32 %s5977_s30, %s7682_s22  ;;  %312 = vst.msk [vmem:[#allocation2] sm:$0xff] (!%p5981_p7), %vm311_vm0, %v6814_v0 }
  0x14   : > { %s5978_s11 = sshll.u32 %s296_s10, 3  ;;  %s5979_s12 = sshll.u32 %s7682_s22, 3 }
  0x15   : > { %s298_s15 = scalar_lea.vmem %s7665_s1, %s5978_s11  ;;  %s6906_s18 = scalar_lea.vmem %s7669_s5, %s5979_s12 }
  0x16   : > { %s6911_s28 = scalar_lea.vmem %s7670_s6, %s5979_s12 }
  0x18 PF: > { %v322_v1 = vlaneseq  ;;  %v6815_v2 = vmov 0   ;;  %v6816_v3 = vmov 1966171168   ;;  %v316_v7 = vld [vmem:[%s298_s15] sm:$0xff]  ;;  %v6817_v13 = vmov 1   ;;  %p6110_p8 = scmp.ne.s32.totalorder %s6796_s21, 1 }
  0x19   : > { %6729 = vset.pattern.permute.xlu1 %v6815_v2  ;;  %v320_v4 = vunpack.c.l.s4 %v6816_v3  ;;  %6727 = vset.pattern.permute.xlu0 %v6815_v2  ;;  %v318_v15 = vcombine.high %v316_v7, %v316_v7  ;;  %v6818_v16 = vmov 0.0   ;;  %vm6819_vm1 = vmmov 0   ;;  %v7013_v33 = vld [vmem:[%s7666_s2] sm:$0x1] }
  0x1a   : > { %v6914_v5 = vshrl.u32 %v322_v1, 7  ;;  %6243 = vmatprep.subr.mxu0 %v6818_v16  ;;  %6245 = vmatprep.mubr.msk.f32.mxu0 %vm6819_vm1, %v6818_v16  ;;  %v6820_v24 = vmov 2   ;;  %v6821_v25 = vmov 3   ;;  %v6822_v26 = vmov 4   ;;  %v7021_v37 = vld [vmem:[%s7667_s3] sm:$0x1] }
  0x1b   : > { %v321_v6 = vunpack.c.0.s8 %v320_v4  ;;  %6283 = vmatprep.subr.mxu1 %v6818_v16  ;;  %6285 = vmatprep.mubr.msk.f32.mxu1 %vm6819_vm1, %v6818_v16  ;;  %v6823_v27 = vmov 5   ;;  %v6824_v28 = vmov 6   ;;  %v6825_v29 = vmov 7   ;;  %v7027_v41 = vld [vmem:[%s6898_s9] sm:$0xff] }
  0x1c   : > { %v7006_v30 = vsub.s32 0, %v6914_v5  ;;  %vm460_vm2 = vcmask 1040384   ;;  %v7034_v47 = vrot.slane %v7027_v41, 1  ;;  %vm457_vm3 = vcmask 7168  }
  0x1d   : > { %v324_v8 = vsub.s32 %v321_v6, %v6914_v5  ;;  %vm5840_vm4 = vcmask 1041408   ;;  %vm5842_vm5 = vcmask 1042432   ;;  %vm5844_vm6 = vcmask 1043456  }
  0x1e   : > { %vm5846_vm7 = vcmask 1044480   ;;  %vm5848_vm8 = vcmask 1045504   ;;  %vm5850_vm9 = vcmask 1046528   ;;  %vm5853_vm10 = vcmask 130048  }
  0x1f   : > { %v325_v9 = vrot.slane %v316_v7, %v324_v8  ;;  %v332_v18 = vrot.slane %v318_v15, %v324_v8 }
  0x21   : > { %v6917_v10 = vrot.slane %v325_v9, %v324_v8  ;;  %v333_v11 = vcombine.high %v325_v9, %v325_v9  ;;  %v6942_v19 = vrot.slane %v332_v18, %v324_v8  ;;  %v334_v20 = vcombine.high %v332_v18, %v332_v18 }
  0x23   : > { %368 = vperm.xlu1 %6729, %v6917_v10   ;;  %v6920_v12 = vrot.slane %v333_v11, %v324_v8  ;;  %v6926_v14 = vcombine.high %v6917_v10, %v6917_v10  ;;  %v6946_v21 = vrot.slane %v334_v20, %v324_v8  ;;  %v6952_v22 = vcombine.high %v6942_v19, %v6942_v19 }
  0x25   : > { %376 = vperm.xlu0 %6727, %v6920_v12   ;;  %v6933_v17 = vcombine.high %v6920_v12, %v6920_v12  ;;  %v6958_v23 = vcombine.high %v6946_v21, %v6946_v21 }
  0x27   : > { %6730 = vset.pattern.permute.xlu1 %v6817_v13 }
  0x28   : > { %1072 = vperm.xlu1 %6730, %v6917_v10  }
  0x29   : > { %6728 = vset.pattern.permute.xlu0 %v6817_v13 }
  0x2a   : > { %1080 = vperm.xlu0 %6728, %v6920_v12  }
  0x2c   : > { %6731 = vset.pattern.permute.xlu1 %v6815_v2 }
  0x2d   : > { %384 = vperm.xlu1 %6731, %v6926_v14  }
  0x2e   : > { %1088 = vperm.xlu0 %6728, %v6926_v14  }
  0x31   : > { %392 = vperm.xlu1 %6731, %v6933_v17  }
  0x32   : > { %1096 = vperm.xlu0 %6728, %v6933_v17  }
  0x35   : > { %400 = vperm.xlu1 %6731, %v6942_v19  }
  0x36   : > { %1104 = vperm.xlu0 %6728, %v6942_v19  }
  0x39   : > { %408 = vperm.xlu1 %6731, %v6946_v21  }
  0x3a   : > { %1112 = vperm.xlu0 %6728, %v6946_v21  }
  0x3d   : > { %416 = vperm.xlu1 %6731, %v6952_v22  }
  0x3e   : > { %1120 = vperm.xlu0 %6728, %v6952_v22  }
  0x41   : > { %424 = vperm.xlu1 %6731, %v6958_v23  }
  0x42   : > { %1128 = vperm.xlu0 %6728, %v6958_v23  }
  0x45   : > { %6732 = vset.pattern.permute.xlu1 %v6820_v24 }
  0x46   : > { %1758 = vperm.xlu1 %6732, %v6920_v12   ;;  %6733 = vset.pattern.permute.xlu0 %v6821_v25 }
  0x47   : > { %2436 = vperm.xlu0 %6733, %v6920_v12  }
  0x4a   : > { %1750 = vperm.xlu1 %6732, %v6917_v10  }
  0x4b   : > { %6735 = vset.pattern.permute.xlu0 %v6820_v24 }
  0x4c   : > { %1766 = vperm.xlu0 %6735, %v6926_v14  }
  0x4e   : > { %6734 = vset.pattern.permute.xlu1 %v6821_v25 }
  0x4f   : > { %2428 = vperm.xlu1 %6734, %v6917_v10  }
  0x50   : > { %6737 = vset.pattern.permute.xlu0 %v6821_v25 }
  0x51   : > { %2452 = vperm.xlu0 %6737, %v6933_v17  }
  0x53   : > { %2444 = vperm.xlu1 %6734, %v6926_v14  }
  0x55   : > { %6739 = vset.pattern.permute.xlu0 %v6820_v24 }
  0x56   : > { %1790 = vperm.xlu0 %6739, %v6946_v21  }
  0x57   : > { %6736 = vset.pattern.permute.xlu1 %v6820_v24 }
  0x58   : > { %1774 = vperm.xlu1 %6736, %v6933_v17  }
  0x5a   : > { %6741 = vset.pattern.permute.xlu0 %v6821_v25 }
  0x5b   : > { %2476 = vperm.xlu0 %6741, %v6952_v22  }
  0x5c   : > { %1782 = vperm.xlu1 %6736, %v6942_v19  }
  0x5f   : > { %6743 = vset.pattern.permute.xlu0 %v6822_v26 }
  0x60   : > { %6738 = vset.pattern.permute.xlu1 %v6821_v25  ;;  %3114 = vperm.xlu0 %6743, %v6920_v12  }
  0x61   : > { %2460 = vperm.xlu1 %6738, %v6942_v19  }
  0x64   : > { %6746 = vset.pattern.permute.xlu0 %v6823_v27 }
  0x65   : > { %2468 = vperm.xlu1 %6738, %v6946_v21   ;;  %3784 = vperm.xlu0 %6746, %v6917_v10  }
  0x69   : > { %6740 = vset.pattern.permute.xlu1 %v6820_v24  ;;  %6748 = vset.pattern.permute.xlu0 %v6822_v26 }
  0x6a   : > { %1798 = vperm.xlu1 %6740, %v6952_v22   ;;  %3130 = vperm.xlu0 %6748, %v6933_v17  }
  0x6e   : > { %1806 = vperm.xlu1 %6740, %v6958_v23   ;;  %6750 = vset.pattern.permute.xlu0 %v6823_v27 }
  0x6f   : > { %3816 = vperm.xlu0 %6750, %v6942_v19  }
  0x72   : > { %6742 = vset.pattern.permute.xlu1 %v6821_v25 }
  0x73   : > { %2484 = vperm.xlu1 %6742, %v6958_v23   ;;  %6752 = vset.pattern.permute.xlu0 %v6822_v26 }
  0x74   : > { %3154 = vperm.xlu0 %6752, %v6952_v22  }
  0x77   : > { %6744 = vset.pattern.permute.xlu1 %v6823_v27 }
  0x78   : > { %3792 = vperm.xlu1 %6744, %v6920_v12   ;;  %6754 = vset.pattern.permute.xlu0 %v6823_v27 }
  0x79   : > { %3840 = vperm.xlu0 %6754, %v6958_v23  }
  0x7c   : > { %6745 = vset.pattern.permute.xlu1 %v6822_v26 }
  0x7d   : > { %3106 = vperm.xlu1 %6745, %v6917_v10   ;;  %6757 = vset.pattern.permute.xlu0 %v6824_v28 }
  0x7e   : > { %4462 = vperm.xlu0 %6757, %v6917_v10  }
  0x81   : > { %3122 = vperm.xlu1 %6745, %v6926_v14  }
  0x82   : > { %6759 = vset.pattern.permute.xlu0 %v6825_v29 }
  0x83   : > { %5156 = vperm.xlu0 %6759, %v6926_v14  }
  0x85   : > { %6747 = vset.pattern.permute.xlu1 %v6823_v27 }
  0x86   : > { %3800 = vperm.xlu1 %6747, %v6926_v14  }
  0x87   : > { %6761 = vset.pattern.permute.xlu0 %v6824_v28 }
  0x88   : > { %4494 = vperm.xlu0 %6761, %v6942_v19  }
  0x8a   : > { %3808 = vperm.xlu1 %6747, %v6933_v17  }
  0x8c   : > { %6763 = vset.pattern.permute.xlu0 %v6825_v29 }
  0x8d   : > { %5180 = vperm.xlu0 %6763, %v6946_v21  }
  0x8e   : > { %6749 = vset.pattern.permute.xlu1 %v6822_v26 }
  0x8f   : > { %3138 = vperm.xlu1 %6749, %v6942_v19  }
  0x91   : > { %6765 = vset.pattern.permute.xlu0 %v6824_v28 }
  0x92   : > { %4518 = vperm.xlu0 %6765, %v6958_v23  }
  0x93   : > { %3146 = vperm.xlu1 %6749, %v6946_v21  }
  0x96   : > { %6766 = vset.pattern.permute.xlu0 %v6825_v29 }
  0x97   : > { %6751 = vset.pattern.permute.xlu1 %v6823_v27  ;;  %v7103_v27 = vrot.slane %v7027_v41, 3 }
  0x98   : > { %3824 = vperm.xlu1 %6751, %v6946_v21  }
  0x9c   : > { %3832 = vperm.xlu1 %6751, %v6952_v22  }
  0xa0   : > { %6753 = vset.pattern.permute.xlu1 %v6822_v26 }
  0xa1   : > { %3162 = vperm.xlu1 %6753, %v6958_v23  }
  0xa2   : > { %v369_v31 = vpop.permute.xlu1 %368 }
  0xa3   : > { %v374_v32 = vrot.slane %v369_v31, %v7006_v30 }
  0xa4   : > { %v377_v34 = vpop.permute.xlu0 %376 }
  0xa5   : > { %v431_v35 = vmul.f32 %v374_v32, %v7013_v33  ;;  %v382_v36 = vrot.slane %v377_v34, %v7006_v30  ;;  %6755 = vset.pattern.permute.xlu1 %v6824_v28 }
  0xa6   : > { %4470 = vperm.xlu1 %6755, %v6920_v12  }
  0xa7   : > { %v439_v38 = vadd.f32 %v431_v35, %v7021_v37  ;;  %v432_v39 = vmul.f32 %v382_v36, %v7013_v33  ;;  %v1073_v40 = vpop.permute.xlu1 %1072 }
  0xa8   : > { %v1078_v42 = vrot.slane %v1073_v40, %v7006_v30 }
  0xa9   : > { %v1081_v43 = vpop.permute.xlu0 %1080  ;;  %v440_v44 = vadd.f32 %v432_v39, %v7021_v37  ;;  %v447_v48 = vmax.f32 %v439_v38, 0.0 }
  0xaa   : > { %v1135_v45 = vmul.f32 %v1078_v42, %v7013_v33  ;;  %v1086_v46 = vrot.slane %v1081_v43, %v7006_v30  ;;  %6756 = vset.pattern.permute.xlu1 %v6825_v29  ;;  %v7126_v42 = vrot.slane %v7027_v41, 4 }
  0xab   : > { %v448_v49 = vmax.f32 %v440_v44, 0.0  ;;  %5148 = vperm.xlu1 %6756, %v6920_v12  }
  0xac   : > { %v1143_v50 = vadd.f32 %v1135_v45, %v7021_v37  ;;  %v1136_v51 = vmul.f32 %v1086_v46, %v7013_v33  ;;  %v385_v52 = vpop.permute.xlu1 %384 }
  0xad   : > { %v390_v53 = vrot.slane %v385_v52, %v7006_v30  ;;  %v1089_v54 = vpop.permute.xlu0 %1088  ;;  %6244 = vmatpush3.msk.msra.mxu0 %vm460_vm2, %v448_v49  ;;  %v7149_v52 = vrot.slane %v7027_v41, 5 }
  0xae   : > { %v1094_v55 = vrot.slane %v1089_v54, %v7006_v30  ;;  %6246 = vmatmul.mubr.msk.f32.vlgmr.msra.gmra.mrb[0].mxu0 %vm457_vm3, %v7034_v47  ;;  %6248 = vmatprep.subr.mxu0 %v6818_v16  ;;  %v1144_v56 = vadd.f32 %v1136_v51, %v7021_v37  ;;  %v1151_v58 = vmax.f32 %v1143_v50, 0.0 }
  0xaf   : > { %v433_v57 = vmul.f32 %v390_v53, %v7013_v33  ;;  %6249 = vmatpush3.msk.msra.mxu0 %vm460_vm2, %v447_v48  ;;  %6250 = vmatprep.mubr.msk.f32.mxu0 %vm6819_vm1, %v6818_v16 }
  0xb0   : > { %v393_v59 = vpop.permute.xlu1 %392  ;;  %v1152_v60 = vmax.f32 %v1144_v56, 0.0  ;;  %6253 = vmatprep.subr.mxu0 %v6818_v16  ;;  %5140 = vperm.xlu1 %6756, %v6917_v10   ;;  %v1137_v63 = vmul.f32 %v1094_v55, %v7013_v33  ;;  %v7079_v10 = vrot.slane %v7027_v41, 2 }
  0xb1   : > { %v441_v61 = vadd.f32 %v433_v57, %v7021_v37  ;;  %v398_v62 = vrot.slane %v393_v59, %v7006_v30  ;;  %v1097_v2 = vpop.permute.xlu0 %1096 }
  0xb2   : > { %6284 = vmatpush3.msk.msra.mxu1 %vm460_vm2, %v1152_v60  ;;  %v1145_v3 = vadd.f32 %v1137_v63, %v7021_v37  ;;  %v1102_v4 = vrot.slane %v1097_v2, %v7006_v30  ;;  %v7173_v63 = vrot.slane %v7027_v41, 6 }
  0xb3   : > { %v449_v0 = vmax.f32 %v441_v61, 0.0  ;;  %v434_v1 = vmul.f32 %v398_v62, %v7013_v33  ;;  %6286 = vmatmul.mubr.msk.f32.vlgmr.msra.gmra.mrb[0].mxu1 %vm457_vm3, %v7034_v47  ;;  %6288 = vmatprep.subr.mxu1 %v6818_v16 }
  0xb4   : > { %6289 = vmatpush3.msk.msra.mxu1 %vm460_vm2, %v1151_v58  ;;  %6290 = vmatprep.mubr.msk.f32.mxu1 %vm6819_vm1, %v6818_v16  ;;  %v401_v6 = vpop.permute.xlu1 %400  ;;  %v1153_v8 = vmax.f32 %v1145_v3, 0.0  ;;  %v1138_v9 = vmul.f32 %v1102_v4, %v7013_v33 }
  0xb5   : > { %6293 = vmatprep.subr.mxu1 %v6818_v16  ;;  %6758 = vset.pattern.permute.xlu1 %v6824_v28  ;;  %v442_v5 = vadd.f32 %v434_v1, %v7021_v37  ;;  %v406_v7 = vrot.slane %v401_v6, %v7006_v30  ;;  %v1105_v12 = vpop.permute.xlu0 %1104 }
  0xb6   : > { %6251 = vmatmul.mubr.msk.f32.vlgmr.msra.gmra.mrb[0].mxu0 %vm457_vm3, %v7027_v41  ;;  %4478 = vperm.xlu1 %6758, %v6926_v14   ;;  %v1146_v14 = vadd.f32 %v1138_v9, %v7021_v37  ;;  %v1110_v15 = vrot.slane %v1105_v12, %v7006_v30  ;;  %v7196_v12 = vrot.slane %v7027_v41, 7 }
  0xb7   : > { %6254 = vmatpush3.msk.msra.mxu0 %vm460_vm2, %v449_v0  ;;  %6255 = vmatprep.mubr.msk.f32.mxu0 %vm6819_vm1, %v6818_v16  ;;  %v450_v11 = vmax.f32 %v442_v5, 0.0  ;;  %v435_v13 = vmul.f32 %v406_v7, %v7013_v33 }
  0xb8   : > { %6258 = vmatprep.subr.mxu0 %v6818_v16  ;;  %v409_v18 = vpop.permute.xlu1 %408  ;;  %v1154_v25 = vmax.f32 %v1146_v14, 0.0  ;;  %v1139_v26 = vmul.f32 %v1110_v15, %v7013_v33 }
  0xb9   : > { %v443_v20 = vadd.f32 %v435_v13, %v7021_v37  ;;  %v414_v24 = vrot.slane %v409_v18, %v7006_v30  ;;  %v1113_v31 = vpop.permute.xlu0 %1112 }
  0xba   : > { %4486 = vperm.xlu1 %6758, %v6933_v17   ;;  %v1147_v34 = vadd.f32 %v1139_v26, %v7021_v37  ;;  %v1118_v35 = vrot.slane %v1113_v31, %v7006_v30 }
  0xbb   : > { %6291 = vmatmul.mubr.msk.f32.vlgmr.msra.gmra.mrb[0].mxu1 %vm457_vm3, %v7027_v41  ;;  %v436_v32 = vmul.f32 %v414_v24, %v7013_v33 }
  0xbc   : > { %6294 = vmatpush3.msk.msra.mxu1 %vm460_vm2, %v1153_v8  ;;  %6295 = vmatprep.mubr.msk.f32.mxu1 %vm6819_vm1, %v6818_v16  ;;  %v417_v36 = vpop.permute.xlu1 %416  ;;  %v1140_v40 = vmul.f32 %v1118_v35, %v7013_v33 }
  0xbd   : > { %6298 = vmatprep.subr.mxu1 %v6818_v16  ;;  %v444_v38 = vadd.f32 %v436_v32, %v7021_v37  ;;  %v422_v39 = vrot.slane %v417_v36, %v7006_v30  ;;  %v1121_v43 = vpop.permute.xlu0 %1120 }
  0xbe   : > { %6256 = vmatmul.mubr.msk.f32.vlgmr.msra.gmra.mrb[0].mxu0 %vm457_vm3, %v7079_v10  ;;  %6760 = vset.pattern.permute.xlu1 %v6825_v29  ;;  %v1148_v45 = vadd.f32 %v1140_v40, %v7021_v37  ;;  %v1126_v46 = vrot.slane %v1121_v43, %v7006_v30 }
  0xbf   : > { %6259 = vmatpush3.msk.msra.mxu0 %vm460_vm2, %v450_v11  ;;  %6260 = vmatprep.mubr.msk.f32.mxu0 %vm6819_vm1, %v6818_v16  ;;  %v452_v44 = vmax.f32 %v444_v38, 0.0 }
  0xc0   : > { %6263 = vmatprep.subr.mxu0 %v6818_v16  ;;  %5164 = vperm.xlu1 %6760, %v6933_v17   ;;  %v451_v17 = vmax.f32 %v443_v20, 0.0  ;;  %v425_v48 = vpop.permute.xlu1 %424  ;;  %v1156_v50 = vmax.f32 %v1148_v45, 0.0  ;;  %v1141_v51 = vmul.f32 %v1126_v46, %v7013_v33 }
  0xc1   : > { %v430_v49 = vrot.slane %v425_v48, %v7006_v30  ;;  %v1129_v54 = vpop.permute.xlu0 %1128 }
  0xc2   : > { %v1149_v57 = vadd.f32 %v1141_v51, %v7021_v37 }
  0xc3   : > { %6296 = vmatmul.mubr.msk.f32.vlgmr.msra.gmra.mrb[0].mxu1 %vm457_vm3, %v7079_v10  ;;  %v438_v56 = vmul.f32 %v430_v49, %v7013_v33 }
  0xc4   : > { %6299 = vmatpush3.msk.msra.mxu1 %vm460_vm2, %v1154_v25  ;;  %6300 = vmatprep.mubr.msk.f32.mxu1 %vm6819_vm1, %v6818_v16  ;;  %v1157_v61 = vmax.f32 %v1149_v57, 0.0 }
  0xc5   : > { %6303 = vmatprep.subr.mxu1 %v6818_v16  ;;  %5172 = vperm.xlu1 %6760, %v6942_v19   ;;  %v1155_v19 = vmax.f32 %v1147_v34, 0.0  ;;  %v1759_v53 = vpop.permute.xlu1 %1758  ;;  %v446_v59 = vadd.f32 %v438_v56, %v7021_v37 }
  0xc6   : > { %6261 = vmatmul.mubr.msk.f32.vlgmr.msra.gmra.mrb[0].mxu0 %vm457_vm3, %v7103_v27  ;;  %v2437_v60 = vpop.permute.xlu0 %2436 }
  0xc7   : > { %6264 = vmatpush3.msk.msra.mxu0 %vm460_vm2, %v451_v17  ;;  %6265 = vmatprep.mubr.msk.f32.mxu0 %vm6819_vm1, %v6818_v16  ;;  %v454_v2 = vmax.f32 %v446_v59, 0.0 }
  0xc8   : > { %6268 = vmatprep.subr.mxu0 %v6818_v16 }
  0xc9   : > { %6762 = vset.pattern.permute.xlu1 %v6824_v28  ;;  %v437_v28 = vmul.f32 %v422_v39, %v7013_v33  ;;  %v1751_v58 = vpop.permute.xlu1 %1750 }
  0xca   : > { %4502 = vperm.xlu1 %6762, %v6946_v21   ;;  %v1756_v1 = vrot.slane %v1751_v58, %v7006_v30 }
  0xcb   : > { %6301 = vmatmul.mubr.msk.f32.vlgmr.msra.gmra.mrb[0].mxu1 %vm457_vm3, %v7103_v27  ;;  %v445_v21 = vadd.f32 %v437_v28, %v7021_v37  ;;  %v1767_v9 = vpop.permute.xlu0 %1766 }
  0xcc   : > { %6304 = vmatpush3.msk.msra.mxu1 %vm460_vm2, %v1155_v19  ;;  %6305 = vmatprep.mubr.msk.f32.mxu1 %vm6819_vm1, %v6818_v16  ;;  %v1813_v6 = vmul.f32 %v1756_v1, %v7013_v33  ;;  %v1772_v15 = vrot.slane %v1767_v9, %v7006_v30 }
  0xcd   : > { %6308 = vmatprep.subr.mxu1 %v6818_v16  ;;  %v453_v55 = vmax.f32 %v445_v21, 0.0 }
  0xce   : > { %6266 = vmatmul.mubr.msk.f32.vlgmr.msra.gmra.mrb[0].mxu0 %vm457_vm3, %v7126_v42  ;;  %4510 = vperm.xlu1 %6762, %v6952_v22   ;;  %v2429_v4 = vpop.permute.xlu1 %2428  ;;  %v1821_v14 = vadd.f32 %v1813_v6, %v7021_v37  ;;  %v1815_v26 = vmul.f32 %v1772_v15, %v7013_v33 }
  0xcf   : > { %6269 = vmatpush3.msk.msra.mxu0 %vm460_vm2, %v452_v44  ;;  %6270 = vmatprep.mubr.msk.f32.mxu0 %vm6819_vm1, %v6818_v16  ;;  %v2434_v8 = vrot.slane %v2429_v4, %v7006_v30 }
  0xd0   : > { %6273 = vmatprep.subr.mxu0 %v6818_v16  ;;  %v1829_v25 = vmax.f32 %v1821_v14, 0.0  ;;  %v1823_v35 = vadd.f32 %v1815_v26, %v7021_v37  ;;  %v2453_v19 = vpop.permute.xlu0 %2452 }
  0xd1   : > { %v2491_v20 = vmul.f32 %v2434_v8, %v7013_v33  ;;  %v2458_v45 = vrot.slane %v2453_v19, %v7006_v30 }
  0xd2   : > { %6764 = vset.pattern.permute.xlu1 %v6825_v29  ;;  %v1134_v29 = vrot.slane %v1129_v54, %v7006_v30  ;;  %v2445_v24 = vpop.permute.xlu1 %2444  ;;  %v1831_v43 = vmax.f32 %v1823_v35, 0.0 }
  0xd3   : > { %6306 = vmatmul.mubr.msk.f32.vlgmr.msra.gmra.mrb[0].mxu1 %vm457_vm3, %v7126_v42  ;;  %5188 = vperm.xlu1 %6764, %v6952_v22   ;;  %v1764_v22 = vrot.slane %v1759_v53, %v7006_v30  ;;  %v2499_v17 = vadd.f32 %v2491_v20, %v7021_v37  ;;  %v2450_v32 = vrot.slane %v2445_v24, %v7006_v30 }
  0xd4   : > { %6309 = vmatpush3.msk.msra.mxu1 %vm460_vm2, %v1156_v50  ;;  %6310 = vmatprep.mubr.msk.f32.mxu1 %vm6819_vm1, %v6818_v16  ;;  %v1142_v62 = vmul.f32 %v1134_v29, %v7013_v33  ;;  %v2494_v49 = vmul.f32 %v2458_v45, %v7013_v33 }
  0xd5   : > { %6313 = vmatprep.subr.mxu1 %v6818_v16  ;;  %v1814_v0 = vmul.f32 %v1764_v22, %v7013_v33  ;;  %v2507_v38 = vmax.f32 %v2499_v17, 0.0  ;;  %v2493_v39 = vmul.f32 %v2450_v32, %v7013_v33  ;;  %v1791_v56 = vpop.permute.xlu0 %1790 }
  0xd6   : > { %6271 = vmatmul.mubr.msk.f32.vlgmr.msra.gmra.mrb[0].mxu0 %vm457_vm3, %v7149_v52  ;;  %v1150_v3 = vadd.f32 %v1142_v62, %v7021_v37  ;;  %v2502_v54 = vadd.f32 %v2494_v49, %v7021_v37  ;;  %v1796_v22 = vrot.slane %v1791_v56, %v7006_v30 }
  0xd7   : > { %6274 = vmatpush3.msk.msra.mxu0 %vm460_vm2, %v453_v55  ;;  %6275 = vmatprep.mubr.msk.f32.mxu0 %vm6819_vm1, %v6818_v16  ;;  %v1822_v5 = vadd.f32 %v1814_v0, %v7021_v37  ;;  %v1775_v34 = vpop.permute.xlu1 %1774  ;;  %v2501_v28 = vadd.f32 %v2493_v39, %v7021_v37 }
  0xd8   : > { %6278 = vmatprep.subr.mxu0 %v6818_v16  ;;  %5196 = vperm.xlu1 %6764, %v6958_v23   ;;  %v2442_v23 = vrot.slane %v2437_v60, %v7006_v30  ;;  %v1158_v11 = vmax.f32 %v1150_v3, 0.0  ;;  %v1780_v36 = vrot.slane %v1775_v34, %v7006_v30  ;;  %v2510_v58 = vmax.f32 %v2502_v54, 0.0 }
  0xd9   : > { %v1830_v13 = vmax.f32 %v1822_v5, 0.0  ;;  %v2509_v21 = vmax.f32 %v2501_v28, 0.0  ;;  %v1818_v62 = vmul.f32 %v1796_v22, %v7013_v33 }
  0xda   : > { %v2492_v7 = vmul.f32 %v2442_v23, %v7013_v33  ;;  %v1816_v44 = vmul.f32 %v1780_v36, %v7013_v33  ;;  %v2477_v6 = vpop.permute.xlu0 %2476 }
  0xdb   : > { %6311 = vmatmul.mubr.msk.f32.vlgmr.msra.gmra.mrb[0].mxu1 %vm457_vm3, %v7149_v52  ;;  %v1783_v40 = vpop.permute.xlu1 %1782  ;;  %v1826_v23 = vadd.f32 %v1818_v62, %v7021_v37 }
  0xdc   : > { %6314 = vmatpush3.msk.msra.mxu1 %vm460_vm2, %v1157_v61  ;;  %6315 = vmatprep.mubr.msk.f32.mxu1 %vm6819_vm1, %v6818_v16  ;;  %v2500_v18 = vadd.f32 %v2492_v7, %v7021_v37  ;;  %v1824_v46 = vadd.f32 %v1816_v44, %v7021_v37  ;;  %v1788_v48 = vrot.slane %v1783_v40, %v7006_v30 }
  0xdd   : > { %6318 = vmatprep.subr.mxu1 %v6818_v16  ;;  %v1834_v7 = vmax.f32 %v1826_v23, 0.0 }
  0xde   : > { %6276 = vmatmul.mubr.msk.f32.vlgmr.msra.gmra.mrb[0].mxu0 %vm457_vm3, %v7173_v63  ;;  %v2508_v31 = vmax.f32 %v2500_v18, 0.0  ;;  %v1832_v51 = vmax.f32 %v1824_v46, 0.0  ;;  %v1817_v53 = vmul.f32 %v1788_v48, %v7013_v33 }
  0xdf   : > { %6279 = vmatpush3.msk.msra.mxu0 %vm460_vm2, %v454_v2  ;;  %6280 = vmatprep.mubr.msk.f32.mxu0 %vm6819_vm1, %v6818_v16  ;;  %v3115_v32 = vpop.permute.xlu0 %3114 }
  0xe0   : > { %6323 = vmatprep.subr.mxu0 %v6818_v16  ;;  %v2461_v50 = vpop.permute.xlu1 %2460  ;;  %v1825_v29 = vadd.f32 %v1817_v53, %v7021_v37  ;;  %v3120_v35 = vrot.slane %v3115_v32, %v7006_v30 }
  0xe1   : > { %v2466_v55 = vrot.slane %v2461_v50, %v7006_v30 }
  0xe2   : > { %v1833_v61 = vmax.f32 %v1825_v29, 0.0  ;;  %v3170_v40 = vmul.f32 %v3120_v35, %v7013_v33 }
  0xe3   : > { %6316 = vmatmul.mubr.msk.f32.vlgmr.msra.gmra.mrb[0].mxu1 %vm457_vm3, %v7173_v63  ;;  %v2495_v59 = vmul.f32 %v2466_v55, %v7013_v33 }
  0xe4   : > { %6319 = vmatpush3.msk.msra.mxu1 %vm460_vm2, %v1158_v11  ;;  %6320 = vmatprep.mubr.msk.f32.mxu1 %vm6819_vm1, %v6818_v16  ;;  %v2469_v57 = vpop.permute.xlu1 %2468  ;;  %v2482_v11 = vrot.slane %v2477_v6, %v7006_v30  ;;  %v3785_v45 = vpop.permute.xlu0 %3784  ;;  %v3178_v46 = vadd.f32 %v3170_v40, %v7021_v37 }
  0xe5   : > { %6363 = vmatprep.subr.mxu1 %v6818_v16  ;;  %v2503_v0 = vadd.f32 %v2495_v59, %v7021_v37  ;;  %v2474_v1 = vrot.slane %v2469_v57, %v7006_v30 }
  0xe6   : > { %6281 = vmatmul.mubr.msk.f32.vlgmr.msra.gmra.mrb[0].mxu0 %vm457_vm3, %v7196_v12  ;;  %v2497_v20 = vmul.f32 %v2482_v11, %v7013_v33  ;;  %v3186_v53 = vmax.f32 %v3178_v46, 0.0 }
  0xe7   : > { %6324 = vmatpush3.msk.msra.mxu0 %vm460_vm2, %v1830_v13  ;;  %6325 = vmatprep.mubr.msk.f32.mxu0 %vm6819_vm1, %v6818_v16  ;;  %v2511_v3 = vmax.f32 %v2503_v0, 0.0  ;;  %v2496_v4 = vmul.f32 %v2474_v1, %v7013_v33 }
  0xe8   : > { %6328 = vmatprep.subr.mxu0 %v6818_v16 }
  0xe9   : > { %v1799_v60 = vpop.permute.xlu1 %1798  ;;  %v2504_v9 = vadd.f32 %v2496_v4, %v7021_v37  ;;  %v3131_v62 = vpop.permute.xlu0 %3130 }
  0xea   : > { %6326 = vmatmul.mubr.msk.f32.vlgmr.msra.gmra.mrb[2].mxu0 %vm457_vm3, %v7034_v47  ;;  %v1804_v2 = vrot.slane %v1799_v60, %v7006_v30  ;;  %v3136_v1 = vrot.slane %v3131_v62, %v7006_v30 }
  0xeb   : > { %6329 = vmatpush3.msk.msra.mxu0 %vm460_vm2, %v1829_v25  ;;  %6321 = vmatmul.mubr.msk.f32.vlgmr.msra.gmra.mrb[0].mxu1 %vm457_vm3, %v7196_v12  ;;  %v2512_v18 = vmax.f32 %v2504_v9, 0.0 }
  0xec   : > { %6364 = vmatpush3.msk.msra.mxu1 %vm460_vm2, %v2508_v31  ;;  %6365 = vmatprep.mubr.msk.f32.mxu1 %vm6819_vm1, %v6818_v16  ;;  %v1819_v8 = vmul.f32 %v1804_v2, %v7013_v33  ;;  %v2505_v31 = vadd.f32 %v2497_v20, %v7021_v37 }
  0xed   : > { %6368 = vmatprep.subr.mxu1 %v6818_v16  ;;  %6330 = vmatprep.mubr.msk.f32.mxu0 %vm6819_vm1, %v6818_v16  ;;  %v1807_v5 = vpop.permute.xlu1 %1806 }
  0xee   : > { %6333 = vmatprep.subr.mxu0 %v6818_v16  ;;  %v1827_v14 = vadd.f32 %v1819_v8, %v7021_v37  ;;  %v1812_v15 = vrot.slane %v1807_v5, %v7006_v30  ;;  %v2513_v36 = vmax.f32 %v2505_v31, 0.0  ;;  %v3172_v5 = vmul.f32 %v3136_v1, %v7013_v33 }
  0xef   : > { %6366 = vmatmul.mubr.msk.f32.vlgmr.msra.gmra.mrb[2].mxu1 %vm457_vm3, %v7034_v47 }
  0xf0   : > { %6369 = vmatpush3.msk.msra.mxu1 %vm460_vm2, %v2507_v38  ;;  %6370 = vmatprep.mubr.msk.f32.mxu1 %vm6819_vm1, %v6818_v16  ;;  %v1835_v25 = vmax.f32 %v1827_v14, 0.0  ;;  %v1820_v26 = vmul.f32 %v1812_v15, %v7013_v33  ;;  %v3180_v9 = vadd.f32 %v3172_v5, %v7021_v37  ;;  %v3817_v15 = vpop.permute.xlu0 %3816 }
  0xf1   : > { %6373 = vmatprep.subr.mxu1 %v6818_v16 }
  0xf2   : > { %6331 = vmatmul.mubr.msk.f32.vlgmr.msra.gmra.mrb[2].mxu0 %vm457_vm3, %v7027_v41  ;;  %v2485_v13 = vpop.permute.xlu1 %2484  ;;  %v1828_v34 = vadd.f32 %v1820_v26, %v7021_v37  ;;  %v3188_v20 = vmax.f32 %v3180_v9, 0.0  ;;  %v3822_v26 = vrot.slane %v3817_v15, %v7006_v30 }
  0xf3   : > { %6334 = vmatpush3.msk.msra.mxu0 %vm460_vm2, %v1831_v43  ;;  %6335 = vmatprep.mubr.msk.f32.mxu0 %vm6819_vm1, %v6818_v16  ;;  %v2490_v17 = vrot.slane %v2485_v13, %v7006_v30 }
  0xf4   : > { %6338 = vmatprep.subr.mxu0 %v6818_v16  ;;  %v1836_v19 = vmax.f32 %v1828_v34, 0.0  ;;  %v3851_v34 = vmul.f32 %v3822_v26, %v7013_v33  ;;  %v3155_v40 = vpop.permute.xlu0 %3154 }
  0xf5   : > { %v2498_v38 = vmul.f32 %v2490_v17, %v7013_v33 }
  0xf7   : > { %6371 = vmatmul.mubr.msk.f32.vlgmr.msra.gmra.mrb[2].mxu1 %vm457_vm3, %v7027_v41  ;;  %v3793_v24 = vpop.permute.xlu1 %3792  ;;  %v2506_v44 = vadd.f32 %v2498_v38, %v7021_v37 }
  0xf8   : > { %6374 = vmatpush3.msk.msra.mxu1 %vm460_vm2, %v2509_v21  ;;  %6375 = vmatprep.mubr.msk.f32.mxu1 %vm6819_vm1, %v6818_v16  ;;  %v3798_v28 = vrot.slane %v3793_v24, %v7006_v30 }
  0xf9   : > { %6378 = vmatprep.subr.mxu1 %v6818_v16  ;;  %v2514_v21 = vmax.f32 %v2506_v44, 0.0 }
  0xfa   : > { %6336 = vmatmul.mubr.msk.f32.vlgmr.msra.gmra.mrb[2].mxu0 %vm457_vm3, %v7079_v10  ;;  %v3848_v49 = vmul.f32 %v3798_v28, %v7013_v33  ;;  %v3160_v28 = vrot.slane %v3155_v40, %v7006_v30 }
  0xfb   : > { %6339 = vmatpush3.msk.msra.mxu0 %vm460_vm2, %v1832_v51  ;;  %6340 = vmatprep.mubr.msk.f32.mxu0 %vm6819_vm1, %v6818_v16  ;;  %v3790_v51 = vrot.slane %v3785_v45, %v7006_v30 }
  0xfc   : > { %6343 = vmatprep.subr.mxu0 %v6818_v16  ;;  %v3107_v39 = vpop.permute.xlu1 %3106  ;;  %v3856_v56 = vadd.f32 %v3848_v49, %v7021_v37  ;;  %v3175_v49 = vmul.f32 %v3160_v28, %v7013_v33 }
  0xfd   : > { %v3112_v43 = vrot.slane %v3107_v39, %v7006_v30  ;;  %v3847_v57 = vmul.f32 %v3790_v51, %v7013_v33  ;;  %v3859_v39 = vadd.f32 %v3851_v34, %v7021_v37 }
  0xfe   : > { %v3864_v59 = vmax.f32 %v3856_v56, 0.0 }
  0xff   : > { %6376 = vmatmul.mubr.msk.f32.vlgmr.msra.gmra.mrb[2].mxu1 %vm457_vm3, %v7079_v10  ;;  %v3169_v48 = vmul.f32 %v3112_v43, %v7013_v33  ;;  %v3855_v60 = vadd.f32 %v3847_v57, %v7021_v37  ;;  %v3867_v45 = vmax.f32 %v3859_v39, 0.0 }
 0x100   : > { %6379 = vmatpush3.msk.msra.mxu1 %vm460_vm2, %v2510_v58  ;;  %6380 = vmatprep.mubr.msk.f32.mxu1 %vm6819_vm1, %v6818_v16  ;;  %v3123_v50 = vpop.permute.xlu1 %3122 }
 0x101   : > { %6383 = vmatprep.subr.mxu1 %v6818_v16  ;;  %v3177_v54 = vadd.f32 %v3169_v48, %v7021_v37  ;;  %v3128_v55 = vrot.slane %v3123_v50, %v7006_v30  ;;  %v3863_v23 = vmax.f32 %v3855_v60, 0.0 }
 0x102   : > { %6341 = vmatmul.mubr.msk.f32.vlgmr.msra.gmra.mrb[2].mxu0 %vm457_vm3, %v7103_v27 }
 0x103   : > { %6344 = vmatpush3.msk.msra.mxu0 %vm460_vm2, %v1833_v61  ;;  %6345 = vmatprep.mubr.msk.f32.mxu0 %vm6819_vm1, %v6818_v16  ;;  %v3185_v22 = vmax.f32 %v3177_v54, 0.0  ;;  %v3171_v58 = vmul.f32 %v3128_v55, %v7013_v33 }
 0x104   : > { %6348 = vmatprep.subr.mxu0 %v6818_v16 }
 0x105   : > { %v3801_v29 = vpop.permute.xlu1 %3800  ;;  %v3179_v0 = vadd.f32 %v3171_v58, %v7021_v37 }
 0x106   : > { %v3806_v61 = vrot.slane %v3801_v29, %v7006_v30  ;;  %v3841_v29 = vpop.permute.xlu0 %3840 }
 0x107   : > { %6381 = vmatmul.mubr.msk.f32.vlgmr.msra.gmra.mrb[2].mxu1 %vm457_vm3, %v7103_v27  ;;  %v3187_v4 = vmax.f32 %v3179_v0, 0.0  ;;  %v3846_v60 = vrot.slane %v3841_v29, %v7006_v30 }
 0x108   : > { %6384 = vmatpush3.msk.msra.mxu1 %vm460_vm2, %v2511_v3  ;;  %6385 = vmatprep.mubr.msk.f32.mxu1 %vm6819_vm1, %v6818_v16  ;;  %v3849_v2 = vmul.f32 %v3806_v61, %v7013_v33 }
 0x109   : > { %6388 = vmatprep.subr.mxu1 %v6818_v16  ;;  %v3809_v3 = vpop.permute.xlu1 %3808 }
 0x10a   : > { %6346 = vmatmul.mubr.msk.f32.vlgmr.msra.gmra.mrb[2].mxu0 %vm457_vm3, %v7126_v42  ;;  %v3857_v6 = vadd.f32 %v3849_v2, %v7021_v37  ;;  %v4463_v2 = vpop.permute.xlu0 %4462 }
 0x10b   : > { %6349 = vmatpush3.msk.msra.mxu0 %vm460_vm2, %v1834_v7  ;;  %6350 = vmatprep.mubr.msk.f32.mxu0 %vm6819_vm1, %v6818_v16  ;;  %v3814_v7 = vrot.slane %v3809_v3, %v7006_v30  ;;  %v4468_v5 = vrot.slane %v4463_v2, %v7006_v30 }
 0x10c   : > { %6353 = vmatprep.subr.mxu0 %v6818_v16  ;;  %v3865_v13 = vmax.f32 %v3857_v6, 0.0 }
 0x10d   : > { %v3850_v14 = vmul.f32 %v3814_v7, %v7013_v33 }
 0x10e   : > { %v3139_v8 = vpop.permute.xlu1 %3138 }
 0x10f   : > { %6386 = vmatmul.mubr.msk.f32.vlgmr.msra.gmra.mrb[2].mxu1 %vm457_vm3, %v7126_v42  ;;  %v3144_v11 = vrot.slane %v3139_v8, %v7006_v30 }
 0x110   : > { %6389 = vmatpush3.msk.msra.mxu1 %vm460_vm2, %v2512_v18  ;;  %6390 = vmatprep.mubr.msk.f32.mxu1 %vm6819_vm1, %v6818_v16 }
 0x111   : > { %6393 = vmatprep.subr.mxu1 %v6818_v16  ;;  %v3173_v24 = vmul.f32 %v3144_v11, %v7013_v33  ;;  %v4525_v11 = vmul.f32 %v4468_v5, %v7013_v33 }
 0x112   : > { %6351 = vmatmul.mubr.msk.f32.vlgmr.msra.gmra.mrb[2].mxu0 %vm457_vm3, %v7149_v52  ;;  %v3147_v18 = vpop.permute.xlu1 %3146 }
 0x113   : > { %6354 = vmatpush3.msk.msra.mxu0 %vm460_vm2, %v1835_v25  ;;  %6355 = vmatprep.mubr.msk.f32.mxu0 %vm6819_vm1, %v6818_v16  ;;  %v3858_v25 = vadd.f32 %v3850_v14, %v7021_v37  ;;  %v3181_v31 = vadd.f32 %v3173_v24, %v7021_v37  ;;  %v3152_v17 = vrot.slane %v3147_v18, %v7006_v30 }
 0x114   : > { %6358 = vmatprep.subr.mxu0 %v6818_v16  ;;  %v4533_v24 = vadd.f32 %v4525_v11, %v7021_v37 }
 0x115   : > { %v3866_v32 = vmax.f32 %v3858_v25, 0.0  ;;  %v3174_v38 = vmul.f32 %v3152_v17, %v7013_v33  ;;  %v5157_v17 = vpop.permute.xlu0 %5156 }
 0x116   : > { %v5162_v39 = vrot.slane %v5157_v17, %v7006_v30 }
 0x117   : > { %6391 = vmatmul.mubr.msk.f32.vlgmr.msra.gmra.mrb[2].mxu1 %vm457_vm3, %v7149_v52  ;;  %v3825_v35 = vpop.permute.xlu1 %3824  ;;  %v3182_v44 = vadd.f32 %v3174_v38, %v7021_v37 }
 0x118   : > { %6394 = vmatpush3.msk.msra.mxu1 %vm460_vm2, %v2513_v36  ;;  %6395 = vmatprep.mubr.msk.f32.mxu1 %vm6819_vm1, %v6818_v16  ;;  %v3189_v36 = vmax.f32 %v3181_v31, 0.0 }
 0x119   : > { %6398 = vmatprep.subr.mxu1 %v6818_v16 }
 0x11a   : > { %6356 = vmatmul.mubr.msk.f32.vlgmr.msra.gmra.mrb[2].mxu0 %vm457_vm3, %v7173_v63 }
 0x11b   : > { %6359 = vmatpush3.msk.msra.mxu0 %vm460_vm2, %v1836_v19  ;;  %6360 = vmatprep.mubr.msk.f32.mxu0 %vm6819_vm1, %v6818_v16  ;;  %v3830_v19 = vrot.slane %v3825_v35, %v7006_v30  ;;  %v3833_v43 = vpop.permute.xlu1 %3832 }
 0x11c   : > { %6403 = vmatprep.subr.mxu0 %v6818_v16  ;;  %v3838_v51 = vrot.slane %v3833_v43, %v7006_v30 }
 0x11d   : > { %v3852_v46 = vmul.f32 %v3830_v19, %v7013_v33 }
 0x11e   : > { %v3853_v56 = vmul.f32 %v3838_v51, %v7013_v33  ;;  %v7539_v51 = vld [vmem:[%s7666_s2] sm:$0x1] }
 0x11f   : > { %6396 = vmatmul.mubr.msk.f32.vlgmr.msra.gmra.mrb[2].mxu1 %vm457_vm3, %v7173_v63  ;;  %v3860_v50 = vadd.f32 %v3852_v46, %v7021_v37 }
 0x120   : > { %6399 = vmatpush3.msk.msra.mxu1 %vm460_vm2, %v2514_v21  ;;  %6400 = vmatprep.mubr.msk.f32.mxu1 %vm6819_vm1, %v6818_v16  ;;  %v3163_v48 = vpop.permute.xlu1 %3162  ;;  %v3190_v21 = vmax.f32 %v3182_v44, 0.0  ;;  %v5205_v44 = vmul.f32 %v5162_v39, %v7013_v33 }
 0x121   : > { %6443 = vmatprep.subr.mxu1 %v6818_v16  ;;  %v3168_v54 = vrot.slane %v3163_v48, %v7006_v30  ;;  %v3868_v55 = vmax.f32 %v3860_v50, 0.0 }
 0x122   : > { %6361 = vmatmul.mubr.msk.f32.vlgmr.msra.gmra.mrb[2].mxu0 %vm457_vm3, %v7196_v12  ;;  %v5213_v48 = vadd.f32 %v5205_v44, %v7021_v37 }
 0x123   : > { %6404 = vmatpush3.msk.msra.mxu0 %vm460_vm2, %v3186_v53  ;;  %6405 = vmatprep.mubr.msk.f32.mxu0 %vm6819_vm1, %v6818_v16  ;;  %v3183_v53 = vadd.f32 %v3175_v49, %v7021_v37  ;;  %v3176_v58 = vmul.f32 %v3168_v54, %v7013_v33  ;;  %v4495_v49 = vpop.permute.xlu0 %4494 }
 0x124   : > { %6408 = vmatprep.subr.mxu0 %v6818_v16  ;;  %v5221_v50 = vmax.f32 %v5213_v48, 0.0 }
 0x125   : > { %v4471_v57 = vpop.permute.xlu1 %4470  ;;  %v3184_v62 = vadd.f32 %v3176_v58, %v7021_v37 }
 0x126   : > { %6406 = vmatmul.mubr.msk.f32.vlgmr.msra.gmra.mrb[4].mxu0 %vm457_vm3, %v7034_v47  ;;  %v4476_v0 = vrot.slane %v4471_v57, %v7006_v30 }
 0x127   : > { %6401 = vmatmul.mubr.msk.f32.vlgmr.msra.gmra.mrb[2].mxu1 %vm457_vm3, %v7196_v12  ;;  %6409 = vmatpush3.msk.msra.mxu0 %vm460_vm2, %v3185_v22  ;;  %v3191_v22 = vmax.f32 %v3183_v53, 0.0  ;;  %v3192_v3 = vmax.f32 %v3184_v62, 0.0 }
 0x128   : > { %6444 = vmatpush3.msk.msra.mxu1 %vm460_vm2, %v3864_v59  ;;  %6445 = vmatprep.mubr.msk.f32.mxu1 %vm6819_vm1, %v6818_v16  ;;  %v3861_v59 = vadd.f32 %v3853_v56, %v7021_v37  ;;  %v7549_v56 = vld [vmem:[%s7667_s3] sm:$0x1] }
 0x129   : > { %6448 = vmatprep.subr.mxu1 %v6818_v16  ;;  %6410 = vmatprep.mubr.msk.f32.mxu0 %vm6819_vm1, %v6818_v16 }
 0x12a   : > { %6413 = vmatprep.subr.mxu0 %v6818_v16  ;;  %v5149_v61 = vpop.permute.xlu1 %5148  ;;  %v3869_v1 = vmax.f32 %v3861_v59, 0.0 }
 0x12b   : > { %6446 = vmatmul.mubr.msk.f32.vlgmr.msra.gmra.mrb[4].mxu1 %vm457_vm3, %v7034_v47  ;;  %v5154_v7 = vrot.slane %v5149_v61, %v7006_v30  ;;  %v5181_v61 = vpop.permute.xlu0 %5180 }
 0x12c   : > { %6449 = vmatpush3.msk.msra.mxu1 %vm460_vm2, %v3863_v23  ;;  %6450 = vmatprep.mubr.msk.f32.mxu1 %vm6819_vm1, %v6818_v16  ;;  %v3854_v23 = vmul.f32 %v3846_v60, %v7013_v33  ;;  %v5186_v2 = vrot.slane %v5181_v61, %v7006_v30  ;;  %v6111_v61 = vld [vmem:[%s7668_s4] ss:$0 sm:$0xff] (!%p6110_p8) }
 0x12d   : > { %6453 = vmatprep.subr.mxu1 %v6818_v16  ;;  %v5204_v14 = vmul.f32 %v5154_v7, %v7013_v33 }
 0x12e   : > { %6411 = vmatmul.mubr.msk.f32.vlgmr.msra.gmra.mrb[4].mxu0 %vm457_vm3, %v7027_v41  ;;  %v3862_v6 = vadd.f32 %v3854_v23, %v7021_v37  ;;  %v5208_v5 = vmul.f32 %v7539_v51, %v5186_v2 }
 0x12f   : > { %6414 = vmatpush3.msk.msra.mxu0 %vm460_vm2, %v3187_v4  ;;  %6415 = vmatprep.mubr.msk.f32.mxu0 %vm6819_vm1, %v6818_v16  ;;  %v4526_v4 = vmul.f32 %v4476_v0, %v7013_v33  ;;  %v5141_v8 = vpop.permute.xlu1 %5140  ;;  %v5212_v26 = vadd.f32 %v5204_v14, %v7021_v37 }
 0x130   : > { %6418 = vmatprep.subr.mxu0 %v6818_v16  ;;  %v5146_v15 = vrot.slane %v5141_v8, %v7006_v30 }
 0x131   : > { %v4534_v9 = vadd.f32 %v4526_v4, %v7021_v37  ;;  %v5220_v35 = vmax.f32 %v5212_v26, 0.0 }
 0x132   : > { %v5203_v31 = vmul.f32 %v5146_v15, %v7013_v33 }
 0x133   : > { %6451 = vmatmul.mubr.msk.f32.vlgmr.msra.gmra.mrb[4].mxu1 %vm457_vm3, %v7027_v41 }
 0x134   : > { %6454 = vmatpush3.msk.msra.mxu1 %vm460_vm2, %v3865_v13  ;;  %6455 = vmatprep.mubr.msk.f32.mxu1 %vm6819_vm1, %v6818_v16  ;;  %v3870_v13 = vmax.f32 %v3862_v6, 0.0 }
 0x135   : > { %6458 = vmatprep.subr.mxu1 %v6818_v16  ;;  %v4479_v18 = vpop.permute.xlu1 %4478 }
 0x136   : > { %6416 = vmatmul.mubr.msk.f32.vlgmr.msra.gmra.mrb[4].mxu0 %vm457_vm3, %v7079_v10  ;;  %v4484_v25 = vrot.slane %v4479_v18, %v7006_v30 }
 0x137   : > { %6419 = vmatpush3.msk.msra.mxu0 %vm460_vm2, %v3188_v20  ;;  %6420 = vmatprep.mubr.msk.f32.mxu0 %vm6819_vm1, %v6818_v16  ;;  %v4542_v20 = vmax.f32 %v4534_v9, 0.0  ;;  %v5216_v9 = vadd.f32 %v7549_v56, %v5208_v5 }
 0x138   : > { %6423 = vmatprep.subr.mxu0 %v6818_v16  ;;  %v4527_v34 = vmul.f32 %v4484_v25, %v7013_v33 }
 0x139   : > { %v4487_v38 = vpop.permute.xlu1 %4486  ;;  %v5224_v15 = vmax.f32 %v5216_v9, 0.0 }
 0x13a   : > { %v4535_v19 = vadd.f32 %v4527_v34, %v7021_v37  ;;  %v4492_v40 = vrot.slane %v4487_v38, %v7006_v30 }
 0x13b   : > { %6456 = vmatmul.mubr.msk.f32.vlgmr.msra.gmra.mrb[4].mxu1 %vm457_vm3, %v7079_v10 }
 0x13c   : > { %6459 = vmatpush3.msk.msra.mxu1 %vm460_vm2, %v3866_v32  ;;  %6460 = vmatprep.mubr.msk.f32.mxu1 %vm6819_vm1, %v6818_v16  ;;  %v4541_v32 = vmax.f32 %v4533_v24, 0.0  ;;  %v4528_v46 = vmul.f32 %v4492_v40, %v7013_v33 }
 0x13d   : > { %6463 = vmatprep.subr.mxu1 %v6818_v16 }
 0x13e   : > { %6421 = vmatmul.mubr.msk.f32.vlgmr.msra.gmra.mrb[4].mxu0 %vm457_vm3, %v7103_v27  ;;  %v4536_v33 = vadd.f32 %v4528_v46, %v7021_v37 }
 0x13f   : > { %6424 = vmatpush3.msk.msra.mxu0 %vm460_vm2, %v3189_v36  ;;  %6425 = vmatprep.mubr.msk.f32.mxu0 %vm6819_vm1, %v6818_v16  ;;  %v5211_v36 = vadd.f32 %v5203_v31, %v7021_v37  ;;  %v5165_v28 = vpop.permute.xlu1 %5164 }
 0x140   : > { %6428 = vmatprep.subr.mxu0 %v6818_v16 }
 0x141   : > { %v5219_v43 = vmax.f32 %v5211_v36, 0.0 }
 0x143   : > { %6461 = vmatmul.mubr.msk.f32.vlgmr.msra.gmra.mrb[4].mxu1 %vm457_vm3, %v7103_v27 }
 0x144   : > { %6464 = vmatpush3.msk.msra.mxu1 %vm460_vm2, %v3867_v45  ;;  %6465 = vmatprep.mubr.msk.f32.mxu1 %vm6819_vm1, %v6818_v16  ;;  %v4543_v45 = vmax.f32 %v4535_v19, 0.0  ;;  %v5173_v54 = vpop.permute.xlu1 %5172 }
 0x145   : > { %6468 = vmatprep.subr.mxu1 %v6818_v16  ;;  %v5178_v29 = vrot.slane %v5173_v54, %v7006_v30 }
 0x146   : > { %6426 = vmatmul.mubr.msk.f32.vlgmr.msra.gmra.mrb[4].mxu0 %vm457_vm3, %v7126_v42 }
 0x147   : > { %6429 = vmatpush3.msk.msra.mxu0 %vm460_vm2, %v3190_v21  ;;  %6430 = vmatprep.mubr.msk.f32.mxu0 %vm6819_vm1, %v6818_v16  ;;  %v5170_v21 = vrot.slane %v5165_v28, %v7006_v30  ;;  %v5207_v60 = vmul.f32 %v7539_v51, %v5178_v29  ;;  %v5817_v29 = vld [vmem:[#allocation2] sm:$0xff] }
 0x148   : > { %6433 = vmatprep.subr.mxu0 %v6818_v16 }
 0x149   : > { %v5206_v53 = vmul.f32 %v7539_v51, %v5170_v21 }
 0x14b   : > { %6466 = vmatmul.mubr.msk.f32.vlgmr.msra.gmra.mrb[4].mxu1 %vm457_vm3, %v7126_v42  ;;  %v5214_v57 = vadd.f32 %v7549_v56, %v5206_v53 }
 0x14c   : > { %6469 = vmatpush3.msk.msra.mxu1 %vm460_vm2, %v3868_v55  ;;  %6470 = vmatprep.mubr.msk.f32.mxu1 %vm6819_vm1, %v6818_v16  ;;  %v4544_v55 = vmax.f32 %v4536_v33, 0.0 }
 0x14d   : > { %6473 = vmatprep.subr.mxu1 %v6818_v16  ;;  %v5222_v59 = vmax.f32 %v5214_v57, 0.0 }
 0x14e   : > { %6431 = vmatmul.mubr.msk.f32.vlgmr.msra.gmra.mrb[4].mxu0 %vm457_vm3, %v7149_v52 }
 0x14f   : > { %6434 = vmatpush3.msk.msra.mxu0 %vm460_vm2, %v3191_v22  ;;  %6435 = vmatprep.mubr.msk.f32.mxu0 %vm6819_vm1, %v6818_v16  ;;  %v4503_v22 = vpop.permute.xlu1 %4502 }
 0x150   : > { %6438 = vmatprep.subr.mxu0 %v6818_v16  ;;  %v4508_v58 = vrot.slane %v4503_v22, %v7006_v30 }
 0x152   : > { %v4530_v0 = vmul.f32 %v7539_v51, %v4508_v58 }
 0x153   : > { %6471 = vmatmul.mubr.msk.f32.vlgmr.msra.gmra.mrb[4].mxu1 %vm457_vm3, %v7149_v52  ;;  %v4511_v23 = vpop.permute.xlu1 %4510 }
 0x154   : > { %6474 = vmatpush3.msk.msra.mxu1 %vm460_vm2, %v3869_v1  ;;  %6475 = vmatprep.mubr.msk.f32.mxu1 %vm6819_vm1, %v6818_v16  ;;  %v5215_v1 = vadd.f32 %v7549_v56, %v5207_v60 }
 0x155   : > { %6478 = vmatprep.subr.mxu1 %v6818_v16 }
 0x156   : > { %6436 = vmatmul.mubr.msk.f32.vlgmr.msra.gmra.mrb[4].mxu0 %vm457_vm3, %v7173_v63  ;;  %v5223_v4 = vmax.f32 %v5215_v1, 0.0 }
 0x157   : > { %6439 = vmatpush3.msk.msra.mxu0 %vm460_vm2, %v3192_v3  ;;  %6440 = vmatprep.mubr.msk.f32.mxu0 %vm6819_vm1, %v6818_v16  ;;  %v4538_v3 = vadd.f32 %v7549_v56, %v4530_v0  ;;  %v5189_v8 = vpop.permute.xlu1 %5188 }
 0x158   : > { %6483 = vmatprep.subr.mxu0 %v6818_v16  ;;  %v5194_v11 = vrot.slane %v5189_v8, %v7006_v30 }
 0x159   : > { %v4546_v6 = vmax.f32 %v4538_v3, 0.0 }
 0x15a   : > { %v5209_v18 = vmul.f32 %v7539_v51, %v5194_v11 }
 0x15b   : > { %6476 = vmatmul.mubr.msk.f32.vlgmr.msra.gmra.mrb[4].mxu1 %vm457_vm3, %v7173_v63 }
 0x15c   : > { %6479 = vmatpush3.msk.msra.mxu1 %vm460_vm2, %v3870_v13  ;;  %6480 = vmatprep.mubr.msk.f32.mxu1 %vm6819_vm1, %v6818_v16  ;;  %v4519_v13 = vpop.permute.xlu0 %4518  ;;  %v5217_v26 = vadd.f32 %v7549_v56, %v5209_v18 }
 0x15d   : > { %6523 = vmatprep.subr.mxu1 %v6818_v16 }
 0x15e   : > { %6441 = vmatmul.mubr.msk.f32.vlgmr.msra.gmra.mrb[4].mxu0 %vm457_vm3, %v7196_v12  ;;  %v5225_v17 = vmax.f32 %v5217_v26, 0.0 }
 0x15f   : > { %6484 = vmatpush3.msk.msra.mxu0 %vm460_vm2, %v4542_v20  ;;  %6485 = vmatprep.mubr.msk.f32.mxu0 %vm6819_vm1, %v6818_v16  ;;  %v5197_v20 = vpop.permute.xlu1 %5196 }
 0x160   : > { %6488 = vmatprep.subr.mxu0 %v6818_v16  ;;  %v5202_v31 = vrot.slane %v5197_v20, %v7006_v30 }
 0x162   : > { %6486 = vmatmul.mubr.msk.f32.vlgmr.msra.gmra.mrb[6].mxu0 %vm457_vm3, %v7034_v47 }
 0x163   : > { %6481 = vmatmul.mubr.msk.f32.vlgmr.msra.gmra.mrb[4].mxu1 %vm457_vm3, %v7196_v12  ;;  %6489 = vmatpush3.msk.msra.mxu0 %vm460_vm2, %v4541_v32 }
 0x164   : > { %6524 = vmatpush3.msk.msra.mxu1 %vm460_vm2, %v5220_v35  ;;  %6525 = vmatprep.mubr.msk.f32.mxu1 %vm6819_vm1, %v6818_v16 }
 0x165   : > { %6528 = vmatprep.subr.mxu1 %v6818_v16  ;;  %6490 = vmatprep.mubr.msk.f32.mxu0 %vm6819_vm1, %v6818_v16 }
 0x166   : > { %6493 = vmatprep.subr.mxu0 %v6818_v16 }
 0x167   : > { %6526 = vmatmul.mubr.msk.f32.vlgmr.msra.gmra.mrb[6].mxu1 %vm457_vm3, %v7034_v47  ;;  %v4500_v47 = vrot.slane %v4495_v49, %v7006_v30 }
 0x168   : > { %6529 = vmatpush3.msk.msra.mxu1 %vm460_vm2, %v5219_v43  ;;  %6530 = vmatprep.mubr.msk.f32.mxu1 %vm6819_vm1, %v6818_v16 }
 0x169   : > { %6533 = vmatprep.subr.mxu1 %v6818_v16  ;;  %v4529_v37 = vmul.f32 %v7539_v51, %v4500_v47 }
 0x16a   : > { %6491 = vmatmul.mubr.msk.f32.vlgmr.msra.gmra.mrb[6].mxu0 %vm457_vm3, %v7027_v41 }
 0x16b   : > { %6494 = vmatpush3.msk.msra.mxu0 %vm460_vm2, %v4543_v45  ;;  %6495 = vmatprep.mubr.msk.f32.mxu0 %vm6819_vm1, %v6818_v16 }
 0x16c   : > { %6498 = vmatprep.subr.mxu0 %v6818_v16 }
 0x16f   : > { %6531 = vmatmul.mubr.msk.f32.vlgmr.msra.gmra.mrb[6].mxu1 %vm457_vm3, %v7027_v41  ;;  %v4537_v41 = vadd.f32 %v7549_v56, %v4529_v37 }
 0x170   : > { %6534 = vmatpush3.msk.msra.mxu1 %vm460_vm2, %v5221_v50  ;;  %6535 = vmatprep.mubr.msk.f32.mxu1 %vm6819_vm1, %v6818_v16 }
 0x171   : > { %6538 = vmatprep.subr.mxu1 %v6818_v16  ;;  %v4545_v62 = vmax.f32 %v4537_v41, 0.0 }
 0x172   : > { %6496 = vmatmul.mubr.msk.f32.vlgmr.msra.gmra.mrb[6].mxu0 %vm457_vm3, %v7079_v10 }
 0x173   : > { %6499 = vmatpush3.msk.msra.mxu0 %vm460_vm2, %v4544_v55  ;;  %6500 = vmatprep.mubr.msk.f32.mxu0 %vm6819_vm1, %v6818_v16 }
 0x174   : > { %6503 = vmatprep.subr.mxu0 %v6818_v16 }
 0x177   : > { %6536 = vmatmul.mubr.msk.f32.vlgmr.msra.gmra.mrb[6].mxu1 %vm457_vm3, %v7079_v10  ;;  %v4516_v10 = vrot.slane %v4511_v23, %v7006_v30 }
 0x178   : > { %6539 = vmatpush3.msk.msra.mxu1 %vm460_vm2, %v5222_v59  ;;  %6540 = vmatprep.mubr.msk.f32.mxu1 %vm6819_vm1, %v6818_v16 }
 0x179   : > { %6543 = vmatprep.subr.mxu1 %v6818_v16  ;;  %v4531_v7 = vmul.f32 %v7539_v51, %v4516_v10 }
 0x17a   : > { %6501 = vmatmul.mubr.msk.f32.vlgmr.msra.gmra.mrb[6].mxu0 %vm457_vm3, %v7103_v27 }
 0x17b   : > { %6504 = vmatpush3.msk.msra.mxu0 %vm460_vm2, %v4545_v62  ;;  %6505 = vmatprep.mubr.msk.f32.mxu0 %vm6819_vm1, %v6818_v16  ;;  %v4539_v14 = vadd.f32 %v7549_v56, %v4531_v7  ;;  %v5868_v62 = vld [vmem:[%s6906_s18] sm:$0xff] (!%p6110_p8) }
 0x17c   : > { %6508 = vmatprep.subr.mxu0 %v6818_v16 }
 0x17d   : > { %v4547_v24 = vmax.f32 %v4539_v14, 0.0 }
 0x17f   : > { %6541 = vmatmul.mubr.msk.f32.vlgmr.msra.gmra.mrb[6].mxu1 %vm457_vm3, %v7103_v27  ;;  %v4524_v27 = vrot.slane %v4519_v13, %v7006_v30  ;;  %v5210_v30 = vmul.f32 %v7539_v51, %v5202_v31 }
 0x180   : > { %6544 = vmatpush3.msk.msra.mxu1 %vm460_vm2, %v5223_v4  ;;  %6545 = vmatprep.mubr.msk.f32.mxu1 %vm6819_vm1, %v6818_v16 }
 0x181   : > { %6548 = vmatprep.subr.mxu1 %v6818_v16  ;;  %v4532_v25 = vmul.f32 %v7539_v51, %v4524_v27  ;;  %v5218_v34 = vadd.f32 %v7549_v56, %v5210_v30 }
 0x182   : > { %6506 = vmatmul.mubr.msk.f32.vlgmr.msra.gmra.mrb[6].mxu0 %vm457_vm3, %v7126_v42 }
 0x183   : > { %6509 = vmatpush3.msk.msra.mxu0 %vm460_vm2, %v4546_v6  ;;  %6510 = vmatprep.mubr.msk.f32.mxu0 %vm6819_vm1, %v6818_v16  ;;  %v5226_v35 = vmax.f32 %v5218_v34, 0.0 }
 0x184   : > { %6513 = vmatprep.subr.mxu0 %v6818_v16 }
 0x187   : > { %6546 = vmatmul.mubr.msk.f32.vlgmr.msra.gmra.mrb[6].mxu1 %vm457_vm3, %v7126_v42  ;;  %v4540_v42 = vadd.f32 %v7549_v56, %v4532_v25 }
 0x188   : > { %6549 = vmatpush3.msk.msra.mxu1 %vm460_vm2, %v5224_v15  ;;  %6550 = vmatprep.mubr.msk.f32.mxu1 %vm6819_vm1, %v6818_v16 }
 0x189   : > { %6553 = vmatprep.subr.mxu1 %v6818_v16  ;;  %v4548_v32 = vmax.f32 %v4540_v42, 0.0 }
 0x18a   : > { %6511 = vmatmul.mubr.msk.f32.vlgmr.msra.gmra.mrb[6].mxu0 %vm457_vm3, %v7149_v52 }
 0x18b   : > { %6514 = vmatpush3.msk.msra.mxu0 %vm460_vm2, %v4547_v24  ;;  %6515 = vmatprep.mubr.msk.f32.mxu0 %vm6819_vm1, %v6818_v16 }
 0x18c   : > { %6518 = vmatprep.subr.mxu0 %v6818_v16 }
 0x18f   : > { %6551 = vmatmul.mubr.msk.f32.vlgmr.msra.gmra.mrb[6].mxu1 %vm457_vm3, %v7149_v52 }
 0x190   : > { %6554 = vmatpush3.msk.msra.mxu1 %vm460_vm2, %v5225_v17  ;;  %6555 = vmatprep.mubr.msk.f32.mxu1 %vm6819_vm1, %v6818_v16 }
 0x191   : > { %6558 = vmatprep.subr.mxu1 %v6818_v16 }
 0x192   : > { %6516 = vmatmul.mubr.msk.f32.vlgmr.msra.gmra.mrb[6].mxu0 %vm457_vm3, %v7173_v63 }
 0x193   : > { %6519 = vmatpush3.msk.msra.mxu0 %vm460_vm2, %v4548_v32  ;;  %6520 = vmatprep.mubr.msk.f32.mxu0 %vm6819_vm1, %v6818_v16 }
 0x197   : > { %6556 = vmatmul.mubr.msk.f32.vlgmr.msra.gmra.mrb[6].mxu1 %vm457_vm3, %v7173_v63 }
 0x198   : > { %6559 = vmatpush3.msk.msra.mxu1 %vm460_vm2, %v5226_v35  ;;  %6560 = vmatprep.mubr.msk.f32.mxu1 %vm6819_vm1, %v6818_v16 }
 0x19a   : > { %6521 = vmatmul.mubr.msk.f32.vlgmr.msra.gmra.mrb[6].mxu0 %vm457_vm3, %v7196_v12 }
 0x19f   : > { %6561 = vmatmul.mubr.msk.f32.vlgmr.msra.gmra.mrb[6].mxu1 %vm457_vm3, %v7196_v12 }
 0x1b9   : > { %v1066_v52 = vpop.f32.mrb[0].mxu0 }
 0x1ba   : > { %v6282_v36 = vpop.f32.mrb[1].mxu0 }
 0x1be   : > { %v1744_v38 = vpop.f32.mrb[0].mxu1 }
 0x1bf   : > { %v5819_v39 = vrot.slane %v1744_v38, 7  ;;  %v6322_v19 = vpop.f32.mrb[1].mxu1 }
 0x1c1   : > { %v5839_v40 = vsel %vm460_vm2, %v1066_v52, %v5819_v39 }
 0x1f5   : > { %v2422_v43 = vpop.f32.mrb[2].mxu0 }
 0x1f6   : > { %v5822_v63 = vrot.slane %v2422_v43, 6  ;;  %v6362_v44 = vpop.f32.mrb[3].mxu0 }
 0x1f8   : > { %v5841_v28 = vsel %vm5840_vm4, %v5839_v40, %v5822_v63 }
 0x1fa   : > { %v3100_v45 = vpop.f32.mrb[2].mxu1 }
 0x1fb   : > { %v5825_v16 = vrot.slane %v3100_v45, 5  ;;  %v6402_v46 = vpop.f32.mrb[3].mxu1 }
 0x1fd   : > { %v5843_v48 = vsel %vm5842_vm5, %v5841_v28, %v5825_v16 }
 0x231   : > { %v3778_v21 = vpop.f32.mrb[4].mxu0 }
 0x232   : > { %v5828_v12 = vrot.slane %v3778_v21, 4  ;;  %v6442_v49 = vpop.f32.mrb[5].mxu0 }
 0x234   : > { %v5845_v33 = vsel %vm5844_vm6, %v5843_v48, %v5828_v12 }
 0x236   : > { %v4456_v47 = vpop.f32.mrb[4].mxu1 }
 0x237   : > { %v5831_v50 = vrot.slane %v4456_v47, 3  ;;  %v6482_v51 = vpop.f32.mrb[5].mxu1 }
 0x239   : > { %v5847_v53 = vsel %vm5846_vm7, %v5845_v33, %v5831_v50 }
 0x26d   : > { %v5134_v54 = vpop.f32.mrb[6].mxu0 }
 0x26e   : > { %v5834_v55 = vrot.slane %v5134_v54, 2  ;;  %v6522_v37 = vpop.f32.mrb[7].mxu0 }
 0x270   : > { %v5849_v56 = vsel %vm5848_vm8, %v5847_v53, %v5834_v55 }
 0x272   : > { %v5812_v57 = vpop.f32.mrb[6].mxu1  ;;  %5858 = sbr.rel (%p6110_p8) target bundleno = 671 (0x29f), region = 52 }
 0x273   : > { %v5837_v22 = vrot.slane %v5812_v57, 1  ;;  %v6562_v41 = vpop.f32.mrb[7].mxu1 }
 0x275   : > { %v5851_v58 = vsel %vm5850_vm9, %v5849_v56, %v5837_v22 }
 0x276   : > { %v5852_v59 = vadd.f32 %v5851_v58, %v5817_v29 }
 0x278   : > { %5854 = vst.msk [vmem:[#allocation2] sm:$0xff] %vm5853_vm10, %v5852_v59 }
 0x27f   : > { %v5859_v60 = vld [vmem:[#allocation2] sm:$0xff] }
 0x280   : > { %v5867_v0 = vmul.f32 %v6111_v61, %v5859_v60 }
 0x282   : > { %v5869_v1 = vadd.f32 %v5868_v62, %v5867_v0 }
 0x284   : > { %v6112_v23 = vmul.f32 -1.442695, %v5869_v1 }
 0x286   : > { %6770 = vpow2.f32 %v6112_v23 }
 0x290   : > { %v6771_v2 = vpop.eup %6770 }
 0x291   : > { %v5873_v3 = vadd.f32 1.0, %v6771_v2 }
 0x293   : > { %6772 = vrcp.f32 %v5873_v3 }
 0x29d   : > { %v6773_v10 = vpop.eup %6772 }
 0x29e   : > { %5876 = vst.msk [vmem:[%s6911_s28] sm:$0xff] %vm5853_vm10, %v6773_v10 }
 0x29f PF: > { %s16_s25 = sadd.s32 1, %s6812_s25   ;;  %s7671_s21 = smov %s6804_s23 }
 0x2a0   : > { %p13_p9 = scmp.ge.s32.totalorder %s16_s25, 6   ;;  %s7672_s22 = smov %s6808_s24 }
 0x2a1   : > { %s7673_s23 = smov %s7676_s26  ;;  %s7674_s24 = smov %s7680_s27 }
 0x2a2   :  { %15 = sbr.rel (!%p13_p9) target bundleno = 3 (0x3), region = 88 }

</bundles_post_ra>
